<compile_context>
chip_gen: v7x
topology: tpu7x:2x2x1
jax: 0.10.0
libtpu: 0.0.40
codegen_flags: <defaults>
</compile_context>

<pallas_src>
import functools

import jax
import jax.numpy as jnp
from jax.experimental import pallas as pl
from jax.experimental.pallas import tpu as pltpu

LATENT = 50
ZPAD = 64          # lane padding for the latent dimension (mu / logvar halves)
HID = 600
IMG = 784


def _default_act_dtype():
    """bf16 softplus on chips with bf16 VPU/EUP (v6e/v7x), f32 otherwise."""
    try:
        kind = jax.devices()[0].device_kind.lower()
    except Exception:
        return jnp.float32
    if ("v6" in kind) or ("v7" in kind) or ("7x" in kind):
        return jnp.bfloat16
    return jnp.float32


def _pick_tile_m(batch):
    """Batch tile: >=2 grid steps when possible (v7x megacore), cap at 256."""
    if batch <= 16:
        return batch                      # full-dim block is always legal
    half = -(-batch // 2)
    tm = 16 * (-(-half // 16))            # multiple of 16 (bf16 sublane pack)
    return min(256, tm)


def _vae_kernel(x_ref, eps_ref,
                w1_ref, b1_ref, w2_ref, b2_ref, w3_ref, b3_ref,
                w4_ref, b4_ref, w5_ref, b5_ref, w6_ref, b6_ref,
                recon_ref, mlv_ref, *, act_dtype):
    def dense(act, w_ref, b_ref):
        # bf16 operands on the MXU, f32 accumulation, bias added in f32.
        return jnp.dot(act.astype(jnp.bfloat16), w_ref[...],
                       preferred_element_type=jnp.float32) + b_ref[...]

    def softplus(v):
        v = v.astype(act_dtype)           # bf16 on v6e/v7x, f32 on v5e
        return jnp.maximum(v, 0.0) + jnp.log1p(jnp.exp(-jnp.abs(v)))

    x = x_ref[...]                                    # (TM, 784) bf16

    # ---- Encoder ----
    h1 = softplus(dense(x, w1_ref, b1_ref))           # (TM, 600)
    h2 = softplus(dense(h1, w2_ref, b2_ref))          # (TM, 600)
    slab = dense(h2, w3_ref, b3_ref)                  # (TM, 128) [mu|0|logvar|0]
    mlv_ref[...] = slab                               # lane-dense store

    # ---- Reparameterize (f32; eps supplied from host, zero-padded to 64) ----
    mu_p = slab[:, :ZPAD]                             # (TM, 64)
    logvar_p = slab[:, ZPAD:]                         # (TM, 64)
    z = mu_p + eps_ref[...] * jnp.exp(0.5 * logvar_p)  # padded lanes -> 0

    # ---- Decoder ----
    h4 = softplus(dense(z, w4_ref, b4_ref))           # (TM, 600)
    h5 = softplus(dense(h4, w5_ref, b5_ref))          # (TM, 600)
    y = dense(h5, w6_ref, b6_ref)                     # (TM, 784) f32

    # Stable sigmoid: one exp + one approx reciprocal (EUP slot).
    pos = y >= 0.0
    ex = jnp.exp(jnp.where(pos, -y, y))               # exp of non-positive arg
    inv = pl.reciprocal(1.0 + ex, approx=True)
    recon_ref[...] = jnp.where(pos, inv, ex * inv)


def vae_forward(x, eps, packed_params, *, act_dtype=None, tile_m=None):
    """Fused VAE forward.  Returns (recon, mu, logvar)."""
    if act_dtype is None:
        act_dtype = _default_act_dtype()

    xf = x.reshape(-1, IMG).astype(jnp.bfloat16)      # torch's x.view(-1, 784)
    batch = xf.shape[0]
    eps_p = jnp.zeros((batch, ZPAD), jnp.float32).at[:, :LATENT].set(
        eps.astype(jnp.float32))

    if tile_m is None:
        tile_m = _pick_tile_m(batch)
    grid = (pl.cdiv(batch, tile_m),)

    kernel = functools.partial(_vae_kernel, act_dtype=act_dtype)

    def act_spec(cols):
        return pl.BlockSpec((tile_m, cols), lambda i: (i, 0))

    out_shape = (
        jax.ShapeDtypeStruct((batch, IMG), jnp.float32),        # recon
        jax.ShapeDtypeStruct((batch, 2 * ZPAD), jnp.float32),   # mu||logvar
    )
    out_specs = (act_spec(IMG), act_spec(2 * ZPAD))

    def run(single_buffer_weights):
        def resident_spec(arr):
            # Same block every grid step -> stays VMEM-resident. Request a
            # single buffer so the bf16 weights are not double-buffered.
            if single_buffer_weights:
                return pl.BlockSpec(arr.shape, lambda i: (0, 0),
                                    pipeline_mode=pl.Buffered(1))
            return pl.BlockSpec(arr.shape, lambda i: (0, 0))

        in_specs = [act_spec(IMG), act_spec(ZPAD)] + \
                   [resident_spec(p) for p in packed_params]

        return pl.pallas_call(
            kernel,
            grid=grid,
            in_specs=in_specs,
            out_specs=out_specs,
            out_shape=out_shape,
            compiler_params=pltpu.CompilerParams(
                dimension_semantics=("parallel",),     # megacore sharding
                vmem_limit_bytes=48 * 1024 * 1024),
        )(xf, eps_p, *packed_params)

    try:
        recon, mlv = run(True)
    except Exception:
        # Fallback if Buffered(1) is rejected by this Pallas/Mosaic version.
        recon, mlv = run(False)

    mu = mlv[:, :LATENT]
    logvar = mlv[:, ZPAD:ZPAD + LATENT]
    return recon, mu, logvar


# ------------------------- parameters & reference ---------------------------

def init_raw_params(key):
    """PyTorch nn.Linear-style init; weights stored (in, out), all f32."""
    def linear(k, fan_in, fan_out):
        kw, kb = jax.random.split(k)
        bound = 1.0 / jnp.sqrt(jnp.float32(fan_in))
        w = jax.random.uniform(kw, (fan_in, fan_out), jnp.float32, -bound, bound)
        b = jax.random.uniform(kb, (1, fan_out), jnp.float32, -bound, bound)
        return w, b

    k = jax.random.split(key, 7)
    w1, b1 = linear(k[0], IMG, HID)        # fc1
    w2, b2 = linear(k[1], HID, HID)        # fc2
    w31, b31 = linear(k[2], HID, LATENT)   # fc31
    w32, b32 = linear(k[3], HID, LATENT)   # fc32
    w4, b4 = linear(k[4], LATENT, HID)     # fc4
    w5, b5 = linear(k[5], HID, HID)        # fc5
    w6, b6 = linear(k[6], HID, IMG)        # fc6
    return (w1, b1, w2, b2, w31, b31, w32, b32, w4, b4, w5, b5, w6, b6)


def pack_params(raw):
    """Fuse fc31/fc32, zero-pad fc4 rows, cast weights to bf16."""
    (w1, b1, w2, b2, w31, b31, w32, b32, w4, b4, w5, b5, w6, b6) = raw

    w3 = jnp.zeros((HID, 2 * ZPAD), jnp.float32)
    w3 = w3.at[:, :LATENT].set(w31).at[:, ZPAD:ZPAD + LATENT].set(w32)
    b3 = jnp.zeros((1, 2 * ZPAD), jnp.float32)
    b3 = b3.at[:, :LATENT].set(b31).at[:, ZPAD:ZPAD + LATENT].set(b32)
    w4p = jnp.zeros((ZPAD, HID), jnp.float32).at[:LATENT, :].set(w4)

    bf = lambda w: w.astype(jnp.bfloat16)
    return (bf(w1), b1, bf(w2), b2, bf(w3), b3, bf(w4p), b4,
            bf(w5), b5, bf(w6), b6)


def reference_forward(x, eps, raw_params, *, act_dtype=jnp.float32):
    """Pure-JAX reference with the same precision policy as the kernel."""
    (w1, b1, w2, b2, w31, b31, w32, b32, w4, b4, w5, b5, w6, b6) = raw_params

    def dense(a, w, b):
        return jnp.dot(a.astype(jnp.bfloat16), w.astype(jnp.bfloat16),
                       preferred_element_type=jnp.float32) + b

    def softplus(v):
        v = v.astype(act_dtype)
        return jnp.maximum(v, 0.0) + jnp.log1p(jnp.exp(-jnp.abs(v)))

    xf = x.reshape(-1, IMG).astype(jnp.bfloat16)
    h1 = softplus(dense(xf, w1, b1))
    h2 = softplus(dense(h1, w2, b2))
    mu = dense(h2, w31, b31)
    logvar = dense(h2, w32, b32)
    z = mu + eps * jnp.exp(0.5 * logvar)
    h4 = softplus(dense(z, w4, b4))
    h5 = softplus(dense(h4, w5, b5))
    recon = jax.nn.sigmoid(dense(h5, w6, b6))
    return recon, mu, logvar


if __name__ == "__main__":
    key = jax.random.PRNGKey(0)
    kp, kx, ke = jax.random.split(key, 3)

    raw = init_raw_params(kp)
    packed = pack_params(raw)

    B = 8
    x = jax.random.uniform(kx, (B, 28, 28), jnp.float32)   # MNIST-like input
    eps = jax.random.normal(ke, (B, LATENT), jnp.float32)  # reparam noise

    act_dtype = _default_act_dtype()
    recon, mu, logvar = jax.block_until_ready(
        vae_forward(x, eps, packed, act_dtype=act_dtype))

    ref_recon, ref_mu, ref_logvar = reference_forward(
        x, eps, raw, act_dtype=act_dtype)

    assert recon.shape == (B, IMG), recon.shape
    assert mu.shape == (B, LATENT), mu.shape
    assert logvar.shape == (B, LATENT), logvar.shape

    # Looser tolerance when activations run in bf16 (v6e/v7x fast path).
    tol = 2e-3 if act_dtype == jnp.float32 else 2e-2
    assert jnp.allclose(recon, ref_recon, atol=tol, rtol=tol), float(
        jnp.max(jnp.abs(recon - ref_recon)))
    assert jnp.allclose(mu, ref_mu, atol=tol, rtol=tol), float(
        jnp.max(jnp.abs(mu - ref_mu)))
    assert jnp.allclose(logvar, ref_logvar, atol=tol, rtol=tol), float(
        jnp.max(jnp.abs(logvar - ref_logvar)))

    print("KERNEL_OK")
</pallas_src>

<mosaic_0001>
module attributes {stable_mosaic.version = 11 : i64} {
  func.func @_vae_kernel(%arg0: i32, %arg1: memref<8x784xbf16, #tpu.memory_space<vmem>>, %arg2: memref<8x64xf32, #tpu.memory_space<vmem>>, %arg3: memref<784x600xbf16, #tpu.memory_space<vmem>>, %arg4: memref<1x600xf32, #tpu.memory_space<vmem>>, %arg5: memref<600x600xbf16, #tpu.memory_space<vmem>>, %arg6: memref<1x600xf32, #tpu.memory_space<vmem>>, %arg7: memref<600x128xbf16, #tpu.memory_space<vmem>>, %arg8: memref<1x128xf32, #tpu.memory_space<vmem>>, %arg9: memref<64x600xbf16, #tpu.memory_space<vmem>>, %arg10: memref<1x600xf32, #tpu.memory_space<vmem>>, %arg11: memref<600x600xbf16, #tpu.memory_space<vmem>>, %arg12: memref<1x600xf32, #tpu.memory_space<vmem>>, %arg13: memref<600x784xbf16, #tpu.memory_space<vmem>>, %arg14: memref<1x784xf32, #tpu.memory_space<vmem>>, %arg15: memref<8x784xf32, #tpu.memory_space<vmem>>, %arg16: memref<8x128xf32, #tpu.memory_space<vmem>>) attributes {dimension_semantics = [#tpu.dimension_semantics<parallel>], iteration_bounds = array<i64: 1>, scalar_prefetch = 0 : i64, scratch_operands = 0 : i64, tpu.core_type = #tpu.core_type<tc>, window_params = [{transform_indices = @transform_0, window_bounds = array<i64: 8, 784>}, {transform_indices = @transform_1, window_bounds = array<i64: 8, 64>}, {pipeline_mode = #tpu.pipeline_mode<synchronous>, transform_indices = @transform_2, window_bounds = array<i64: 784, 600>}, {pipeline_mode = #tpu.pipeline_mode<synchronous>, transform_indices = @transform_3, window_bounds = array<i64: 1, 600>}, {pipeline_mode = #tpu.pipeline_mode<synchronous>, transform_indices = @transform_4, window_bounds = array<i64: 600, 600>}, {pipeline_mode = #tpu.pipeline_mode<synchronous>, transform_indices = @transform_5, window_bounds = array<i64: 1, 600>}, {pipeline_mode = #tpu.pipeline_mode<synchronous>, transform_indices = @transform_6, window_bounds = array<i64: 600, 128>}, {pipeline_mode = #tpu.pipeline_mode<synchronous>, transform_indices = @transform_7, window_bounds = array<i64: 1, 128>}, {pipeline_mode = #tpu.pipeline_mode<synchronous>, transform_indices = @transform_8, window_bounds = array<i64: 64, 600>}, {pipeline_mode = #tpu.pipeline_mode<synchronous>, transform_indices = @transform_9, window_bounds = array<i64: 1, 600>}, {pipeline_mode = #tpu.pipeline_mode<synchronous>, transform_indices = @transform_10, window_bounds = array<i64: 600, 600>}, {pipeline_mode = #tpu.pipeline_mode<synchronous>, transform_indices = @transform_11, window_bounds = array<i64: 1, 600>}, {pipeline_mode = #tpu.pipeline_mode<synchronous>, transform_indices = @transform_12, window_bounds = array<i64: 600, 784>}, {pipeline_mode = #tpu.pipeline_mode<synchronous>, transform_indices = @transform_13, window_bounds = array<i64: 1, 784>}, {transform_indices = @transform_14, window_bounds = array<i64: 8, 784>}, {transform_indices = @transform_15, window_bounds = array<i64: 8, 128>}]} {
    %c0 = arith.constant 0 : index
    %c0_0 = arith.constant 0 : index
    %0 = vector.load %arg1[%c0, %c0_0] : memref<8x784xbf16, #tpu.memory_space<vmem>>, vector<8x784xbf16>
    %c0_1 = arith.constant 0 : index
    %c0_2 = arith.constant 0 : index
    %1 = vector.load %arg3[%c0_1, %c0_2] : memref<784x600xbf16, #tpu.memory_space<vmem>>, vector<784x600xbf16>
    %cst = arith.constant dense<0.000000e+00> : vector<8x600xf32>
    %2 = tpu.matmul %0, %1, %cst {dimension_numbers = #tpu.dot_dimension_numbers<[1], [0], [0], [1], [0, 0, 1, 1], [], []>} : vector<8x784xbf16>, vector<784x600xbf16>, vector<8x600xf32> -> vector<8x600xf32>
    %c0_3 = arith.constant 0 : index
    %c0_4 = arith.constant 0 : index
    %3 = vector.load %arg4[%c0_3, %c0_4] : memref<1x600xf32, #tpu.memory_space<vmem>>, vector<1x600xf32>
    %4 = vector.broadcast %3 : vector<1x600xf32> to vector<8x600xf32>
    %5 = arith.addf %2, %4 : vector<8x600xf32>
    %cst_5 = arith.constant 0.000000e+00 : f32
    %6 = vector.broadcast %cst_5 : f32 to vector<8x600xf32>
    %7 = arith.maximumf %5, %6 : vector<8x600xf32>
    %8 = math.absf %5 : vector<8x600xf32>
    %cst_6 = arith.constant 0.000000e+00 : f32
    %9 = vector.broadcast %cst_6 : f32 to vector<8x600xf32>
    %10 = arith.subf %9, %8 : vector<8x600xf32>
    %11 = math.exp %10 : vector<8x600xf32>
    %12 = math.log1p %11 : vector<8x600xf32>
    %13 = arith.addf %7, %12 : vector<8x600xf32>
    %14 = arith.truncf %13 : vector<8x600xf32> to vector<8x600xbf16>
    %c0_7 = arith.constant 0 : index
    %c0_8 = arith.constant 0 : index
    %15 = vector.load %arg5[%c0_7, %c0_8] : memref<600x600xbf16, #tpu.memory_space<vmem>>, vector<600x600xbf16>
    %cst_9 = arith.constant dense<0.000000e+00> : vector<8x600xf32>
    %16 = tpu.matmul %14, %15, %cst_9 {dimension_numbers = #tpu.dot_dimension_numbers<[1], [0], [0], [1], [0, 0, 1, 1], [], []>} : vector<8x600xbf16>, vector<600x600xbf16>, vector<8x600xf32> -> vector<8x600xf32>
    %c0_10 = arith.constant 0 : index
    %c0_11 = arith.constant 0 : index
    %17 = vector.load %arg6[%c0_10, %c0_11] : memref<1x600xf32, #tpu.memory_space<vmem>>, vector<1x600xf32>
    %18 = vector.broadcast %17 : vector<1x600xf32> to vector<8x600xf32>
    %19 = arith.addf %16, %18 : vector<8x600xf32>
    %cst_12 = arith.constant 0.000000e+00 : f32
    %20 = vector.broadcast %cst_12 : f32 to vector<8x600xf32>
    %21 = arith.maximumf %19, %20 : vector<8x600xf32>
    %22 = math.absf %19 : vector<8x600xf32>
    %cst_13 = arith.constant 0.000000e+00 : f32
    %23 = vector.broadcast %cst_13 : f32 to vector<8x600xf32>
    %24 = arith.subf %23, %22 : vector<8x600xf32>
    %25 = math.exp %24 : vector<8x600xf32>
    %26 = math.log1p %25 : vector<8x600xf32>
    %27 = arith.addf %21, %26 : vector<8x600xf32>
    %28 = arith.truncf %27 : vector<8x600xf32> to vector<8x600xbf16>
    %c0_14 = arith.constant 0 : index
    %c0_15 = arith.constant 0 : index
    %29 = vector.load %arg7[%c0_14, %c0_15] : memref<600x128xbf16, #tpu.memory_space<vmem>>, vector<600x128xbf16>
    %cst_16 = arith.constant dense<0.000000e+00> : vector<8x128xf32>
    %30 = tpu.matmul %28, %29, %cst_16 {dimension_numbers = #tpu.dot_dimension_numbers<[1], [0], [0], [1], [0, 0, 1, 1], [], []>} : vector<8x600xbf16>, vector<600x128xbf16>, vector<8x128xf32> -> vector<8x128xf32>
    %c0_17 = arith.constant 0 : index
    %c0_18 = arith.constant 0 : index
    %31 = vector.load %arg8[%c0_17, %c0_18] : memref<1x128xf32, #tpu.memory_space<vmem>>, vector<1x128xf32>
    %32 = vector.broadcast %31 : vector<1x128xf32> to vector<8x128xf32>
    %33 = arith.addf %30, %32 : vector<8x128xf32>
    %c0_19 = arith.constant 0 : index
    %c0_20 = arith.constant 0 : index
    %34 = vector.load %arg16[%c0_19, %c0_20] : memref<8x128xf32, #tpu.memory_space<vmem>>, vector<8x128xf32>
    tpu.vector_store %arg16[%c0_19, %c0_20], %33 {strides = array<i32>} : memref<8x128xf32, #tpu.memory_space<vmem>>, vector<8x128xf32>,
    %35 = vector.extract_strided_slice %33 {offsets = [0, 0], sizes = [8, 64], strides = [1, 1]} : vector<8x128xf32> to vector<8x64xf32>
    %36 = vector.extract_strided_slice %33 {offsets = [0, 64], sizes = [8, 64], strides = [1, 1]} : vector<8x128xf32> to vector<8x64xf32>
    %c0_21 = arith.constant 0 : index
    %c0_22 = arith.constant 0 : index
    %37 = vector.load %arg2[%c0_21, %c0_22] : memref<8x64xf32, #tpu.memory_space<vmem>>, vector<8x64xf32>
    %cst_23 = arith.constant 5.000000e-01 : f32
    %38 = vector.broadcast %cst_23 : f32 to vector<8x64xf32>
    %39 = arith.mulf %38, %36 : vector<8x64xf32>
    %40 = math.exp %39 : vector<8x64xf32>
    %41 = arith.mulf %37, %40 : vector<8x64xf32>
    %42 = arith.addf %35, %41 : vector<8x64xf32>
    %43 = arith.truncf %42 : vector<8x64xf32> to vector<8x64xbf16>
    %c0_24 = arith.constant 0 : index
    %c0_25 = arith.constant 0 : index
    %44 = vector.load %arg9[%c0_24, %c0_25] : memref<64x600xbf16, #tpu.memory_space<vmem>>, vector<64x600xbf16>
    %cst_26 = arith.constant dense<0.000000e+00> : vector<8x600xf32>
    %45 = tpu.matmul %43, %44, %cst_26 {dimension_numbers = #tpu.dot_dimension_numbers<[1], [0], [0], [1], [0, 0, 1, 1], [], []>} : vector<8x64xbf16>, vector<64x600xbf16>, vector<8x600xf32> -> vector<8x600xf32>
    %c0_27 = arith.constant 0 : index
    %c0_28 = arith.constant 0 : index
    %46 = vector.load %arg10[%c0_27, %c0_28] : memref<1x600xf32, #tpu.memory_space<vmem>>, vector<1x600xf32>
    %47 = vector.broadcast %46 : vector<1x600xf32> to vector<8x600xf32>
    %48 = arith.addf %45, %47 : vector<8x600xf32>
    %cst_29 = arith.constant 0.000000e+00 : f32
    %49 = vector.broadcast %cst_29 : f32 to vector<8x600xf32>
    %50 = arith.maximumf %48, %49 : vector<8x600xf32>
    %51 = math.absf %48 : vector<8x600xf32>
    %cst_30 = arith.constant 0.000000e+00 : f32
    %52 = vector.broadcast %cst_30 : f32 to vector<8x600xf32>
    %53 = arith.subf %52, %51 : vector<8x600xf32>
    %54 = math.exp %53 : vector<8x600xf32>
    %55 = math.log1p %54 : vector<8x600xf32>
    %56 = arith.addf %50, %55 : vector<8x600xf32>
    %57 = arith.truncf %56 : vector<8x600xf32> to vector<8x600xbf16>
    %c0_31 = arith.constant 0 : index
    %c0_32 = arith.constant 0 : index
    %58 = vector.load %arg11[%c0_31, %c0_32] : memref<600x600xbf16, #tpu.memory_space<vmem>>, vector<600x600xbf16>
    %cst_33 = arith.constant dense<0.000000e+00> : vector<8x600xf32>
    %59 = tpu.matmul %57, %58, %cst_33 {dimension_numbers = #tpu.dot_dimension_numbers<[1], [0], [0], [1], [0, 0, 1, 1], [], []>} : vector<8x600xbf16>, vector<600x600xbf16>, vector<8x600xf32> -> vector<8x600xf32>
    %c0_34 = arith.constant 0 : index
    %c0_35 = arith.constant 0 : index
    %60 = vector.load %arg12[%c0_34, %c0_35] : memref<1x600xf32, #tpu.memory_space<vmem>>, vector<1x600xf32>
    %61 = vector.broadcast %60 : vector<1x600xf32> to vector<8x600xf32>
    %62 = arith.addf %59, %61 : vector<8x600xf32>
    %cst_36 = arith.constant 0.000000e+00 : f32
    %63 = vector.broadcast %cst_36 : f32 to vector<8x600xf32>
    %64 = arith.maximumf %62, %63 : vector<8x600xf32>
    %65 = math.absf %62 : vector<8x600xf32>
    %cst_37 = arith.constant 0.000000e+00 : f32
    %66 = vector.broadcast %cst_37 : f32 to vector<8x600xf32>
    %67 = arith.subf %66, %65 : vector<8x600xf32>
    %68 = math.exp %67 : vector<8x600xf32>
    %69 = math.log1p %68 : vector<8x600xf32>
    %70 = arith.addf %64, %69 : vector<8x600xf32>
    %71 = arith.truncf %70 : vector<8x600xf32> to vector<8x600xbf16>
    %c0_38 = arith.constant 0 : index
    %c0_39 = arith.constant 0 : index
    %72 = vector.load %arg13[%c0_38, %c0_39] : memref<600x784xbf16, #tpu.memory_space<vmem>>, vector<600x784xbf16>
    %cst_40 = arith.constant dense<0.000000e+00> : vector<8x784xf32>
    %73 = tpu.matmul %71, %72, %cst_40 {dimension_numbers = #tpu.dot_dimension_numbers<[1], [0], [0], [1], [0, 0, 1, 1], [], []>} : vector<8x600xbf16>, vector<600x784xbf16>, vector<8x784xf32> -> vector<8x784xf32>
    %c0_41 = arith.constant 0 : index
    %c0_42 = arith.constant 0 : index
    %74 = vector.load %arg14[%c0_41, %c0_42] : memref<1x784xf32, #tpu.memory_space<vmem>>, vector<1x784xf32>
    %75 = vector.broadcast %74 : vector<1x784xf32> to vector<8x784xf32>
    %76 = arith.addf %73, %75 : vector<8x784xf32>
    %cst_43 = arith.constant 0.000000e+00 : f32
    %77 = vector.broadcast %cst_43 : f32 to vector<8x784xf32>
    %78 = arith.cmpf oge, %76, %77 : vector<8x784xf32>
    %cst_44 = arith.constant 0.000000e+00 : f32
    %79 = vector.broadcast %cst_44 : f32 to vector<8x784xf32>
    %80 = arith.subf %79, %76 : vector<8x784xf32>
    %81 = arith.select %78, %80, %76 : vector<8x784xi1>, vector<8x784xf32>
    %82 = math.exp %81 : vector<8x784xf32>
    %cst_45 = arith.constant 1.000000e+00 : f32
    %83 = vector.broadcast %cst_45 : f32 to vector<8x784xf32>
    %84 = arith.addf %83, %82 : vector<8x784xf32>
    %85 = tpu.reciprocal %84 {approx = true} : vector<8x784xf32> -> vector<8x784xf32>
    %86 = arith.mulf %82, %85 : vector<8x784xf32>
    %87 = arith.select %78, %85, %86 : vector<8x784xi1>, vector<8x784xf32>
    %c0_46 = arith.constant 0 : index
    %c0_47 = arith.constant 0 : index
    %88 = vector.load %arg15[%c0_46, %c0_47] : memref<8x784xf32, #tpu.memory_space<vmem>>, vector<8x784xf32>
    tpu.vector_store %arg15[%c0_46, %c0_47], %87 {strides = array<i32>} : memref<8x784xf32, #tpu.memory_space<vmem>>, vector<8x784xf32>,
    return
  }
  func.func @transform_0(%arg0: i32) -> (i32, i32) {
    %c0_i32 = arith.constant 0 : i32
    %c0_i32_0 = arith.constant 0 : i32
    return %arg0, %c0_i32 : i32, i32
  }
  func.func @transform_1(%arg0: i32) -> (i32, i32) {
    %c0_i32 = arith.constant 0 : i32
    %c0_i32_0 = arith.constant 0 : i32
    return %arg0, %c0_i32 : i32, i32
  }
  func.func @transform_2(%arg0: i32) -> (i32, i32) {
    %c0_i32 = arith.constant 0 : i32
    %c0_i32_0 = arith.constant 0 : i32
    %c0_i32_1 = arith.constant 0 : i32
    return %c0_i32, %c0_i32_0 : i32, i32
  }
  func.func @transform_3(%arg0: i32) -> (i32, i32) {
    %c0_i32 = arith.constant 0 : i32
    %c0_i32_0 = arith.constant 0 : i32
    %c0_i32_1 = arith.constant 0 : i32
    return %c0_i32, %c0_i32_0 : i32, i32
  }
  func.func @transform_4(%arg0: i32) -> (i32, i32) {
    %c0_i32 = arith.constant 0 : i32
    %c0_i32_0 = arith.constant 0 : i32
    %c0_i32_1 = arith.constant 0 : i32
    return %c0_i32, %c0_i32_0 : i32, i32
  }
  func.func @transform_5(%arg0: i32) -> (i32, i32) {
    %c0_i32 = arith.constant 0 : i32
    %c0_i32_0 = arith.constant 0 : i32
    %c0_i32_1 = arith.constant 0 : i32
    return %c0_i32, %c0_i32_0 : i32, i32
  }
  func.func @transform_6(%arg0: i32) -> (i32, i32) {
    %c0_i32 = arith.constant 0 : i32
    %c0_i32_0 = arith.constant 0 : i32
    %c0_i32_1 = arith.constant 0 : i32
    return %c0_i32, %c0_i32_0 : i32, i32
  }
  func.func @transform_7(%arg0: i32) -> (i32, i32) {
    %c0_i32 = arith.constant 0 : i32
    %c0_i32_0 = arith.constant 0 : i32
    %c0_i32_1 = arith.constant 0 : i32
    return %c0_i32, %c0_i32_0 : i32, i32
  }
  func.func @transform_8(%arg0: i32) -> (i32, i32) {
    %c0_i32 = arith.constant 0 : i32
    %c0_i32_0 = arith.constant 0 : i32
    %c0_i32_1 = arith.constant 0 : i32
    return %c0_i32, %c0_i32_0 : i32, i32
  }
  func.func @transform_9(%arg0: i32) -> (i32, i32) {
    %c0_i32 = arith.constant 0 : i32
    %c0_i32_0 = arith.constant 0 : i32
    %c0_i32_1 = arith.constant 0 : i32
    return %c0_i32, %c0_i32_0 : i32, i32
  }
  func.func @transform_10(%arg0: i32) -> (i32, i32) {
    %c0_i32 = arith.constant 0 : i32
    %c0_i32_0 = arith.constant 0 : i32
    %c0_i32_1 = arith.constant 0 : i32
    return %c0_i32, %c0_i32_0 : i32, i32
  }
  func.func @transform_11(%arg0: i32) -> (i32, i32) {
    %c0_i32 = arith.constant 0 : i32
    %c0_i32_0 = arith.constant 0 : i32
    %c0_i32_1 = arith.constant 0 : i32
    return %c0_i32, %c0_i32_0 : i32, i32
  }
  func.func @transform_12(%arg0: i32) -> (i32, i32) {
    %c0_i32 = arith.constant 0 : i32
    %c0_i32_0 = arith.constant 0 : i32
    %c0_i32_1 = arith.constant 0 : i32
    return %c0_i32, %c0_i32_0 : i32, i32
  }
  func.func @transform_13(%arg0: i32) -> (i32, i32) {
    %c0_i32 = arith.constant 0 : i32
    %c0_i32_0 = arith.constant 0 : i32
    %c0_i32_1 = arith.constant 0 : i32
    return %c0_i32, %c0_i32_0 : i32, i32
  }
  func.func @transform_14(%arg0: i32) -> (i32, i32) {
    %c0_i32 = arith.constant 0 : i32
    %c0_i32_0 = arith.constant 0 : i32
    return %arg0, %c0_i32 : i32, i32
  }
  func.func @transform_15(%arg0: i32) -> (i32, i32) {
    %c0_i32 = arith.constant 0 : i32
    %c0_i32_0 = arith.constant 0 : i32
    return %arg0, %c0_i32 : i32, i32
  }
}

module attributes {stable_mosaic.version = 11 : i64} {
  func.func @_vae_kernel(%arg0: i32, %arg1: memref<8x784xbf16, #tpu.memory_space<vmem>>, %arg2: memref<8x64xf32, #tpu.memory_space<vmem>>, %arg3: memref<784x600xbf16, #tpu.memory_space<vmem>>, %arg4: memref<1x600xf32, #tpu.memory_space<vmem>>, %arg5: memref<600x600xbf16, #tpu.memory_space<vmem>>, %arg6: memref<1x600xf32, #tpu.memory_space<vmem>>, %arg7: memref<600x128xbf16, #tpu.memory_space<vmem>>, %arg8: memref<1x128xf32, #tpu.memory_space<vmem>>, %arg9: memref<64x600xbf16, #tpu.memory_space<vmem>>, %arg10: memref<1x600xf32, #tpu.memory_space<vmem>>, %arg11: memref<600x600xbf16, #tpu.memory_space<vmem>>, %arg12: memref<1x600xf32, #tpu.memory_space<vmem>>, %arg13: memref<600x784xbf16, #tpu.memory_space<vmem>>, %arg14: memref<1x784xf32, #tpu.memory_space<vmem>>, %arg15: memref<8x784xf32, #tpu.memory_space<vmem>>, %arg16: memref<8x128xf32, #tpu.memory_space<vmem>>) attributes {dimension_semantics = [#tpu.dimension_semantics<parallel>], iteration_bounds = array<i64: 1>, scalar_prefetch = 0 : i64, scratch_operands = 0 : i64, tpu.core_type = #tpu.core_type<tc>, window_params = [{transform_indices = @transform_0, window_bounds = array<i64: 8, 784>}, {transform_indices = @transform_1, window_bounds = array<i64: 8, 64>}, {pipeline_mode = #tpu.pipeline_mode<synchronous>, transform_indices = @transform_2, window_bounds = array<i64: 784, 600>}, {pipeline_mode = #tpu.pipeline_mode<synchronous>, transform_indices = @transform_3, window_bounds = array<i64: 1, 600>}, {pipeline_mode = #tpu.pipeline_mode<synchronous>, transform_indices = @transform_4, window_bounds = array<i64: 600, 600>}, {pipeline_mode = #tpu.pipeline_mode<synchronous>, transform_indices = @transform_5, window_bounds = array<i64: 1, 600>}, {pipeline_mode = #tpu.pipeline_mode<synchronous>, transform_indices = @transform_6, window_bounds = array<i64: 600, 128>}, {pipeline_mode = #tpu.pipeline_mode<synchronous>, transform_indices = @transform_7, window_bounds = array<i64: 1, 128>}, {pipeline_mode = #tpu.pipeline_mode<synchronous>, transform_indices = @transform_8, window_bounds = array<i64: 64, 600>}, {pipeline_mode = #tpu.pipeline_mode<synchronous>, transform_indices = @transform_9, window_bounds = array<i64: 1, 600>}, {pipeline_mode = #tpu.pipeline_mode<synchronous>, transform_indices = @transform_10, window_bounds = array<i64: 600, 600>}, {pipeline_mode = #tpu.pipeline_mode<synchronous>, transform_indices = @transform_11, window_bounds = array<i64: 1, 600>}, {pipeline_mode = #tpu.pipeline_mode<synchronous>, transform_indices = @transform_12, window_bounds = array<i64: 600, 784>}, {pipeline_mode = #tpu.pipeline_mode<synchronous>, transform_indices = @transform_13, window_bounds = array<i64: 1, 784>}, {transform_indices = @transform_14, window_bounds = array<i64: 8, 784>}, {transform_indices = @transform_15, window_bounds = array<i64: 8, 128>}]} {
    %c0 = arith.constant 0 : index
    %c0_0 = arith.constant 0 : index
    %0 = vector.load %arg1[%c0, %c0_0] : memref<8x784xbf16, #tpu.memory_space<vmem>>, vector<8x784xbf16>
    %c0_1 = arith.constant 0 : index
    %c0_2 = arith.constant 0 : index
    %1 = vector.load %arg3[%c0_1, %c0_2] : memref<784x600xbf16, #tpu.memory_space<vmem>>, vector<784x600xbf16>
    %cst = arith.constant dense<0.000000e+00> : vector<8x600xf32>
    %2 = tpu.matmul %0, %1, %cst {dimension_numbers = #tpu.dot_dimension_numbers<[1], [0], [0], [1], [0, 0, 1, 1], [], []>} : vector<8x784xbf16>, vector<784x600xbf16>, vector<8x600xf32> -> vector<8x600xf32>
    %c0_3 = arith.constant 0 : index
    %c0_4 = arith.constant 0 : index
    %3 = vector.load %arg4[%c0_3, %c0_4] : memref<1x600xf32, #tpu.memory_space<vmem>>, vector<1x600xf32>
    %4 = vector.broadcast %3 : vector<1x600xf32> to vector<8x600xf32>
    %5 = arith.addf %2, %4 : vector<8x600xf32>
    %cst_5 = arith.constant 0.000000e+00 : f32
    %6 = vector.broadcast %cst_5 : f32 to vector<8x600xf32>
    %7 = arith.maximumf %5, %6 : vector<8x600xf32>
    %8 = math.absf %5 : vector<8x600xf32>
    %cst_6 = arith.constant 0.000000e+00 : f32
    %9 = vector.broadcast %cst_6 : f32 to vector<8x600xf32>
    %10 = arith.subf %9, %8 : vector<8x600xf32>
    %11 = math.exp %10 : vector<8x600xf32>
    %12 = math.log1p %11 : vector<8x600xf32>
    %13 = arith.addf %7, %12 : vector<8x600xf32>
    %14 = arith.truncf %13 : vector<8x600xf32> to vector<8x600xbf16>
    %c0_7 = arith.constant 0 : index
    %c0_8 = arith.constant 0 : index
    %15 = vector.load %arg5[%c0_7, %c0_8] : memref<600x600xbf16, #tpu.memory_space<vmem>>, vector<600x600xbf16>
    %cst_9 = arith.constant dense<0.000000e+00> : vector<8x600xf32>
    %16 = tpu.matmul %14, %15, %cst_9 {dimension_numbers = #tpu.dot_dimension_numbers<[1], [0], [0], [1], [0, 0, 1, 1], [], []>} : vector<8x600xbf16>, vector<600x600xbf16>, vector<8x600xf32> -> vector<8x600xf32>
    %c0_10 = arith.constant 0 : index
    %c0_11 = arith.constant 0 : index
    %17 = vector.load %arg6[%c0_10, %c0_11] : memref<1x600xf32, #tpu.memory_space<vmem>>, vector<1x600xf32>
    %18 = vector.broadcast %17 : vector<1x600xf32> to vector<8x600xf32>
    %19 = arith.addf %16, %18 : vector<8x600xf32>
    %cst_12 = arith.constant 0.000000e+00 : f32
    %20 = vector.broadcast %cst_12 : f32 to vector<8x600xf32>
    %21 = arith.maximumf %19, %20 : vector<8x600xf32>
    %22 = math.absf %19 : vector<8x600xf32>
    %cst_13 = arith.constant 0.000000e+00 : f32
    %23 = vector.broadcast %cst_13 : f32 to vector<8x600xf32>
    %24 = arith.subf %23, %22 : vector<8x600xf32>
    %25 = math.exp %24 : vector<8x600xf32>
    %26 = math.log1p %25 : vector<8x600xf32>
    %27 = arith.addf %21, %26 : vector<8x600xf32>
    %28 = arith.truncf %27 : vector<8x600xf32> to vector<8x600xbf16>
    %c0_14 = arith.constant 0 : index
    %c0_15 = arith.constant 0 : index
    %29 = vector.load %arg7[%c0_14, %c0_15] : memref<600x128xbf16, #tpu.memory_space<vmem>>, vector<600x128xbf16>
    %cst_16 = arith.constant dense<0.000000e+00> : vector<8x128xf32>
    %30 = tpu.matmul %28, %29, %cst_16 {dimension_numbers = #tpu.dot_dimension_numbers<[1], [0], [0], [1], [0, 0, 1, 1], [], []>} : vector<8x600xbf16>, vector<600x128xbf16>, vector<8x128xf32> -> vector<8x128xf32>
    %c0_17 = arith.constant 0 : index
    %c0_18 = arith.constant 0 : index
    %31 = vector.load %arg8[%c0_17, %c0_18] : memref<1x128xf32, #tpu.memory_space<vmem>>, vector<1x128xf32>
    %32 = vector.broadcast %31 : vector<1x128xf32> to vector<8x128xf32>
    %33 = arith.addf %30, %32 : vector<8x128xf32>
    %c0_19 = arith.constant 0 : index
    %c0_20 = arith.constant 0 : index
    %34 = vector.load %arg16[%c0_19, %c0_20] : memref<8x128xf32, #tpu.memory_space<vmem>>, vector<8x128xf32>
    tpu.vector_store %arg16[%c0_19, %c0_20], %33 {strides = array<i32>} : memref<8x128xf32, #tpu.memory_space<vmem>>, vector<8x128xf32>,
    %35 = vector.extract_strided_slice %33 {offsets = [0, 0], sizes = [8, 64], strides = [1, 1]} : vector<8x128xf32> to vector<8x64xf32>
    %36 = vector.extract_strided_slice %33 {offsets = [0, 64], sizes = [8, 64], strides = [1, 1]} : vector<8x128xf32> to vector<8x64xf32>
    %c0_21 = arith.constant 0 : index
    %c0_22 = arith.constant 0 : index
    %37 = vector.load %arg2[%c0_21, %c0_22] : memref<8x64xf32, #tpu.memory_space<vmem>>, vector<8x64xf32>
    %cst_23 = arith.constant 5.000000e-01 : f32
    %38 = vector.broadcast %cst_23 : f32 to vector<8x64xf32>
    %39 = arith.mulf %38, %36 : vector<8x64xf32>
    %40 = math.exp %39 : vector<8x64xf32>
    %41 = arith.mulf %37, %40 : vector<8x64xf32>
    %42 = arith.addf %35, %41 : vector<8x64xf32>
    %43 = arith.truncf %42 : vector<8x64xf32> to vector<8x64xbf16>
    %c0_24 = arith.constant 0 : index
    %c0_25 = arith.constant 0 : index
    %44 = vector.load %arg9[%c0_24, %c0_25] : memref<64x600xbf16, #tpu.memory_space<vmem>>, vector<64x600xbf16>
    %cst_26 = arith.constant dense<0.000000e+00> : vector<8x600xf32>
    %45 = tpu.matmul %43, %44, %cst_26 {dimension_numbers = #tpu.dot_dimension_numbers<[1], [0], [0], [1], [0, 0, 1, 1], [], []>} : vector<8x64xbf16>, vector<64x600xbf16>, vector<8x600xf32> -> vector<8x600xf32>
    %c0_27 = arith.constant 0 : index
    %c0_28 = arith.constant 0 : index
    %46 = vector.load %arg10[%c0_27, %c0_28] : memref<1x600xf32, #tpu.memory_space<vmem>>, vector<1x600xf32>
    %47 = vector.broadcast %46 : vector<1x600xf32> to vector<8x600xf32>
    %48 = arith.addf %45, %47 : vector<8x600xf32>
    %cst_29 = arith.constant 0.000000e+00 : f32
    %49 = vector.broadcast %cst_29 : f32 to vector<8x600xf32>
    %50 = arith.maximumf %48, %49 : vector<8x600xf32>
    %51 = math.absf %48 : vector<8x600xf32>
    %cst_30 = arith.constant 0.000000e+00 : f32
    %52 = vector.broadcast %cst_30 : f32 to vector<8x600xf32>
    %53 = arith.subf %52, %51 : vector<8x600xf32>
    %54 = math.exp %53 : vector<8x600xf32>
    %55 = math.log1p %54 : vector<8x600xf32>
    %56 = arith.addf %50, %55 : vector<8x600xf32>
    %57 = arith.truncf %56 : vector<8x600xf32> to vector<8x600xbf16>
    %c0_31 = arith.constant 0 : index
    %c0_32 = arith.constant 0 : index
    %58 = vector.load %arg11[%c0_31, %c0_32] : memref<600x600xbf16, #tpu.memory_space<vmem>>, vector<600x600xbf16>
    %cst_33 = arith.constant dense<0.000000e+00> : vector<8x600xf32>
    %59 = tpu.matmul %57, %58, %cst_33 {dimension_numbers = #tpu.dot_dimension_numbers<[1], [0], [0], [1], [0, 0, 1, 1], [], []>} : vector<8x600xbf16>, vector<600x600xbf16>, vector<8x600xf32> -> vector<8x600xf32>
    %c0_34 = arith.constant 0 : index
    %c0_35 = arith.constant 0 : index
    %60 = vector.load %arg12[%c0_34, %c0_35] : memref<1x600xf32, #tpu.memory_space<vmem>>, vector<1x600xf32>
    %61 = vector.broadcast %60 : vector<1x600xf32> to vector<8x600xf32>
    %62 = arith.addf %59, %61 : vector<8x600xf32>
    %cst_36 = arith.constant 0.000000e+00 : f32
    %63 = vector.broadcast %cst_36 : f32 to vector<8x600xf32>
    %64 = arith.maximumf %62, %63 : vector<8x600xf32>
    %65 = math.absf %62 : vector<8x600xf32>
    %cst_37 = arith.constant 0.000000e+00 : f32
    %66 = vector.broadcast %cst_37 : f32 to vector<8x600xf32>
    %67 = arith.subf %66, %65 : vector<8x600xf32>
    %68 = math.exp %67 : vector<8x600xf32>
    %69 = math.log1p %68 : vector<8x600xf32>
    %70 = arith.addf %64, %69 : vector<8x600xf32>
    %71 = arith.truncf %70 : vector<8x600xf32> to vector<8x600xbf16>
    %c0_38 = arith.constant 0 : index
    %c0_39 = arith.constant 0 : index
    %72 = vector.load %arg13[%c0_38, %c0_39] : memref<600x784xbf16, #tpu.memory_space<vmem>>, vector<600x784xbf16>
    %cst_40 = arith.constant dense<0.000000e+00> : vector<8x784xf32>
    %73 = tpu.matmul %71, %72, %cst_40 {dimension_numbers = #tpu.dot_dimension_numbers<[1], [0], [0], [1], [0, 0, 1, 1], [], []>} : vector<8x600xbf16>, vector<600x784xbf16>, vector<8x784xf32> -> vector<8x784xf32>
    %c0_41 = arith.constant 0 : index
    %c0_42 = arith.constant 0 : index
    %74 = vector.load %arg14[%c0_41, %c0_42] : memref<1x784xf32, #tpu.memory_space<vmem>>, vector<1x784xf32>
    %75 = vector.broadcast %74 : vector<1x784xf32> to vector<8x784xf32>
    %76 = arith.addf %73, %75 : vector<8x784xf32>
    %cst_43 = arith.constant 0.000000e+00 : f32
    %77 = vector.broadcast %cst_43 : f32 to vector<8x784xf32>
    %78 = arith.cmpf oge, %76, %77 : vector<8x784xf32>
    %cst_44 = arith.constant 0.000000e+00 : f32
    %79 = vector.broadcast %cst_44 : f32 to vector<8x784xf32>
    %80 = arith.subf %79, %76 : vector<8x784xf32>
    %81 = arith.select %78, %80, %76 : vector<8x784xi1>, vector<8x784xf32>
    %82 = math.exp %81 : vector<8x784xf32>
    %cst_45 = arith.constant 1.000000e+00 : f32
    %83 = vector.broadcast %cst_45 : f32 to vector<8x784xf32>
    %84 = arith.addf %83, %82 : vector<8x784xf32>
    %85 = tpu.reciprocal %84 {approx = true} : vector<8x784xf32> -> vector<8x784xf32>
    %86 = arith.mulf %82, %85 : vector<8x784xf32>
    %87 = arith.select %78, %85, %86 : vector<8x784xi1>, vector<8x784xf32>
    %c0_46 = arith.constant 0 : index
    %c0_47 = arith.constant 0 : index
    %88 = vector.load %arg15[%c0_46, %c0_47] : memref<8x784xf32, #tpu.memory_space<vmem>>, vector<8x784xf32>
    tpu.vector_store %arg15[%c0_46, %c0_47], %87 {strides = array<i32>} : memref<8x784xf32, #tpu.memory_space<vmem>>, vector<8x784xf32>,
    return
  }
  func.func @transform_0(%arg0: i32) -> (i32, i32) {
    %c0_i32 = arith.constant 0 : i32
    %c0_i32_0 = arith.constant 0 : i32
    return %arg0, %c0_i32 : i32, i32
  }
  func.func @transform_1(%arg0: i32) -> (i32, i32) {
    %c0_i32 = arith.constant 0 : i32
    %c0_i32_0 = arith.constant 0 : i32
    return %arg0, %c0_i32 : i32, i32
  }
  func.func @transform_2(%arg0: i32) -> (i32, i32) {
    %c0_i32 = arith.constant 0 : i32
    %c0_i32_0 = arith.constant 0 : i32
    %c0_i32_1 = arith.constant 0 : i32
    return %c0_i32, %c0_i32_0 : i32, i32
  }
  func.func @transform_3(%arg0: i32) -> (i32, i32) {
    %c0_i32 = arith.constant 0 : i32
    %c0_i32_0 = arith.constant 0 : i32
    %c0_i32_1 = arith.constant 0 : i32
    return %c0_i32, %c0_i32_0 : i32, i32
  }
  func.func @transform_4(%arg0: i32) -> (i32, i32) {
    %c0_i32 = arith.constant 0 : i32
    %c0_i32_0 = arith.constant 0 : i32
    %c0_i32_1 = arith.constant 0 : i32
    return %c0_i32, %c0_i32_0 : i32, i32
  }
  func.func @transform_5(%arg0: i32) -> (i32, i32) {
    %c0_i32 = arith.constant 0 : i32
    %c0_i32_0 = arith.constant 0 : i32
    %c0_i32_1 = arith.constant 0 : i32
    return %c0_i32, %c0_i32_0 : i32, i32
  }
  func.func @transform_6(%arg0: i32) -> (i32, i32) {
    %c0_i32 = arith.constant 0 : i32
    %c0_i32_0 = arith.constant 0 : i32
    %c0_i32_1 = arith.constant 0 : i32
    return %c0_i32, %c0_i32_0 : i32, i32
  }
  func.func @transform_7(%arg0: i32) -> (i32, i32) {
    %c0_i32 = arith.constant 0 : i32
    %c0_i32_0 = arith.constant 0 : i32
    %c0_i32_1 = arith.constant 0 : i32
    return %c0_i32, %c0_i32_0 : i32, i32
  }
  func.func @transform_8(%arg0: i32) -> (i32, i32) {
    %c0_i32 = arith.constant 0 : i32
    %c0_i32_0 = arith.constant 0 : i32
    %c0_i32_1 = arith.constant 0 : i32
    return %c0_i32, %c0_i32_0 : i32, i32
  }
  func.func @transform_9(%arg0: i32) -> (i32, i32) {
    %c0_i32 = arith.constant 0 : i32
    %c0_i32_0 = arith.constant 0 : i32
    %c0_i32_1 = arith.constant 0 : i32
    return %c0_i32, %c0_i32_0 : i32, i32
  }
  func.func @transform_10(%arg0: i32) -> (i32, i32) {
    %c0_i32 = arith.constant 0 : i32
    %c0_i32_0 = arith.constant 0 : i32
    %c0_i32_1 = arith.constant 0 : i32
    return %c0_i32, %c0_i32_0 : i32, i32
  }
  func.func @transform_11(%arg0: i32) -> (i32, i32) {
    %c0_i32 = arith.constant 0 : i32
    %c0_i32_0 = arith.constant 0 : i32
    %c0_i32_1 = arith.constant 0 : i32
    return %c0_i32, %c0_i32_0 : i32, i32
  }
  func.func @transform_12(%arg0: i32) -> (i32, i32) {
    %c0_i32 = arith.constant 0 : i32
    %c0_i32_0 = arith.constant 0 : i32
    %c0_i32_1 = arith.constant 0 : i32
    return %c0_i32, %c0_i32_0 : i32, i32
  }
  func.func @transform_13(%arg0: i32) -> (i32, i32) {
    %c0_i32 = arith.constant 0 : i32
    %c0_i32_0 = arith.constant 0 : i32
    %c0_i32_1 = arith.constant 0 : i32
    return %c0_i32, %c0_i32_0 : i32, i32
  }
  func.func @transform_14(%arg0: i32) -> (i32, i32) {
    %c0_i32 = arith.constant 0 : i32
    %c0_i32_0 = arith.constant 0 : i32
    return %arg0, %c0_i32 : i32, i32
  }
  func.func @transform_15(%arg0: i32) -> (i32, i32) {
    %c0_i32 = arith.constant 0 : i32
    %c0_i32_0 = arith.constant 0 : i32
    return %arg0, %c0_i32 : i32, i32
  }
}

</mosaic_0001>

<bundles_post_ra>
// kernel: tpu_custom_call.1
= control target key start
LH: loop header
LB: loop body
LE: loop exit
PB: predicated region body
PF: predicated region fallthrough
CT: control target
= control target key end

     0   :  { %21 = vsyncpa [#allocation3], 0  ;;  %s14528_s0 = inlined_call_operand.vmem [shape: bf16[8,784], index: 0, kind: input, shape index: {}]   ;;  %s14529_s1 = inlined_call_operand.vmem [shape: f32[8,64], index: 1, kind: input, shape index: {}]   ;;  %s14530_s2 = inlined_call_operand.vmem [shape: bf16[784,600], index: 2, kind: input, shape index: {}]   ;;  %s14531_s3 = inlined_call_operand.vmem [shape: f32[1,600], index: 3, kind: input, shape index: {}]   ;;  %s14532_s4 = inlined_call_operand.vmem [shape: bf16[600,600], index: 4, kind: input, shape index: {}]   ;;  %s14533_s5 = inlined_call_operand.vmem [shape: f32[1,600], index: 5, kind: input, shape index: {}]   ;;  %s14534_s6 = inlined_call_operand.vmem [shape: bf16[600,128], index: 6, kind: input, shape index: {}]   ;;  %s14535_s7 = inlined_call_operand.vmem [shape: f32[1,128], index: 7, kind: input, shape index: {}]   ;;  %s14536_s8 = inlined_call_operand.vmem [shape: bf16[64,600], index: 8, kind: input, shape index: {}]   ;;  %s14537_s9 = inlined_call_operand.vmem [shape: f32[1,600], index: 9, kind: input, shape index: {}]   ;;  %s14538_s10 = inlined_call_operand.hbm [shape: bf16[600,600], index: 10, kind: input, shape index: {}]   ;;  %s14539_s11 = inlined_call_operand.vmem [shape: f32[1,600], index: 11, kind: input, shape index: {}]   ;;  %s14540_s12 = inlined_call_operand.vmem [shape: bf16[600,784], index: 12, kind: input, shape index: {}]   ;;  %s14541_s13 = inlined_call_operand.vmem [shape: f32[1,784], index: 13, kind: input, shape index: {}]   ;;  %s14542_s14 = inlined_call_operand.hbm [shape: f32[8,784], index: 14, kind: output, shape index: {0}]   ;;  %s14543_s15 = inlined_call_operand.hbm [shape: f32[8,128], index: 15, kind: output, shape index: {1}]  }
   0x1   :  { %22 = vsyncpa [#allocation4], 0 }
   0x2   :  { %23 = vsyncpa [#allocation7], 0  ;;  %s11698_s18 = smov [#allocation2]   ;;  %s11626_s22 = scalar_lea.hbm %s14538_s10, 24000 }
   0x3   :  { %s49_s19 = sshll.u32 %s11698_s18, 4  ;;  %p11627_p0 = scmp.ne.s32.totalorder %s14538_s10, %s11626_s22  ;;  %s50_s19 = int_to_ptr.vmem [resolvable:$true] %s49_s19 }
   0x4   :  { %p11630_p1 = scmp.lt.u32.totalorder %s11626_s22, %s14538_s10 }
   0x6   :  { %p11632_p2 = pnand %p11630_p1, %p11627_p0 }
   0x8   :  { %11635 = shalt.err (!%p11632_p2)
}
   0x9   :  { %s11636_s27 = scalar_lea.vmem %s50_s19, 24000  ;;  %p11641_p4 = scmp.lt.s32.totalorder %s50_s19, %s50_s19 }
   0xa   :  { %p11637_p3 = scmp.ne.s32.totalorder %s50_s19, %s11636_s27  ;;  %p11642_p5 = scmp.lt.s32.totalorder %s11636_s27, %s11636_s27 }
   0xc   :  { %p11643_p6 = por %p11642_p5, %p11641_p4 }
   0xe   :  { %p11644_p7 = pnand %p11643_p6, %p11637_p3 }
  0x10   :  { %11647 = shalt.err (!%p11644_p7)
}
  0x11   :  { %s11699_s28 = smov 320   ;;  %s11700_s29 = smov 20  }
  0x12   :  { %55 = dma.hbm_to_vmem [thread:$0]  %s14538_s10, 24000, %s50_s19, [#allocation3], %s11699_s28, %s11699_s28, %s11700_s29  }
  0x13   :  { %11692 = dma.done.wait [#allocation3], 24000  }
  0x14   :  { %11693 = vsyncadd [#allocation3], 4294943296  ;;  %v10195_v0 = vld [vmem:[%s14530_s2 + $0x4] ss:$20 sps:$4 sm:$0xff]   ;;  %v10197_v1 = vld [vmem:[%s14530_s2 + $0xc] ss:$20 sps:$4 sm:$0xff]  }
  0x15   :  { %1693 = vmatprep.subr.bf16.mxu0 %v10195_v0  ;;  %v10199_v2 = vld [vmem:[%s14530_s2] ss:$20 sps:$4 sm:$0xff]   ;;  %v10200_v3 = vld [vmem:[%s14530_s2 + $0x8] ss:$20 sps:$4 sm:$0xff]   ;;  %1857 = vmatprep.subr.bf16.mxu1 %v10197_v1  ;;  %v10206_v7 = vld [vmem:[%s14530_s2 + $0x30] ss:$20 sps:$4 sm:$0xff]  }
  0x16   :  { %v10201_v4 = vld [vmem:[%s14530_s2 + $0x2c] ss:$20 sps:$4 sm:$0xff]   ;;  %1694 = vmatpush1.bf16.msra.mxu0 %v10199_v2  ;;  %1858 = vmatpush1.bf16.msra.mxu1 %v10200_v3  ;;  %v10203_v5 = vld [vmem:[%s14530_s2 + $0x34] ss:$20 sps:$4 sm:$0xff]   ;;  %v10209_v9 = vld [vmem:[%s14530_s2 + $0x5c] ss:$20 sps:$4 sm:$0xff]  }
  0x17   :  { %v10205_v6 = vld [vmem:[%s14530_s2 + $0x28] ss:$20 sps:$4 sm:$0xff]   ;;  %1695 = vmatprep.subr.bf16.mxu0 %v10201_v4  ;;  %1859 = vmatprep.subr.bf16.mxu1 %v10203_v5  ;;  %v10211_v10 = vld [vmem:[%s14530_s2 + $0x50] ss:$20 sps:$4 sm:$0xff]   ;;  %v10212_v11 = vld [vmem:[%s14530_s2 + $0x58] ss:$20 sps:$4 sm:$0xff]  }
  0x18   :  { %v10207_v8 = vld [vmem:[%s14530_s2 + $0x54] ss:$20 sps:$4 sm:$0xff]   ;;  %v10213_v12 = vld [vmem:[%s14530_s2 + $0x7c] ss:$20 sps:$4 sm:$0xff]   ;;  %v10215_v13 = vld [vmem:[%s14530_s2 + $0x84] ss:$20 sps:$4 sm:$0xff]  }
  0x19   :  { %v10217_v14 = vld [vmem:[%s14530_s2 + $0x78] ss:$20 sps:$4 sm:$0xff]   ;;  %v10218_v15 = vld [vmem:[%s14530_s2 + $0x80] ss:$20 sps:$4 sm:$0xff]   ;;  %v10224_v19 = vld [vmem:[%s14530_s2 + $0xa8] ss:$20 sps:$4 sm:$0xff]  }
  0x1a   :  { %1696 = vmatpush1.bf16.msra.mxu0 %v10205_v6  ;;  %1860 = vmatpush1.bf16.msra.mxu1 %v10206_v7  ;;  %v10219_v16 = vld [vmem:[%s14530_s2 + $0xa4] ss:$20 sps:$4 sm:$0xff]   ;;  %v10221_v17 = vld [vmem:[%s14530_s2 + $0xac] ss:$20 sps:$4 sm:$0xff]   ;;  %v10227_v21 = vld [vmem:[%s14530_s2 + $0xd4] ss:$20 sps:$4 sm:$0xff]  }
  0x1b   :  { %1697 = vmatprep.subr.bf16.mxu0 %v10207_v8  ;;  %1861 = vmatprep.subr.bf16.mxu1 %v10209_v9  ;;  %v10223_v18 = vld [vmem:[%s14530_s2 + $0xa0] ss:$20 sps:$4 sm:$0xff]   ;;  %v10229_v22 = vld [vmem:[%s14530_s2 + $0xc8] ss:$20 sps:$4 sm:$0xff]   ;;  %v10230_v23 = vld [vmem:[%s14530_s2 + $0xd0] ss:$20 sps:$4 sm:$0xff]  }
  0x1c   :  { %v10225_v20 = vld [vmem:[%s14530_s2 + $0xcc] ss:$20 sps:$4 sm:$0xff]   ;;  %v10231_v24 = vld [vmem:[%s14530_s2 + $0xf4] ss:$20 sps:$4 sm:$0xff]   ;;  %v10233_v25 = vld [vmem:[%s14530_s2 + $0xfc] ss:$20 sps:$4 sm:$0xff]  }
  0x1d   :  { %v10235_v26 = vld [vmem:[%s14530_s2 + $0xf0] ss:$20 sps:$4 sm:$0xff]   ;;  %v10236_v27 = vld [vmem:[%s14530_s2 + $0xf8] ss:$20 sps:$4 sm:$0xff]   ;;  %v10242_v31 = vld [vmem:[%s14530_s2 + $0x120] ss:$20 sps:$4 sm:$0xff]  }
  0x1e   :  { %1698 = vmatpush1.bf16.msra.mxu0 %v10211_v10  ;;  %1862 = vmatpush1.bf16.msra.mxu1 %v10212_v11  ;;  %v10237_v28 = vld [vmem:[%s14530_s2 + $0x11c] ss:$20 sps:$4 sm:$0xff]   ;;  %v10239_v29 = vld [vmem:[%s14530_s2 + $0x124] ss:$20 sps:$4 sm:$0xff]   ;;  %v10245_v33 = vld [vmem:[%s14530_s2 + $0x14c] ss:$20 sps:$4 sm:$0xff]  }
  0x1f   :  { %1699 = vmatprep.subr.bf16.mxu0 %v10213_v12  ;;  %1863 = vmatprep.subr.bf16.mxu1 %v10215_v13  ;;  %v10241_v30 = vld [vmem:[%s14530_s2 + $0x118] ss:$20 sps:$4 sm:$0xff]   ;;  %v10247_v34 = vld [vmem:[%s14530_s2 + $0x140] ss:$20 sps:$4 sm:$0xff]   ;;  %v10248_v35 = vld [vmem:[%s14530_s2 + $0x148] ss:$20 sps:$4 sm:$0xff]  }
  0x20   :  { %v10243_v32 = vld [vmem:[%s14530_s2 + $0x144] ss:$20 sps:$4 sm:$0xff]   ;;  %v10249_v36 = vld [vmem:[%s14530_s2 + $0x16c] ss:$20 sps:$4 sm:$0xff]   ;;  %v10251_v37 = vld [vmem:[%s14530_s2 + $0x174] ss:$20 sps:$4 sm:$0xff]  }
  0x21   :  { %v10253_v38 = vld [vmem:[%s14530_s2 + $0x168] ss:$20 sps:$4 sm:$0xff]   ;;  %v10254_v39 = vld [vmem:[%s14530_s2 + $0x170] ss:$20 sps:$4 sm:$0xff]   ;;  %v10260_v43 = vld [vmem:[%s14530_s2 + $0x198] ss:$20 sps:$4 sm:$0xff]  }
  0x22   :  { %1700 = vmatpush1.bf16.msra.mxu0 %v10217_v14  ;;  %1864 = vmatpush1.bf16.msra.mxu1 %v10218_v15  ;;  %v10255_v40 = vld [vmem:[%s14530_s2 + $0x194] ss:$20 sps:$4 sm:$0xff]   ;;  %v10257_v41 = vld [vmem:[%s14530_s2 + $0x19c] ss:$20 sps:$4 sm:$0xff]   ;;  %v10263_v45 = vld [vmem:[%s14530_s2 + $0x1c4] ss:$20 sps:$4 sm:$0xff]  }
  0x23   :  { %1701 = vmatprep.subr.bf16.mxu0 %v10219_v16  ;;  %1865 = vmatprep.subr.bf16.mxu1 %v10221_v17  ;;  %v10259_v42 = vld [vmem:[%s14530_s2 + $0x190] ss:$20 sps:$4 sm:$0xff]   ;;  %v10265_v47 = vld [vmem:[%s14530_s2 + $0x1b8] ss:$20 sps:$4 sm:$0xff]   ;;  %v10266_v49 = vld [vmem:[%s14530_s2 + $0x1c0] ss:$20 sps:$4 sm:$0xff]  }
  0x24   :  { %v10261_v44 = vld [vmem:[%s14530_s2 + $0x1bc] ss:$20 sps:$4 sm:$0xff]   ;;  %v66_v46 = vld [vmem:[%s14528_s0] sm:$0xff]  ;;  %v10275_v55 = vld [vmem:[%s14530_s2 + $0x214] ss:$20 sps:$4 sm:$0xff]   ;;  %vm1689_vm0 = vcmask 130048  }
  0x25   :  { %v11943_v48 = vcombine.high %v66_v46, %v66_v46  ;;  %v10267_v50 = vld [vmem:[%s14530_s2 + $0x1e4] ss:$20 sps:$4 sm:$0xff]   ;;  %v10269_v51 = vld [vmem:[%s14530_s2 + $0x1ec] ss:$20 sps:$4 sm:$0xff]   ;;  %v10272_v53 = vld [vmem:[%s14530_s2 + $0x1e8] ss:$20 sps:$4 sm:$0xff]   ;;  %v12007_v5 = vcombine.low %v66_v46, %v66_v46 }
  0x26   :  { %1702 = vmatpush1.bf16.msra.mxu0 %v10223_v18  ;;  %1866 = vmatpush1.bf16.msra.mxu1 %v10224_v19  ;;  %v10271_v52 = vld [vmem:[%s14530_s2 + $0x1e0] ss:$20 sps:$4 sm:$0xff]   ;;  %v10277_v56 = vld [vmem:[%s14530_s2 + $0x208] ss:$20 sps:$4 sm:$0xff]   ;;  %v10278_v57 = vld [vmem:[%s14530_s2 + $0x210] ss:$20 sps:$4 sm:$0xff]  }
  0x27   :  { %1703 = vmatprep.subr.bf16.mxu0 %v10225_v20  ;;  %1867 = vmatprep.subr.bf16.mxu1 %v10227_v21  ;;  %v10273_v54 = vld [vmem:[%s14530_s2 + $0x20c] ss:$20 sps:$4 sm:$0xff]   ;;  %v10279_v58 = vld [vmem:[%s14530_s2 + $0x234] ss:$20 sps:$4 sm:$0xff]   ;;  %v10281_v59 = vld [vmem:[%s14530_s2 + $0x23c] ss:$20 sps:$4 sm:$0xff]  }
  0x28   :  { %1725 = vmatprep.mubr.bf16.mxu0 %v11943_v48  ;;  %1889 = vmatprep.mubr.bf16.mxu1 %v11943_v48  ;;  %v10283_v60 = vld [vmem:[%s14530_s2 + $0x230] ss:$20 sps:$4 sm:$0xff]   ;;  %v10284_v61 = vld [vmem:[%s14530_s2 + $0x238] ss:$20 sps:$4 sm:$0xff]   ;;  %v10290_v1 = vld [vmem:[%s14530_s2 + $0x260] ss:$20 sps:$4 sm:$0xff]  }
  0x29   :  { %v10285_v62 = vld [vmem:[%s14530_s2 + $0x25c] ss:$20 sps:$4 sm:$0xff]   ;;  %v10287_v63 = vld [vmem:[%s14530_s2 + $0x264] ss:$20 sps:$4 sm:$0xff]   ;;  %v10297_v3 = vld [vmem:[%s14530_s2 + $0x28c] ss:$20 sps:$4 sm:$0xff]  }
  0x2a   :  { %1704 = vmatpush1.bf16.msra.mxu0 %v10229_v22  ;;  %1868 = vmatpush1.bf16.msra.mxu1 %v10230_v23  ;;  %v10289_v0 = vld [vmem:[%s14530_s2 + $0x258] ss:$20 sps:$4 sm:$0xff]   ;;  %v10292_v4 = vld [vmem:[%s14530_s2 + $0x280] ss:$20 sps:$4 sm:$0xff]   ;;  %v10295_v6 = vld [vmem:[%s14530_s2 + $0x288] ss:$20 sps:$4 sm:$0xff]  }
  0x2b   :  { %1705 = vmatprep.subr.bf16.mxu0 %v10231_v24  ;;  %1869 = vmatprep.subr.bf16.mxu1 %v10233_v25  ;;  %v10294_v2 = vld [vmem:[%s14530_s2 + $0x284] ss:$20 sps:$4 sm:$0xff]   ;;  %v10301_v7 = vld [vmem:[%s14530_s2 + $0x2ac] ss:$20 sps:$4 sm:$0xff]   ;;  %v10304_v8 = vld [vmem:[%s14530_s2 + $0x2b4] ss:$20 sps:$4 sm:$0xff]  }
  0x2c   :  { %v10299_v9 = vld [vmem:[%s14530_s2 + $0x2a8] ss:$20 sps:$4 sm:$0xff]   ;;  %v10302_v10 = vld [vmem:[%s14530_s2 + $0x2b0] ss:$20 sps:$4 sm:$0xff]   ;;  %v10308_v14 = vld [vmem:[%s14530_s2 + $0x2d8] ss:$20 sps:$4 sm:$0xff]  }
  0x2d   :  { %v10307_v11 = vld [vmem:[%s14530_s2 + $0x2d4] ss:$20 sps:$4 sm:$0xff]   ;;  %v10310_v12 = vld [vmem:[%s14530_s2 + $0x2dc] ss:$20 sps:$4 sm:$0xff]   ;;  %v10316_v16 = vld [vmem:[%s14530_s2 + $0x304] ss:$20 sps:$4 sm:$0xff]  }
  0x2e   :  { %1706 = vmatpush1.bf16.msra.mxu0 %v10235_v26  ;;  %1870 = vmatpush1.bf16.msra.mxu1 %v10236_v27  ;;  %v10305_v13 = vld [vmem:[%s14530_s2 + $0x2d0] ss:$20 sps:$4 sm:$0xff]   ;;  %v10311_v17 = vld [vmem:[%s14530_s2 + $0x2f8] ss:$20 sps:$4 sm:$0xff]   ;;  %v10314_v18 = vld [vmem:[%s14530_s2 + $0x300] ss:$20 sps:$4 sm:$0xff]  }
  0x2f   :  { %1707 = vmatprep.subr.bf16.mxu0 %v10237_v28  ;;  %1871 = vmatprep.subr.bf16.mxu1 %v10239_v29  ;;  %v10313_v15 = vld [vmem:[%s14530_s2 + $0x2fc] ss:$20 sps:$4 sm:$0xff]   ;;  %v10319_v19 = vld [vmem:[%s14530_s2 + $0x324] ss:$20 sps:$4 sm:$0xff]   ;;  %v10322_v20 = vld [vmem:[%s14530_s2 + $0x32c] ss:$20 sps:$4 sm:$0xff]  }
  0x30   :  { %v10317_v21 = vld [vmem:[%s14530_s2 + $0x320] ss:$20 sps:$4 sm:$0xff]   ;;  %v10320_v22 = vld [vmem:[%s14530_s2 + $0x328] ss:$20 sps:$4 sm:$0xff]   ;;  %v10326_v26 = vld [vmem:[%s14530_s2 + $0x350] ss:$20 sps:$4 sm:$0xff]  }
  0x31   :  { %v10325_v23 = vld [vmem:[%s14530_s2 + $0x34c] ss:$20 sps:$4 sm:$0xff]   ;;  %v10328_v24 = vld [vmem:[%s14530_s2 + $0x354] ss:$20 sps:$4 sm:$0xff]   ;;  %v10334_v28 = vld [vmem:[%s14530_s2 + $0x37c] ss:$20 sps:$4 sm:$0xff]  }
  0x32   :  { %1708 = vmatpush1.bf16.msra.mxu0 %v10241_v30  ;;  %1872 = vmatpush1.bf16.msra.mxu1 %v10242_v31  ;;  %v10323_v25 = vld [vmem:[%s14530_s2 + $0x348] ss:$20 sps:$4 sm:$0xff]   ;;  %v10329_v31 = vld [vmem:[%s14530_s2 + $0x370] ss:$20 sps:$4 sm:$0xff]   ;;  %vm11703_vm1 = vmmov 0   ;;  %vm3492_vm7 = vcmask 1043456  }
  0x33   :  { %1709 = vmatprep.subr.bf16.mxu0 %v10243_v32  ;;  %1873 = vmatprep.subr.bf16.mxu1 %v10245_v33  ;;  %v10331_v27 = vld [vmem:[%s14530_s2 + $0x374] ss:$20 sps:$4 sm:$0xff]   ;;  %v10332_v32 = vld [vmem:[%s14530_s2 + $0x378] ss:$20 sps:$4 sm:$0xff]   ;;  %v10337_v33 = vld [vmem:[%s14530_s2 + $0x39c] ss:$20 sps:$4 sm:$0xff]  }
  0x34   :  { %v12083_v29 = vld [vmem:[%s14528_s0 + $0x8] sm:$0xff]  ;;  %v10358_v46 = vld [vmem:[%s14530_s2 + $0x41c] ss:$20 sps:$4 sm:$0xff]   ;;  %vm3488_vm8 = vcmask 719872   ;;  %s11704_s21 = smov 64   ;;  %vm4554_vm14 = vcmask 523264  }
  0x35   :  { %v12087_v30 = vcombine.high %v12083_v29, %v12083_v29 }
  0x36   :  { %1710 = vmatpush1.bf16.msra.mxu0 %v10247_v34  ;;  %1874 = vmatpush1.bf16.msra.mxu1 %v10248_v35  ;;  %v10340_v34 = vld [vmem:[%s14530_s2 + $0x3a4] ss:$20 sps:$4 sm:$0xff]  }
  0x37   :  { %1711 = vmatprep.subr.bf16.mxu0 %v10249_v36  ;;  %1875 = vmatprep.subr.bf16.mxu1 %v10251_v37  ;;  %v10335_v35 = vld [vmem:[%s14530_s2 + $0x398] ss:$20 sps:$4 sm:$0xff]   ;;  %v10338_v36 = vld [vmem:[%s14530_s2 + $0x3a0] ss:$20 sps:$4 sm:$0xff]  }
  0x38   :  { %v10343_v37 = vld [vmem:[%s14530_s2 + $0x3c4] ss:$20 sps:$4 sm:$0xff]  }
  0x3a   :  { %1712 = vmatpush1.bf16.msra.mxu0 %v10253_v38  ;;  %1876 = vmatpush1.bf16.msra.mxu1 %v10254_v39  ;;  %v10346_v38 = vld [vmem:[%s14530_s2 + $0x3cc] ss:$20 sps:$4 sm:$0xff]  }
  0x3b   :  { %1713 = vmatprep.subr.bf16.mxu0 %v10255_v40  ;;  %1877 = vmatprep.subr.bf16.mxu1 %v10257_v41  ;;  %v10341_v39 = vld [vmem:[%s14530_s2 + $0x3c0] ss:$20 sps:$4 sm:$0xff]   ;;  %v10344_v40 = vld [vmem:[%s14530_s2 + $0x3c8] ss:$20 sps:$4 sm:$0xff]  }
  0x3c   :  { %v10349_v41 = vld [vmem:[%s14530_s2 + $0x3ec] ss:$20 sps:$4 sm:$0xff]  }
  0x3e   :  { %1714 = vmatpush1.bf16.msra.mxu0 %v10259_v42  ;;  %1878 = vmatpush1.bf16.msra.mxu1 %v10260_v43  ;;  %v10352_v42 = vld [vmem:[%s14530_s2 + $0x3f4] ss:$20 sps:$4 sm:$0xff]  }
  0x3f   :  { %1715 = vmatprep.subr.bf16.mxu0 %v10261_v44  ;;  %1879 = vmatprep.subr.bf16.mxu1 %v10263_v45  ;;  %v10347_v43 = vld [vmem:[%s14530_s2 + $0x3e8] ss:$20 sps:$4 sm:$0xff]   ;;  %v10350_v44 = vld [vmem:[%s14530_s2 + $0x3f0] ss:$20 sps:$4 sm:$0xff]  }
  0x40   :  { %v10355_v45 = vld [vmem:[%s14530_s2 + $0x414] ss:$20 sps:$4 sm:$0xff]  }
  0x42   :  { %1716 = vmatpush1.bf16.msra.mxu0 %v10265_v47  ;;  %1880 = vmatpush1.bf16.msra.mxu1 %v10266_v49  ;;  %v10353_v47 = vld [vmem:[%s14530_s2 + $0x410] ss:$20 sps:$4 sm:$0xff]   ;;  %v10356_v49 = vld [vmem:[%s14530_s2 + $0x418] ss:$20 sps:$4 sm:$0xff]  }
  0x43   :  { %1717 = vmatprep.subr.bf16.mxu0 %v10267_v50  ;;  %1881 = vmatprep.subr.bf16.mxu1 %v10269_v51  ;;  %v10361_v50 = vld [vmem:[%s14530_s2 + $0x43c] ss:$20 sps:$4 sm:$0xff]   ;;  %v10364_v51 = vld [vmem:[%s14530_s2 + $0x444] ss:$20 sps:$4 sm:$0xff]  }
  0x46   :  { %1718 = vmatpush1.bf16.msra.mxu0 %v10271_v52  ;;  %1882 = vmatpush1.bf16.msra.mxu1 %v10272_v53  ;;  %v10359_v52 = vld [vmem:[%s14530_s2 + $0x438] ss:$20 sps:$4 sm:$0xff]   ;;  %v10362_v53 = vld [vmem:[%s14530_s2 + $0x440] ss:$20 sps:$4 sm:$0xff]  }
  0x47   :  { %1719 = vmatprep.subr.bf16.mxu0 %v10273_v54  ;;  %1883 = vmatprep.subr.bf16.mxu1 %v10275_v55  ;;  %v10367_v54 = vld [vmem:[%s14530_s2 + $0x464] ss:$20 sps:$4 sm:$0xff]   ;;  %v10370_v55 = vld [vmem:[%s14530_s2 + $0x46c] ss:$20 sps:$4 sm:$0xff]  }
  0x4a   :  { %1720 = vmatpush1.bf16.msra.mxu0 %v10277_v56  ;;  %1884 = vmatpush1.bf16.msra.mxu1 %v10278_v57  ;;  %v10365_v56 = vld [vmem:[%s14530_s2 + $0x460] ss:$20 sps:$4 sm:$0xff]   ;;  %v10368_v57 = vld [vmem:[%s14530_s2 + $0x468] ss:$20 sps:$4 sm:$0xff]  }
  0x4b   :  { %1721 = vmatprep.subr.bf16.mxu0 %v10279_v58  ;;  %1885 = vmatprep.subr.bf16.mxu1 %v10281_v59  ;;  %v10373_v58 = vld [vmem:[%s14530_s2 + $0x48c] ss:$20 sps:$4 sm:$0xff]   ;;  %v10376_v59 = vld [vmem:[%s14530_s2 + $0x494] ss:$20 sps:$4 sm:$0xff]  }
  0x4e   :  { %1722 = vmatpush1.bf16.msra.mxu0 %v10283_v60  ;;  %1886 = vmatpush1.bf16.msra.mxu1 %v10284_v61  ;;  %v10371_v60 = vld [vmem:[%s14530_s2 + $0x488] ss:$20 sps:$4 sm:$0xff]   ;;  %v10374_v61 = vld [vmem:[%s14530_s2 + $0x490] ss:$20 sps:$4 sm:$0xff]  }
  0x4f   :  { %1723 = vmatprep.subr.bf16.mxu0 %v10285_v62  ;;  %1887 = vmatprep.subr.bf16.mxu1 %v10287_v63  ;;  %v10379_v62 = vld [vmem:[%s14530_s2 + $0x4b4] ss:$20 sps:$4 sm:$0xff]   ;;  %v10382_v63 = vld [vmem:[%s14530_s2 + $0x4bc] ss:$20 sps:$4 sm:$0xff]  }
  0x52   :  { %1724 = vmatpush1.bf16.msra.mxu0 %v10289_v0  ;;  %1888 = vmatpush1.bf16.msra.mxu1 %v10290_v1  ;;  %v10377_v0 = vld [vmem:[%s14530_s2 + $0x4b0] ss:$20 sps:$4 sm:$0xff]   ;;  %v10380_v1 = vld [vmem:[%s14530_s2 + $0x4b8] ss:$20 sps:$4 sm:$0xff]  }
  0x53   :  { %1734 = vmatprep.subr.bf16.mxu0 %v10294_v2  ;;  %1898 = vmatprep.subr.bf16.mxu1 %v10297_v3  ;;  %v10385_v2 = vld [vmem:[%s14530_s2 + $0x4dc] ss:$20 sps:$4 sm:$0xff]   ;;  %v10388_v3 = vld [vmem:[%s14530_s2 + $0x4e4] ss:$20 sps:$4 sm:$0xff]  }
  0x55   :  { %1726 = vmatmul.mubr.bf16.vlgmr.msra.gmra.mrb[0].mxu0 %v12007_v5  ;;  %1890 = vmatmul.mubr.bf16.vlgmr.msra.gmra.mrb[0].mxu1 %v12007_v5 }
  0x56   :  { %1735 = vmatpush1.bf16.msra.mxu0 %v10292_v4  ;;  %1899 = vmatpush1.bf16.msra.mxu1 %v10295_v6  ;;  %v10383_v4 = vld [vmem:[%s14530_s2 + $0x4d8] ss:$20 sps:$4 sm:$0xff]   ;;  %v10386_v6 = vld [vmem:[%s14530_s2 + $0x4e0] ss:$20 sps:$4 sm:$0xff]  }
  0x57   :  { %1736 = vmatprep.subr.bf16.mxu0 %v10301_v7  ;;  %1900 = vmatprep.subr.bf16.mxu1 %v10304_v8  ;;  %v10393_v7 = vld [vmem:[%s14530_s2 + $0x504] ss:$20 sps:$4 sm:$0xff]   ;;  %v10396_v8 = vld [vmem:[%s14530_s2 + $0x50c] ss:$20 sps:$4 sm:$0xff]  }
  0x58   :  { %1766 = vmatprep.mubr.bf16.mxu0 %v12087_v30  ;;  %1930 = vmatprep.mubr.bf16.mxu1 %v12087_v30 }
  0x5a   :  { %1737 = vmatpush1.bf16.msra.mxu0 %v10299_v9  ;;  %1901 = vmatpush1.bf16.msra.mxu1 %v10302_v10  ;;  %v12213_v9 = vcombine.low %v12083_v29, %v12083_v29  ;;  %v10391_v10 = vld [vmem:[%s14530_s2 + $0x500] ss:$20 sps:$4 sm:$0xff]   ;;  %v10418_v29 = vld [vmem:[%s14530_s2 + $0x5a8] ss:$20 sps:$4 sm:$0xff]  }
  0x5b   :  { %1738 = vmatprep.subr.bf16.mxu0 %v10307_v11  ;;  %1902 = vmatprep.subr.bf16.mxu1 %v10310_v12  ;;  %v10394_v11 = vld [vmem:[%s14530_s2 + $0x508] ss:$20 sps:$4 sm:$0xff]   ;;  %v10399_v12 = vld [vmem:[%s14530_s2 + $0x52c] ss:$20 sps:$4 sm:$0xff]  }
  0x5e   :  { %1739 = vmatpush1.bf16.msra.mxu0 %v10305_v13  ;;  %1903 = vmatpush1.bf16.msra.mxu1 %v10308_v14  ;;  %v12227_v13 = vld [vmem:[%s14528_s0 + $0x10] sm:$0xff] }
  0x5f   :  { %1740 = vmatprep.subr.bf16.mxu0 %v10313_v15  ;;  %1904 = vmatprep.subr.bf16.mxu1 %v10316_v16  ;;  %v10402_v14 = vld [vmem:[%s14530_s2 + $0x534] ss:$20 sps:$4 sm:$0xff]   ;;  %v12234_v15 = vcombine.high %v12227_v13, %v12227_v13 }
  0x60   :  { %v10397_v16 = vld [vmem:[%s14530_s2 + $0x528] ss:$20 sps:$4 sm:$0xff]  }
  0x62   :  { %1741 = vmatpush1.bf16.msra.mxu0 %v10311_v17  ;;  %1905 = vmatpush1.bf16.msra.mxu1 %v10314_v18  ;;  %v10400_v17 = vld [vmem:[%s14530_s2 + $0x530] ss:$20 sps:$4 sm:$0xff]   ;;  %v10405_v18 = vld [vmem:[%s14530_s2 + $0x554] ss:$20 sps:$4 sm:$0xff]  }
  0x63   :  { %1742 = vmatprep.subr.bf16.mxu0 %v10319_v19  ;;  %1906 = vmatprep.subr.bf16.mxu1 %v10322_v20  ;;  %v10408_v19 = vld [vmem:[%s14530_s2 + $0x55c] ss:$20 sps:$4 sm:$0xff]  }
  0x64   :  { %v10403_v20 = vld [vmem:[%s14530_s2 + $0x550] ss:$20 sps:$4 sm:$0xff]  }
  0x66   :  { %1743 = vmatpush1.bf16.msra.mxu0 %v10317_v21  ;;  %1907 = vmatpush1.bf16.msra.mxu1 %v10320_v22  ;;  %v10406_v21 = vld [vmem:[%s14530_s2 + $0x558] ss:$20 sps:$4 sm:$0xff]   ;;  %v10411_v22 = vld [vmem:[%s14530_s2 + $0x57c] ss:$20 sps:$4 sm:$0xff]  }
  0x67   :  { %1744 = vmatprep.subr.bf16.mxu0 %v10325_v23  ;;  %1908 = vmatprep.subr.bf16.mxu1 %v10328_v24  ;;  %v10414_v23 = vld [vmem:[%s14530_s2 + $0x584] ss:$20 sps:$4 sm:$0xff]  }
  0x68   :  { %v10409_v24 = vld [vmem:[%s14530_s2 + $0x578] ss:$20 sps:$4 sm:$0xff]  }
  0x6a   :  { %1745 = vmatpush1.bf16.msra.mxu0 %v10323_v25  ;;  %1909 = vmatpush1.bf16.msra.mxu1 %v10326_v26  ;;  %v10412_v25 = vld [vmem:[%s14530_s2 + $0x580] ss:$20 sps:$4 sm:$0xff]   ;;  %v10417_v26 = vld [vmem:[%s14530_s2 + $0x5a4] ss:$20 sps:$4 sm:$0xff]  }
  0x6b   :  { %1746 = vmatprep.subr.bf16.mxu0 %v10331_v27  ;;  %1910 = vmatprep.subr.bf16.mxu1 %v10334_v28  ;;  %v10420_v27 = vld [vmem:[%s14530_s2 + $0x5ac] ss:$20 sps:$4 sm:$0xff]  }
  0x6c   :  { %v10415_v28 = vld [vmem:[%s14530_s2 + $0x5a0] ss:$20 sps:$4 sm:$0xff]  }
  0x6e   :  { %1747 = vmatpush1.bf16.msra.mxu0 %v10329_v31  ;;  %1911 = vmatpush1.bf16.msra.mxu1 %v10332_v32  ;;  %v10423_v31 = vld [vmem:[%s14530_s2 + $0x5cc] ss:$20 sps:$4 sm:$0xff]   ;;  %v10426_v32 = vld [vmem:[%s14530_s2 + $0x5d4] ss:$20 sps:$4 sm:$0xff]  }
  0x6f   :  { %1748 = vmatprep.subr.bf16.mxu0 %v10337_v33  ;;  %1912 = vmatprep.subr.bf16.mxu1 %v10340_v34  ;;  %v10421_v33 = vld [vmem:[%s14530_s2 + $0x5c8] ss:$20 sps:$4 sm:$0xff]   ;;  %v10424_v34 = vld [vmem:[%s14530_s2 + $0x5d0] ss:$20 sps:$4 sm:$0xff]  }
  0x72   :  { %1749 = vmatpush1.bf16.msra.mxu0 %v10335_v35  ;;  %1913 = vmatpush1.bf16.msra.mxu1 %v10338_v36  ;;  %v10429_v35 = vld [vmem:[%s14530_s2 + $0x5f4] ss:$20 sps:$4 sm:$0xff]   ;;  %v10432_v36 = vld [vmem:[%s14530_s2 + $0x5fc] ss:$20 sps:$4 sm:$0xff]  }
  0x73   :  { %1750 = vmatprep.subr.bf16.mxu0 %v10343_v37  ;;  %1914 = vmatprep.subr.bf16.mxu1 %v10346_v38  ;;  %v10427_v37 = vld [vmem:[%s14530_s2 + $0x5f0] ss:$20 sps:$4 sm:$0xff]   ;;  %v10430_v38 = vld [vmem:[%s14530_s2 + $0x5f8] ss:$20 sps:$4 sm:$0xff]  }
  0x76   :  { %1751 = vmatpush1.bf16.msra.mxu0 %v10341_v39  ;;  %1915 = vmatpush1.bf16.msra.mxu1 %v10344_v40  ;;  %v10435_v39 = vld [vmem:[%s14530_s2 + $0x61c] ss:$20 sps:$4 sm:$0xff]   ;;  %v10438_v40 = vld [vmem:[%s14530_s2 + $0x624] ss:$20 sps:$4 sm:$0xff]  }
  0x77   :  { %1752 = vmatprep.subr.bf16.mxu0 %v10349_v41  ;;  %1916 = vmatprep.subr.bf16.mxu1 %v10352_v42  ;;  %v10433_v41 = vld [vmem:[%s14530_s2 + $0x618] ss:$20 sps:$4 sm:$0xff]   ;;  %v10436_v42 = vld [vmem:[%s14530_s2 + $0x620] ss:$20 sps:$4 sm:$0xff]  }
  0x7a   :  { %1753 = vmatpush1.bf16.msra.mxu0 %v10347_v43  ;;  %1917 = vmatpush1.bf16.msra.mxu1 %v10350_v44  ;;  %v10441_v43 = vld [vmem:[%s14530_s2 + $0x644] ss:$20 sps:$4 sm:$0xff]   ;;  %v10444_v44 = vld [vmem:[%s14530_s2 + $0x64c] ss:$20 sps:$4 sm:$0xff]  }
  0x7b   :  { %1754 = vmatprep.subr.bf16.mxu0 %v10355_v45  ;;  %1918 = vmatprep.subr.bf16.mxu1 %v10358_v46  ;;  %v10439_v45 = vld [vmem:[%s14530_s2 + $0x640] ss:$20 sps:$4 sm:$0xff]   ;;  %v10442_v46 = vld [vmem:[%s14530_s2 + $0x648] ss:$20 sps:$4 sm:$0xff]  }
  0x7e   :  { %1755 = vmatpush1.bf16.msra.mxu0 %v10353_v47  ;;  %1919 = vmatpush1.bf16.msra.mxu1 %v10356_v49  ;;  %v10447_v47 = vld [vmem:[%s14530_s2 + $0x66c] ss:$20 sps:$4 sm:$0xff]   ;;  %v10450_v49 = vld [vmem:[%s14530_s2 + $0x674] ss:$20 sps:$4 sm:$0xff]  }
  0x7f   :  { %1756 = vmatprep.subr.bf16.mxu0 %v10361_v50  ;;  %1920 = vmatprep.subr.bf16.mxu1 %v10364_v51  ;;  %v10445_v50 = vld [vmem:[%s14530_s2 + $0x668] ss:$20 sps:$4 sm:$0xff]   ;;  %v10448_v51 = vld [vmem:[%s14530_s2 + $0x670] ss:$20 sps:$4 sm:$0xff]  }
  0x82   :  { %1757 = vmatpush1.bf16.msra.mxu0 %v10359_v52  ;;  %1921 = vmatpush1.bf16.msra.mxu1 %v10362_v53  ;;  %v10453_v52 = vld [vmem:[%s14530_s2 + $0x694] ss:$20 sps:$4 sm:$0xff]   ;;  %v10456_v53 = vld [vmem:[%s14530_s2 + $0x69c] ss:$20 sps:$4 sm:$0xff]  }
  0x83   :  { %1758 = vmatprep.subr.bf16.mxu0 %v10367_v54  ;;  %1922 = vmatprep.subr.bf16.mxu1 %v10370_v55  ;;  %v10451_v54 = vld [vmem:[%s14530_s2 + $0x690] ss:$20 sps:$4 sm:$0xff]   ;;  %v10454_v55 = vld [vmem:[%s14530_s2 + $0x698] ss:$20 sps:$4 sm:$0xff]  }
  0x86   :  { %1759 = vmatpush1.bf16.msra.mxu0 %v10365_v56  ;;  %1923 = vmatpush1.bf16.msra.mxu1 %v10368_v57  ;;  %v10459_v56 = vld [vmem:[%s14530_s2 + $0x6bc] ss:$20 sps:$4 sm:$0xff]   ;;  %v10462_v57 = vld [vmem:[%s14530_s2 + $0x6c4] ss:$20 sps:$4 sm:$0xff]  }
  0x87   :  { %1760 = vmatprep.subr.bf16.mxu0 %v10373_v58  ;;  %1924 = vmatprep.subr.bf16.mxu1 %v10376_v59  ;;  %v10457_v58 = vld [vmem:[%s14530_s2 + $0x6b8] ss:$20 sps:$4 sm:$0xff]   ;;  %v10460_v59 = vld [vmem:[%s14530_s2 + $0x6c0] ss:$20 sps:$4 sm:$0xff]  }
  0x8a   :  { %1761 = vmatpush1.bf16.msra.mxu0 %v10371_v60  ;;  %1925 = vmatpush1.bf16.msra.mxu1 %v10374_v61  ;;  %v10465_v60 = vld [vmem:[%s14530_s2 + $0x6e4] ss:$20 sps:$4 sm:$0xff]   ;;  %v10468_v61 = vld [vmem:[%s14530_s2 + $0x6ec] ss:$20 sps:$4 sm:$0xff]  }
  0x8b   :  { %1762 = vmatprep.subr.bf16.mxu0 %v10379_v62  ;;  %1926 = vmatprep.subr.bf16.mxu1 %v10382_v63  ;;  %v10463_v62 = vld [vmem:[%s14530_s2 + $0x6e0] ss:$20 sps:$4 sm:$0xff]   ;;  %v10466_v63 = vld [vmem:[%s14530_s2 + $0x6e8] ss:$20 sps:$4 sm:$0xff]  }
  0x8e   :  { %1763 = vmatpush1.bf16.msra.mxu0 %v10377_v0  ;;  %1927 = vmatpush1.bf16.msra.mxu1 %v10380_v1  ;;  %v10471_v0 = vld [vmem:[%s14530_s2 + $0x70c] ss:$20 sps:$4 sm:$0xff]   ;;  %v10474_v1 = vld [vmem:[%s14530_s2 + $0x714] ss:$20 sps:$4 sm:$0xff]  }
  0x8f   :  { %1764 = vmatprep.subr.bf16.mxu0 %v10385_v2  ;;  %1928 = vmatprep.subr.bf16.mxu1 %v10388_v3  ;;  %v10469_v2 = vld [vmem:[%s14530_s2 + $0x708] ss:$20 sps:$4 sm:$0xff]   ;;  %v10472_v3 = vld [vmem:[%s14530_s2 + $0x710] ss:$20 sps:$4 sm:$0xff]  }
  0x92   :  { %1765 = vmatpush1.bf16.msra.mxu0 %v10383_v4  ;;  %1929 = vmatpush1.bf16.msra.mxu1 %v10386_v6  ;;  %v10477_v4 = vld [vmem:[%s14530_s2 + $0x734] ss:$20 sps:$4 sm:$0xff]   ;;  %v10480_v6 = vld [vmem:[%s14530_s2 + $0x73c] ss:$20 sps:$4 sm:$0xff]  }
  0x93   :  { %1775 = vmatprep.subr.bf16.mxu0 %v10393_v7  ;;  %1939 = vmatprep.subr.bf16.mxu1 %v10396_v8  ;;  %v10475_v7 = vld [vmem:[%s14530_s2 + $0x730] ss:$20 sps:$4 sm:$0xff]   ;;  %v10478_v8 = vld [vmem:[%s14530_s2 + $0x738] ss:$20 sps:$4 sm:$0xff]  }
  0x95   :  { %1767 = vmatmul.mubr.bf16.vlgmr.msra.gmra.mrb[0].mxu0 %v12213_v9  ;;  %1931 = vmatmul.mubr.bf16.vlgmr.msra.gmra.mrb[0].mxu1 %v12213_v9 }
  0x96   :  { %1776 = vmatpush1.bf16.msra.mxu0 %v10391_v10  ;;  %1940 = vmatpush1.bf16.msra.mxu1 %v10394_v11  ;;  %v10483_v10 = vld [vmem:[%s14530_s2 + $0x75c] ss:$20 sps:$4 sm:$0xff]   ;;  %v10486_v11 = vld [vmem:[%s14530_s2 + $0x764] ss:$20 sps:$4 sm:$0xff]  }
  0x97   :  { %1777 = vmatprep.subr.bf16.mxu0 %v10399_v12  ;;  %1941 = vmatprep.subr.bf16.mxu1 %v10402_v14  ;;  %v10481_v12 = vld [vmem:[%s14530_s2 + $0x758] ss:$20 sps:$4 sm:$0xff]   ;;  %v10484_v14 = vld [vmem:[%s14530_s2 + $0x760] ss:$20 sps:$4 sm:$0xff]  }
  0x98   :  { %1807 = vmatprep.mubr.bf16.mxu0 %v12234_v15  ;;  %1971 = vmatprep.mubr.bf16.mxu1 %v12234_v15 }
  0x9a   :  { %1778 = vmatpush1.bf16.msra.mxu0 %v10397_v16  ;;  %1942 = vmatpush1.bf16.msra.mxu1 %v10400_v17  ;;  %v10491_v16 = vld [vmem:[%s14530_s2 + $0x784] ss:$20 sps:$4 sm:$0xff]   ;;  %v10494_v17 = vld [vmem:[%s14530_s2 + $0x78c] ss:$20 sps:$4 sm:$0xff]  }
  0x9b   :  { %1779 = vmatprep.subr.bf16.mxu0 %v10405_v18  ;;  %1943 = vmatprep.subr.bf16.mxu1 %v10408_v19  ;;  %v12422_v18 = vcombine.low %v12227_v13, %v12227_v13  ;;  %v10489_v19 = vld [vmem:[%s14530_s2 + $0x780] ss:$20 sps:$4 sm:$0xff]   ;;  %v10510_v13 = vld [vmem:[%s14530_s2 + $0x3d0] ss:$20 sps:$4 sm:$0xff]  }
  0x9e   :  { %1780 = vmatpush1.bf16.msra.mxu0 %v10403_v20  ;;  %1944 = vmatpush1.bf16.msra.mxu1 %v10406_v21  ;;  %v10492_v20 = vld [vmem:[%s14530_s2 + $0x788] ss:$20 sps:$4 sm:$0xff]   ;;  %v10495_v21 = vld [vmem:[%s14530_s2 + $0x150] ss:$20 sps:$4 sm:$0xff]  }
  0x9f   :  { %1781 = vmatprep.subr.bf16.mxu0 %v10411_v22  ;;  %1945 = vmatprep.subr.bf16.mxu1 %v10414_v23  ;;  %v11701_v22 = vmov 0   ;;  %v12443_v23 = vld [vmem:[%s14528_s0 + $0x18] ss:$0 sps:$4 sm:$0xff]  }
  0xa2   :  { %1782 = vmatpush1.bf16.msra.mxu0 %v10409_v24  ;;  %1946 = vmatpush1.bf16.msra.mxu1 %v10412_v25  ;;  %v10497_v24 = vld [vmem:[%s14530_s2 + $0x10] ss:$20 sps:$4 sm:$0xff]  }
  0xa3   :  { %1783 = vmatprep.subr.bf16.mxu0 %v10417_v26  ;;  %1947 = vmatprep.subr.bf16.mxu1 %v10420_v27  ;;  %v10511_v25 = vld [vmem:[%s14530_s2 + $0x290] ss:$20 sps:$4 sm:$0xff]   ;;  %v10498_v26 = vld [vmem:[%s14530_s2 + $0x178] ss:$20 sps:$4 sm:$0xff]  }
  0xa4   :  { %v10514_v27 = vld [vmem:[%s14530_s2 + $0x3f8] ss:$20 sps:$4 sm:$0xff]  }
  0xa6   :  { %1784 = vmatpush1.bf16.msra.mxu0 %v10415_v28  ;;  %1948 = vmatpush1.bf16.msra.mxu1 %v10418_v29  ;;  %v10499_v28 = vld [vmem:[%s14530_s2 + $0x38] ss:$20 sps:$4 sm:$0xff]  }
  0xa7   :  { %1785 = vmatprep.subr.bf16.mxu0 %v10423_v31  ;;  %1949 = vmatprep.subr.bf16.mxu1 %v10426_v32  ;;  %v10515_v29 = vld [vmem:[%s14530_s2 + $0x2b8] ss:$20 sps:$4 sm:$0xff]   ;;  %v10500_v31 = vld [vmem:[%s14530_s2 + $0x1a0] ss:$20 sps:$4 sm:$0xff]  }
  0xa8   :  { %v10517_v32 = vld [vmem:[%s14530_s2 + $0x420] ss:$20 sps:$4 sm:$0xff]  }
  0xaa   :  { %1786 = vmatpush1.bf16.msra.mxu0 %v10421_v33  ;;  %1950 = vmatpush1.bf16.msra.mxu1 %v10424_v34  ;;  %v10501_v33 = vld [vmem:[%s14530_s2 + $0x60] ss:$20 sps:$4 sm:$0xff]  }
  0xab   :  { %1787 = vmatprep.subr.bf16.mxu0 %v10429_v35  ;;  %1951 = vmatprep.subr.bf16.mxu1 %v10432_v36  ;;  %v10519_v34 = vld [vmem:[%s14530_s2 + $0x2e0] ss:$20 sps:$4 sm:$0xff]   ;;  %v10502_v35 = vld [vmem:[%s14530_s2 + $0x1c8] ss:$20 sps:$4 sm:$0xff]  }
  0xac   :  { %v10521_v36 = vld [vmem:[%s14530_s2 + $0x448] ss:$20 sps:$4 sm:$0xff]  }
  0xae   :  { %1788 = vmatpush1.bf16.msra.mxu0 %v10427_v37  ;;  %1952 = vmatpush1.bf16.msra.mxu1 %v10430_v38  ;;  %v10504_v37 = vld [vmem:[%s14530_s2 + $0x1f0] ss:$20 sps:$4 sm:$0xff]  }
  0xaf   :  { %1789 = vmatprep.subr.bf16.mxu0 %v10435_v39  ;;  %1953 = vmatprep.subr.bf16.mxu1 %v10438_v40  ;;  %v10525_v38 = vld [vmem:[%s14530_s2 + $0x470] ss:$20 sps:$4 sm:$0xff]  }
  0xb0   :  { %v10505_v39 = vld [vmem:[%s14530_s2 + $0xb0] ss:$20 sps:$4 sm:$0xff]  }
  0xb1   :  { %v10527_v40 = vld [vmem:[%s14530_s2 + $0x330] ss:$20 sps:$4 sm:$0xff]  }
  0xb2   :  { %1790 = vmatpush1.bf16.msra.mxu0 %v10433_v41  ;;  %1954 = vmatpush1.bf16.msra.mxu1 %v10436_v42  ;;  %v10506_v41 = vld [vmem:[%s14530_s2 + $0x218] ss:$20 sps:$4 sm:$0xff]  }
  0xb3   :  { %1791 = vmatprep.subr.bf16.mxu0 %v10441_v43  ;;  %1955 = vmatprep.subr.bf16.mxu1 %v10444_v44  ;;  %v10529_v42 = vld [vmem:[%s14530_s2 + $0x498] ss:$20 sps:$4 sm:$0xff]  }
  0xb4   :  { %v10507_v43 = vld [vmem:[%s14530_s2 + $0xd8] ss:$20 sps:$4 sm:$0xff]  }
  0xb5   :  { %v10531_v44 = vld [vmem:[%s14530_s2 + $0x358] ss:$20 sps:$4 sm:$0xff]  }
  0xb6   :  { %1792 = vmatpush1.bf16.msra.mxu0 %v10439_v45  ;;  %1956 = vmatpush1.bf16.msra.mxu1 %v10442_v46  ;;  %v10508_v45 = vld [vmem:[%s14530_s2 + $0x240] ss:$20 sps:$4 sm:$0xff]  }
  0xb7   :  { %1793 = vmatprep.subr.bf16.mxu0 %v10447_v47  ;;  %1957 = vmatprep.subr.bf16.mxu1 %v10450_v49  ;;  %v10533_v46 = vld [vmem:[%s14530_s2 + $0x4c0] ss:$20 sps:$4 sm:$0xff]  }
  0xb8   :  { %v10509_v47 = vld [vmem:[%s14530_s2 + $0x100] ss:$20 sps:$4 sm:$0xff]  }
  0xb9   :  { %v10535_v49 = vld [vmem:[%s14530_s2 + $0x380] ss:$20 sps:$4 sm:$0xff]  }
  0xba   :  { %1794 = vmatpush1.bf16.msra.mxu0 %v10445_v50  ;;  %1958 = vmatpush1.bf16.msra.mxu1 %v10448_v51  ;;  %v10512_v50 = vld [vmem:[%s14530_s2 + $0x268] ss:$20 sps:$4 sm:$0xff]  }
  0xbb   :  { %1795 = vmatprep.subr.bf16.mxu0 %v10453_v52  ;;  %1959 = vmatprep.subr.bf16.mxu1 %v10456_v53  ;;  %v10537_v51 = vld [vmem:[%s14530_s2 + $0x4e8] ss:$20 sps:$4 sm:$0xff]  }
  0xbc   :  { %v10513_v52 = vld [vmem:[%s14530_s2 + $0x128] ss:$20 sps:$4 sm:$0xff]  }
  0xbd   :  { %v10539_v53 = vld [vmem:[%s14530_s2 + $0x3a8] ss:$20 sps:$4 sm:$0xff]  }
  0xbe   :  { %1796 = vmatpush1.bf16.msra.mxu0 %v10451_v54  ;;  %1960 = vmatpush1.bf16.msra.mxu1 %v10454_v55  ;;  %v10516_v54 = vld [vmem:[%s14530_s2 + $0x650] ss:$20 sps:$4 sm:$0xff]  }
  0xbf   :  { %1797 = vmatprep.subr.bf16.mxu0 %v10459_v56  ;;  %1961 = vmatprep.subr.bf16.mxu1 %v10462_v57  ;;  %v10518_v55 = vld [vmem:[%s14530_s2 + $0x510] ss:$20 sps:$4 sm:$0xff]   ;;  %v10520_v56 = vld [vmem:[%s14530_s2 + $0x678] ss:$20 sps:$4 sm:$0xff]  }
  0xc0   :  { %v10544_v57 = vld [vmem:[%s14530_s2 + $0x790] ss:$20 sps:$4 sm:$0xff]  }
  0xc2   :  { %1798 = vmatpush1.bf16.msra.mxu0 %v10457_v58  ;;  %1962 = vmatpush1.bf16.msra.mxu1 %v10460_v59  ;;  %v10547_v58 = vld [vmem:[%s14532_s4 + $0x4] ss:$20 sps:$4 sm:$0xff]   ;;  %v11702_v59 = vmov 0.0  }
  0xc3   :  { %1799 = vmatprep.subr.bf16.mxu0 %v10465_v60  ;;  %1963 = vmatprep.subr.bf16.mxu1 %v10468_v61  ;;  %v10522_v60 = vld [vmem:[%s14530_s2 + $0x538] ss:$20 sps:$4 sm:$0xff]   ;;  %v10524_v61 = vld [vmem:[%s14530_s2 + $0x6a0] ss:$20 sps:$4 sm:$0xff]  }
  0xc6   :  { %1800 = vmatpush1.bf16.msra.mxu0 %v10463_v62  ;;  %1964 = vmatpush1.bf16.msra.mxu1 %v10466_v63  ;;  %v10526_v62 = vld [vmem:[%s14530_s2 + $0x560] ss:$20 sps:$4 sm:$0xff]   ;;  %v10530_v63 = vld [vmem:[%s14530_s2 + $0x588] ss:$20 sps:$4 sm:$0xff]  }
  0xc7   :  { %1801 = vmatprep.subr.bf16.mxu0 %v10471_v0  ;;  %1965 = vmatprep.subr.bf16.mxu1 %v10474_v1  ;;  %v10551_v0 = vld [vmem:[%s14532_s4 + $0x28] ss:$20 sps:$4 sm:$0xff]   ;;  %v10532_v1 = vld [vmem:[%s14530_s2 + $0x6f0] ss:$20 sps:$4 sm:$0xff]  }
  0xca   :  { %1802 = vmatpush1.bf16.msra.mxu0 %v10469_v2  ;;  %1966 = vmatpush1.bf16.msra.mxu1 %v10472_v3  ;;  %v10559_v2 = vld [vmem:[%s14532_s4 + $0x54] ss:$20 sps:$4 sm:$0xff]   ;;  %v10534_v3 = vld [vmem:[%s14530_s2 + $0x5b0] ss:$20 sps:$4 sm:$0xff]  }
  0xcb   :  { %1803 = vmatprep.subr.bf16.mxu0 %v10477_v4  ;;  %1967 = vmatprep.subr.bf16.mxu1 %v10480_v6  ;;  %v10557_v4 = vld [vmem:[%s14532_s4 + $0x50] ss:$20 sps:$4 sm:$0xff]   ;;  %v10536_v6 = vld [vmem:[%s14530_s2 + $0x718] ss:$20 sps:$4 sm:$0xff]  }
  0xce   :  { %1804 = vmatpush1.bf16.msra.mxu0 %v10475_v7  ;;  %1968 = vmatpush1.bf16.msra.mxu1 %v10478_v8  ;;  %v10565_v7 = vld [vmem:[%s14532_s4 + $0x7c] ss:$20 sps:$4 sm:$0xff]   ;;  %v10538_v8 = vld [vmem:[%s14530_s2 + $0x5d8] ss:$20 sps:$4 sm:$0xff]  }
  0xcf   :  { %1805 = vmatprep.subr.bf16.mxu0 %v10483_v10  ;;  %1969 = vmatprep.subr.bf16.mxu1 %v10486_v11  ;;  %v10563_v10 = vld [vmem:[%s14532_s4 + $0x78] ss:$20 sps:$4 sm:$0xff]   ;;  %v10540_v11 = vld [vmem:[%s14530_s2 + $0x740] ss:$20 sps:$4 sm:$0xff]  }
  0xd2   :  { %1806 = vmatpush1.bf16.msra.mxu0 %v10481_v12  ;;  %1970 = vmatpush1.bf16.msra.mxu1 %v10484_v14  ;;  %v10571_v12 = vld [vmem:[%s14532_s4 + $0xa4] ss:$20 sps:$4 sm:$0xff]   ;;  %v10541_v14 = vld [vmem:[%s14530_s2 + $0x600] ss:$20 sps:$4 sm:$0xff]  }
  0xd3   :  { %1816 = vmatprep.subr.bf16.mxu0 %v10491_v16  ;;  %1980 = vmatprep.subr.bf16.mxu1 %v10494_v17  ;;  %v10569_v16 = vld [vmem:[%s14532_s4 + $0xa0] ss:$20 sps:$4 sm:$0xff]   ;;  %v10542_v17 = vld [vmem:[%s14530_s2 + $0x768] ss:$20 sps:$4 sm:$0xff]  }
  0xd5   :  { %1808 = vmatmul.mubr.bf16.vlgmr.msra.gmra.mrb[0].mxu0 %v12422_v18  ;;  %1972 = vmatmul.mubr.bf16.vlgmr.msra.gmra.mrb[0].mxu1 %v12422_v18 }
  0xd6   :  { %1817 = vmatpush1.bf16.msra.mxu0 %v10489_v19  ;;  %1981 = vmatpush1.bf16.msra.mxu1 %v10492_v20  ;;  %v10577_v19 = vld [vmem:[%s14532_s4 + $0xcc] ss:$20 sps:$4 sm:$0xff]   ;;  %v10543_v20 = vld [vmem:[%s14530_s2 + $0x628] ss:$20 sps:$4 sm:$0xff]  }
  0xd7   :  { %1848 = vmatprep.mubr.bf16.mxu0 %v11701_v22  ;;  %2012 = vmatprep.mubr.bf16.mxu1 %v11701_v22 }
  0xd8   :  { %9731 = vmatprep.subr.bf16.mxu0 %v10495_v21  ;;  %9753 = vmatprep.subr.bf16.mxu1 %v10510_v13  ;;  %v10575_v21 = vld [vmem:[%s14532_s4 + $0xc8] ss:$20 sps:$4 sm:$0xff]   ;;  %v10550_v13 = vld [vmem:[%s14532_s4 + $0xc] ss:$20 sps:$4 sm:$0xff]  }
  0xe1   :  { %9002 = vmatmul.mubr.msk.bf16.vlgmr.msra.gmra.mrb[0].mxu0 %vm1689_vm0, %v12443_v23  ;;  %9003 = vmatmul.mubr.msk.bf16.vlgmr.msra.gmra.mrb[0].mxu1 %vm1689_vm0, %v12443_v23 }
  0xe2   :  { %9732 = vmatpush3.bf16.msra.mxu0 %v10497_v24  ;;  %9754 = vmatpush3.bf16.msra.mxu1 %v10511_v25  ;;  %v10556_v24 = vld [vmem:[%s14532_s4 + $0x34] ss:$20 sps:$4 sm:$0xff]   ;;  %v10554_v25 = vld [vmem:[%s14532_s4 + $0x30] ss:$20 sps:$4 sm:$0xff]  }
  0xe3   :  { %9733 = vmatprep.subr.bf16.mxu0 %v10498_v26  ;;  %9755 = vmatprep.subr.bf16.mxu1 %v10514_v27  ;;  %v10562_v26 = vld [vmem:[%s14532_s4 + $0x5c] ss:$20 sps:$4 sm:$0xff]   ;;  %v10560_v27 = vld [vmem:[%s14532_s4 + $0x58] ss:$20 sps:$4 sm:$0xff]  }
  0xe4   :  { %2053 = vmatprep.mubr.bf16.mxu0 %v11943_v48  ;;  %2093 = vmatprep.mubr.bf16.mxu1 %v12087_v30  ;;  %v10503_v48 = vld [vmem:[%s14530_s2 + $0x88] ss:$20 sps:$4 sm:$0xff]  }
  0xe5   :  { %v10523_v30 = vld [vmem:[%s14530_s2 + $0x308] ss:$20 sps:$4 sm:$0xff]  }
  0xe6   :  { %9734 = vmatpush3.bf16.msra.mxu0 %v10499_v28  ;;  %9756 = vmatpush3.bf16.msra.mxu1 %v10515_v29  ;;  %v10568_v28 = vld [vmem:[%s14532_s4 + $0x84] ss:$20 sps:$4 sm:$0xff]   ;;  %v10574_v29 = vld [vmem:[%s14532_s4 + $0xac] ss:$20 sps:$4 sm:$0xff]  }
  0xe7   :  { %9735 = vmatprep.subr.bf16.mxu0 %v10500_v31  ;;  %9757 = vmatprep.subr.bf16.mxu1 %v10517_v32  ;;  %v10572_v31 = vld [vmem:[%s14532_s4 + $0xa8] ss:$20 sps:$4 sm:$0xff]  }
  0xe8   :  { %v10580_v32 = vld [vmem:[%s14532_s4 + $0xd4] ss:$20 sps:$4 sm:$0xff]  }
  0xea   :  { %9736 = vmatpush3.bf16.msra.mxu0 %v10501_v33  ;;  %9758 = vmatpush3.bf16.msra.mxu1 %v10519_v34  ;;  %v10578_v33 = vld [vmem:[%s14532_s4 + $0xd0] ss:$20 sps:$4 sm:$0xff]   ;;  %v10583_v34 = vld [vmem:[%s14532_s4 + $0xf4] ss:$20 sps:$4 sm:$0xff]  }
  0xeb   :  { %9737 = vmatprep.subr.bf16.mxu0 %v10502_v35  ;;  %9759 = vmatprep.subr.bf16.mxu1 %v10521_v36  ;;  %v10586_v35 = vld [vmem:[%s14532_s4 + $0xfc] ss:$20 sps:$4 sm:$0xff]  }
  0xec   :  { %v10581_v36 = vld [vmem:[%s14532_s4 + $0xf0] ss:$20 sps:$4 sm:$0xff]  }
  0xee   :  { %9738 = vmatpush3.bf16.msra.mxu0 %v10503_v48  ;;  %9760 = vmatpush3.bf16.msra.mxu1 %v10523_v30  ;;  %v10584_v48 = vld [vmem:[%s14532_s4 + $0xf8] ss:$20 sps:$4 sm:$0xff]   ;;  %v10589_v30 = vld [vmem:[%s14532_s4 + $0x11c] ss:$20 sps:$4 sm:$0xff]  }
  0xef   :  { %9739 = vmatprep.subr.bf16.mxu0 %v10504_v37  ;;  %9761 = vmatprep.subr.bf16.mxu1 %v10525_v38  ;;  %v10592_v37 = vld [vmem:[%s14532_s4 + $0x124] ss:$20 sps:$4 sm:$0xff]  }
  0xf0   :  { %v10587_v38 = vld [vmem:[%s14532_s4 + $0x118] ss:$20 sps:$4 sm:$0xff]  }
  0xf2   :  { %9740 = vmatpush3.bf16.msra.mxu0 %v10505_v39  ;;  %9762 = vmatpush3.bf16.msra.mxu1 %v10527_v40  ;;  %v10590_v39 = vld [vmem:[%s14532_s4 + $0x120] ss:$20 sps:$4 sm:$0xff]   ;;  %v10595_v40 = vld [vmem:[%s14532_s4 + $0x144] ss:$20 sps:$4 sm:$0xff]  }
  0xf3   :  { %9741 = vmatprep.subr.bf16.mxu0 %v10506_v41  ;;  %9763 = vmatprep.subr.bf16.mxu1 %v10529_v42  ;;  %v10598_v41 = vld [vmem:[%s14532_s4 + $0x14c] ss:$20 sps:$4 sm:$0xff]  }
  0xf4   :  { %v10593_v42 = vld [vmem:[%s14532_s4 + $0x140] ss:$20 sps:$4 sm:$0xff]  }
  0xf6   :  { %9742 = vmatpush3.bf16.msra.mxu0 %v10507_v43  ;;  %9764 = vmatpush3.bf16.msra.mxu1 %v10531_v44  ;;  %v10596_v43 = vld [vmem:[%s14532_s4 + $0x148] ss:$20 sps:$4 sm:$0xff]   ;;  %v10601_v44 = vld [vmem:[%s14532_s4 + $0x16c] ss:$20 sps:$4 sm:$0xff]  }
  0xf7   :  { %9743 = vmatprep.subr.bf16.mxu0 %v10508_v45  ;;  %9765 = vmatprep.subr.bf16.mxu1 %v10533_v46  ;;  %v10604_v45 = vld [vmem:[%s14532_s4 + $0x174] ss:$20 sps:$4 sm:$0xff]  }
  0xf8   :  { %v10599_v46 = vld [vmem:[%s14532_s4 + $0x168] ss:$20 sps:$4 sm:$0xff]  }
  0xfa   :  { %9744 = vmatpush3.bf16.msra.mxu0 %v10509_v47  ;;  %9766 = vmatpush3.bf16.msra.mxu1 %v10535_v49  ;;  %v10602_v47 = vld [vmem:[%s14532_s4 + $0x170] ss:$20 sps:$4 sm:$0xff]   ;;  %v10607_v49 = vld [vmem:[%s14532_s4 + $0x194] ss:$20 sps:$4 sm:$0xff]  }
  0xfb   :  { %9745 = vmatprep.subr.bf16.mxu0 %v10512_v50  ;;  %9767 = vmatprep.subr.bf16.mxu1 %v10537_v51  ;;  %v10610_v50 = vld [vmem:[%s14532_s4 + $0x19c] ss:$20 sps:$4 sm:$0xff]  }
  0xfc   :  { %v10605_v51 = vld [vmem:[%s14532_s4 + $0x190] ss:$20 sps:$4 sm:$0xff]  }
  0xfe   :  { %9746 = vmatpush3.bf16.msra.mxu0 %v10513_v52  ;;  %9768 = vmatpush3.bf16.msra.mxu1 %v10539_v53  ;;  %v10608_v52 = vld [vmem:[%s14532_s4 + $0x198] ss:$20 sps:$4 sm:$0xff]   ;;  %v10613_v53 = vld [vmem:[%s14532_s4 + $0x1bc] ss:$20 sps:$4 sm:$0xff]  }
  0xff   :  { %9775 = vmatprep.subr.bf16.mxu0 %v10516_v54  ;;  %10008 = vmatprep.subr.bf16.mxu1 %v11702_v59  ;;  %v10616_v54 = vld [vmem:[%s14532_s4 + $0x1c4] ss:$20 sps:$4 sm:$0xff]  }
 0x101   :  { %2054 = vmatmul.mubr.bf16.vlgmr.msra.gmra.mrb[4].mxu0 %v12007_v5  ;;  %2094 = vmatmul.mubr.bf16.vlgmr.msra.gmra.mrb[4].mxu1 %v12213_v9  ;;  %v10545_v5 = vld [vmem:[%s14532_s4] ss:$20 sps:$4 sm:$0xff]   ;;  %v10528_v9 = vld [vmem:[%s14530_s2 + $0x6c8] ss:$20 sps:$4 sm:$0xff]  }
 0x102   :  { %9776 = vmatpush3.bf16.msra.mxu0 %v10518_v55  ;;  %2133 = vmatprep.mubr.bf16.mxu0 %v12234_v15  ;;  %v10553_v15 = vld [vmem:[%s14532_s4 + $0x2c] ss:$20 sps:$4 sm:$0xff]  }
 0x103   :  { %9777 = vmatprep.subr.bf16.mxu0 %v10520_v56  ;;  %10009 = vmatpush3.bf16.msra.mxu1 %v10544_v57  ;;  %v10611_v55 = vld [vmem:[%s14532_s4 + $0x1b8] ss:$20 sps:$4 sm:$0xff]   ;;  %v10614_v56 = vld [vmem:[%s14532_s4 + $0x1c0] ss:$20 sps:$4 sm:$0xff]  }
 0x104   :  { %10010 = vmatprep.mubr.msk.bf16.mxu1 %vm11703_vm1, %v11702_v59  ;;  %3508 = vmatprep.subr.bf16.mxu1 %v10547_v58  ;;  %v10619_v57 = vld [vmem:[%s14532_s4 + $0x1e4] ss:$20 sps:$4 sm:$0xff]   ;;  %v10622_v58 = vld [vmem:[%s14532_s4 + $0x1ec] ss:$20 sps:$4 sm:$0xff]  }
 0x106   :  { %9778 = vmatpush3.bf16.msra.mxu0 %v10522_v60  ;;  %v10617_v60 = vld [vmem:[%s14532_s4 + $0x1e0] ss:$20 sps:$4 sm:$0xff]  }
 0x107   :  { %9779 = vmatprep.subr.bf16.mxu0 %v10524_v61  ;;  %v10620_v61 = vld [vmem:[%s14532_s4 + $0x1e8] ss:$20 sps:$4 sm:$0xff]  }
 0x109   :  { %10011 = vmatmul.mubr.msk.bf16.vlgmr.msra.gmra.mrb[8].mxu1 %vm1689_vm0, %v12443_v23  ;;  %v10548_v23 = vld [vmem:[%s14532_s4 + $0x8] ss:$20 sps:$4 sm:$0xff]  }
 0x10a   :  { %9780 = vmatpush3.bf16.msra.mxu0 %v10526_v62  ;;  %3509 = vmatpush1.bf16.msra.mxu1 %v10545_v5  ;;  %v10625_v62 = vld [vmem:[%s14532_s4 + $0x20c] ss:$20 sps:$4 sm:$0xff]   ;;  %v10628_v5 = vld [vmem:[%s14532_s4 + $0x214] ss:$20 sps:$4 sm:$0xff]  }
 0x10b   :  { %9781 = vmatprep.subr.bf16.mxu0 %v10528_v9  ;;  %3510 = vmatprep.subr.bf16.mxu1 %v10553_v15  ;;  %v10623_v9 = vld [vmem:[%s14532_s4 + $0x208] ss:$20 sps:$4 sm:$0xff]   ;;  %v10626_v15 = vld [vmem:[%s14532_s4 + $0x210] ss:$20 sps:$4 sm:$0xff]  }
 0x10e   :  { %9782 = vmatpush3.bf16.msra.mxu0 %v10530_v63  ;;  %3511 = vmatpush1.bf16.msra.mxu1 %v10551_v0  ;;  %v10631_v63 = vld [vmem:[%s14532_s4 + $0x234] ss:$20 sps:$4 sm:$0xff]   ;;  %v10634_v0 = vld [vmem:[%s14532_s4 + $0x23c] ss:$20 sps:$4 sm:$0xff]  }
 0x10f   :  { %9783 = vmatprep.subr.bf16.mxu0 %v10532_v1  ;;  %3512 = vmatprep.subr.bf16.mxu1 %v10559_v2  ;;  %v10629_v1 = vld [vmem:[%s14532_s4 + $0x230] ss:$20 sps:$4 sm:$0xff]   ;;  %v10632_v2 = vld [vmem:[%s14532_s4 + $0x238] ss:$20 sps:$4 sm:$0xff]  }
 0x112   :  { %9784 = vmatpush3.bf16.msra.mxu0 %v10534_v3  ;;  %3513 = vmatpush1.bf16.msra.mxu1 %v10557_v4  ;;  %v10637_v3 = vld [vmem:[%s14532_s4 + $0x25c] ss:$20 sps:$4 sm:$0xff]   ;;  %v10640_v4 = vld [vmem:[%s14532_s4 + $0x264] ss:$20 sps:$4 sm:$0xff]  }
 0x113   :  { %9785 = vmatprep.subr.bf16.mxu0 %v10536_v6  ;;  %3514 = vmatprep.subr.bf16.mxu1 %v10565_v7  ;;  %v10635_v6 = vld [vmem:[%s14532_s4 + $0x258] ss:$20 sps:$4 sm:$0xff]   ;;  %v10638_v7 = vld [vmem:[%s14532_s4 + $0x260] ss:$20 sps:$4 sm:$0xff]  }
 0x116   :  { %9786 = vmatpush3.bf16.msra.mxu0 %v10538_v8  ;;  %3515 = vmatpush1.bf16.msra.mxu1 %v10563_v10  ;;  %v10643_v8 = vld [vmem:[%s14532_s4 + $0x284] ss:$20 sps:$4 sm:$0xff]   ;;  %v10646_v10 = vld [vmem:[%s14532_s4 + $0x28c] ss:$20 sps:$4 sm:$0xff]  }
 0x117   :  { %9787 = vmatprep.subr.bf16.mxu0 %v10540_v11  ;;  %3516 = vmatprep.subr.bf16.mxu1 %v10571_v12  ;;  %v366_v11 = vlaneseq }
 0x119   :  { %v12799_v12 = vshrl.u32 %v366_v11, 7 }
 0x11a   :  { %9788 = vmatpush3.bf16.msra.mxu0 %v10541_v14  ;;  %3517 = vmatpush1.bf16.msra.mxu1 %v10569_v16  ;;  %v12804_v14 = vld [vmem:[%s14531_s3] sm:$0x1f] }
 0x11b   :  { %9789 = vmatprep.subr.bf16.mxu0 %v10542_v17  ;;  %3518 = vmatprep.subr.bf16.mxu1 %v10577_v19  ;;  %v12807_v16 = vsub.s32 0, %v12799_v12  ;;  %v12810_v17 = vsub.s32 1, %v12799_v12  ;;  %v12813_v19 = vsub.s32 3, %v12799_v12 }
 0x11e   :  { %9790 = vmatpush3.bf16.msra.mxu0 %v10543_v20  ;;  %3519 = vmatpush1.bf16.msra.mxu1 %v10575_v21  ;;  %v369_v20 = vrot.slane %v12804_v14, %v12807_v16  ;;  %v373_v21 = vrot.slane %v12804_v14, %v12810_v17 }
 0x11f   :  { %3631 = vmatprep.subr.bf16.mxu0 %v10550_v13  ;;  %3520 = vmatprep.subr.bf16.mxu1 %v10583_v34  ;;  %v381_v13 = vrot.slane %v12804_v14, %v12813_v19 }
 0x121   :  { %2134 = vmatmul.mubr.bf16.vlgmr.msra.gmra.mrb[8].mxu0 %v12422_v18  ;;  %v10566_v18 = vld [vmem:[%s14532_s4 + $0x80] ss:$20 sps:$4 sm:$0xff]  }
 0x122   :  { %3632 = vmatpush1.bf16.msra.mxu0 %v10548_v23  ;;  %3521 = vmatpush1.bf16.msra.mxu1 %v10581_v36 }
 0x123   :  { %3633 = vmatprep.subr.bf16.mxu0 %v10556_v24  ;;  %3522 = vmatprep.subr.bf16.mxu1 %v10589_v30 }
 0x126   :  { %3634 = vmatpush1.bf16.msra.mxu0 %v10554_v25  ;;  %3523 = vmatpush1.bf16.msra.mxu1 %v10587_v38 }
 0x127   :  { %3635 = vmatprep.subr.bf16.mxu0 %v10562_v26  ;;  %3524 = vmatprep.subr.bf16.mxu1 %v10595_v40 }
 0x12a   :  { %3636 = vmatpush1.bf16.msra.mxu0 %v10560_v27  ;;  %3525 = vmatpush1.bf16.msra.mxu1 %v10593_v42 }
 0x12b   :  { %3637 = vmatprep.subr.bf16.mxu0 %v10568_v28  ;;  %3526 = vmatprep.subr.bf16.mxu1 %v10601_v44 }
 0x12e   :  { %3638 = vmatpush1.bf16.msra.mxu0 %v10566_v18  ;;  %3527 = vmatpush1.bf16.msra.mxu1 %v10599_v46 }
 0x12f   :  { %3639 = vmatprep.subr.bf16.mxu0 %v10574_v29  ;;  %3528 = vmatprep.subr.bf16.mxu1 %v10607_v49 }
 0x132   :  { %3640 = vmatpush1.bf16.msra.mxu0 %v10572_v31  ;;  %3529 = vmatpush1.bf16.msra.mxu1 %v10605_v51  ;;  %v12833_v51 = vsub.s32 4, %v12799_v12 }
 0x133   :  { %3641 = vmatprep.subr.bf16.mxu0 %v10580_v32  ;;  %3530 = vmatprep.subr.bf16.mxu1 %v10613_v53 }
 0x136   :  { %3642 = vmatpush1.bf16.msra.mxu0 %v10578_v33  ;;  %3531 = vmatpush1.bf16.msra.mxu1 %v10611_v55 }
 0x137   :  { %3643 = vmatprep.subr.bf16.mxu0 %v10586_v35  ;;  %3532 = vmatprep.subr.bf16.mxu1 %v10619_v57 }
 0x13a   :  { %3644 = vmatpush1.bf16.msra.mxu0 %v10584_v48  ;;  %3533 = vmatpush1.bf16.msra.mxu1 %v10617_v60  ;;  %v385_v60 = vrot.slane %v12804_v14, %v12833_v51 }
 0x13b   :  { %3645 = vmatprep.subr.bf16.mxu0 %v10592_v37  ;;  %3534 = vmatprep.subr.bf16.mxu1 %v10625_v62 }
 0x13e   :  { %3646 = vmatpush1.bf16.msra.mxu0 %v10590_v39  ;;  %3535 = vmatpush1.bf16.msra.mxu1 %v10623_v9 }
 0x13f   :  { %3647 = vmatprep.subr.bf16.mxu0 %v10598_v41  ;;  %3536 = vmatprep.subr.bf16.mxu1 %v10631_v63 }
 0x142   :  { %3648 = vmatpush1.bf16.msra.mxu0 %v10596_v43  ;;  %3537 = vmatpush1.bf16.msra.mxu1 %v10629_v1 }
 0x143   :  { %3649 = vmatprep.subr.bf16.mxu0 %v10604_v45  ;;  %3538 = vmatprep.subr.bf16.mxu1 %v10637_v3 }
 0x146   :  { %3650 = vmatpush1.bf16.msra.mxu0 %v10602_v47  ;;  %3539 = vmatpush1.bf16.msra.mxu1 %v10635_v6 }
 0x147   :  { %3651 = vmatprep.subr.bf16.mxu0 %v10610_v50  ;;  %3549 = vmatprep.subr.bf16.mxu1 %v10643_v8 }
 0x14a   :  { %3652 = vmatpush1.bf16.msra.mxu0 %v10608_v52 }
 0x14b   :  { %3653 = vmatprep.subr.bf16.mxu0 %v10616_v54  ;;  %v10661_v54 = vld [vmem:[%s14532_s4 + $0x2fc] ss:$20 sps:$4 sm:$0xff]  }
 0x14e   :  { %3654 = vmatpush1.bf16.msra.mxu0 %v10614_v56 }
 0x14f   :  { %3655 = vmatprep.subr.bf16.mxu0 %v10622_v58 }
 0x152   :  { %3656 = vmatpush1.bf16.msra.mxu0 %v10620_v61 }
 0x153   :  { %3657 = vmatprep.subr.bf16.mxu0 %v10628_v5 }
 0x156   :  { %3658 = vmatpush1.bf16.msra.mxu0 %v10626_v15 }
 0x157   :  { %3659 = vmatprep.subr.bf16.mxu0 %v10634_v0 }
 0x15a   :  { %3660 = vmatpush1.bf16.msra.mxu0 %v10632_v2 }
 0x15b   :  { %3661 = vmatprep.subr.bf16.mxu0 %v10640_v4 }
 0x15e   :  { %3662 = vmatpush1.bf16.msra.mxu0 %v10638_v7 }
 0x15f   :  { %3672 = vmatprep.subr.bf16.mxu0 %v10646_v10 }
 0x1b4   :  { %v1850_v23 = vpop.f32.mrb[0].mxu0  ;;  %v12821_v24 = vpop.f32.mrb[0].mxu1 }
 0x1b5   :  { %v12823_v25 = vadd.f32 %v1850_v23, %v369_v20  ;;  %v1852_v26 = vpop.f32.mrb[1].mxu0  ;;  %v2016_v27 = vpop.f32.mrb[1].mxu1 }
 0x1b6   :  { %v12825_v28 = vadd.f32 %v1852_v26, %v373_v21  ;;  %v12827_v18 = vadd.f32 %v2016_v27, %v381_v13  ;;  %v1854_v29 = vpop.f32.mrb[2].mxu0  ;;  %v2018_v31 = vpop.f32.mrb[2].mxu1 }
 0x1b7   :  { %v2186_v32 = vand.u32 2147483647, %v12823_v25  ;;  %v1855_v36 = vpop.f32.mrb[3].mxu0  ;;  %v2019_v48 = vpop.f32.mrb[3].mxu1  ;;  %v2181_v62 = vmax.f32 %v12823_v25, 0.0 }
 0x1b8   :  { %v2187_v33 = vand.u32 2147483647, %v12825_v28  ;;  %v2189_v34 = vand.u32 2147483647, %v12827_v18  ;;  %v2182_v23 = vmax.f32 %v12825_v28, 0.0  ;;  %v12855_v28 = vsub.s32 2, %v12799_v12 }
 0x1b9   :  { %v2191_v35 = vsub.f32 0.0, %v2186_v32  ;;  %v2184_v32 = vmax.f32 %v12827_v18, 0.0  ;;  %v10649_v18 = vld [vmem:[%s14532_s4 + $0x2ac] ss:$20 sps:$4 sm:$0xff]  }
 0x1ba   :  { %v2192_v30 = vsub.f32 0.0, %v2187_v33  ;;  %v2194_v37 = vsub.f32 0.0, %v2189_v34  ;;  %v10641_v34 = vld [vmem:[%s14532_s4 + $0x280] ss:$20 sps:$4 sm:$0xff]  }
 0x1bb   :  { %v2196_v38 = vmul.f32 1.442695, %v2191_v35  ;;  %v10644_v35 = vld [vmem:[%s14532_s4 + $0x288] ss:$20 sps:$4 sm:$0xff]  }
 0x1bc   :  { %v2198_v39 = vmul.f32 1.442695, %v2192_v30  ;;  %v2202_v40 = vmul.f32 1.442695, %v2194_v37 }
 0x1bd   :  { %11516 = vpow2.f32 %v2196_v38 }
 0x1be   :  { %11518 = vpow2.f32 %v2198_v39 }
 0x1bf   :  { %11520 = vpow2.f32 %v2202_v40  ;;  %v10652_v40 = vld [vmem:[%s14532_s4 + $0x2b4] ss:$20 sps:$4 sm:$0xff]  }
 0x1c7   :  { %v11517_v41 = vpop.eup %11516 }
 0x1c8   :  { %v2206_v42 = vadd.f32 1.0, %v11517_v41  ;;  %v11519_v43 = vpop.eup %11518  ;;  %v2209_v47 = vmul.f32 -0.5, %v11517_v41  ;;  %v2212_v49 = vand.u32 2147483647, %v11517_v41 }
 0x1c9   :  { %v11521_v44 = vpop.eup %11520  ;;  %v2215_v45 = vadd.f32 1.0, %v11519_v43  ;;  %v2218_v50 = vmul.f32 -0.5, %v11519_v43  ;;  %v2221_v57 = vand.u32 2147483647, %v11519_v43 }
 0x1ca   :  { %11522 = vlog2.f32 %v2206_v42  ;;  %v2233_v46 = vadd.f32 1.0, %v11521_v44  ;;  %v2210_v52 = vadd.f32 1.0, %v2209_v47  ;;  %v2236_v53 = vmul.f32 -0.5, %v11521_v44  ;;  %v10647_v42 = vld [vmem:[%s14532_s4 + $0x2a8] ss:$20 sps:$4 sm:$0xff]  }
 0x1cb   :  { %11524 = vlog2.f32 %v2215_v45  ;;  %vm12835_vm2 = vcmp.lt.f32.partialorder %v2212_v49, 0.0004427343  ;;  %v2219_v55 = vadd.f32 1.0, %v2218_v50  ;;  %v2239_v2 = vand.u32 2147483647, %v11521_v44 }
 0x1cc   :  { %11526 = vlog2.f32 %v2233_v46  ;;  %v2211_v9 = vmul.f32 %v11517_v41, %v2210_v52  ;;  %v2237_v15 = vadd.f32 1.0, %v2236_v53  ;;  %vm2222_vm3 = vcmp.lt.f32.partialorder %v2221_v57, 0.0004427343  ;;  %v10655_v49 = vld [vmem:[%s14532_s4 + $0x2d4] ss:$20 sps:$4 sm:$0xff]  }
 0x1cd   :  { %v2220_v11 = vmul.f32 %v11519_v43, %v2219_v55  ;;  %vm2240_vm4 = vcmp.lt.f32.partialorder %v2239_v2, 0.0004427343  ;;  %v10650_v43 = vld [vmem:[%s14532_s4 + $0x2b0] ss:$20 sps:$4 sm:$0xff]   ;;  %v377_v45 = vrot.slane %v12804_v14, %v12855_v28  ;;  %v10656_v52 = vld [vmem:[%s14532_s4 + $0x2d8] ss:$20 sps:$4 sm:$0xff]  }
 0x1ce   :  { %v2238_v31 = vmul.f32 %v11521_v44, %v2237_v15  ;;  %v10658_v14 = vld [vmem:[%s14532_s4 + $0x2dc] ss:$20 sps:$4 sm:$0xff]   ;;  %v10664_v55 = vld [vmem:[%s14532_s4 + $0x304] ss:$20 sps:$4 sm:$0xff]   ;;  %v10676_v15 = vld [vmem:[%s14532_s4 + $0x354] ss:$20 sps:$4 sm:$0xff]  }
 0x1cf   :  { %v10653_v50 = vld [vmem:[%s14532_s4 + $0x2d0] ss:$20 sps:$4 sm:$0xff]   ;;  %v12898_v53 = vadd.f32 %v12821_v24, %v377_v45  ;;  %v10662_v24 = vld [vmem:[%s14532_s4 + $0x300] ss:$20 sps:$4 sm:$0xff]  }
 0x1d0   :  { %v10679_v2 = vld [vmem:[%s14532_s4 + $0x374] ss:$20 sps:$4 sm:$0xff]   ;;  %v10709_v45 = vld [vmem:[%s14532_s4 + $0x43c] ss:$20 sps:$4 sm:$0xff]  }
 0x1d1   :  { %v2188_v57 = vand.u32 2147483647, %v12898_v53 }
 0x1d4   :  { %v11523_v56 = vpop.eup %11522  ;;  %v9747_v58 = vpop.f32.mrb[4].mxu0 }
 0x1d5   :  { %v9769_v61 = vpop.f32.mrb[4].mxu1  ;;  %v2208_v5 = vmul.f32 0.6931472, %v11523_v56  ;;  %v9748_v63 = vpop.f32.mrb[5].mxu0  ;;  %v10659_v56 = vld [vmem:[%s14532_s4 + $0x2f8] ss:$20 sps:$4 sm:$0xff]  }
 0x1d6   :  { %v9770_v0 = vpop.f32.mrb[5].mxu1  ;;  %v11525_v1 = vpop.eup %11524  ;;  %v9749_v3 = vadd.f32 %v9748_v63, %v9747_v58  ;;  %v10667_v58 = vld [vmem:[%s14532_s4 + $0x324] ss:$20 sps:$4 sm:$0xff]   ;;  %v10671_v63 = vld [vmem:[%s14532_s4 + $0x348] ss:$20 sps:$4 sm:$0xff]  }
 0x1d7   :  { %v9750_v4 = vpop.f32.mrb[6].mxu0  ;;  %v9771_v6 = vadd.f32 %v9770_v0, %v9769_v61  ;;  %v9772_v7 = vpop.f32.mrb[6].mxu1  ;;  %v2214_v8 = vsel %vm12835_vm2, %v2211_v9, %v2208_v5  ;;  %v2217_v10 = vmul.f32 0.6931472, %v11525_v1  ;;  %v10665_v61 = vld [vmem:[%s14532_s4 + $0x320] ss:$20 sps:$4 sm:$0xff]  }
 0x1d8   :  { %v9751_v20 = vpop.f32.mrb[7].mxu0  ;;  %v9773_v21 = vpop.f32.mrb[7].mxu1  ;;  %v2056_v25 = vadd.f32 %v9749_v3, %v385_v60  ;;  %v2251_v26 = vadd.f32 %v2214_v8, %v2181_v62  ;;  %v10670_v60 = vld [vmem:[%s14532_s4 + $0x32c] ss:$20 sps:$4 sm:$0xff]   ;;  %v10668_v62 = vld [vmem:[%s14532_s4 + $0x328] ss:$20 sps:$4 sm:$0xff]  }
 0x1d9   :  { %v11527_v13 = vpop.eup %11526  ;;  %v2223_v27 = vsel %vm2222_vm3, %v2220_v11, %v2217_v10  ;;  %v2193_v5 = vsub.f32 0.0, %v2188_v57  ;;  %v10673_v9 = vld [vmem:[%s14532_s4 + $0x34c] ss:$20 sps:$4 sm:$0xff]   ;;  %v10674_v0 = vld [vmem:[%s14532_s4 + $0x350] ss:$20 sps:$4 sm:$0xff]  }
 0x1da   :  { %v2235_v29 = vmul.f32 0.6931472, %v11527_v13  ;;  %v2252_v33 = vadd.f32 %v2223_v27, %v2182_v23  ;;  %v12852_v36 = vadd.f32 %v9771_v6, %v2056_v25  ;;  %v12864_v39 = vpack.c.bf16 %v2251_v26, %v2251_v26  ;;  %v10682_v3 = vld [vmem:[%s14532_s4 + $0x37c] ss:$20 sps:$4 sm:$0xff]   ;;  %v10680_v6 = vld [vmem:[%s14532_s4 + $0x378] ss:$20 sps:$4 sm:$0xff]  }
 0x1db   :  { %v2200_v1 = vmul.f32 1.442695, %v2193_v5  ;;  %v10677_v4 = vld [vmem:[%s14532_s4 + $0x370] ss:$20 sps:$4 sm:$0xff]   ;;  %v10683_v21 = vld [vmem:[%s14532_s4 + $0x398] ss:$20 sps:$4 sm:$0xff]  }
 0x1dc   :  { %v2241_v48 = vsel %vm2240_vm4, %v2238_v31, %v2235_v29  ;;  %v12857_v30 = vpack.c.bf16 %v2252_v33, %v2252_v33  ;;  %v12862_v38 = vpop.f32.mrb[8].mxu1  ;;  %v10685_v7 = vld [vmem:[%s14532_s4 + $0x39c] ss:$20 sps:$4 sm:$0xff]   ;;  %v10688_v11 = vld [vmem:[%s14532_s4 + $0x3a4] ss:$20 sps:$4 sm:$0xff]  }
 0x1dd   :  { %v2254_v37 = vadd.f32 %v2241_v48, %v2184_v32  ;;  %v10012_v41 = vpop.f32.mrb[9].mxu1  ;;  %11528 = vpow2.f32 %v2200_v1  ;;  %v10686_v13 = vld [vmem:[%s14532_s4 + $0x3a0] ss:$20 sps:$4 sm:$0xff]   ;;  %v10691_v25 = vld [vmem:[%s14532_s4 + $0x3c4] ss:$20 sps:$4 sm:$0xff]  }
 0x1de   :  { %3540 = vmatprep.mubr.bf16.mxu1 %v12857_v30  ;;  %3663 = vmatprep.mubr.bf16.mxu0 %v12857_v30  ;;  %v2178_v44 = vpop.f32.mrb[10].mxu1  ;;  %v10694_v29 = vld [vmem:[%s14532_s4 + $0x3cc] ss:$20 sps:$4 sm:$0xff]   ;;  %v10692_v33 = vld [vmem:[%s14532_s4 + $0x3c8] ss:$20 sps:$4 sm:$0xff]  }
 0x1df   :  { %3541 = vmatmul.mubr.bf16.vlgmr.msra.gmra.mrb[12].mxu1 %v12864_v39  ;;  %3664 = vmatmul.mubr.bf16.vlgmr.msra.gmra.mrb[12].mxu0 %v12864_v39  ;;  %v12881_v46 = vpack.c.bf16 %v2254_v37, %v2254_v37  ;;  %v10013_v47 = vpop.f32.mrb[11].mxu1  ;;  %v10689_v32 = vld [vmem:[%s14532_s4 + $0x3c0] ss:$20 sps:$4 sm:$0xff]   ;;  %v10695_v37 = vld [vmem:[%s14532_s4 + $0x3e8] ss:$20 sps:$4 sm:$0xff]  }
 0x1e0   :  { %3550 = vmatpush1.bf16.msra.mxu1 %v10641_v34  ;;  %3673 = vmatpush1.bf16.msra.mxu0 %v10644_v35  ;;  %v10697_v34 = vld [vmem:[%s14532_s4 + $0x3ec] ss:$20 sps:$4 sm:$0xff]   ;;  %v10700_v35 = vld [vmem:[%s14532_s4 + $0x3f4] ss:$20 sps:$4 sm:$0xff]   ;;  %v10706_v41 = vld [vmem:[%s14532_s4 + $0x41c] ss:$20 sps:$4 sm:$0xff]  }
 0x1e1   :  { %3581 = vmatprep.mubr.bf16.mxu1 %v12881_v46  ;;  %3704 = vmatprep.mubr.bf16.mxu0 %v12881_v46  ;;  %v10712_v47 = vld [vmem:[%s14532_s4 + $0x444] ss:$20 sps:$4 sm:$0xff]   ;;  %v10721_v57 = vld [vmem:[%s14532_s4 + $0x48c] ss:$20 sps:$4 sm:$0xff]  }
 0x1e2   :  { %3551 = vmatprep.subr.bf16.mxu1 %v10649_v18  ;;  %3674 = vmatprep.subr.bf16.mxu0 %v10652_v40  ;;  %v10698_v18 = vld [vmem:[%s14532_s4 + $0x3f0] ss:$20 sps:$4 sm:$0xff]  }
 0x1e3   :  { %v10725_v1 = vld [vmem:[%s14532_s4 + $0x4b0] ss:$20 sps:$4 sm:$0xff]  }
 0x1e4   :  { %3552 = vmatpush1.bf16.msra.mxu1 %v10647_v42  ;;  %3675 = vmatpush1.bf16.msra.mxu0 %v10650_v43  ;;  %v10701_v42 = vld [vmem:[%s14532_s4 + $0x410] ss:$20 sps:$4 sm:$0xff]   ;;  %v10704_v43 = vld [vmem:[%s14532_s4 + $0x418] ss:$20 sps:$4 sm:$0xff]  }
 0x1e5   :  { %3553 = vmatprep.subr.bf16.mxu1 %v10655_v49  ;;  %3676 = vmatprep.subr.bf16.mxu0 %v10658_v14  ;;  %v10707_v49 = vld [vmem:[%s14532_s4 + $0x438] ss:$20 sps:$4 sm:$0xff]   ;;  %v10710_v14 = vld [vmem:[%s14532_s4 + $0x440] ss:$20 sps:$4 sm:$0xff]  }
 0x1e8   :  { %3554 = vmatpush1.bf16.msra.mxu1 %v10653_v50  ;;  %3677 = vmatpush1.bf16.msra.mxu0 %v10656_v52  ;;  %v10715_v52 = vld [vmem:[%s14532_s4 + $0x464] ss:$20 sps:$4 sm:$0xff]  }
 0x1e9   :  { %3555 = vmatprep.subr.bf16.mxu1 %v10661_v54  ;;  %3678 = vmatprep.subr.bf16.mxu0 %v10664_v55  ;;  %v10718_v54 = vld [vmem:[%s14532_s4 + $0x46c] ss:$20 sps:$4 sm:$0xff]  }
 0x1ea   :  { %v10713_v55 = vld [vmem:[%s14532_s4 + $0x460] ss:$20 sps:$4 sm:$0xff]  }
 0x1ec   :  { %3556 = vmatpush1.bf16.msra.mxu1 %v10659_v56  ;;  %3679 = vmatpush1.bf16.msra.mxu0 %v10662_v24  ;;  %v10716_v56 = vld [vmem:[%s14532_s4 + $0x468] ss:$20 sps:$4 sm:$0xff]  }
 0x1ed   :  { %3557 = vmatprep.subr.bf16.mxu1 %v10667_v58  ;;  %3680 = vmatprep.subr.bf16.mxu0 %v10670_v60  ;;  %v10724_v58 = vld [vmem:[%s14532_s4 + $0x494] ss:$20 sps:$4 sm:$0xff]  }
 0x1f0   :  { %3558 = vmatpush1.bf16.msra.mxu1 %v10665_v61  ;;  %3681 = vmatpush1.bf16.msra.mxu0 %v10668_v62  ;;  %v10719_v61 = vld [vmem:[%s14532_s4 + $0x488] ss:$20 sps:$4 sm:$0xff]   ;;  %v10722_v62 = vld [vmem:[%s14532_s4 + $0x490] ss:$20 sps:$4 sm:$0xff]  }
 0x1f1   :  { %3559 = vmatprep.subr.bf16.mxu1 %v10673_v9  ;;  %3682 = vmatprep.subr.bf16.mxu0 %v10676_v15  ;;  %v10727_v15 = vld [vmem:[%s14532_s4 + $0x4b4] ss:$20 sps:$4 sm:$0xff]  }
 0x1f4   :  { %3560 = vmatpush1.bf16.msra.mxu1 %v10671_v63  ;;  %3683 = vmatpush1.bf16.msra.mxu0 %v10674_v0  ;;  %v9791_v8 = vpop.f32.mrb[8].mxu0  ;;  %v10730_v63 = vld [vmem:[%s14532_s4 + $0x4bc] ss:$20 sps:$4 sm:$0xff]  }
 0x1f5   :  { %v9792_v10 = vpop.f32.mrb[9].mxu0  ;;  %3561 = vmatprep.subr.bf16.mxu1 %v10679_v2  ;;  %3684 = vmatprep.subr.bf16.mxu0 %v10682_v3  ;;  %v10728_v2 = vld [vmem:[%s14532_s4 + $0x4b8] ss:$20 sps:$4 sm:$0xff]   ;;  %v10733_v3 = vld [vmem:[%s14532_s4 + $0x4dc] ss:$20 sps:$4 sm:$0xff]  }
 0x1f6   :  { %v9793_v20 = vadd.f32 %v9792_v10, %v9791_v8  ;;  %v9794_v23 = vpop.f32.mrb[10].mxu0  ;;  %v10731_v10 = vld [vmem:[%s14532_s4 + $0x4d8] ss:$20 sps:$4 sm:$0xff]  }
 0x1f7   :  { %v9795_v26 = vpop.f32.mrb[11].mxu0 }
 0x1f8   :  { %3562 = vmatpush1.bf16.msra.mxu1 %v10677_v4  ;;  %3685 = vmatpush1.bf16.msra.mxu0 %v10680_v6  ;;  %v2136_v27 = vadd.f32 %v9793_v20, %v12852_v36  ;;  %v11529_v36 = vpop.eup %11528  ;;  %v10736_v4 = vld [vmem:[%s14532_s4 + $0x4e4] ss:$20 sps:$4 sm:$0xff]   ;;  %v2183_v20 = vmax.f32 %v12898_v53, 0.0  ;;  %v10737_v26 = vld [vmem:[%s14532_s4 + $0x500] ss:$20 sps:$4 sm:$0xff]  }
 0x1f9   :  { %3563 = vmatprep.subr.bf16.mxu1 %v10685_v7  ;;  %3686 = vmatprep.subr.bf16.mxu0 %v10688_v11  ;;  %v2224_v40 = vadd.f32 1.0, %v11529_v36  ;;  %v2227_v24 = vmul.f32 -0.5, %v11529_v36  ;;  %v2230_v9 = vand.u32 2147483647, %v11529_v36  ;;  %v10734_v11 = vld [vmem:[%s14532_s4 + $0x4e0] ss:$20 sps:$4 sm:$0xff]  }
 0x1fa   :  { %v12969_v31 = vadd.f32 %v12862_v38, %v2136_v27  ;;  %v10703_v38 = vld [vmem:[%s14532_s4 + $0x414] ss:$20 sps:$4 sm:$0xff]   ;;  %v10741_v53 = vld [vmem:[%s14532_s4 + $0x290] ss:$20 sps:$4 sm:$0xff]   ;;  %v10744_v27 = vld [vmem:[%s14532_s4 + $0x52c] ss:$20 sps:$4 sm:$0xff]  }
 0x1fb   :  { %11530 = vlog2.f32 %v2224_v40  ;;  %v2228_v5 = vadd.f32 1.0, %v2227_v24  ;;  %vm2231_vm5 = vcmp.lt.f32.partialorder %v2230_v9, 0.0004427343  ;;  %v10752_v40 = vld [vmem:[%s14532_s4 + $0x578] ss:$20 sps:$4 sm:$0xff]  }
 0x1fc   :  { %3564 = vmatpush1.bf16.msra.mxu1 %v10683_v21  ;;  %3687 = vmatpush1.bf16.msra.mxu0 %v10686_v13  ;;  %v2190_v48 = vand.u32 2147483647, %v12969_v31  ;;  %v10739_v21 = vld [vmem:[%s14532_s4 + $0x504] ss:$20 sps:$4 sm:$0xff]   ;;  %v10766_v9 = vld [vmem:[%s14532_s4 + $0x508] ss:$20 sps:$4 sm:$0xff]  }
 0x1fd   :  { %3565 = vmatprep.subr.bf16.mxu1 %v10691_v25  ;;  %3688 = vmatprep.subr.bf16.mxu0 %v10694_v29  ;;  %v2229_v6 = vmul.f32 %v11529_v36, %v2228_v5  ;;  %v10740_v13 = vld [vmem:[%s14532_s4 + $0x3d0] ss:$20 sps:$4 sm:$0xff]   ;;  %v10745_v29 = vld [vmem:[%s14532_s4 + $0x3f8] ss:$20 sps:$4 sm:$0xff]   ;;  %v10750_v36 = vld [vmem:[%s14532_s4 + $0x420] ss:$20 sps:$4 sm:$0xff]  }
 0x1fe   :  { %v2195_v44 = vsub.f32 0.0, %v2190_v48  ;;  %v10747_v48 = vld [vmem:[%s14532_s4 + $0x550] ss:$20 sps:$4 sm:$0xff]   ;;  %v10768_v5 = vld [vmem:[%s14532_s4 + $0x50c] ss:$20 sps:$4 sm:$0xff]  }
 0x200   :  { %3566 = vmatpush1.bf16.msra.mxu1 %v10689_v32  ;;  %3689 = vmatpush1.bf16.msra.mxu0 %v10692_v33  ;;  %v2204_v50 = vmul.f32 1.442695, %v2195_v44  ;;  %v10742_v33 = vld [vmem:[%s14532_s4 + $0x528] ss:$20 sps:$4 sm:$0xff]  }
 0x201   :  { %3567 = vmatprep.subr.bf16.mxu1 %v10697_v34  ;;  %3690 = vmatprep.subr.bf16.mxu0 %v10700_v35  ;;  %v10746_v34 = vld [vmem:[%s14532_s4 + $0x2b8] ss:$20 sps:$4 sm:$0xff]   ;;  %v10749_v35 = vld [vmem:[%s14532_s4 + $0x554] ss:$20 sps:$4 sm:$0xff]  }
 0x202   :  { %11532 = vpow2.f32 %v2204_v50 }
 0x204   :  { %3568 = vmatpush1.bf16.msra.mxu1 %v10695_v37  ;;  %3691 = vmatpush1.bf16.msra.mxu0 %v10698_v18  ;;  %v10751_v37 = vld [vmem:[%s14532_s4 + $0x2e0] ss:$20 sps:$4 sm:$0xff]   ;;  %v10754_v18 = vld [vmem:[%s14532_s4 + $0x57c] ss:$20 sps:$4 sm:$0xff]  }
 0x205   :  { %3569 = vmatprep.subr.bf16.mxu1 %v10703_v38  ;;  %3692 = vmatprep.subr.bf16.mxu0 %v10706_v41  ;;  %v11531_v60 = vpop.eup %11530  ;;  %v10756_v41 = vld [vmem:[%s14532_s4 + $0x308] ss:$20 sps:$4 sm:$0xff]  }
 0x206   :  { %v2226_v0 = vmul.f32 0.6931472, %v11531_v60  ;;  %v10765_v60 = vld [vmem:[%s14532_s4 + $0x358] ss:$20 sps:$4 sm:$0xff]  }
 0x208   :  { %3570 = vmatpush1.bf16.msra.mxu1 %v10701_v42  ;;  %3693 = vmatpush1.bf16.msra.mxu0 %v10704_v43  ;;  %v2232_v8 = vsel %vm2231_vm5, %v2229_v6, %v2226_v0  ;;  %v10773_v0 = vld [vmem:[%s14532_s4 + $0x534] ss:$20 sps:$4 sm:$0xff]   ;;  %v10776_v6 = vld [vmem:[%s14532_s4 + $0x558] ss:$20 sps:$4 sm:$0xff]  }
 0x209   :  { %3571 = vmatprep.subr.bf16.mxu1 %v10709_v45  ;;  %3694 = vmatprep.subr.bf16.mxu0 %v10712_v47  ;;  %v2253_v23 = vadd.f32 %v2232_v8, %v2183_v20  ;;  %v10759_v45 = vld [vmem:[%s14532_s4 + $0x5a4] ss:$20 sps:$4 sm:$0xff]   ;;  %v10779_v8 = vld [vmem:[%s14532_s4 + $0x580] ss:$20 sps:$4 sm:$0xff]   ;;  %v10782_v20 = vld [vmem:[%s14532_s4 + $0x5a8] ss:$20 sps:$4 sm:$0xff]  }
 0x20a   :  { %v10760_v47 = vld [vmem:[%s14532_s4 + $0x470] ss:$20 sps:$4 sm:$0xff]  }
 0x20b   :  { %v13081_v32 = vpack.c.bf16 %v2253_v23, %v2253_v23 }
 0x20c   :  { %3572 = vmatpush1.bf16.msra.mxu1 %v10707_v49  ;;  %3695 = vmatpush1.bf16.msra.mxu0 %v10710_v14  ;;  %v11533_v7 = vpop.eup %11532  ;;  %v2483_v14 = vld [vmem:[%s14532_s4 + $0x5c8] sm:$0xff] }
 0x20d   :  { %3573 = vmatprep.subr.bf16.mxu1 %v10715_v52  ;;  %3696 = vmatprep.subr.bf16.mxu0 %v10718_v54  ;;  %v2242_v25 = vadd.f32 1.0, %v11533_v7  ;;  %v2245_v38 = vmul.f32 -0.5, %v11533_v7  ;;  %v2248_v44 = vand.u32 2147483647, %v11533_v7  ;;  %v10757_v52 = vld [vmem:[%s14532_s4 + $0x5a0] ss:$20 sps:$4 sm:$0xff]   ;;  %v9190_v24 = vcombine.low %v2483_v14, %v2483_v14 }
 0x20e   :  { %v10761_v54 = vld [vmem:[%s14532_s4 + $0x330] ss:$20 sps:$4 sm:$0xff]  }
 0x20f   :  { %11534 = vlog2.f32 %v2242_v25  ;;  %v2246_v43 = vadd.f32 1.0, %v2245_v38  ;;  %vm2249_vm6 = vcmp.lt.f32.partialorder %v2248_v44, 0.0004427343  ;;  %v10787_v25 = vld [vmem:[%s14532_s4 + $0x150] ss:$20 sps:$4 sm:$0xff]  }
 0x210   :  { %3574 = vmatpush1.bf16.msra.mxu1 %v10713_v55  ;;  %3697 = vmatpush1.bf16.msra.mxu0 %v10716_v56  ;;  %v9191_v55 = vcombine.high %v2483_v14, %v2483_v14  ;;  %v10763_v56 = vld [vmem:[%s14532_s4 + $0x498] ss:$20 sps:$4 sm:$0xff]   ;;  %v10802_v38 = vld [vmem:[%s14532_s4 + $0x128] ss:$20 sps:$4 sm:$0xff]  }
 0x211   :  { %3575 = vmatprep.subr.bf16.mxu1 %v10721_v57  ;;  %3698 = vmatprep.subr.bf16.mxu0 %v10724_v58  ;;  %v2247_v50 = vmul.f32 %v11533_v7, %v2246_v43  ;;  %v2185_v58 = vmax.f32 %v12969_v31, 0.0  ;;  %v10769_v31 = vld [vmem:[%s14532_s4 + $0x4c0] ss:$20 sps:$4 sm:$0xff]   ;;  %v10781_v7 = vld [vmem:[%s14532_s4 + $0x584] ss:$20 sps:$4 sm:$0xff]   ;;  %v10811_v14 = vld [vmem:[%s14534_s6 + $0x48] sm:$0xff]  }
 0x212   :  { %v10807_v43 = vld [vmem:[%s14532_s4 + $0x5b0] ss:$20 sps:$4 sm:$0xff]   ;;  %v10808_v44 = vld [vmem:[%s14532_s4 + $0x5d8] ss:$0 sps:$4 sm:$0xff]  }
 0x214   :  { %3576 = vmatpush1.bf16.msra.mxu1 %v10719_v61  ;;  %3699 = vmatpush1.bf16.msra.mxu0 %v10722_v62  ;;  %v3494_v62 = vsel %vm3492_vm7, %v9190_v24, 0  ;;  %v10817_v24 = vld [vmem:[%s14534_s6 + $0x60] sm:$0xff]  }
 0x215   :  { %3577 = vmatprep.subr.bf16.mxu1 %v10727_v15  ;;  %3700 = vmatprep.subr.bf16.mxu0 %v10730_v63  ;;  %v10770_v15 = vld [vmem:[%s14532_s4 + $0x380] ss:$20 sps:$4 sm:$0xff]  }
 0x218   :  { %3578 = vmatpush1.bf16.msra.mxu1 %v10725_v1  ;;  %3701 = vmatpush1.bf16.msra.mxu0 %v10728_v2  ;;  %v10774_v1 = vld [vmem:[%s14532_s4 + $0x4e8] ss:$20 sps:$4 sm:$0xff]   ;;  %v10771_v2 = vld [vmem:[%s14532_s4 + $0x530] ss:$20 sps:$4 sm:$0xff]  }
 0x219   :  { %3579 = vmatprep.subr.bf16.mxu1 %v10733_v3  ;;  %3702 = vmatprep.subr.bf16.mxu0 %v10736_v4  ;;  %v11535_v42 = vpop.eup %11534  ;;  %v10775_v3 = vld [vmem:[%s14532_s4 + $0x3a8] ss:$20 sps:$4 sm:$0xff]  }
 0x21a   :  { %v2244_v49 = vmul.f32 0.6931472, %v11535_v42  ;;  %v10778_v4 = vld [vmem:[%s14532_s4 + $0x55c] ss:$20 sps:$4 sm:$0xff]   ;;  %v10805_v42 = vld [vmem:[%s14532_s4 + $0x560] ss:$20 sps:$4 sm:$0xff]  }
 0x21c   :  { %3580 = vmatpush1.bf16.msra.mxu1 %v10731_v10  ;;  %3703 = vmatpush1.bf16.msra.mxu0 %v10734_v11  ;;  %v2250_v57 = vsel %vm2249_vm6, %v2247_v50, %v2244_v49  ;;  %v10784_v10 = vld [vmem:[%s14532_s4 + $0x5ac] ss:$20 sps:$4 sm:$0xff]   ;;  %v2484_v11 = vld [vmem:[%s14532_s4 + $0x5d0] sm:$0xff] }
 0x21d   :  { %3590 = vmatprep.subr.bf16.mxu1 %v10739_v21  ;;  %9821 = vmatprep.subr.bf16.mxu0 %v10740_v13  ;;  %v2255_v61 = vadd.f32 %v2250_v57, %v2185_v58  ;;  %v9193_v21 = vcombine.high %v2484_v11, %v2484_v11  ;;  %v9192_v13 = vcombine.low %v2484_v11, %v2484_v11  ;;  %v10810_v49 = vld [vmem:[%s14534_s6] sm:$0xff]   ;;  %v10812_v50 = vld [vmem:[%s14534_s6 + $0x8] sm:$0xff]   ;;  %v10837_v11 = vld [vmem:[%s14534_s6 + $0xf0] sm:$0xff]  }
 0x21e   :  { %v10818_v57 = vld [vmem:[%s14534_s6 + $0x20] sm:$0xff]   ;;  %v10819_v58 = vld [vmem:[%s14534_s6 + $0x68] sm:$0xff]  }
 0x21f   :  { %3582 = vmatmul.mubr.bf16.vlgmr.msra.gmra.mrb[12].mxu1 %v13081_v32  ;;  %3705 = vmatmul.mubr.bf16.vlgmr.msra.gmra.mrb[12].mxu0 %v13081_v32  ;;  %v13153_v63 = vpack.c.bf16 %v2255_v61, %v2255_v61  ;;  %v3500_v23 = vsel %vm3492_vm7, %v9192_v13, 0  ;;  %v10821_v61 = vld [vmem:[%s14534_s6 + $0x70] sm:$0xff]   ;;  %v10840_v13 = vld [vmem:[%s14534_s6 + $0xb8] sm:$0xff]  }
 0x220   :  { %3591 = vmatpush1.bf16.msra.mxu1 %v10737_v26  ;;  %9822 = vmatpush3.bf16.msra.mxu0 %v10741_v53  ;;  %v10788_v26 = vld [vmem:[%s14532_s4 + $0x10] ss:$20 sps:$4 sm:$0xff]   ;;  %v10789_v53 = vld [vmem:[%s14532_s4 + $0x178] ss:$20 sps:$4 sm:$0xff]  }
 0x221   :  { %3826 = vmatprep.mubr.bf16.mxu0 %v12881_v46  ;;  %3592 = vmatprep.subr.bf16.mxu1 %v10744_v27  ;;  %v10755_v46 = vld [vmem:[%s14532_s4 + $0x448] ss:$20 sps:$4 sm:$0xff]   ;;  %v10790_v27 = vld [vmem:[%s14532_s4 + $0x38] ss:$20 sps:$4 sm:$0xff]  }
 0x222   :  { %9823 = vmatprep.subr.bf16.mxu0 %v10745_v29  ;;  %3622 = vmatprep.mubr.bf16.mxu1 %v11701_v22  ;;  %v10791_v29 = vld [vmem:[%s14532_s4 + $0x1a0] ss:$20 sps:$4 sm:$0xff]  }
 0x224   :  { %3593 = vmatpush1.bf16.msra.mxu1 %v10742_v33  ;;  %9824 = vmatpush3.bf16.msra.mxu0 %v10746_v34  ;;  %v10793_v33 = vld [vmem:[%s14532_s4 + $0x1c8] ss:$20 sps:$4 sm:$0xff]   ;;  %v10795_v34 = vld [vmem:[%s14532_s4 + $0x1f0] ss:$20 sps:$4 sm:$0xff]  }
 0x225   :  { %3594 = vmatprep.subr.bf16.mxu1 %v10749_v35  ;;  %9825 = vmatprep.subr.bf16.mxu0 %v10750_v36  ;;  %v10796_v35 = vld [vmem:[%s14532_s4 + $0xb0] ss:$20 sps:$4 sm:$0xff]   ;;  %v10797_v36 = vld [vmem:[%s14532_s4 + $0x218] ss:$20 sps:$4 sm:$0xff]  }
 0x228   :  { %3595 = vmatpush1.bf16.msra.mxu1 %v10747_v48  ;;  %9826 = vmatpush3.bf16.msra.mxu0 %v10751_v37  ;;  %v10798_v48 = vld [vmem:[%s14532_s4 + $0xd8] ss:$20 sps:$4 sm:$0xff]   ;;  %v10799_v37 = vld [vmem:[%s14532_s4 + $0x240] ss:$20 sps:$4 sm:$0xff]  }
 0x229   :  { %3596 = vmatprep.subr.bf16.mxu1 %v10754_v18  ;;  %9827 = vmatprep.subr.bf16.mxu0 %v10755_v46  ;;  %v10800_v18 = vld [vmem:[%s14532_s4 + $0x100] ss:$20 sps:$4 sm:$0xff]   ;;  %v10801_v46 = vld [vmem:[%s14532_s4 + $0x268] ss:$20 sps:$4 sm:$0xff]  }
 0x22c   :  { %3597 = vmatpush1.bf16.msra.mxu1 %v10752_v40  ;;  %9828 = vmatpush3.bf16.msra.mxu0 %v10756_v41  ;;  %v10803_v40 = vld [vmem:[%s14532_s4 + $0x510] ss:$20 sps:$4 sm:$0xff]   ;;  %v10804_v41 = vld [vmem:[%s14532_s4 + $0x538] ss:$20 sps:$4 sm:$0xff]  }
 0x22d   :  { %3598 = vmatprep.subr.bf16.mxu1 %v10759_v45  ;;  %9829 = vmatprep.subr.bf16.mxu0 %v10760_v47  ;;  %v3506_v45 = vsel %vm3492_vm7, %v10808_v44, 0  ;;  %v10809_v47 = vld [vmem:[%s14534_s6 + $0x40] sm:$0xff]  }
 0x230   :  { %3599 = vmatpush1.bf16.msra.mxu1 %v10757_v52  ;;  %9830 = vmatpush3.bf16.msra.mxu0 %v10761_v54  ;;  %v10813_v52 = vld [vmem:[%s14534_s6 + $0x50] sm:$0xff]  }
 0x231   :  { %9195 = vmatprep.subr.msk.bf16.mxu1 %vm3492_vm7, %v9191_v55  ;;  %9831 = vmatprep.subr.bf16.mxu0 %v10763_v56  ;;  %v10814_v54 = vld [vmem:[%s14534_s6 + $0x10] sm:$0xff]   ;;  %v10815_v55 = vld [vmem:[%s14534_s6 + $0x58] sm:$0xff]  }
 0x232   :  { %v10816_v56 = vld [vmem:[%s14534_s6 + $0x18] sm:$0xff]  }
 0x234   :  { %3601 = vmatpush1.bf16.msra.mxu1 %v3494_v62  ;;  %9832 = vmatpush3.bf16.msra.mxu0 %v10765_v60  ;;  %v10820_v60 = vld [vmem:[%s14534_s6 + $0x28] sm:$0xff]   ;;  %v10822_v62 = vld [vmem:[%s14534_s6 + $0xc0] sm:$0xff]  }
 0x235   :  { %3713 = vmatprep.subr.bf16.mxu1 %v10768_v5  ;;  %9833 = vmatprep.subr.bf16.mxu0 %v10769_v31  ;;  %v10823_v5 = vld [vmem:[%s14534_s6 + $0x30] sm:$0xff]   ;;  %v10824_v31 = vld [vmem:[%s14534_s6 + $0x80] sm:$0xff]  }
 0x237   :  { %9196 = vmatmul.mubr.msk.bf16.vlgmr.msra.gmra.mrb[12].mxu1 %vm3488_vm8, %v13153_v63 }
 0x238   :  { %3714 = vmatpush1.bf16.msra.mxu1 %v10766_v9  ;;  %9834 = vmatpush3.bf16.msra.mxu0 %v10770_v15  ;;  %v10825_v9 = vld [vmem:[%s14534_s6 + $0x78] sm:$0xff]   ;;  %v10826_v15 = vld [vmem:[%s14534_s6 + $0xc8] sm:$0xff]  }
 0x239   :  { %3715 = vmatprep.subr.bf16.mxu1 %v10773_v0  ;;  %9835 = vmatprep.subr.bf16.mxu0 %v10774_v1  ;;  %v10828_v0 = vld [vmem:[%s14534_s6 + $0x88] sm:$0xff]   ;;  %v10829_v1 = vld [vmem:[%s14534_s6 + $0xd0] sm:$0xff]  }
 0x23a   :  { %3745 = vmatprep.mubr.bf16.mxu1 %v11701_v22 }
 0x23c   :  { %3716 = vmatpush1.bf16.msra.mxu1 %v10771_v2  ;;  %9836 = vmatpush3.bf16.msra.mxu0 %v10775_v3  ;;  %v10830_v2 = vld [vmem:[%s14534_s6 + $0x90] sm:$0xff]   ;;  %v10831_v3 = vld [vmem:[%s14534_s6 + $0xd8] sm:$0xff]  }
 0x23d   :  { %3717 = vmatprep.subr.bf16.mxu1 %v10778_v4  ;;  %9850 = vmatprep.subr.bf16.mxu0 %v10809_v47  ;;  %v10832_v4 = vld [vmem:[%s14534_s6 + $0x98] sm:$0xff]  }
 0x23f   :  { %3827 = vmatmul.mubr.bf16.vlgmr.msra.gmra.mrb[16].mxu0 %v13081_v32  ;;  %v10792_v32 = vld [vmem:[%s14532_s4 + $0x60] ss:$20 sps:$4 sm:$0xff]  }
 0x240   :  { %3718 = vmatpush1.bf16.msra.mxu1 %v10776_v6  ;;  %9851 = vmatpush3.bf16.msra.mxu0 %v10810_v49  ;;  %v10833_v6 = vld [vmem:[%s14534_s6 + $0xe0] sm:$0xff]  }
 0x241   :  { %3719 = vmatprep.subr.bf16.mxu1 %v10781_v7  ;;  %9852 = vmatprep.subr.bf16.mxu0 %v10811_v14  ;;  %v10834_v7 = vld [vmem:[%s14534_s6 + $0xa0] sm:$0xff]  }
 0x244   :  { %3720 = vmatpush1.bf16.msra.mxu1 %v10779_v8  ;;  %9853 = vmatpush3.bf16.msra.mxu0 %v10812_v50  ;;  %v10835_v8 = vld [vmem:[%s14534_s6 + $0xe8] sm:$0xff]  }
 0x245   :  { %3721 = vmatprep.subr.bf16.mxu1 %v10784_v10  ;;  %9854 = vmatprep.subr.bf16.mxu0 %v10813_v52  ;;  %v10836_v10 = vld [vmem:[%s14534_s6 + $0xa8] sm:$0xff]  }
 0x248   :  { %3722 = vmatpush1.bf16.msra.mxu1 %v10782_v20  ;;  %9855 = vmatpush3.bf16.msra.mxu0 %v10814_v54  ;;  %v10838_v20 = vld [vmem:[%s14534_s6 + $0xb0] sm:$0xff]  }
 0x249   :  { %9197 = vmatprep.subr.msk.bf16.mxu1 %vm3492_vm7, %v9193_v21  ;;  %9856 = vmatprep.subr.bf16.mxu0 %v10815_v55  ;;  %v10839_v21 = vld [vmem:[%s14534_s6 + $0xf8] sm:$0xff]  }
 0x24c   :  { %3724 = vmatpush1.bf16.msra.mxu1 %v3500_v23  ;;  %9857 = vmatpush3.bf16.msra.mxu0 %v10816_v56 }
 0x24d   :  { %9799 = vmatprep.subr.bf16.mxu1 %v10787_v25  ;;  %9858 = vmatprep.subr.bf16.mxu0 %v10817_v24 }
 0x24f   :  { %9198 = vmatmul.mubr.msk.bf16.vlgmr.msra.gmra.mrb[16].mxu1 %vm3488_vm8, %v13153_v63 }
 0x250   :  { %9800 = vmatpush3.bf16.msra.mxu1 %v10788_v26  ;;  %3786 = vmatprep.mubr.bf16.mxu1 %v12857_v30  ;;  %v10794_v30 = vld [vmem:[%s14532_s4 + $0x88] ss:$20 sps:$4 sm:$0xff]  }
 0x251   :  { %9801 = vmatprep.subr.bf16.mxu1 %v10789_v53  ;;  %9859 = vmatpush3.bf16.msra.mxu0 %v10818_v57 }
 0x252   :  { %9860 = vmatprep.subr.bf16.mxu0 %v10819_v58 }
 0x254   :  { %9802 = vmatpush3.bf16.msra.mxu1 %v10790_v27  ;;  %v13375_v27 = vld [vmem:[%s14533_s5] sm:$0x1f] }
 0x255   :  { %9803 = vmatprep.subr.bf16.mxu1 %v10791_v29  ;;  %9861 = vmatpush3.bf16.msra.mxu0 %v10820_v60  ;;  %v2491_v29 = vrot.slane %v13375_v27, %v12807_v16  ;;  %v2499_v49 = vrot.slane %v13375_v27, %v12855_v28  ;;  %v2503_v50 = vrot.slane %v13375_v27, %v12813_v19 }
 0x256   :  { %9862 = vmatprep.subr.bf16.mxu0 %v10821_v61 }
 0x258   :  { %9804 = vmatpush3.bf16.msra.mxu1 %v10792_v32  ;;  %v2495_v32 = vrot.slane %v13375_v27, %v12810_v17 }
 0x259   :  { %9805 = vmatprep.subr.bf16.mxu1 %v10793_v33  ;;  %9863 = vmatpush3.bf16.msra.mxu0 %v10823_v5 }
 0x25a   :  { %9864 = vmatprep.subr.bf16.mxu0 %v10825_v9 }
 0x25c   :  { %9806 = vmatpush3.bf16.msra.mxu1 %v10794_v30 }
 0x25d   :  { %9807 = vmatprep.subr.bf16.mxu1 %v10795_v34 }
 0x260   :  { %9808 = vmatpush3.bf16.msra.mxu1 %v10796_v35 }
 0x261   :  { %9809 = vmatprep.subr.bf16.mxu1 %v10797_v36 }
 0x264   :  { %9810 = vmatpush3.bf16.msra.mxu1 %v10798_v48 }
 0x265   :  { %9811 = vmatprep.subr.bf16.mxu1 %v10799_v37 }
 0x268   :  { %9812 = vmatpush3.bf16.msra.mxu1 %v10800_v18 }
 0x269   :  { %9813 = vmatprep.subr.bf16.mxu1 %v10801_v46 }
 0x26c   :  { %9814 = vmatpush3.bf16.msra.mxu1 %v10802_v38 }
 0x26d   :  { %10014 = vmatprep.subr.bf16.mxu1 %v11702_v59 }
 0x26f   :  { %3787 = vmatmul.mubr.bf16.vlgmr.msra.gmra.mrb[20].mxu1 %v12864_v39  ;;  %v10806_v39 = vld [vmem:[%s14532_s4 + $0x588] ss:$20 sps:$4 sm:$0xff]  }
 0x270   :  { %10015 = vmatpush3.bf16.msra.mxu1 %v10803_v40  ;;  %10026 = vmatprep.mubr.msk.bf16.mxu1 %vm11703_vm1, %v11702_v59 }
 0x271   :  { %10016 = vmatprep.subr.bf16.mxu1 %v11702_v59 }
 0x274   :  { %10017 = vmatpush3.bf16.msra.mxu1 %v10804_v41 }
 0x275   :  { %10018 = vmatprep.subr.bf16.mxu1 %v11702_v59 }
 0x278   :  { %10019 = vmatpush3.bf16.msra.mxu1 %v10805_v42 }
 0x279   :  { %10020 = vmatprep.subr.bf16.mxu1 %v11702_v59 }
 0x27c   :  { %10021 = vmatpush3.bf16.msra.mxu1 %v10806_v39 }
 0x27d   :  { %10022 = vmatprep.subr.bf16.mxu1 %v11702_v59 }
 0x280   :  { %10023 = vmatpush3.bf16.msra.mxu1 %v10807_v43 }
 0x281   :  { %10024 = vmatprep.subr.bf16.mxu1 %v11702_v59 }
 0x284   :  { %10025 = vmatpush3.bf16.msra.mxu1 %v3506_v45 }
 0x285   :  { %9872 = vmatprep.subr.bf16.mxu1 %v10822_v62 }
 0x287   :  { %10027 = vmatmul.mubr.msk.bf16.vlgmr.msra.gmra.mrb[24].mxu1 %vm3488_vm8, %v13153_v63  ;;  %v10827_v63 = vld [vmem:[%s14534_s6 + $0x38] sm:$0xff]  }
 0x288   :  { %9873 = vmatpush3.bf16.msra.mxu1 %v10824_v31  ;;  %9865 = vmatpush3.bf16.msra.mxu0 %v10827_v63 }
 0x289   :  { %9874 = vmatprep.subr.bf16.mxu1 %v10826_v15  ;;  %10030 = vmatprep.subr.bf16.mxu0 %v11702_v59 }
 0x28c   :  { %9875 = vmatpush3.bf16.msra.mxu1 %v10828_v0 }
 0x28d   :  { %9876 = vmatprep.subr.bf16.mxu1 %v10829_v1 }
 0x290   :  { %9877 = vmatpush3.bf16.msra.mxu1 %v10830_v2 }
 0x291   :  { %9878 = vmatprep.subr.bf16.mxu1 %v10831_v3 }
 0x294   :  { %9879 = vmatpush3.bf16.msra.mxu1 %v10832_v4 }
 0x295   :  { %9880 = vmatprep.subr.bf16.mxu1 %v10833_v6 }
 0x298   :  { %9881 = vmatpush3.bf16.msra.mxu1 %v10834_v7 }
 0x299   :  { %9882 = vmatprep.subr.bf16.mxu1 %v10835_v8 }
 0x29c   :  { %9883 = vmatpush3.bf16.msra.mxu1 %v10836_v10 }
 0x29d   :  { %9884 = vmatprep.subr.bf16.mxu1 %v10837_v11 }
 0x2a0   :  { %9885 = vmatpush3.bf16.msra.mxu1 %v10838_v20 }
 0x2a1   :  { %9886 = vmatprep.subr.bf16.mxu1 %v10839_v21 }
 0x2a4   :  { %9887 = vmatpush3.bf16.msra.mxu1 %v10840_v13 }
 0x2f2   :  { %v3706_v23 = vpop.f32.mrb[12].mxu0 }
 0x2f3   :  { %v3708_v25 = vpop.f32.mrb[13].mxu0  ;;  %v10096_v55 = vadd.f32 %v3706_v23, %v2499_v49 }
 0x2f4   :  { %v3710_v26 = vpop.f32.mrb[14].mxu0  ;;  %v10098_v56 = vadd.f32 %v3708_v25, %v2503_v50  ;;  %v2507_v50 = vrot.slane %v13375_v27, %v12833_v51 }
 0x2f5   :  { %v3711_v53 = vpop.f32.mrb[15].mxu0 }
 0x30a   :  { %v3624_v33 = vpop.f32.mrb[12].mxu1 }
 0x30b   :  { %v10094_v30 = vadd.f32 %v3624_v33, %v2491_v29  ;;  %v3626_v34 = vpop.f32.mrb[13].mxu1 }
 0x30c   :  { %v10095_v35 = vadd.f32 %v3626_v34, %v2495_v32  ;;  %v3628_v36 = vpop.f32.mrb[14].mxu1  ;;  %v10841_v34 = vld [vmem:[%s14534_s6 + $0x100] sm:$0xff]  }
 0x30d   :  { %v3879_v48 = vand.u32 2147483647, %v10094_v30  ;;  %v3629_v37 = vpop.f32.mrb[15].mxu1  ;;  %v3874_v11 = vmax.f32 %v10094_v30, 0.0 }
 0x30e   :  { %v3880_v18 = vand.u32 2147483647, %v10095_v35  ;;  %v3875_v26 = vmax.f32 %v10095_v35, 0.0 }
 0x30f   :  { %v3884_v46 = vsub.f32 0.0, %v3879_v48  ;;  %v10842_v48 = vld [vmem:[%s14534_s6 + $0x108] sm:$0xff]  }
 0x310   :  { %v3885_v38 = vsub.f32 0.0, %v3880_v18 }
 0x311   :  { %v3889_v40 = vmul.f32 1.442695, %v3884_v46  ;;  %v10843_v46 = vld [vmem:[%s14534_s6 + $0x110] sm:$0xff]  }
 0x312   :  { %v3891_v41 = vmul.f32 1.442695, %v3885_v38  ;;  %v9837_v42 = vpop.f32.mrb[16].mxu0 }
 0x313   :  { %11536 = vpow2.f32 %v3889_v40  ;;  %v9838_v39 = vpop.f32.mrb[17].mxu0 }
 0x314   :  { %11538 = vpow2.f32 %v3891_v41  ;;  %v13381_v43 = vadd.f32 %v9838_v39, %v9837_v42  ;;  %v9840_v44 = vpop.f32.mrb[18].mxu0  ;;  %v10844_v41 = vld [vmem:[%s14534_s6 + $0x118] sm:$0xff]  }
 0x315   :  { %v9841_v45 = vpop.f32.mrb[19].mxu0 }
 0x31d   :  { %v11537_v47 = vpop.eup %11536 }
 0x31e   :  { %v11539_v14 = vpop.eup %11538  ;;  %v3899_v52 = vadd.f32 1.0, %v11537_v47  ;;  %v3902_v57 = vmul.f32 -0.5, %v11537_v47  ;;  %v3905_v1 = vand.u32 2147483647, %v11537_v47 }
 0x31f   :  { %v3908_v54 = vadd.f32 1.0, %v11539_v14  ;;  %v3911_v5 = vmul.f32 -0.5, %v11539_v14  ;;  %v3914_v6 = vand.u32 2147483647, %v11539_v14 }
 0x320   :  { %11540 = vlog2.f32 %v3899_v52  ;;  %v3903_v63 = vadd.f32 1.0, %v3902_v57  ;;  %vm3906_vm9 = vcmp.lt.f32.partialorder %v3905_v1, 0.0004427343  ;;  %v10846_v52 = vld [vmem:[%s14534_s6 + $0x128] ss:$0 sps:$4 sm:$0xff]  }
 0x321   :  { %11542 = vlog2.f32 %v3908_v54  ;;  %v3912_v3 = vadd.f32 1.0, %v3911_v5  ;;  %vm3915_vm10 = vcmp.lt.f32.partialorder %v3914_v6, 0.0004427343 }
 0x322   :  { %v3747_v24 = vpop.f32.mrb[16].mxu1  ;;  %v3904_v21 = vmul.f32 %v11537_v47, %v3903_v63  ;;  %v10845_v47 = vld [vmem:[%s14534_s6 + $0x120] sm:$0xff]  }
 0x323   :  { %v13387_v58 = vadd.f32 %v10096_v55, %v3747_v24  ;;  %v3749_v60 = vpop.f32.mrb[17].mxu1  ;;  %v3913_v23 = vmul.f32 %v11539_v14, %v3912_v3 }
 0x324   :  { %v13389_v61 = vadd.f32 %v10098_v56, %v3749_v60  ;;  %v3751_v62 = vpop.f32.mrb[18].mxu1 }
 0x325   :  { %v3881_v31 = vand.u32 2147483647, %v13387_v58  ;;  %v3752_v9 = vpop.f32.mrb[19].mxu1  ;;  %v3876_v55 = vmax.f32 %v13387_v58, 0.0  ;;  %v4265_v58 = vsel %vm3492_vm7, %v10846_v52, 0 }
 0x326   :  { %v3882_v15 = vand.u32 2147483647, %v13389_v61  ;;  %v3877_v27 = vmax.f32 %v13389_v61, 0.0 }
 0x327   :  { %v3886_v0 = vsub.f32 0.0, %v3881_v31 }
 0x328   :  { %v3887_v2 = vsub.f32 0.0, %v3882_v15 }
 0x329   :  { %v3893_v4 = vmul.f32 1.442695, %v3886_v0 }
 0x32a   :  { %v11541_v7 = vpop.eup %11540  ;;  %v3895_v8 = vmul.f32 1.442695, %v3887_v2 }
 0x32b   :  { %v11543_v10 = vpop.eup %11542  ;;  %v3901_v20 = vmul.f32 0.6931472, %v11541_v7  ;;  %11544 = vpow2.f32 %v3893_v4 }
 0x32c   :  { %11546 = vpow2.f32 %v3895_v8  ;;  %v3910_v13 = vmul.f32 0.6931472, %v11543_v10 }
 0x32d   :  { %v3907_v25 = vsel %vm3906_vm9, %v3904_v21, %v3901_v20 }
 0x32e   :  { %v3944_v53 = vadd.f32 %v3907_v25, %v3874_v11  ;;  %v3916_v29 = vsel %vm3915_vm10, %v3913_v23, %v3910_v13 }
 0x32f   :  { %v3945_v32 = vadd.f32 %v3916_v29, %v3875_v26 }
 0x330   :  { %v3949_v36 = vpack.c.bf16 %v3944_v53, %v3944_v53 }
 0x331   :  { %v3950_v33 = vpack.c.bf16 %v3945_v32, %v3945_v32 }
 0x333   :  { %4299 = vmatprep.mubr.bf16.mxu0 %v3950_v33 }
 0x334   :  { %4300 = vmatmul.mubr.bf16.vlgmr.msra.gmra.mrb[20].mxu0 %v3949_v36 }
 0x335   :  { %v11545_v30 = vpop.eup %11544  ;;  %10031 = vmatpush3.bf16.msra.mxu0 %v10841_v34  ;;  %10042 = vmatprep.mubr.msk.bf16.mxu0 %vm11703_vm1, %v11702_v59 }
 0x336   :  { %v11547_v35 = vpop.eup %11546  ;;  %v3917_v37 = vadd.f32 1.0, %v11545_v30  ;;  %10032 = vmatprep.subr.bf16.mxu0 %v11702_v59  ;;  %v3920_v38 = vmul.f32 -0.5, %v11545_v30  ;;  %v3923_v39 = vand.u32 2147483647, %v11545_v30 }
 0x337   :  { %v3926_v18 = vadd.f32 1.0, %v11547_v35  ;;  %v3929_v40 = vmul.f32 -0.5, %v11547_v35  ;;  %v3932_v45 = vand.u32 2147483647, %v11547_v35 }
 0x338   :  { %11548 = vlog2.f32 %v3917_v37  ;;  %v3921_v42 = vadd.f32 1.0, %v3920_v38  ;;  %vm3924_vm11 = vcmp.lt.f32.partialorder %v3923_v39, 0.0004427343  ;;  %v10849_v37 = vld [vmem:[%s14536_s8 + $0x4] ss:$20 sps:$4 sm:$0xff]  }
 0x339   :  { %11550 = vlog2.f32 %v3926_v18  ;;  %10033 = vmatpush3.bf16.msra.mxu0 %v10842_v48  ;;  %v3930_v44 = vadd.f32 1.0, %v3929_v40  ;;  %vm3933_vm12 = vcmp.lt.f32.partialorder %v3932_v45, 0.0004427343  ;;  %v10850_v18 = vld [vmem:[%s14536_s8 + $0x10] ss:$20 sps:$4 sm:$0xff]   ;;  %4558 = vmatprep.subr.bf16.mxu1 %v10849_v37 }
 0x33a   :  { %10034 = vmatprep.subr.bf16.mxu0 %v11702_v59  ;;  %v3922_v24 = vmul.f32 %v11545_v30, %v3921_v42  ;;  %v10854_v38 = vld [vmem:[%s14536_s8 + $0x38] ss:$20 sps:$4 sm:$0xff]   ;;  %v10851_v40 = vld [vmem:[%s14536_s8 + $0x28] ss:$20 sps:$4 sm:$0xff]   ;;  %v10855_v42 = vld [vmem:[%s14536_s8 + $0x50] ss:$20 sps:$4 sm:$0xff]  }
 0x33b   :  { %v3931_v31 = vmul.f32 %v11547_v35, %v3930_v44  ;;  %v10847_v35 = vld [vmem:[%s14536_s8] ss:$20 sps:$4 sm:$0xff]  }
 0x33c   :  { %v10883_v37 = vld [vmem:[#allocation2 + $0x2c] ss:$20 sps:$4 sm:$0xff]  }
 0x33d   :  { %10035 = vmatpush3.bf16.msra.mxu0 %v10843_v46  ;;  %v10853_v46 = vld [vmem:[%s14536_s8 + $0x2c] ss:$20 sps:$4 sm:$0xff]  }
 0x33e   :  { %10036 = vmatprep.subr.bf16.mxu0 %v11702_v59 }
 0x341   :  { %10037 = vmatpush3.bf16.msra.mxu0 %v10844_v41  ;;  %v10857_v41 = vld [vmem:[%s14536_s8 + $0x54] ss:$20 sps:$4 sm:$0xff]  }
 0x342   :  { %v11549_v49 = vpop.eup %11548  ;;  %v9815_v14 = vpop.f32.mrb[20].mxu1  ;;  %10038 = vmatprep.subr.bf16.mxu0 %v11702_v59 }
 0x343   :  { %v11551_v54 = vpop.eup %11550  ;;  %v3919_v56 = vmul.f32 0.6931472, %v11549_v49  ;;  %v9816_v57 = vpop.f32.mrb[21].mxu1 }
 0x344   :  { %v9817_v60 = vadd.f32 %v9816_v57, %v9815_v14  ;;  %v9818_v62 = vpop.f32.mrb[22].mxu1  ;;  %v3928_v5 = vmul.f32 0.6931472, %v11551_v54  ;;  %v9200_v14 = vld [vmem:[%s14535_s7] ss:$0 sm:$0xff] }
 0x345   :  { %v3925_v9 = vsel %vm3924_vm11, %v3922_v24, %v3919_v56  ;;  %v9819_v15 = vpop.f32.mrb[23].mxu1  ;;  %10039 = vmatpush3.bf16.msra.mxu0 %v10845_v47 }
 0x346   :  { %v3946_v63 = vadd.f32 %v3925_v9, %v3876_v55  ;;  %v3789_v0 = vadd.f32 %v9817_v60, %v2507_v50  ;;  %v3934_v1 = vsel %vm3933_vm12, %v3931_v31, %v3928_v5  ;;  %10040 = vmatprep.subr.bf16.mxu0 %v11702_v59  ;;  %v10858_v15 = vld [vmem:[%s14536_s8 + $0x60] ss:$20 sps:$4 sm:$0xff]  }
 0x347   :  { %v3947_v2 = vadd.f32 %v3934_v1, %v3877_v27  ;;  %v10859_v1 = vld [vmem:[%s14536_s8 + $0x78] ss:$20 sps:$4 sm:$0xff]  }
 0x348   :  { %v3829_v3 = vadd.f32 %v13381_v43, %v3789_v0  ;;  %v3951_v6 = vpack.c.bf16 %v3946_v63, %v3946_v63  ;;  %v10861_v0 = vld [vmem:[%s14536_s8 + $0x7c] ss:$20 sps:$4 sm:$0xff]  }
 0x349   :  { %v3952_v4 = vpack.c.bf16 %v3947_v2, %v3947_v2  ;;  %10041 = vmatpush3.bf16.msra.mxu0 %v4265_v58  ;;  %v10862_v58 = vld [vmem:[%s14536_s8 + $0x88] ss:$20 sps:$4 sm:$0xff]   ;;  %v10865_v2 = vld [vmem:[%s14536_s8 + $0xc] ss:$20 sps:$4 sm:$0xff]  }
 0x34a   :  { %10046 = vmatprep.subr.bf16.mxu0 %v11702_v59 }
 0x34b   :  { %4339 = vmatprep.mubr.bf16.mxu1 %v3952_v4  ;;  %v10880_v4 = vld [vmem:[#allocation2 + $0xc] ss:$20 sps:$4 sm:$0xff]  }
 0x34c   :  { %4340 = vmatmul.mubr.bf16.vlgmr.msra.gmra.mrb[28].mxu1 %v3951_v6  ;;  %v4388_v6 = vld [vmem:[%s14529_s1] sm:$0xff] }
 0x34d   :  { %4590 = vmatprep.mubr.bf16.mxu1 %v11701_v22  ;;  %4559 = vmatpush1.bf16.msra.mxu1 %v10847_v35  ;;  %v10875_v35 = vld [vmem:[#allocation2] ss:$20 sps:$4 sm:$0xff]  }
 0x34e   :  { %4560 = vmatprep.subr.bf16.mxu1 %v10853_v46  ;;  %v10910_v46 = vld [vmem:[#allocation2 + $0xd4] ss:$20 sps:$4 sm:$0xff]  }
 0x351   :  { %4561 = vmatpush1.bf16.msra.mxu1 %v10851_v40  ;;  %v10889_v40 = vld [vmem:[#allocation2 + $0x54] ss:$20 sps:$4 sm:$0xff]  }
 0x352   :  { %4562 = vmatprep.subr.bf16.mxu1 %v10857_v41  ;;  %v10908_v41 = vld [vmem:[#allocation2 + $0xd0] ss:$20 sps:$4 sm:$0xff]  }
 0x355   :  { %4563 = vmatpush1.bf16.msra.mxu1 %v10855_v42  ;;  %v10887_v42 = vld [vmem:[#allocation2 + $0x50] ss:$20 sps:$4 sm:$0xff]  }
 0x356   :  { %4564 = vmatprep.subr.bf16.mxu1 %v10861_v0  ;;  %v10932_v0 = vld [vmem:[#allocation2 + $0x170] ss:$20 sps:$4 sm:$0xff]  }
 0x359   :  { %4565 = vmatpush1.bf16.msra.mxu1 %v10859_v1  ;;  %v10937_v1 = vld [vmem:[#allocation2 + $0x194] ss:$20 sps:$4 sm:$0xff]  }
 0x35a   :  { %v3868_v61 = vpop.f32.mrb[24].mxu1  ;;  %4599 = vmatprep.subr.bf16.mxu1 %v10865_v2  ;;  %v10935_v2 = vld [vmem:[#allocation2 + $0x190] ss:$20 sps:$4 sm:$0xff]  }
 0x35b   :  { %v3869_v7 = vadd.f32 %v3868_v61, %v3829_v3  ;;  %v10028_v8 = vpop.f32.mrb[25].mxu1 }
 0x35c   :  { %v3871_v10 = vpop.f32.mrb[26].mxu1 }
 0x35d   :  { %v3883_v11 = vand.u32 2147483647, %v3869_v7  ;;  %v10029_v20 = vpop.f32.mrb[27].mxu1  ;;  %v3878_v34 = vmax.f32 %v3869_v7, 0.0  ;;  %v10863_v10 = vld [vmem:[%s14536_s8 + $0x8] ss:$20 sps:$4 sm:$0xff]  }
 0x35e   :  { %v10868_v20 = vld [vmem:[%s14536_s8 + $0x34] ss:$20 sps:$4 sm:$0xff]  }
 0x35f   :  { %v3888_v21 = vsub.f32 0.0, %v3883_v11 }
 0x361   :  { %v3897_v13 = vmul.f32 1.442695, %v3888_v21  ;;  %v10878_v21 = vld [vmem:[#allocation2 + $0x8] ss:$20 sps:$4 sm:$0xff]  }
 0x363   :  { %11552 = vpow2.f32 %v3897_v13  ;;  %v10886_v13 = vld [vmem:[#allocation2 + $0x34] ss:$20 sps:$4 sm:$0xff]  }
 0x36d   :  { %v11553_v23 = vpop.eup %11552 }
 0x36e   :  { %v3935_v43 = vadd.f32 1.0, %v11553_v23  ;;  %v3938_v25 = vmul.f32 -0.5, %v11553_v23  ;;  %v3941_v53 = vand.u32 2147483647, %v11553_v23 }
 0x370   :  { %11554 = vlog2.f32 %v3935_v43  ;;  %v3939_v26 = vadd.f32 1.0, %v3938_v25  ;;  %vm3942_vm13 = vcmp.lt.f32.partialorder %v3941_v53, 0.0004427343  ;;  %v10871_v43 = vld [vmem:[%s14536_s8 + $0x5c] ss:$20 sps:$4 sm:$0xff]  }
 0x371   :  { %v10884_v25 = vld [vmem:[#allocation2 + $0x30] ss:$20 sps:$4 sm:$0xff]   ;;  %v10869_v53 = vld [vmem:[%s14536_s8 + $0x58] ss:$20 sps:$4 sm:$0xff]  }
 0x372   :  { %v3940_v33 = vmul.f32 %v11553_v23, %v3939_v26  ;;  %v10866_v23 = vld [vmem:[%s14536_s8 + $0x30] ss:$20 sps:$4 sm:$0xff]  }
 0x373   :  { %v10892_v26 = vld [vmem:[#allocation2 + $0x5c] ss:$20 sps:$4 sm:$0xff]  }
 0x37a   :  { %v11555_v29 = vpop.eup %11554 }
 0x37b   :  { %v3937_v32 = vmul.f32 0.6931472, %v11555_v29  ;;  %v10874_v29 = vld [vmem:[%s14536_s8 + $0x84] ss:$20 sps:$4 sm:$0xff]  }
 0x37d   :  { %v3943_v36 = vsel %vm3942_vm13, %v3940_v33, %v3937_v32  ;;  %v10890_v32 = vld [vmem:[#allocation2 + $0x58] ss:$20 sps:$4 sm:$0xff]  }
 0x37e   :  { %v3948_v30 = vadd.f32 %v3943_v36, %v3878_v34  ;;  %v10898_v33 = vld [vmem:[#allocation2 + $0x84] ss:$20 sps:$4 sm:$0xff]   ;;  %v10872_v34 = vld [vmem:[%s14536_s8 + $0x80] ss:$20 sps:$4 sm:$0xff]  }
 0x37f   :  { %v10877_v36 = vld [vmem:[#allocation2 + $0x4] ss:$20 sps:$4 sm:$0xff]  }
 0x380   :  { %v3953_v48 = vpack.c.bf16 %v3948_v30, %v3948_v30  ;;  %v10896_v30 = vld [vmem:[#allocation2 + $0x80] ss:$20 sps:$4 sm:$0xff]  }
 0x382   :  { %10043 = vmatmul.mubr.msk.bf16.vlgmr.msra.gmra.mrb[24].mxu0 %vm3488_vm8, %v3953_v48  ;;  %v10904_v48 = vld [vmem:[#allocation2 + $0xac] ss:$20 sps:$4 sm:$0xff]  }
 0x383   :  { %10054 = vmatprep.mubr.msk.bf16.mxu0 %vm11703_vm1, %v11702_v59  ;;  %10047 = vmatpush3.bf16.msra.mxu0 %v10850_v18  ;;  %v10902_v18 = vld [vmem:[#allocation2 + $0xa8] ss:$20 sps:$4 sm:$0xff]  }
 0x384   :  { %10048 = vmatprep.subr.bf16.mxu0 %v11702_v59 }
 0x387   :  { %10049 = vmatpush3.bf16.msra.mxu0 %v10854_v38  ;;  %v10881_v38 = vld [vmem:[#allocation2 + $0x28] ss:$20 sps:$4 sm:$0xff]  }
 0x388   :  { %10050 = vmatprep.subr.bf16.mxu0 %v11702_v59 }
 0x38b   :  { %10051 = vmatpush3.bf16.msra.mxu0 %v10858_v15  ;;  %v10934_v15 = vld [vmem:[#allocation2 + $0x174] ss:$20 sps:$4 sm:$0xff]  }
 0x38c   :  { %10052 = vmatprep.subr.bf16.mxu0 %v11702_v59 }
 0x38f   :  { %10053 = vmatpush3.bf16.msra.mxu0 %v10862_v58  ;;  %v10940_v58 = vld [vmem:[#allocation2 + $0x19c] ss:$20 sps:$4 sm:$0xff]  }
 0x390   :  { %6128 = vmatprep.subr.bf16.mxu0 %v10880_v4  ;;  %v10943_v4 = vld [vmem:[#allocation2 + $0x1bc] ss:$20 sps:$4 sm:$0xff]  }
 0x407   :  { %v9866_v39 = vpop.f32.mrb[20].mxu0 }
 0x408   :  { %v9867_v44 = vpop.f32.mrb[21].mxu0 }
 0x409   :  { %v9868_v45 = vadd.f32 %v9867_v44, %v9866_v39  ;;  %v9869_v47 = vpop.f32.mrb[22].mxu0  ;;  %v10895_v39 = vld [vmem:[#allocation2 + $0x7c] ss:$20 sps:$4 sm:$0xff]   ;;  %v10893_v44 = vld [vmem:[#allocation2 + $0x78] ss:$20 sps:$4 sm:$0xff]  }
 0x40a   :  { %v9870_v49 = vpop.f32.mrb[23].mxu0  ;;  %v10899_v47 = vld [vmem:[#allocation2 + $0xa0] ss:$20 sps:$4 sm:$0xff]  }
 0x40b   :  { %v4302_v54 = vadd.f32 %v9868_v45, %v9200_v14  ;;  %v10901_v45 = vld [vmem:[#allocation2 + $0xa4] ss:$20 sps:$4 sm:$0xff]   ;;  %v10907_v49 = vld [vmem:[#allocation2 + $0xcc] ss:$20 sps:$4 sm:$0xff]   ;;  %v10905_v14 = vld [vmem:[#allocation2 + $0xc8] ss:$20 sps:$4 sm:$0xff]  }
 0x41f   :  { %v9888_v50 = vpop.f32.mrb[28].mxu1 }
 0x420   :  { %v9889_v52 = vpop.f32.mrb[29].mxu1 }
 0x421   :  { %v9890_v55 = vadd.f32 %v9889_v52, %v9888_v50  ;;  %v9891_v56 = vpop.f32.mrb[30].mxu1  ;;  %v10913_v50 = vld [vmem:[#allocation2 + $0xf4] ss:$20 sps:$4 sm:$0xff]   ;;  %v10916_v52 = vld [vmem:[#allocation2 + $0xfc] ss:$20 sps:$4 sm:$0xff]  }
 0x422   :  { %v9892_v24 = vpop.f32.mrb[31].mxu1  ;;  %v10919_v56 = vld [vmem:[#allocation2 + $0x11c] ss:$20 sps:$4 sm:$0xff]  }
 0x423   :  { %v4342_v57 = vadd.f32 %v9890_v55, %v4302_v54  ;;  %v10911_v54 = vld [vmem:[#allocation2 + $0xf0] ss:$20 sps:$4 sm:$0xff]   ;;  %v10914_v55 = vld [vmem:[#allocation2 + $0xf8] ss:$20 sps:$4 sm:$0xff]  }
 0x424   :  { %v10922_v24 = vld [vmem:[#allocation2 + $0x124] ss:$20 sps:$4 sm:$0xff]  }
 0x455   :  { %v4381_v60 = vpop.f32.mrb[24].mxu0 }
 0x456   :  { %v4382_v62 = vadd.f32 %v4381_v60, %v4342_v57  ;;  %v10044_v5 = vpop.f32.mrb[25].mxu0  ;;  %v10917_v57 = vld [vmem:[#allocation2 + $0x118] ss:$20 sps:$4 sm:$0xff]   ;;  %v10920_v60 = vld [vmem:[#allocation2 + $0x120] ss:$20 sps:$4 sm:$0xff]  }
 0x457   :  { %v4384_v31 = vpop.f32.mrb[26].mxu0  ;;  %v10928_v5 = vld [vmem:[#allocation2 + $0x14c] ss:$20 sps:$4 sm:$0xff]  }
 0x458   :  { %v4389_v9 = vmul.f32 0.5, %v4382_v62  ;;  %4387 = vst [vmem:[#allocation6] sm:$0xff] %v4382_v62  ;;  %v10045_v27 = vpop.f32.mrb[27].mxu0  ;;  %v10923_v31 = vld [vmem:[#allocation2 + $0x140] ss:$20 sps:$4 sm:$0xff]  }
 0x459   :  { %v10931_v27 = vld [vmem:[#allocation2 + $0x16c] ss:$20 sps:$4 sm:$0xff]  }
 0x45a   :  { %v4390_v63 = vmul.f32 1.442695, %v4389_v9  ;;  %v10926_v9 = vld [vmem:[#allocation2 + $0x148] ss:$20 sps:$4 sm:$0xff]  }
 0x45c   :  { %11556 = vpow2.f32 %v4390_v63  ;;  %v10929_v63 = vld [vmem:[#allocation2 + $0x168] ss:$20 sps:$4 sm:$0xff]  }
 0x466   :  { %v11557_v3 = vpop.eup %11556 }
 0x467   :  { %4393 = vrot.lane.b32.xlu0 %v11557_v3, %s11704_s21  ;;  %v10938_v3 = vld [vmem:[#allocation2 + $0x198] ss:$20 sps:$4 sm:$0xff]  }
 0x4d9   :  { %v4394_v61 = vpop.permute.xlu0 %4393 }
 0x4da   :  { %v4396_v7 = vmul.f32 %v4394_v61, %v4388_v6  ;;  %v10946_v6 = vld [vmem:[#allocation2 + $0x1c4] ss:$20 sps:$4 sm:$0xff]  }
 0x4db   :  { %v10941_v61 = vld [vmem:[#allocation2 + $0x1b8] ss:$20 sps:$4 sm:$0xff]  }
 0x4dc   :  { %v4397_v8 = vadd.f32 %v4396_v7, %v4382_v62  ;;  %v10925_v62 = vld [vmem:[#allocation2 + $0x144] ss:$20 sps:$4 sm:$0xff]   ;;  %v10944_v7 = vld [vmem:[#allocation2 + $0x1c0] ss:$20 sps:$4 sm:$0xff]  }
 0x4de   :  { %v4398_v11 = vpack.c.bf16 %v4397_v8, %v4397_v8  ;;  %v10949_v8 = vld [vmem:[#allocation2 + $0x1e4] ss:$20 sps:$4 sm:$0xff]  }
 0x4e0   :  { %9260 = vmatmul.mubr.msk.bf16.vlgmr.msra.gmra.mrb[32].mxu1 %vm4554_vm14, %v4398_v11  ;;  %10055 = vmatmul.mubr.msk.bf16.vlgmr.msra.gmra.mrb[28].mxu0 %vm4554_vm14, %v4398_v11 }
 0x4e1   :  { %4600 = vmatpush1.bf16.msra.mxu1 %v10863_v10  ;;  %4631 = vmatprep.mubr.bf16.mxu1 %v11701_v22  ;;  %v10952_v10 = vld [vmem:[#allocation2 + $0x1ec] ss:$20 sps:$4 sm:$0xff]  }
 0x4e2   :  { %4601 = vmatprep.subr.bf16.mxu1 %v10868_v20  ;;  %6129 = vmatpush1.bf16.msra.mxu0 %v10878_v21  ;;  %v10950_v20 = vld [vmem:[#allocation2 + $0x1e8] ss:$20 sps:$4 sm:$0xff]   ;;  %v10955_v21 = vld [vmem:[#allocation2 + $0x20c] ss:$20 sps:$4 sm:$0xff]  }
 0x4e3   :  { %6130 = vmatprep.subr.bf16.mxu0 %v10886_v13  ;;  %v10958_v13 = vld [vmem:[#allocation2 + $0x214] ss:$20 sps:$4 sm:$0xff]  }
 0x4e5   :  { %4602 = vmatpush1.bf16.msra.mxu1 %v10866_v23  ;;  %v10953_v23 = vld [vmem:[#allocation2 + $0x208] ss:$20 sps:$4 sm:$0xff]  }
 0x4e6   :  { %4603 = vmatprep.subr.bf16.mxu1 %v10871_v43  ;;  %6131 = vmatpush1.bf16.msra.mxu0 %v10884_v25  ;;  %v10956_v43 = vld [vmem:[#allocation2 + $0x210] ss:$20 sps:$4 sm:$0xff]   ;;  %v10961_v25 = vld [vmem:[#allocation2 + $0x234] ss:$20 sps:$4 sm:$0xff]  }
 0x4e7   :  { %6132 = vmatprep.subr.bf16.mxu0 %v10892_v26  ;;  %v10964_v26 = vld [vmem:[#allocation2 + $0x23c] ss:$20 sps:$4 sm:$0xff]  }
 0x4e9   :  { %4604 = vmatpush1.bf16.msra.mxu1 %v10869_v53  ;;  %v10959_v53 = vld [vmem:[#allocation2 + $0x230] ss:$20 sps:$4 sm:$0xff]  }
 0x4ea   :  { %4605 = vmatprep.subr.bf16.mxu1 %v10874_v29  ;;  %6133 = vmatpush1.bf16.msra.mxu0 %v10890_v32  ;;  %v10962_v29 = vld [vmem:[#allocation2 + $0x238] ss:$20 sps:$4 sm:$0xff]   ;;  %v10967_v32 = vld [vmem:[#allocation2 + $0x25c] ss:$20 sps:$4 sm:$0xff]  }
 0x4eb   :  { %6134 = vmatprep.subr.bf16.mxu0 %v10898_v33  ;;  %v10970_v33 = vld [vmem:[#allocation2 + $0x264] ss:$20 sps:$4 sm:$0xff]  }
 0x4ed   :  { %4606 = vmatpush1.bf16.msra.mxu1 %v10872_v34  ;;  %v10965_v34 = vld [vmem:[#allocation2 + $0x258] ss:$20 sps:$4 sm:$0xff]  }
 0x4ee   :  { %6005 = vmatprep.subr.bf16.mxu1 %v10877_v36  ;;  %6135 = vmatpush1.bf16.msra.mxu0 %v10896_v30  ;;  %v10968_v36 = vld [vmem:[#allocation2 + $0x260] ss:$20 sps:$4 sm:$0xff]   ;;  %v10973_v30 = vld [vmem:[#allocation2 + $0x284] ss:$20 sps:$4 sm:$0xff]  }
 0x4ef   :  { %6136 = vmatprep.subr.bf16.mxu0 %v10904_v48  ;;  %v10976_v48 = vld [vmem:[#allocation2 + $0x28c] ss:$20 sps:$4 sm:$0xff]  }
 0x4f0   :  { %9261 = vmatmul.mubr.msk.bf16.vlgmr.msra.gmra.mrb[36].mxu1 %vm4554_vm14, %v4398_v11  ;;  %v10947_v11 = vld [vmem:[#allocation2 + $0x1e0] ss:$20 sps:$4 sm:$0xff]  }
 0x4f1   :  { %6006 = vmatpush1.bf16.msra.mxu1 %v10875_v35  ;;  %v13505_v35 = vld [vmem:[%s14537_s9] sm:$0x1f] }
 0x4f2   :  { %6007 = vmatprep.subr.bf16.mxu1 %v10883_v37  ;;  %6137 = vmatpush1.bf16.msra.mxu0 %v10902_v18  ;;  %v4428_v37 = vrot.slane %v13505_v35, %v12807_v16  ;;  %v4432_v18 = vrot.slane %v13505_v35, %v12810_v17 }
 0x4f3   :  { %6138 = vmatprep.subr.bf16.mxu0 %v10910_v46 }
 0x4f5   :  { %6008 = vmatpush1.bf16.msra.mxu1 %v10881_v38 }
 0x4f6   :  { %6009 = vmatprep.subr.bf16.mxu1 %v10889_v40  ;;  %6139 = vmatpush1.bf16.msra.mxu0 %v10908_v41 }
 0x4f7   :  { %6140 = vmatprep.subr.bf16.mxu0 %v10916_v52 }
 0x4f9   :  { %6010 = vmatpush1.bf16.msra.mxu1 %v10887_v42 }
 0x4fa   :  { %6011 = vmatprep.subr.bf16.mxu1 %v10895_v39  ;;  %6141 = vmatpush1.bf16.msra.mxu0 %v10914_v55 }
 0x4fb   :  { %6142 = vmatprep.subr.bf16.mxu0 %v10922_v24  ;;  %v4440_v24 = vrot.slane %v13505_v35, %v12813_v19 }
 0x4fd   :  { %6012 = vmatpush1.bf16.msra.mxu1 %v10893_v44 }
 0x4fe   :  { %6013 = vmatprep.subr.bf16.mxu1 %v10901_v45  ;;  %6143 = vmatpush1.bf16.msra.mxu0 %v10920_v60 }
 0x4ff   :  { %6144 = vmatprep.subr.bf16.mxu0 %v10928_v5 }
 0x501   :  { %6014 = vmatpush1.bf16.msra.mxu1 %v10899_v47 }
 0x502   :  { %6015 = vmatprep.subr.bf16.mxu1 %v10907_v49  ;;  %6145 = vmatpush1.bf16.msra.mxu0 %v10926_v9 }
 0x503   :  { %6146 = vmatprep.subr.bf16.mxu0 %v10934_v15 }
 0x505   :  { %6016 = vmatpush1.bf16.msra.mxu1 %v10905_v14 }
 0x506   :  { %6017 = vmatprep.subr.bf16.mxu1 %v10913_v50  ;;  %6147 = vmatpush1.bf16.msra.mxu0 %v10932_v0 }
 0x507   :  { %6148 = vmatprep.subr.bf16.mxu0 %v10940_v58 }
 0x509   :  { %6018 = vmatpush1.bf16.msra.mxu1 %v10911_v54 }
 0x50a   :  { %6019 = vmatprep.subr.bf16.mxu1 %v10919_v56  ;;  %6149 = vmatpush1.bf16.msra.mxu0 %v10938_v3 }
 0x50b   :  { %6150 = vmatprep.subr.bf16.mxu0 %v10946_v6 }
 0x50d   :  { %6020 = vmatpush1.bf16.msra.mxu1 %v10917_v57 }
 0x50e   :  { %6021 = vmatprep.subr.bf16.mxu1 %v10925_v62  ;;  %6151 = vmatpush1.bf16.msra.mxu0 %v10944_v7 }
 0x50f   :  { %6152 = vmatprep.subr.bf16.mxu0 %v10952_v10 }
 0x511   :  { %6022 = vmatpush1.bf16.msra.mxu1 %v10923_v31 }
 0x512   :  { %6023 = vmatprep.subr.bf16.mxu1 %v10931_v27  ;;  %6153 = vmatpush1.bf16.msra.mxu0 %v10950_v20 }
 0x513   :  { %6154 = vmatprep.subr.bf16.mxu0 %v10958_v13 }
 0x515   :  { %6024 = vmatpush1.bf16.msra.mxu1 %v10929_v63 }
 0x516   :  { %6025 = vmatprep.subr.bf16.mxu1 %v10937_v1  ;;  %6155 = vmatpush1.bf16.msra.mxu0 %v10956_v43 }
 0x517   :  { %6156 = vmatprep.subr.bf16.mxu0 %v10964_v26 }
 0x519   :  { %6026 = vmatpush1.bf16.msra.mxu1 %v10935_v2 }
 0x51a   :  { %6027 = vmatprep.subr.bf16.mxu1 %v10943_v4  ;;  %6157 = vmatpush1.bf16.msra.mxu0 %v10962_v29 }
 0x51b   :  { %6158 = vmatprep.subr.bf16.mxu0 %v10970_v33 }
 0x51d   :  { %6028 = vmatpush1.bf16.msra.mxu1 %v10941_v61 }
 0x51e   :  { %6029 = vmatprep.subr.bf16.mxu1 %v10949_v8  ;;  %6159 = vmatpush1.bf16.msra.mxu0 %v10968_v36  ;;  %v10971_v36 = vld [vmem:[#allocation2 + $0x280] ss:$20 sps:$4 sm:$0xff]  }
 0x51f   :  { %6169 = vmatprep.subr.bf16.mxu0 %v10976_v48 }
 0x521   :  { %6030 = vmatpush1.bf16.msra.mxu1 %v10947_v11 }
 0x522   :  { %6031 = vmatprep.subr.bf16.mxu1 %v10955_v21 }
 0x525   :  { %6032 = vmatpush1.bf16.msra.mxu1 %v10953_v23 }
 0x526   :  { %6033 = vmatprep.subr.bf16.mxu1 %v10961_v25 }
 0x529   :  { %6034 = vmatpush1.bf16.msra.mxu1 %v10959_v53 }
 0x52a   :  { %6035 = vmatprep.subr.bf16.mxu1 %v10967_v32 }
 0x52d   :  { %6036 = vmatpush1.bf16.msra.mxu1 %v10965_v34 }
 0x52e   :  { %6046 = vmatprep.subr.bf16.mxu1 %v10973_v30  ;;  %v10974_v30 = vld [vmem:[#allocation2 + $0x288] ss:$20 sps:$4 sm:$0xff]  }
 0x5b3   :  { %v4592_v46 = vpop.f32.mrb[32].mxu1  ;;  %v13511_v38 = vpop.f32.mrb[28].mxu0 }
 0x5b4   :  { %v4593_v40 = vadd.f32 %v4592_v46, %v4428_v37  ;;  %v4594_v41 = vpop.f32.mrb[33].mxu1  ;;  %v10056_v42 = vpop.f32.mrb[29].mxu0  ;;  %v10979_v37 = vld [vmem:[#allocation2 + $0x2ac] ss:$20 sps:$4 sm:$0xff]  }
 0x5b5   :  { %v4595_v39 = vadd.f32 %v4594_v41, %v4432_v18  ;;  %v4596_v44 = vpop.f32.mrb[34].mxu1  ;;  %v4677_v45 = vpop.f32.mrb[30].mxu0  ;;  %v10982_v18 = vld [vmem:[#allocation2 + $0x2b4] ss:$20 sps:$4 sm:$0xff]   ;;  %v10980_v42 = vld [vmem:[#allocation2 + $0x2b0] ss:$20 sps:$4 sm:$0xff]  }
 0x5b6   :  { %v4685_v47 = vand.u32 2147483647, %v4593_v40  ;;  %v4597_v14 = vpop.f32.mrb[35].mxu1  ;;  %v10057_v50 = vpop.f32.mrb[31].mxu0  ;;  %v4680_v13 = vmax.f32 %v4593_v40, 0.0  ;;  %v4436_v40 = vrot.slane %v13505_v35, %v12855_v28 }
 0x5b7   :  { %v4686_v49 = vand.u32 2147483647, %v4595_v39  ;;  %v4681_v26 = vmax.f32 %v4595_v39, 0.0  ;;  %v10977_v41 = vld [vmem:[#allocation2 + $0x2a8] ss:$20 sps:$4 sm:$0xff]  }
 0x5b8   :  { %v4690_v52 = vsub.f32 0.0, %v4685_v47  ;;  %v10985_v39 = vld [vmem:[#allocation2 + $0x2d4] ss:$20 sps:$4 sm:$0xff]   ;;  %v10988_v44 = vld [vmem:[#allocation2 + $0x2dc] ss:$20 sps:$4 sm:$0xff]  }
 0x5b9   :  { %v4691_v54 = vsub.f32 0.0, %v4686_v49  ;;  %v10983_v14 = vld [vmem:[#allocation2 + $0x2d0] ss:$20 sps:$4 sm:$0xff]   ;;  %v10986_v50 = vld [vmem:[#allocation2 + $0x2d8] ss:$20 sps:$4 sm:$0xff]  }
 0x5ba   :  { %v4695_v55 = vmul.f32 1.442695, %v4690_v52 }
 0x5bb   :  { %v4697_v56 = vmul.f32 1.442695, %v4691_v54  ;;  %v10991_v54 = vld [vmem:[#allocation2 + $0x2fc] ss:$20 sps:$4 sm:$0xff]  }
 0x5bc   :  { %11558 = vpow2.f32 %v4695_v55  ;;  %v10994_v55 = vld [vmem:[#allocation2 + $0x304] ss:$20 sps:$4 sm:$0xff]  }
 0x5bd   :  { %11560 = vpow2.f32 %v4697_v56 }
 0x5c3   :  { %v4633_v57 = vpop.f32.mrb[36].mxu1 }
 0x5c4   :  { %v4635_v60 = vpop.f32.mrb[37].mxu1  ;;  %v13528_v49 = vadd.f32 %v4633_v57, %v4436_v40  ;;  %v10989_v57 = vld [vmem:[#allocation2 + $0x2f8] ss:$20 sps:$4 sm:$0xff]   ;;  %v11036_v40 = vld [vmem:[#allocation2 + $0x41c] ss:$20 sps:$4 sm:$0xff]  }
 0x5c5   :  { %v13515_v62 = vadd.f32 %v4635_v60, %v4440_v24  ;;  %v4637_v5 = vpop.f32.mrb[38].mxu1 }
 0x5c6   :  { %v11559_v31 = vpop.eup %11558  ;;  %v4638_v9 = vpop.f32.mrb[39].mxu1  ;;  %v4687_v5 = vand.u32 2147483647, %v13528_v49 }
 0x5c7   :  { %v4705_v27 = vadd.f32 1.0, %v11559_v31  ;;  %v11561_v15 = vpop.eup %11560  ;;  %v4688_v63 = vand.u32 2147483647, %v13515_v62  ;;  %v4708_v58 = vmul.f32 -0.5, %v11559_v31  ;;  %v4711_v6 = vand.u32 2147483647, %v11559_v31 }
 0x5c8   :  { %v4714_v1 = vadd.f32 1.0, %v11561_v15  ;;  %v4717_v3 = vmul.f32 -0.5, %v11561_v15  ;;  %v4720_v11 = vand.u32 2147483647, %v11561_v15  ;;  %v4683_v60 = vmax.f32 %v13515_v62, 0.0 }
 0x5c9   :  { %11562 = vlog2.f32 %v4705_v27  ;;  %v4693_v0 = vsub.f32 0.0, %v4688_v63  ;;  %v4709_v4 = vadd.f32 1.0, %v4708_v58  ;;  %vm4712_vm15 = vcmp.lt.f32.partialorder %v4711_v6, 0.0004427343  ;;  %v11000_v63 = vld [vmem:[#allocation2 + $0x32c] ss:$20 sps:$4 sm:$0xff]  }
 0x5ca   :  { %11564 = vlog2.f32 %v4714_v1  ;;  %v4718_v8 = vadd.f32 1.0, %v4717_v3  ;;  %vm4721_vm2 = vcmp.lt.f32.partialorder %v4720_v11, 0.0004427343  ;;  %v4692_v1 = vsub.f32 0.0, %v4687_v5  ;;  %v10995_v58 = vld [vmem:[#allocation2 + $0x320] ss:$20 sps:$4 sm:$0xff]  }
 0x5cb   :  { %v4701_v2 = vmul.f32 1.442695, %v4693_v0  ;;  %v4710_v10 = vmul.f32 %v11559_v31, %v4709_v4  ;;  %v10992_v31 = vld [vmem:[#allocation2 + $0x300] ss:$20 sps:$4 sm:$0xff]   ;;  %v10998_v62 = vld [vmem:[#allocation2 + $0x328] ss:$20 sps:$4 sm:$0xff]  }
 0x5cc   :  { %v4719_v43 = vmul.f32 %v11561_v15, %v4718_v8  ;;  %v10997_v15 = vld [vmem:[#allocation2 + $0x324] ss:$20 sps:$4 sm:$0xff]   ;;  %v11006_v3 = vld [vmem:[#allocation2 + $0x354] ss:$20 sps:$4 sm:$0xff]   ;;  %v4699_v4 = vmul.f32 1.442695, %v4692_v1 }
 0x5cd   :  { %11566 = vpow2.f32 %v4701_v2  ;;  %v11003_v2 = vld [vmem:[#allocation2 + $0x34c] ss:$20 sps:$4 sm:$0xff]   ;;  %v11001_v6 = vld [vmem:[#allocation2 + $0x348] ss:$20 sps:$4 sm:$0xff]  }
 0x5ce   :  { %v11012_v8 = vld [vmem:[#allocation2 + $0x37c] ss:$20 sps:$4 sm:$0xff]   ;;  %v11010_v11 = vld [vmem:[#allocation2 + $0x378] ss:$20 sps:$4 sm:$0xff]   ;;  %v11054_v5 = vld [vmem:[#allocation2 + $0x494] ss:$20 sps:$4 sm:$0xff]  }
 0x5cf   :  { %v11060_v1 = vld [vmem:[#allocation2 + $0x4bc] ss:$20 sps:$4 sm:$0xff]  }
 0x5d3   :  { %v11563_v61 = vpop.eup %11562 }
 0x5d4   :  { %v4707_v7 = vmul.f32 0.6931472, %v11563_v61  ;;  %v11565_v20 = vpop.eup %11564  ;;  %v11004_v61 = vld [vmem:[#allocation2 + $0x350] ss:$20 sps:$4 sm:$0xff]  }
 0x5d5   :  { %v4716_v23 = vmul.f32 0.6931472, %v11565_v20  ;;  %v11015_v20 = vld [vmem:[#allocation2 + $0x39c] ss:$20 sps:$4 sm:$0xff]  }
 0x5d6   :  { %v4713_v21 = vsel %vm4712_vm15, %v4710_v10, %v4707_v7  ;;  %v11009_v7 = vld [vmem:[#allocation2 + $0x374] ss:$20 sps:$4 sm:$0xff]   ;;  %v11007_v10 = vld [vmem:[#allocation2 + $0x370] ss:$20 sps:$4 sm:$0xff]  }
 0x5d7   :  { %v11567_v25 = vpop.eup %11566  ;;  %v4750_v53 = vadd.f32 %v4713_v21, %v4680_v13  ;;  %v4722_v29 = vsel %vm4721_vm2, %v4719_v43, %v4716_v23  ;;  %v11018_v21 = vld [vmem:[#allocation2 + $0x3a4] ss:$20 sps:$4 sm:$0xff]   ;;  %v4444_v13 = vrot.slane %v13505_v35, %v12833_v51  ;;  %v11016_v43 = vld [vmem:[#allocation2 + $0x3a0] ss:$20 sps:$4 sm:$0xff]  }
 0x5d8   :  { %v4732_v32 = vadd.f32 1.0, %v11567_v25  ;;  %v4751_v33 = vadd.f32 %v4722_v29, %v4681_v26  ;;  %v4735_v46 = vmul.f32 -0.5, %v11567_v25  ;;  %v4738_v47 = vand.u32 2147483647, %v11567_v25  ;;  %v11013_v23 = vld [vmem:[#allocation2 + $0x398] ss:$20 sps:$4 sm:$0xff]  }
 0x5d9   :  { %v13520_v48 = vpack.c.bf16 %v4750_v53, %v4750_v53  ;;  %v11024_v26 = vld [vmem:[#allocation2 + $0x3cc] ss:$20 sps:$4 sm:$0xff]   ;;  %v13539_v53 = vadd.f32 %v13511_v38, %v4444_v13  ;;  %v11033_v38 = vld [vmem:[#allocation2 + $0x414] ss:$20 sps:$4 sm:$0xff]   ;;  %v11069_v13 = vld [vmem:[#allocation2 + $0x504] ss:$20 sps:$4 sm:$0xff]  }
 0x5da   :  { %11568 = vlog2.f32 %v4732_v32  ;;  %v13518_v34 = vpack.c.bf16 %v4751_v33, %v4751_v33  ;;  %v4736_v45 = vadd.f32 1.0, %v4735_v46  ;;  %vm4739_vm3 = vcmp.lt.f32.partialorder %v4738_v47, 0.0004427343  ;;  %v11019_v29 = vld [vmem:[#allocation2 + $0x3c0] ss:$20 sps:$4 sm:$0xff]  }
 0x5db   :  { %11570 = vpow2.f32 %v4699_v4  ;;  %v11022_v32 = vld [vmem:[#allocation2 + $0x3c8] ss:$20 sps:$4 sm:$0xff]   ;;  %v11027_v33 = vld [vmem:[#allocation2 + $0x3ec] ss:$20 sps:$4 sm:$0xff]  }
 0x5dc   :  { %6037 = vmatprep.mubr.bf16.mxu1 %v13518_v34  ;;  %6160 = vmatprep.mubr.bf16.mxu0 %v13518_v34  ;;  %v4737_v24 = vmul.f32 %v11567_v25, %v4736_v45  ;;  %v11021_v25 = vld [vmem:[#allocation2 + $0x3c4] ss:$20 sps:$4 sm:$0xff]   ;;  %v11063_v4 = vld [vmem:[#allocation2 + $0x4dc] ss:$20 sps:$4 sm:$0xff]  }
 0x5dd   :  { %6038 = vmatmul.mubr.bf16.vlgmr.msra.gmra.mrb[40].mxu1 %v13520_v48  ;;  %6161 = vmatmul.mubr.bf16.vlgmr.msra.gmra.mrb[32].mxu0 %v13520_v48  ;;  %v11042_v45 = vld [vmem:[#allocation2 + $0x444] ss:$20 sps:$4 sm:$0xff]  }
 0x5de   :  { %6047 = vmatpush1.bf16.msra.mxu1 %v10971_v36  ;;  %6170 = vmatpush1.bf16.msra.mxu0 %v10974_v30  ;;  %v11030_v36 = vld [vmem:[#allocation2 + $0x3f4] ss:$20 sps:$4 sm:$0xff]   ;;  %v4689_v30 = vand.u32 2147483647, %v13539_v53 }
 0x5df   :  { %6048 = vmatprep.subr.bf16.mxu1 %v10979_v37  ;;  %6171 = vmatprep.subr.bf16.mxu0 %v10982_v18  ;;  %v11025_v37 = vld [vmem:[#allocation2 + $0x3e8] ss:$20 sps:$4 sm:$0xff]   ;;  %v11028_v18 = vld [vmem:[#allocation2 + $0x3f0] ss:$20 sps:$4 sm:$0xff]  }
 0x5e2   :  { %6049 = vmatpush1.bf16.msra.mxu1 %v10977_v41  ;;  %6172 = vmatpush1.bf16.msra.mxu0 %v10980_v42  ;;  %v4694_v41 = vsub.f32 0.0, %v4689_v30  ;;  %v11031_v42 = vld [vmem:[#allocation2 + $0x410] ss:$20 sps:$4 sm:$0xff]  }
 0x5e3   :  { %6050 = vmatprep.subr.bf16.mxu1 %v10985_v39  ;;  %6173 = vmatprep.subr.bf16.mxu0 %v10988_v44  ;;  %v11034_v39 = vld [vmem:[#allocation2 + $0x418] ss:$20 sps:$4 sm:$0xff]   ;;  %v11039_v44 = vld [vmem:[#allocation2 + $0x43c] ss:$20 sps:$4 sm:$0xff]  }
 0x5e4   :  { %v11569_v52 = vpop.eup %11568  ;;  %v4703_v47 = vmul.f32 1.442695, %v4694_v41  ;;  %v11085_v41 = vld [vmem:[#allocation2 + $0x578] ss:$20 sps:$4 sm:$0xff]  }
 0x5e5   :  { %v4734_v56 = vmul.f32 0.6931472, %v11569_v52  ;;  %v11571_v35 = vpop.eup %11570  ;;  %v11045_v52 = vld [vmem:[#allocation2 + $0x464] ss:$20 sps:$4 sm:$0xff]  }
 0x5e6   :  { %6051 = vmatpush1.bf16.msra.mxu1 %v10983_v14  ;;  %6174 = vmatpush1.bf16.msra.mxu0 %v10986_v50  ;;  %v4723_v46 = vadd.f32 1.0, %v11571_v35  ;;  %v11037_v14 = vld [vmem:[#allocation2 + $0x438] ss:$20 sps:$4 sm:$0xff]   ;;  %v11040_v50 = vld [vmem:[#allocation2 + $0x440] ss:$20 sps:$4 sm:$0xff]  }
 0x5e7   :  { %v4740_v9 = vsel %vm4739_vm3, %v4737_v24, %v4734_v56  ;;  %6052 = vmatprep.subr.bf16.mxu1 %v10991_v54  ;;  %6175 = vmatprep.subr.bf16.mxu0 %v10994_v55  ;;  %v11048_v54 = vld [vmem:[#allocation2 + $0x46c] ss:$20 sps:$4 sm:$0xff]   ;;  %v4726_v55 = vmul.f32 -0.5, %v11571_v35  ;;  %v11046_v24 = vld [vmem:[#allocation2 + $0x468] ss:$20 sps:$4 sm:$0xff]  }
 0x5e8   :  { %v4753_v27 = vadd.f32 %v4740_v9, %v4683_v60  ;;  %11572 = vlog2.f32 %v4723_v46  ;;  %v11043_v56 = vld [vmem:[#allocation2 + $0x460] ss:$20 sps:$4 sm:$0xff]   ;;  %v11049_v9 = vld [vmem:[#allocation2 + $0x488] ss:$20 sps:$4 sm:$0xff]  }
 0x5e9   :  { %11574 = vpow2.f32 %v4703_v47  ;;  %v11051_v60 = vld [vmem:[#allocation2 + $0x48c] ss:$20 sps:$4 sm:$0xff]   ;;  %v11087_v46 = vld [vmem:[#allocation2 + $0x57c] ss:$20 sps:$4 sm:$0xff]  }
 0x5ea   :  { %v13532_v0 = vpack.c.bf16 %v4753_v27, %v4753_v27  ;;  %6053 = vmatpush1.bf16.msra.mxu1 %v10989_v57  ;;  %6176 = vmatpush1.bf16.msra.mxu0 %v10992_v31  ;;  %v4727_v31 = vadd.f32 1.0, %v4726_v55  ;;  %v11052_v27 = vld [vmem:[#allocation2 + $0x490] ss:$20 sps:$4 sm:$0xff]   ;;  %v11096_v47 = vld [vmem:[#allocation2 + $0x5ac] ss:$20 sps:$4 sm:$0xff]  }
 0x5eb   :  { %6054 = vmatprep.subr.bf16.mxu1 %v10997_v15  ;;  %6177 = vmatprep.subr.bf16.mxu0 %v11000_v63  ;;  %v4729_v15 = vand.u32 2147483647, %v11571_v35  ;;  %v11057_v63 = vld [vmem:[#allocation2 + $0x4b4] ss:$20 sps:$4 sm:$0xff]  }
 0x5ec   :  { %6078 = vmatprep.mubr.bf16.mxu1 %v13532_v0  ;;  %6201 = vmatprep.mubr.bf16.mxu0 %v13532_v0  ;;  %v11091_v55 = vld [vmem:[#allocation2 + $0x5a0] ss:$20 sps:$4 sm:$0xff]  }
 0x5ed   :  { %vm4730_vm4 = vcmp.lt.f32.partialorder %v4729_v15, 0.0004427343 }
 0x5ee   :  { %6055 = vmatpush1.bf16.msra.mxu1 %v10995_v58  ;;  %6178 = vmatpush1.bf16.msra.mxu0 %v10998_v62  ;;  %v4728_v62 = vmul.f32 %v11571_v35, %v4727_v31  ;;  %v11084_v35 = vld [vmem:[#allocation2 + $0x55c] ss:$20 sps:$4 sm:$0xff]  }
 0x5ef   :  { %6056 = vmatprep.subr.bf16.mxu1 %v11003_v2  ;;  %6179 = vmatprep.subr.bf16.mxu0 %v11006_v3  ;;  %v11055_v2 = vld [vmem:[#allocation2 + $0x4b0] ss:$20 sps:$4 sm:$0xff]   ;;  %v11058_v3 = vld [vmem:[#allocation2 + $0x4b8] ss:$20 sps:$4 sm:$0xff]  }
 0x5f2   :  { %6057 = vmatpush1.bf16.msra.mxu1 %v11001_v6  ;;  %6180 = vmatpush1.bf16.msra.mxu0 %v11004_v61  ;;  %v11573_v57 = vpop.eup %11572  ;;  %v11066_v6 = vld [vmem:[#allocation2 + $0x4e4] ss:$20 sps:$4 sm:$0xff]  }
 0x5f3   :  { %6058 = vmatprep.subr.bf16.mxu1 %v11009_v7  ;;  %6181 = vmatprep.subr.bf16.mxu0 %v11012_v8  ;;  %v4725_v58 = vmul.f32 0.6931472, %v11573_v57  ;;  %v13542_v61 = vpop.eup %11574  ;;  %v4682_v8 = vmax.f32 %v13528_v49, 0.0  ;;  %v11075_v49 = vld [vmem:[#allocation2 + $0x52c] ss:$20 sps:$4 sm:$0xff]  }
 0x5f4   :  { %v4744_v30 = vmul.f32 -0.5, %v13542_v61 }
 0x5f5   :  { %v4731_v7 = vsel %vm4730_vm4, %v4728_v62, %v4725_v58  ;;  %v11102_v58 = vld [vmem:[#allocation2 + $0x3d0] ss:$20 sps:$4 sm:$0xff]  }
 0x5f6   :  { %6059 = vmatpush1.bf16.msra.mxu1 %v11007_v10  ;;  %6182 = vmatpush1.bf16.msra.mxu0 %v11010_v11  ;;  %v11061_v10 = vld [vmem:[#allocation2 + $0x4d8] ss:$20 sps:$4 sm:$0xff]   ;;  %v11064_v11 = vld [vmem:[#allocation2 + $0x4e0] ss:$20 sps:$4 sm:$0xff]   ;;  %v11103_v62 = vld [vmem:[#allocation2 + $0x10] ss:$20 sps:$4 sm:$0xff]  }
 0x5f7   :  { %6060 = vmatprep.subr.bf16.mxu1 %v11015_v20  ;;  %6183 = vmatprep.subr.bf16.mxu0 %v11018_v21  ;;  %v4741_v20 = vadd.f32 1.0, %v13542_v61  ;;  %v4752_v21 = vadd.f32 %v4731_v7, %v4682_v8  ;;  %v11109_v7 = vld [vmem:[#allocation2 + $0x1a0] ss:$20 sps:$4 sm:$0xff]  }
 0x5f8   :  { %v11110_v8 = vld [vmem:[#allocation2 + $0x420] ss:$20 sps:$4 sm:$0xff]  }
 0x5f9   :  { %11576 = vlog2.f32 %v4741_v20  ;;  %v11113_v20 = vld [vmem:[#allocation2 + $0x1c8] ss:$20 sps:$4 sm:$0xff]  }
 0x5fa   :  { %6061 = vmatpush1.bf16.msra.mxu1 %v11013_v23  ;;  %6184 = vmatpush1.bf16.msra.mxu0 %v11016_v43  ;;  %v11072_v23 = vld [vmem:[#allocation2 + $0x50c] ss:$20 sps:$4 sm:$0xff]  }
 0x5fb   :  { %6062 = vmatprep.subr.bf16.mxu1 %v11021_v25  ;;  %6185 = vmatprep.subr.bf16.mxu0 %v11024_v26  ;;  %v11067_v43 = vld [vmem:[#allocation2 + $0x500] ss:$20 sps:$4 sm:$0xff]   ;;  %v11070_v25 = vld [vmem:[#allocation2 + $0x508] ss:$20 sps:$4 sm:$0xff]   ;;  %v13546_v26 = vpack.c.bf16 %v4752_v21, %v4752_v21 }
 0x5fc   :  { %v11114_v21 = vld [vmem:[#allocation2 + $0x448] ss:$20 sps:$4 sm:$0xff]  }
 0x5fe   :  { %6063 = vmatpush1.bf16.msra.mxu1 %v11019_v29  ;;  %6186 = vmatpush1.bf16.msra.mxu0 %v11022_v32  ;;  %v11078_v29 = vld [vmem:[#allocation2 + $0x534] ss:$20 sps:$4 sm:$0xff]  }
 0x5ff   :  { %6064 = vmatprep.subr.bf16.mxu1 %v11027_v33  ;;  %6187 = vmatprep.subr.bf16.mxu0 %v11030_v36  ;;  %v11073_v32 = vld [vmem:[#allocation2 + $0x528] ss:$20 sps:$4 sm:$0xff]   ;;  %v11076_v33 = vld [vmem:[#allocation2 + $0x530] ss:$20 sps:$4 sm:$0xff]  }
 0x600   :  { %v11081_v36 = vld [vmem:[#allocation2 + $0x554] ss:$20 sps:$4 sm:$0xff]  }
 0x602   :  { %6065 = vmatpush1.bf16.msra.mxu1 %v11025_v37  ;;  %6188 = vmatpush1.bf16.msra.mxu0 %v11028_v18  ;;  %v11079_v37 = vld [vmem:[#allocation2 + $0x550] ss:$20 sps:$4 sm:$0xff]   ;;  %v11082_v18 = vld [vmem:[#allocation2 + $0x558] ss:$20 sps:$4 sm:$0xff]  }
 0x603   :  { %6066 = vmatprep.subr.bf16.mxu1 %v11033_v38  ;;  %6189 = vmatprep.subr.bf16.mxu0 %v11036_v40  ;;  %v11090_v38 = vld [vmem:[#allocation2 + $0x584] ss:$20 sps:$4 sm:$0xff]   ;;  %v11577_v40 = vpop.eup %11576 }
 0x606   :  { %6067 = vmatpush1.bf16.msra.mxu1 %v11031_v42  ;;  %6190 = vmatpush1.bf16.msra.mxu0 %v11034_v39  ;;  %v4745_v42 = vadd.f32 1.0, %v4744_v30  ;;  %v11088_v39 = vld [vmem:[#allocation2 + $0x580] ss:$20 sps:$4 sm:$0xff]  }
 0x607   :  { %6068 = vmatprep.subr.bf16.mxu1 %v11039_v44  ;;  %6191 = vmatprep.subr.bf16.mxu0 %v11042_v45  ;;  %v11093_v44 = vld [vmem:[#allocation2 + $0x5a4] ss:$20 sps:$4 sm:$0xff]   ;;  %v4747_v45 = vand.u32 2147483647, %v13542_v61  ;;  %v11127_v30 = vld [vmem:[#allocation2 + $0x100] ss:$20 sps:$4 sm:$0xff]  }
 0x609   :  { %vm4748_vm5 = vcmp.lt.f32.partialorder %v4747_v45, 0.0004427343  ;;  %v11134_v45 = vld [vmem:[#allocation2 + $0x538] ss:$20 sps:$4 sm:$0xff]  }
 0x60a   :  { %6069 = vmatpush1.bf16.msra.mxu1 %v11037_v14  ;;  %6192 = vmatpush1.bf16.msra.mxu0 %v11040_v50  ;;  %v4982_v14 = vld [vmem:[#allocation2 + $0x5c8] sm:$0xff]  ;;  %v4743_v50 = vmul.f32 0.6931472, %v11577_v40 }
 0x60b   :  { %6070 = vmatprep.subr.bf16.mxu1 %v11045_v52  ;;  %6193 = vmatprep.subr.bf16.mxu0 %v11048_v54  ;;  %v4983_v52 = vld [vmem:[#allocation2 + $0x5d0] sm:$0xff]  ;;  %v4746_v54 = vmul.f32 %v13542_v61, %v4745_v42  ;;  %v11108_v61 = vld [vmem:[#allocation2 + $0x2b8] ss:$20 sps:$4 sm:$0xff]   ;;  %v11132_v40 = vld [vmem:[#allocation2 + $0x3a8] ss:$20 sps:$4 sm:$0xff]  }
 0x60c   :  { %v9450_v57 = vcombine.low %v4983_v52, %v4983_v52  ;;  %v11133_v42 = vld [vmem:[#allocation2 + $0x510] ss:$20 sps:$4 sm:$0xff]  }
 0x60d   :  { %v4749_v31 = vsel %vm4748_vm5, %v4746_v54, %v4743_v50  ;;  %v11159_v50 = vld [vmem:[%s14540_s12 + $0xac] ss:$28 sps:$4 sm:$0xff]  }
 0x60e   :  { %6071 = vmatpush1.bf16.msra.mxu1 %v11043_v56  ;;  %6194 = vmatpush1.bf16.msra.mxu0 %v11046_v24  ;;  %v11094_v56 = vld [vmem:[#allocation2 + $0x5a8] ss:$20 sps:$4 sm:$0xff]   ;;  %v9449_v24 = vcombine.high %v4982_v14, %v4982_v14 }
 0x60f   :  { %6072 = vmatprep.subr.bf16.mxu1 %v11051_v60  ;;  %6195 = vmatprep.subr.bf16.mxu0 %v11054_v5  ;;  %v9451_v60 = vcombine.high %v4983_v52, %v4983_v52  ;;  %v9448_v5 = vcombine.low %v4982_v14, %v4982_v14  ;;  %v11135_v14 = vld [vmem:[#allocation2 + $0x560] ss:$20 sps:$4 sm:$0xff]   ;;  %v11136_v52 = vld [vmem:[#allocation2 + $0x588] ss:$20 sps:$4 sm:$0xff]  }
 0x610   :  { %v11157_v54 = vld [vmem:[%s14540_s12 + $0xa8] ss:$28 sps:$4 sm:$0xff]  }
 0x611   :  { %v5991_v15 = vsel %vm3492_vm7, %v9448_v5, 0  ;;  %v11171_v5 = vld [vmem:[%s14540_s12 + $0x11c] ss:$28 sps:$4 sm:$0xff]  }
 0x612   :  { %6073 = vmatpush1.bf16.msra.mxu1 %v11049_v9  ;;  %6196 = vmatpush1.bf16.msra.mxu0 %v11052_v27  ;;  %v4684_v9 = vmax.f32 %v13539_v53, 0.0  ;;  %v11104_v53 = vld [vmem:[#allocation2 + $0x290] ss:$20 sps:$4 sm:$0xff]  }
 0x613   :  { %6074 = vmatprep.subr.bf16.mxu1 %v11057_v63  ;;  %6197 = vmatprep.subr.bf16.mxu0 %v11060_v1  ;;  %v5997_v63 = vsel %vm3492_vm7, %v9450_v57, 0  ;;  %v11101_v1 = vld [vmem:[#allocation2 + $0x150] ss:$20 sps:$4 sm:$0xff]  }
 0x614   :  { %v4754_v27 = vadd.f32 %v4749_v31, %v4684_v9  ;;  %v11144_v31 = vld [vmem:[%s14540_s12 + $0xc] ss:$28 sps:$4 sm:$0xff]   ;;  %v11169_v9 = vld [vmem:[%s14540_s12 + $0x118] ss:$28 sps:$4 sm:$0xff]  }
 0x616   :  { %6075 = vmatpush1.bf16.msra.mxu1 %v11055_v2  ;;  %6198 = vmatpush1.bf16.msra.mxu0 %v11058_v3  ;;  %v13560_v2 = vpack.c.bf16 %v4754_v27, %v4754_v27  ;;  %v11105_v3 = vld [vmem:[#allocation2 + $0x178] ss:$20 sps:$4 sm:$0xff]   ;;  %v11142_v27 = vld [vmem:[%s14540_s12 + $0x8] ss:$28 sps:$4 sm:$0xff]  }
 0x617   :  { %6076 = vmatprep.subr.bf16.mxu1 %v11063_v4  ;;  %6199 = vmatprep.subr.bf16.mxu0 %v11066_v6  ;;  %v11106_v4 = vld [vmem:[#allocation2 + $0x3f8] ss:$20 sps:$4 sm:$0xff]  }
 0x618   :  { %v11107_v6 = vld [vmem:[#allocation2 + $0x38] ss:$20 sps:$4 sm:$0xff]  }
 0x61a   :  { %6077 = vmatpush1.bf16.msra.mxu1 %v11061_v10  ;;  %6200 = vmatpush1.bf16.msra.mxu0 %v11064_v11  ;;  %v11111_v10 = vld [vmem:[#allocation2 + $0x60] ss:$20 sps:$4 sm:$0xff]  }
 0x61b   :  { %6087 = vmatprep.subr.bf16.mxu1 %v11069_v13  ;;  %6210 = vmatprep.subr.bf16.mxu0 %v11072_v23  ;;  %v11112_v11 = vld [vmem:[#allocation2 + $0x2e0] ss:$20 sps:$4 sm:$0xff]   ;;  %v11115_v13 = vld [vmem:[#allocation2 + $0x88] ss:$20 sps:$4 sm:$0xff]   ;;  %v11117_v23 = vld [vmem:[#allocation2 + $0x1f0] ss:$20 sps:$4 sm:$0xff]  }
 0x61d   :  { %6079 = vmatmul.mubr.bf16.vlgmr.msra.gmra.mrb[40].mxu1 %v13546_v26  ;;  %6202 = vmatmul.mubr.bf16.vlgmr.msra.gmra.mrb[32].mxu0 %v13546_v26 }
 0x61e   :  { %6088 = vmatpush1.bf16.msra.mxu1 %v11067_v43  ;;  %6211 = vmatpush1.bf16.msra.mxu0 %v11070_v25  ;;  %v11119_v43 = vld [vmem:[#allocation2 + $0xb0] ss:$20 sps:$4 sm:$0xff]  }
 0x61f   :  { %6089 = vmatprep.subr.bf16.mxu1 %v11075_v49  ;;  %6212 = vmatprep.subr.bf16.mxu0 %v11078_v29  ;;  %v11120_v25 = vld [vmem:[#allocation2 + $0x330] ss:$20 sps:$4 sm:$0xff]   ;;  %v11121_v49 = vld [vmem:[#allocation2 + $0x218] ss:$20 sps:$4 sm:$0xff]  }
 0x620   :  { %6119 = vmatprep.mubr.bf16.mxu1 %v11701_v22  ;;  %6242 = vmatprep.mubr.bf16.mxu0 %v11701_v22  ;;  %v11122_v29 = vld [vmem:[#allocation2 + $0x498] ss:$20 sps:$4 sm:$0xff]  }
 0x622   :  { %6090 = vmatpush1.bf16.msra.mxu1 %v11073_v32  ;;  %6213 = vmatpush1.bf16.msra.mxu0 %v11076_v33  ;;  %v11123_v32 = vld [vmem:[#allocation2 + $0xd8] ss:$20 sps:$4 sm:$0xff]  }
 0x623   :  { %6091 = vmatprep.subr.bf16.mxu1 %v11081_v36  ;;  %6214 = vmatprep.subr.bf16.mxu0 %v11084_v35  ;;  %v11124_v33 = vld [vmem:[#allocation2 + $0x358] ss:$20 sps:$4 sm:$0xff]   ;;  %v11125_v36 = vld [vmem:[#allocation2 + $0x240] ss:$20 sps:$4 sm:$0xff]  }
 0x624   :  { %v11126_v35 = vld [vmem:[#allocation2 + $0x4c0] ss:$20 sps:$4 sm:$0xff]  }
 0x626   :  { %6092 = vmatpush1.bf16.msra.mxu1 %v11079_v37  ;;  %6215 = vmatpush1.bf16.msra.mxu0 %v11082_v18  ;;  %v11128_v37 = vld [vmem:[#allocation2 + $0x380] ss:$20 sps:$4 sm:$0xff]   ;;  %v11129_v18 = vld [vmem:[#allocation2 + $0x268] ss:$20 sps:$4 sm:$0xff]  }
 0x627   :  { %6093 = vmatprep.subr.bf16.mxu1 %v11087_v46  ;;  %6216 = vmatprep.subr.bf16.mxu0 %v11090_v38  ;;  %v11130_v46 = vld [vmem:[#allocation2 + $0x4e8] ss:$20 sps:$4 sm:$0xff]  }
 0x628   :  { %v11131_v38 = vld [vmem:[#allocation2 + $0x128] ss:$20 sps:$4 sm:$0xff]  }
 0x62a   :  { %6094 = vmatpush1.bf16.msra.mxu1 %v11085_v41  ;;  %6217 = vmatpush1.bf16.msra.mxu0 %v11088_v39  ;;  %v11141_v41 = vld [vmem:[%s14540_s12 + $0x4] ss:$28 sps:$4 sm:$0xff]  }
 0x62b   :  { %6095 = vmatprep.subr.bf16.mxu1 %v11093_v44  ;;  %6218 = vmatprep.subr.bf16.mxu0 %v11096_v47  ;;  %v11139_v39 = vld [vmem:[%s14540_s12] ss:$28 sps:$4 sm:$0xff]   ;;  %v11145_v47 = vld [vmem:[%s14540_s12 + $0x38] ss:$28 sps:$4 sm:$0xff]  }
 0x62c   :  { %v11147_v44 = vld [vmem:[%s14540_s12 + $0x3c] ss:$28 sps:$4 sm:$0xff]  }
 0x62e   :  { %6096 = vmatpush1.bf16.msra.mxu1 %v11091_v55  ;;  %6219 = vmatpush1.bf16.msra.mxu0 %v11094_v56  ;;  %v11165_v55 = vld [vmem:[%s14540_s12 + $0xe4] ss:$28 sps:$4 sm:$0xff]  }
 0x62f   :  { %9453 = vmatprep.subr.msk.bf16.mxu1 %vm3492_vm7, %v9449_v24  ;;  %9455 = vmatprep.subr.msk.bf16.mxu0 %vm3492_vm7, %v9451_v60  ;;  %v11137_v56 = vld [vmem:[#allocation2 + $0x5b0] ss:$20 sps:$4 sm:$0xff]   ;;  %v11138_v24 = vld [vmem:[#allocation2 + $0x5d8] ss:$0 sps:$4 sm:$0xff]   ;;  %v11163_v60 = vld [vmem:[%s14540_s12 + $0xe0] ss:$28 sps:$4 sm:$0xff]  }
 0x630   :  { %v6003_v57 = vsel %vm3492_vm7, %v11138_v24, 0  ;;  %v11232_v24 = vld [vmem:[%s14540_s12 + $0x350] ss:$28 sps:$4 sm:$0xff]  }
 0x632   :  { %6098 = vmatpush1.bf16.msra.mxu1 %v5991_v15  ;;  %6221 = vmatpush1.bf16.msra.mxu0 %v5997_v63  ;;  %v11150_v15 = vld [vmem:[%s14540_s12 + $0x44] ss:$28 sps:$4 sm:$0xff]  }
 0x633   :  { %9906 = vmatprep.subr.bf16.mxu1 %v11101_v1  ;;  %9928 = vmatprep.subr.bf16.mxu0 %v11102_v58  ;;  %v11148_v63 = vld [vmem:[%s14540_s12 + $0x40] ss:$28 sps:$4 sm:$0xff]   ;;  %v11154_v58 = vld [vmem:[%s14540_s12 + $0x78] ss:$28 sps:$4 sm:$0xff]  }
 0x634   :  { %v11156_v1 = vld [vmem:[%s14540_s12 + $0x7c] ss:$28 sps:$4 sm:$0xff]  }
 0x635   :  { %9454 = vmatmul.mubr.msk.bf16.vlgmr.msra.gmra.mrb[40].mxu1 %vm3488_vm8, %v13560_v2  ;;  %9456 = vmatmul.mubr.msk.bf16.vlgmr.msra.gmra.mrb[32].mxu0 %vm3488_vm8, %v13560_v2 }
 0x636   :  { %9907 = vmatpush3.bf16.msra.mxu1 %v11103_v62  ;;  %6283 = vmatprep.mubr.bf16.mxu1 %v13518_v34  ;;  %v11116_v34 = vld [vmem:[#allocation2 + $0x308] ss:$20 sps:$4 sm:$0xff]   ;;  %v11162_v62 = vld [vmem:[%s14540_s12 + $0xb4] ss:$28 sps:$4 sm:$0xff]  }
 0x637   :  { %9929 = vmatpush3.bf16.msra.mxu0 %v11104_v53  ;;  %6323 = vmatprep.mubr.bf16.mxu0 %v13532_v0  ;;  %v11118_v0 = vld [vmem:[#allocation2 + $0x470] ss:$20 sps:$4 sm:$0xff]   ;;  %v11168_v53 = vld [vmem:[%s14540_s12 + $0xec] ss:$28 sps:$4 sm:$0xff]  }
 0x638   :  { %9908 = vmatprep.subr.bf16.mxu1 %v11105_v3  ;;  %9930 = vmatprep.subr.bf16.mxu0 %v11106_v4  ;;  %v11166_v3 = vld [vmem:[%s14540_s12 + $0xe8] ss:$28 sps:$4 sm:$0xff]  }
 0x639   :  { %v11174_v4 = vld [vmem:[%s14540_s12 + $0x124] ss:$28 sps:$4 sm:$0xff]  }
 0x63a   :  { %9909 = vmatpush3.bf16.msra.mxu1 %v11107_v6  ;;  %v11172_v6 = vld [vmem:[%s14540_s12 + $0x120] ss:$28 sps:$4 sm:$0xff]  }
 0x63b   :  { %9931 = vmatpush3.bf16.msra.mxu0 %v11108_v61  ;;  %9910 = vmatprep.subr.bf16.mxu1 %v11109_v7  ;;  %v11177_v61 = vld [vmem:[%s14540_s12 + $0x154] ss:$28 sps:$4 sm:$0xff]   ;;  %v11180_v7 = vld [vmem:[%s14540_s12 + $0x15c] ss:$28 sps:$4 sm:$0xff]  }
 0x63c   :  { %9932 = vmatprep.subr.bf16.mxu0 %v11110_v8  ;;  %v11175_v8 = vld [vmem:[%s14540_s12 + $0x150] ss:$28 sps:$4 sm:$0xff]  }
 0x63e   :  { %9911 = vmatpush3.bf16.msra.mxu1 %v11111_v10  ;;  %v11178_v10 = vld [vmem:[%s14540_s12 + $0x158] ss:$28 sps:$4 sm:$0xff]  }
 0x63f   :  { %9933 = vmatpush3.bf16.msra.mxu0 %v11112_v11  ;;  %9912 = vmatprep.subr.bf16.mxu1 %v11113_v20  ;;  %v11183_v11 = vld [vmem:[%s14540_s12 + $0x18c] ss:$28 sps:$4 sm:$0xff]   ;;  %v11186_v20 = vld [vmem:[%s14540_s12 + $0x194] ss:$28 sps:$4 sm:$0xff]  }
 0x640   :  { %9934 = vmatprep.subr.bf16.mxu0 %v11114_v21  ;;  %v11181_v21 = vld [vmem:[%s14540_s12 + $0x188] ss:$28 sps:$4 sm:$0xff]  }
 0x642   :  { %9913 = vmatpush3.bf16.msra.mxu1 %v11115_v13  ;;  %v11184_v13 = vld [vmem:[%s14540_s12 + $0x190] ss:$28 sps:$4 sm:$0xff]  }
 0x643   :  { %9935 = vmatpush3.bf16.msra.mxu0 %v11116_v34  ;;  %9914 = vmatprep.subr.bf16.mxu1 %v11117_v23  ;;  %v11189_v34 = vld [vmem:[%s14540_s12 + $0x1c4] ss:$28 sps:$4 sm:$0xff]   ;;  %v11192_v23 = vld [vmem:[%s14540_s12 + $0x1cc] ss:$28 sps:$4 sm:$0xff]  }
 0x644   :  { %9936 = vmatprep.subr.bf16.mxu0 %v11118_v0  ;;  %v11187_v0 = vld [vmem:[%s14540_s12 + $0x1c0] ss:$28 sps:$4 sm:$0xff]  }
 0x646   :  { %9915 = vmatpush3.bf16.msra.mxu1 %v11119_v43  ;;  %v11190_v43 = vld [vmem:[%s14540_s12 + $0x1c8] ss:$28 sps:$4 sm:$0xff]  }
 0x647   :  { %9937 = vmatpush3.bf16.msra.mxu0 %v11120_v25  ;;  %9916 = vmatprep.subr.bf16.mxu1 %v11121_v49  ;;  %v11195_v25 = vld [vmem:[%s14540_s12 + $0x1fc] ss:$28 sps:$4 sm:$0xff]   ;;  %v11198_v49 = vld [vmem:[%s14540_s12 + $0x204] ss:$28 sps:$4 sm:$0xff]  }
 0x648   :  { %9938 = vmatprep.subr.bf16.mxu0 %v11122_v29  ;;  %v11193_v29 = vld [vmem:[%s14540_s12 + $0x1f8] ss:$28 sps:$4 sm:$0xff]  }
 0x64a   :  { %9917 = vmatpush3.bf16.msra.mxu1 %v11123_v32  ;;  %v11196_v32 = vld [vmem:[%s14540_s12 + $0x200] ss:$28 sps:$4 sm:$0xff]  }
 0x64b   :  { %9939 = vmatpush3.bf16.msra.mxu0 %v11124_v33  ;;  %9918 = vmatprep.subr.bf16.mxu1 %v11125_v36  ;;  %v11201_v33 = vld [vmem:[%s14540_s12 + $0x234] ss:$28 sps:$4 sm:$0xff]   ;;  %v11204_v36 = vld [vmem:[%s14540_s12 + $0x23c] ss:$28 sps:$4 sm:$0xff]  }
 0x64c   :  { %9940 = vmatprep.subr.bf16.mxu0 %v11126_v35  ;;  %v11199_v35 = vld [vmem:[%s14540_s12 + $0x230] ss:$28 sps:$4 sm:$0xff]  }
 0x64e   :  { %9919 = vmatpush3.bf16.msra.mxu1 %v11127_v30  ;;  %v11202_v30 = vld [vmem:[%s14540_s12 + $0x238] ss:$28 sps:$4 sm:$0xff]  }
 0x64f   :  { %9941 = vmatpush3.bf16.msra.mxu0 %v11128_v37  ;;  %9920 = vmatprep.subr.bf16.mxu1 %v11129_v18  ;;  %v11207_v37 = vld [vmem:[%s14540_s12 + $0x26c] ss:$28 sps:$4 sm:$0xff]   ;;  %v11210_v18 = vld [vmem:[%s14540_s12 + $0x274] ss:$28 sps:$4 sm:$0xff]  }
 0x650   :  { %9942 = vmatprep.subr.bf16.mxu0 %v11130_v46  ;;  %v11205_v46 = vld [vmem:[%s14540_s12 + $0x268] ss:$28 sps:$4 sm:$0xff]  }
 0x652   :  { %9921 = vmatpush3.bf16.msra.mxu1 %v11131_v38  ;;  %v11208_v38 = vld [vmem:[%s14540_s12 + $0x270] ss:$28 sps:$4 sm:$0xff]  }
 0x653   :  { %9943 = vmatpush3.bf16.msra.mxu0 %v11132_v40  ;;  %10058 = vmatprep.subr.bf16.mxu1 %v11702_v59  ;;  %v11213_v40 = vld [vmem:[%s14540_s12 + $0x2a4] ss:$28 sps:$4 sm:$0xff]  }
 0x654   :  { %8162 = vmatprep.subr.bf16.mxu0 %v11141_v41  ;;  %v11216_v41 = vld [vmem:[%s14540_s12 + $0x2ac] ss:$28 sps:$4 sm:$0xff]  }
 0x655   :  { %6284 = vmatmul.mubr.bf16.vlgmr.msra.gmra.mrb[44].mxu1 %v13520_v48  ;;  %v11153_v48 = vld [vmem:[%s14540_s12 + $0x74] ss:$28 sps:$4 sm:$0xff]  }
 0x656   :  { %6324 = vmatmul.mubr.bf16.vlgmr.msra.gmra.mrb[36].mxu0 %v13546_v26  ;;  %10059 = vmatpush3.bf16.msra.mxu1 %v11133_v42  ;;  %v11151_v26 = vld [vmem:[%s14540_s12 + $0x70] ss:$28 sps:$4 sm:$0xff]   ;;  %v11211_v42 = vld [vmem:[%s14540_s12 + $0x2a0] ss:$28 sps:$4 sm:$0xff]  }
 0x657   :  { %10060 = vmatprep.subr.bf16.mxu1 %v11702_v59  ;;  %10070 = vmatprep.mubr.msk.bf16.mxu1 %vm11703_vm1, %v11702_v59 }
 0x658   :  { %8163 = vmatpush1.bf16.msra.mxu0 %v11139_v39  ;;  %v11214_v39 = vld [vmem:[%s14540_s12 + $0x2a8] ss:$28 sps:$4 sm:$0xff]  }
 0x659   :  { %8164 = vmatprep.subr.bf16.mxu0 %v11147_v44  ;;  %v11219_v44 = vld [vmem:[%s14540_s12 + $0x2dc] ss:$28 sps:$4 sm:$0xff]  }
 0x65a   :  { %10061 = vmatpush3.bf16.msra.mxu1 %v11134_v45  ;;  %v11222_v45 = vld [vmem:[%s14540_s12 + $0x2e4] ss:$28 sps:$4 sm:$0xff]  }
 0x65b   :  { %10062 = vmatprep.subr.bf16.mxu1 %v11702_v59 }
 0x65c   :  { %8165 = vmatpush1.bf16.msra.mxu0 %v11145_v47  ;;  %v11217_v47 = vld [vmem:[%s14540_s12 + $0x2d8] ss:$28 sps:$4 sm:$0xff]  }
 0x65d   :  { %8166 = vmatprep.subr.bf16.mxu0 %v11153_v48  ;;  %v11220_v48 = vld [vmem:[%s14540_s12 + $0x2e0] ss:$28 sps:$4 sm:$0xff]  }
 0x65e   :  { %10063 = vmatpush3.bf16.msra.mxu1 %v11135_v14  ;;  %v11225_v14 = vld [vmem:[%s14540_s12 + $0x314] ss:$28 sps:$4 sm:$0xff]  }
 0x65f   :  { %10064 = vmatprep.subr.bf16.mxu1 %v11702_v59 }
 0x660   :  { %8167 = vmatpush1.bf16.msra.mxu0 %v11151_v26  ;;  %v11228_v26 = vld [vmem:[%s14540_s12 + $0x31c] ss:$28 sps:$4 sm:$0xff]  }
 0x661   :  { %8168 = vmatprep.subr.bf16.mxu0 %v11159_v50  ;;  %v11223_v50 = vld [vmem:[%s14540_s12 + $0x310] ss:$28 sps:$4 sm:$0xff]  }
 0x662   :  { %10065 = vmatpush3.bf16.msra.mxu1 %v11136_v52  ;;  %v11226_v52 = vld [vmem:[%s14540_s12 + $0x318] ss:$28 sps:$4 sm:$0xff]  }
 0x663   :  { %10066 = vmatprep.subr.bf16.mxu1 %v11702_v59 }
 0x664   :  { %8169 = vmatpush1.bf16.msra.mxu0 %v11157_v54  ;;  %v11231_v54 = vld [vmem:[%s14540_s12 + $0x34c] ss:$28 sps:$4 sm:$0xff]  }
 0x665   :  { %8170 = vmatprep.subr.bf16.mxu0 %v11165_v55  ;;  %v11234_v55 = vld [vmem:[%s14540_s12 + $0x354] ss:$28 sps:$4 sm:$0xff]  }
 0x666   :  { %10067 = vmatpush3.bf16.msra.mxu1 %v11137_v56  ;;  %v11229_v56 = vld [vmem:[%s14540_s12 + $0x348] ss:$28 sps:$4 sm:$0xff]  }
 0x667   :  { %10068 = vmatprep.subr.bf16.mxu1 %v11702_v59 }
 0x668   :  { %8171 = vmatpush1.bf16.msra.mxu0 %v11163_v60  ;;  %v11237_v60 = vld [vmem:[%s14540_s12 + $0x384] ss:$28 sps:$4 sm:$0xff]  }
 0x669   :  { %8172 = vmatprep.subr.bf16.mxu0 %v11171_v5  ;;  %v11240_v5 = vld [vmem:[%s14540_s12 + $0x38c] ss:$28 sps:$4 sm:$0xff]  }
 0x66a   :  { %10069 = vmatpush3.bf16.msra.mxu1 %v6003_v57  ;;  %v13782_v57 = vld [vmem:[%s14539_s11] sm:$0x1f] }
 0x66b   :  { %8285 = vmatprep.subr.bf16.mxu1 %v11144_v31  ;;  %v4990_v31 = vrot.slane %v13782_v57, %v12807_v16 }
 0x66c   :  { %8173 = vmatpush1.bf16.msra.mxu0 %v11169_v9  ;;  %v4994_v9 = vrot.slane %v13782_v57, %v12810_v17 }
 0x66d   :  { %10071 = vmatmul.mubr.msk.bf16.vlgmr.msra.gmra.mrb[48].mxu1 %vm3488_vm8, %v13560_v2  ;;  %v11160_v2 = vld [vmem:[%s14540_s12 + $0xb0] ss:$28 sps:$4 sm:$0xff]   ;;  %8174 = vmatprep.subr.bf16.mxu0 %v11177_v61 }
 0x66e   :  { %8286 = vmatpush1.bf16.msra.mxu1 %v11142_v27  ;;  %v5002_v27 = vrot.slane %v13782_v57, %v12813_v19 }
 0x66f   :  { %8287 = vmatprep.subr.bf16.mxu1 %v11150_v15 }
 0x670   :  { %8175 = vmatpush1.bf16.msra.mxu0 %v11175_v8 }
 0x671   :  { %8176 = vmatprep.subr.bf16.mxu0 %v11183_v11 }
 0x672   :  { %8288 = vmatpush1.bf16.msra.mxu1 %v11148_v63 }
 0x673   :  { %8289 = vmatprep.subr.bf16.mxu1 %v11156_v1 }
 0x674   :  { %8177 = vmatpush1.bf16.msra.mxu0 %v11181_v21 }
 0x675   :  { %8178 = vmatprep.subr.bf16.mxu0 %v11189_v34 }
 0x676   :  { %8290 = vmatpush1.bf16.msra.mxu1 %v11154_v58 }
 0x677   :  { %8291 = vmatprep.subr.bf16.mxu1 %v11162_v62 }
 0x678   :  { %8179 = vmatpush1.bf16.msra.mxu0 %v11187_v0 }
 0x679   :  { %8180 = vmatprep.subr.bf16.mxu0 %v11195_v25 }
 0x67a   :  { %8292 = vmatpush1.bf16.msra.mxu1 %v11160_v2 }
 0x67b   :  { %8293 = vmatprep.subr.bf16.mxu1 %v11168_v53 }
 0x67c   :  { %8181 = vmatpush1.bf16.msra.mxu0 %v11193_v29 }
 0x67d   :  { %8182 = vmatprep.subr.bf16.mxu0 %v11201_v33 }
 0x67e   :  { %8294 = vmatpush1.bf16.msra.mxu1 %v11166_v3 }
 0x67f   :  { %8295 = vmatprep.subr.bf16.mxu1 %v11174_v4 }
 0x680   :  { %8183 = vmatpush1.bf16.msra.mxu0 %v11199_v35 }
 0x681   :  { %8184 = vmatprep.subr.bf16.mxu0 %v11207_v37 }
 0x682   :  { %8296 = vmatpush1.bf16.msra.mxu1 %v11172_v6 }
 0x683   :  { %8297 = vmatprep.subr.bf16.mxu1 %v11180_v7 }
 0x684   :  { %8185 = vmatpush1.bf16.msra.mxu0 %v11205_v46 }
 0x685   :  { %8186 = vmatprep.subr.bf16.mxu0 %v11213_v40 }
 0x686   :  { %8298 = vmatpush1.bf16.msra.mxu1 %v11178_v10 }
 0x687   :  { %8299 = vmatprep.subr.bf16.mxu1 %v11186_v20 }
 0x688   :  { %8187 = vmatpush1.bf16.msra.mxu0 %v11211_v42 }
 0x689   :  { %8188 = vmatprep.subr.bf16.mxu0 %v11219_v44 }
 0x68a   :  { %8300 = vmatpush1.bf16.msra.mxu1 %v11184_v13 }
 0x68b   :  { %8301 = vmatprep.subr.bf16.mxu1 %v11192_v23 }
 0x68c   :  { %8189 = vmatpush1.bf16.msra.mxu0 %v11217_v47 }
 0x68d   :  { %8190 = vmatprep.subr.bf16.mxu0 %v11225_v14 }
 0x68e   :  { %8302 = vmatpush1.bf16.msra.mxu1 %v11190_v43 }
 0x68f   :  { %8303 = vmatprep.subr.bf16.mxu1 %v11198_v49 }
 0x690   :  { %8191 = vmatpush1.bf16.msra.mxu0 %v11223_v50 }
 0x691   :  { %8192 = vmatprep.subr.bf16.mxu0 %v11231_v54 }
 0x692   :  { %8304 = vmatpush1.bf16.msra.mxu1 %v11196_v32 }
 0x693   :  { %8305 = vmatprep.subr.bf16.mxu1 %v11204_v36 }
 0x694   :  { %8193 = vmatpush1.bf16.msra.mxu0 %v11229_v56 }
 0x695   :  { %8203 = vmatprep.subr.bf16.mxu0 %v11237_v60 }
 0x696   :  { %8306 = vmatpush1.bf16.msra.mxu1 %v11202_v30 }
 0x697   :  { %8307 = vmatprep.subr.bf16.mxu1 %v11210_v18 }
 0x69a   :  { %8308 = vmatpush1.bf16.msra.mxu1 %v11208_v38 }
 0x69b   :  { %8309 = vmatprep.subr.bf16.mxu1 %v11216_v41  ;;  %v5006_v41 = vrot.slane %v13782_v57, %v12833_v51 }
 0x69e   :  { %8310 = vmatpush1.bf16.msra.mxu1 %v11214_v39 }
 0x69f   :  { %8311 = vmatprep.subr.bf16.mxu1 %v11222_v45 }
 0x6a2   :  { %8312 = vmatpush1.bf16.msra.mxu1 %v11220_v48 }
 0x6a3   :  { %8313 = vmatprep.subr.bf16.mxu1 %v11228_v26 }
 0x6a6   :  { %8314 = vmatpush1.bf16.msra.mxu1 %v11226_v52 }
 0x6a7   :  { %8315 = vmatprep.subr.bf16.mxu1 %v11234_v55 }
 0x6aa   :  { %8316 = vmatpush1.bf16.msra.mxu1 %v11232_v24 }
 0x6ab   :  { %8326 = vmatprep.subr.bf16.mxu1 %v11240_v5 }
 0x708   :  { %v6121_v15 = vpop.f32.mrb[40].mxu1  ;;  %v13790_v63 = vpop.f32.mrb[32].mxu0 }
 0x709   :  { %v13792_v1 = vadd.f32 %v6121_v15, %v4990_v31  ;;  %v6123_v58 = vpop.f32.mrb[41].mxu1  ;;  %v6246_v62 = vpop.f32.mrb[33].mxu0 }
 0x70a   :  { %v13794_v2 = vadd.f32 %v6123_v58, %v4994_v9  ;;  %v13796_v53 = vadd.f32 %v6246_v62, %v5002_v27  ;;  %v6125_v3 = vpop.f32.mrb[42].mxu1  ;;  %v6248_v4 = vpop.f32.mrb[34].mxu0 }
 0x70b   :  { %v6376_v6 = vand.u32 2147483647, %v13792_v1  ;;  %v6126_v10 = vpop.f32.mrb[43].mxu1  ;;  %v6249_v11 = vpop.f32.mrb[35].mxu0  ;;  %v6371_v42 = vmax.f32 %v13792_v1, 0.0 }
 0x70c   :  { %v6377_v61 = vand.u32 2147483647, %v13794_v2  ;;  %v6379_v7 = vand.u32 2147483647, %v13796_v53  ;;  %v6372_v15 = vmax.f32 %v13794_v2, 0.0 }
 0x70d   :  { %v6381_v8 = vsub.f32 0.0, %v6376_v6  ;;  %v11235_v2 = vld [vmem:[%s14540_s12 + $0x380] ss:$28 sps:$4 sm:$0xff]  }
 0x70e   :  { %v6382_v20 = vsub.f32 0.0, %v6377_v61  ;;  %v6384_v21 = vsub.f32 0.0, %v6379_v7  ;;  %v6374_v7 = vmax.f32 %v13796_v53, 0.0  ;;  %v11243_v53 = vld [vmem:[%s14540_s12 + $0x3bc] ss:$28 sps:$4 sm:$0xff]  }
 0x70f   :  { %v6386_v13 = vmul.f32 1.442695, %v6381_v8 }
 0x710   :  { %v6388_v34 = vmul.f32 1.442695, %v6382_v20  ;;  %v6392_v23 = vmul.f32 1.442695, %v6384_v21  ;;  %v11238_v21 = vld [vmem:[%s14540_s12 + $0x388] ss:$28 sps:$4 sm:$0xff]  }
 0x711   :  { %11578 = vpow2.f32 %v6386_v13 }
 0x712   :  { %11580 = vpow2.f32 %v6388_v34  ;;  %v11246_v34 = vld [vmem:[%s14540_s12 + $0x3c4] ss:$28 sps:$4 sm:$0xff]  }
 0x713   :  { %11582 = vpow2.f32 %v6392_v23 }
 0x71b   :  { %v11579_v0 = vpop.eup %11578 }
 0x71c   :  { %v6396_v43 = vadd.f32 1.0, %v11579_v0  ;;  %v11581_v25 = vpop.eup %11580  ;;  %v6399_v33 = vmul.f32 -0.5, %v11579_v0  ;;  %v6402_v37 = vand.u32 2147483647, %v11579_v0 }
 0x71d   :  { %v11583_v49 = vpop.eup %11582  ;;  %v6405_v29 = vadd.f32 1.0, %v11581_v25  ;;  %v6408_v36 = vmul.f32 -0.5, %v11581_v25  ;;  %v6411_v38 = vand.u32 2147483647, %v11581_v25 }
 0x71e   :  { %11584 = vlog2.f32 %v6396_v43  ;;  %v6423_v32 = vadd.f32 1.0, %v11583_v49  ;;  %v6400_v35 = vadd.f32 1.0, %v6399_v33  ;;  %v6426_v30 = vmul.f32 -0.5, %v11583_v49  ;;  %v11241_v43 = vld [vmem:[%s14540_s12 + $0x3b8] ss:$28 sps:$4 sm:$0xff]  }
 0x71f   :  { %11586 = vlog2.f32 %v6405_v29  ;;  %v6409_v18 = vadd.f32 1.0, %v6408_v36  ;;  %vm13804_vm6 = vcmp.lt.f32.partialorder %v6402_v37, 0.0004427343  ;;  %v6429_v50 = vand.u32 2147483647, %v11583_v49 }
 0x720   :  { %11588 = vlog2.f32 %v6423_v32  ;;  %v6401_v44 = vmul.f32 %v11579_v0, %v6400_v35  ;;  %v6427_v45 = vadd.f32 1.0, %v6426_v30  ;;  %vm6412_vm9 = vcmp.lt.f32.partialorder %v6411_v38, 0.0004427343  ;;  %v11247_v32 = vld [vmem:[%s14540_s12 + $0x3f0] ss:$28 sps:$4 sm:$0xff]  }
 0x721   :  { %v6410_v60 = vmul.f32 %v11581_v25, %v6409_v18  ;;  %vm6430_vm10 = vcmp.lt.f32.partialorder %v6429_v50, 0.0004427343  ;;  %v4998_v0 = vrot.slane %v13782_v57, %v12855_v28  ;;  %v11244_v25 = vld [vmem:[%s14540_s12 + $0x3c0] ss:$28 sps:$4 sm:$0xff]   ;;  %v11250_v33 = vld [vmem:[%s14540_s12 + $0x3f8] ss:$28 sps:$4 sm:$0xff]  }
 0x722   :  { %v6428_v6 = vmul.f32 %v11583_v49, %v6427_v45  ;;  %v11249_v49 = vld [vmem:[%s14540_s12 + $0x3f4] ss:$28 sps:$4 sm:$0xff]   ;;  %v11252_v57 = vld [vmem:[%s14540_s12 + $0x3fc] ss:$28 sps:$4 sm:$0xff]   ;;  %v11255_v36 = vld [vmem:[%s14540_s12 + $0x42c] ss:$28 sps:$4 sm:$0xff]  }
 0x723   :  { %v13851_v29 = vadd.f32 %v13790_v63, %v4998_v0  ;;  %v11258_v63 = vld [vmem:[%s14540_s12 + $0x434] ss:$28 sps:$4 sm:$0xff]   ;;  %v11253_v30 = vld [vmem:[%s14540_s12 + $0x428] ss:$28 sps:$4 sm:$0xff]   ;;  %v11267_v45 = vld [vmem:[%s14540_s12 + $0x49c] ss:$28 sps:$4 sm:$0xff]  }
 0x724   :  { %v11256_v37 = vld [vmem:[%s14540_s12 + $0x430] ss:$28 sps:$4 sm:$0xff]   ;;  %v11261_v18 = vld [vmem:[%s14540_s12 + $0x464] ss:$28 sps:$4 sm:$0xff]   ;;  %v11265_v50 = vld [vmem:[%s14540_s12 + $0x498] ss:$28 sps:$4 sm:$0xff]  }
 0x725   :  { %v6378_v35 = vand.u32 2147483647, %v13851_v29  ;;  %v11306_v0 = vld [vmem:[%s14540_s12 + $0x5f4] ss:$28 sps:$4 sm:$0xff]  }
 0x727   :  { %v6383_v38 = vsub.f32 0.0, %v6378_v35  ;;  %v11315_v35 = vld [vmem:[%s14540_s12 + $0x65c] ss:$28 sps:$4 sm:$0xff]  }
 0x728   :  { %v11585_v46 = vpop.eup %11584  ;;  %v9922_v40 = vpop.f32.mrb[44].mxu1 }
 0x729   :  { %v6398_v39 = vmul.f32 0.6931472, %v11585_v46  ;;  %v9944_v47 = vpop.f32.mrb[36].mxu0  ;;  %v9923_v48 = vpop.f32.mrb[45].mxu1  ;;  %v11264_v46 = vld [vmem:[%s14540_s12 + $0x46c] ss:$28 sps:$4 sm:$0xff]  }
 0x72a   :  { %v11587_v14 = vpop.eup %11586  ;;  %v9924_v52 = vadd.f32 %v9923_v48, %v9922_v40  ;;  %v9945_v54 = vpop.f32.mrb[37].mxu0  ;;  %v6390_v26 = vmul.f32 1.442695, %v6383_v38  ;;  %v11316_v38 = vld [vmem:[%s14540_s12 + $0x660] ss:$28 sps:$4 sm:$0xff]  }
 0x72b   :  { %v9925_v55 = vpop.f32.mrb[46].mxu1  ;;  %v6404_v56 = vsel %vm13804_vm6, %v6401_v44, %v6398_v39  ;;  %v6407_v24 = vmul.f32 0.6931472, %v11587_v14  ;;  %v9946_v5 = vadd.f32 %v9945_v54, %v9944_v47  ;;  %v9947_v31 = vpop.f32.mrb[38].mxu0  ;;  %v11270_v47 = vld [vmem:[%s14540_s12 + $0x4a4] ss:$28 sps:$4 sm:$0xff]  }
 0x72c   :  { %v9926_v9 = vpop.f32.mrb[47].mxu1  ;;  %v11589_v27 = vpop.eup %11588  ;;  %v6286_v1 = vadd.f32 %v9924_v52, %v5006_v41  ;;  %v6441_v62 = vadd.f32 %v6404_v56, %v6371_v42  ;;  %v11259_v41 = vld [vmem:[%s14540_s12 + $0x460] ss:$28 sps:$4 sm:$0xff]   ;;  %v11262_v42 = vld [vmem:[%s14540_s12 + $0x468] ss:$28 sps:$4 sm:$0xff]   ;;  %11590 = vpow2.f32 %v6390_v26 }
 0x72d   :  { %v9948_v58 = vpop.f32.mrb[39].mxu0  ;;  %v6413_v3 = vsel %vm6412_vm9, %v6410_v60, %v6407_v24  ;;  %v6425_v4 = vmul.f32 0.6931472, %v11589_v27  ;;  %v11268_v52 = vld [vmem:[%s14540_s12 + $0x4a0] ss:$28 sps:$4 sm:$0xff]  }
 0x72e   :  { %v6442_v61 = vadd.f32 %v6413_v3, %v6372_v15  ;;  %v6326_v8 = vadd.f32 %v9946_v5, %v6286_v1  ;;  %v13820_v13 = vpack.c.bf16 %v6441_v62, %v6441_v62  ;;  %v11273_v54 = vld [vmem:[%s14540_s12 + $0x4d4] ss:$28 sps:$4 sm:$0xff]   ;;  %v11276_v55 = vld [vmem:[%s14540_s12 + $0x4dc] ss:$28 sps:$4 sm:$0xff]   ;;  %v11279_v60 = vld [vmem:[%s14540_s12 + $0x50c] ss:$28 sps:$4 sm:$0xff]  }
 0x72f   :  { %v6431_v10 = vsel %vm6430_vm10, %v6428_v6, %v6425_v4  ;;  %v11271_v56 = vld [vmem:[%s14540_s12 + $0x4d0] ss:$28 sps:$4 sm:$0xff]   ;;  %v11274_v24 = vld [vmem:[%s14540_s12 + $0x4d8] ss:$28 sps:$4 sm:$0xff]   ;;  %v11277_v31 = vld [vmem:[%s14540_s12 + $0x508] ss:$28 sps:$4 sm:$0xff]  }
 0x730   :  { %v13812_v11 = vpack.c.bf16 %v6442_v61, %v6442_v61  ;;  %v6444_v20 = vadd.f32 %v6431_v10, %v6374_v7  ;;  %v11282_v5 = vld [vmem:[%s14540_s12 + $0x514] ss:$28 sps:$4 sm:$0xff]   ;;  %v11285_v27 = vld [vmem:[%s14540_s12 + $0x544] ss:$28 sps:$4 sm:$0xff]   ;;  %v11288_v15 = vld [vmem:[%s14540_s12 + $0x54c] ss:$28 sps:$4 sm:$0xff]  }
 0x731   :  { %v11280_v9 = vld [vmem:[%s14540_s12 + $0x510] ss:$28 sps:$4 sm:$0xff]   ;;  %v11283_v1 = vld [vmem:[%s14540_s12 + $0x540] ss:$28 sps:$4 sm:$0xff]   ;;  %v11286_v58 = vld [vmem:[%s14540_s12 + $0x548] ss:$28 sps:$4 sm:$0xff]  }
 0x732   :  { %8194 = vmatprep.mubr.bf16.mxu0 %v13812_v11  ;;  %8317 = vmatprep.mubr.bf16.mxu1 %v13812_v11  ;;  %v13830_v23 = vpack.c.bf16 %v6444_v20, %v6444_v20  ;;  %v11291_v62 = vld [vmem:[%s14540_s12 + $0x57c] ss:$28 sps:$4 sm:$0xff]   ;;  %v11294_v3 = vld [vmem:[%s14540_s12 + $0x584] ss:$28 sps:$4 sm:$0xff]   ;;  %v11297_v10 = vld [vmem:[%s14540_s12 + $0x5b4] ss:$28 sps:$4 sm:$0xff]  }
 0x733   :  { %8195 = vmatmul.mubr.bf16.vlgmr.msra.gmra.mrb[40].mxu0 %v13820_v13  ;;  %8318 = vmatmul.mubr.bf16.vlgmr.msra.gmra.mrb[52].mxu1 %v13820_v13  ;;  %v11289_v61 = vld [vmem:[%s14540_s12 + $0x578] ss:$28 sps:$4 sm:$0xff]   ;;  %v11292_v7 = vld [vmem:[%s14540_s12 + $0x580] ss:$28 sps:$4 sm:$0xff]  }
 0x734   :  { %8204 = vmatpush1.bf16.msra.mxu0 %v11235_v2  ;;  %8327 = vmatpush1.bf16.msra.mxu1 %v11238_v21  ;;  %v11300_v20 = vld [vmem:[%s14540_s12 + $0x5bc] ss:$28 sps:$4 sm:$0xff]   ;;  %v11295_v21 = vld [vmem:[%s14540_s12 + $0x5b0] ss:$28 sps:$4 sm:$0xff]  }
 0x735   :  { %8235 = vmatprep.mubr.bf16.mxu0 %v13830_v23  ;;  %8358 = vmatprep.mubr.bf16.mxu1 %v13830_v23  ;;  %v11330_v26 = vld [vmem:[%s14540_s12 + $0x6d4] ss:$28 sps:$4 sm:$0xff]  }
 0x736   :  { %8205 = vmatprep.subr.bf16.mxu0 %v11243_v53  ;;  %8328 = vmatprep.subr.bf16.mxu1 %v11246_v34  ;;  %v11591_v4 = vpop.eup %11590  ;;  %v11298_v53 = vld [vmem:[%s14540_s12 + $0x5b8] ss:$28 sps:$4 sm:$0xff]   ;;  %v11303_v34 = vld [vmem:[%s14540_s12 + $0x5ec] ss:$28 sps:$4 sm:$0xff]  }
 0x738   :  { %8206 = vmatpush1.bf16.msra.mxu0 %v11241_v43  ;;  %8329 = vmatpush1.bf16.msra.mxu1 %v11244_v25  ;;  %v11301_v25 = vld [vmem:[%s14540_s12 + $0x5e8] ss:$28 sps:$4 sm:$0xff]  }
 0x739   :  { %8207 = vmatprep.subr.bf16.mxu0 %v11249_v49  ;;  %8330 = vmatprep.subr.bf16.mxu1 %v11252_v57  ;;  %v11304_v49 = vld [vmem:[%s14540_s12 + $0x5f0] ss:$28 sps:$4 sm:$0xff]   ;;  %v11309_v57 = vld [vmem:[%s14540_s12 + $0x624] ss:$28 sps:$4 sm:$0xff]  }
 0x73c   :  { %8208 = vmatpush1.bf16.msra.mxu0 %v11247_v32  ;;  %8331 = vmatpush1.bf16.msra.mxu1 %v11250_v33  ;;  %v11312_v32 = vld [vmem:[%s14540_s12 + $0x62c] ss:$28 sps:$4 sm:$0xff]   ;;  %v6417_v33 = vmul.f32 -0.5, %v11591_v4 }
 0x73d   :  { %8209 = vmatprep.subr.bf16.mxu0 %v11255_v36  ;;  %8332 = vmatprep.subr.bf16.mxu1 %v11258_v63  ;;  %v11307_v36 = vld [vmem:[%s14540_s12 + $0x620] ss:$28 sps:$4 sm:$0xff]   ;;  %v11310_v63 = vld [vmem:[%s14540_s12 + $0x628] ss:$28 sps:$4 sm:$0xff]  }
 0x740   :  { %8210 = vmatpush1.bf16.msra.mxu0 %v11253_v30  ;;  %8333 = vmatpush1.bf16.msra.mxu1 %v11256_v37  ;;  %v6365_v40 = vpop.f32.mrb[48].mxu1  ;;  %v11318_v30 = vld [vmem:[%s14540_s12 + $0x664] ss:$28 sps:$4 sm:$0xff]  }
 0x741   :  { %v13884_v39 = vadd.f32 %v6365_v40, %v6326_v8  ;;  %v10072_v44 = vpop.f32.mrb[49].mxu1  ;;  %8211 = vmatprep.subr.bf16.mxu0 %v11261_v18  ;;  %8334 = vmatprep.subr.bf16.mxu1 %v11264_v46  ;;  %v6414_v8 = vadd.f32 1.0, %v11591_v4  ;;  %v6418_v18 = vadd.f32 1.0, %v6417_v33  ;;  %v11313_v46 = vld [vmem:[%s14540_s12 + $0x658] ss:$28 sps:$4 sm:$0xff]  }
 0x742   :  { %v6368_v48 = vpop.f32.mrb[50].mxu1  ;;  %v6420_v40 = vand.u32 2147483647, %v11591_v4  ;;  %v11355_v33 = vld [vmem:[%s14540_s12 + $0x7e0] ss:$28 sps:$4 sm:$0xff]  }
 0x743   :  { %v10073_v14 = vpop.f32.mrb[51].mxu1  ;;  %v6380_v6 = vand.u32 2147483647, %v13884_v39  ;;  %11592 = vlog2.f32 %v6414_v8  ;;  %v11322_v48 = vld [vmem:[%s14540_s12 + $0x698] ss:$28 sps:$4 sm:$0xff]  }
 0x744   :  { %8212 = vmatpush1.bf16.msra.mxu0 %v11259_v41  ;;  %8335 = vmatpush1.bf16.msra.mxu1 %v11262_v42  ;;  %v11321_v41 = vld [vmem:[%s14540_s12 + $0x694] ss:$28 sps:$4 sm:$0xff]   ;;  %v11324_v42 = vld [vmem:[%s14540_s12 + $0x69c] ss:$28 sps:$4 sm:$0xff]   ;;  %vm6421_vm11 = vcmp.lt.f32.partialorder %v6420_v40, 0.0004427343 }
 0x745   :  { %8213 = vmatprep.subr.bf16.mxu0 %v11267_v45  ;;  %8336 = vmatprep.subr.bf16.mxu1 %v11270_v47  ;;  %v6385_v2 = vsub.f32 0.0, %v6380_v6  ;;  %v6419_v45 = vmul.f32 %v11591_v4, %v6418_v18  ;;  %v11319_v47 = vld [vmem:[%s14540_s12 + $0x690] ss:$28 sps:$4 sm:$0xff]   ;;  %v11348_v4 = vld [vmem:[%s14540_s12 + $0x77c] ss:$28 sps:$4 sm:$0xff]  }
 0x746   :  { %v11327_v14 = vld [vmem:[%s14540_s12 + $0x6cc] ss:$28 sps:$4 sm:$0xff]  }
 0x747   :  { %v6394_v43 = vmul.f32 1.442695, %v6385_v2  ;;  %v11351_v8 = vld [vmem:[%s14540_s12 + $0x7ac] ss:$28 sps:$4 sm:$0xff]  }
 0x748   :  { %8214 = vmatpush1.bf16.msra.mxu0 %v11265_v50  ;;  %8337 = vmatpush1.bf16.msra.mxu1 %v11268_v52  ;;  %v11349_v2 = vld [vmem:[%s14540_s12 + $0x7a8] ss:$28 sps:$4 sm:$0xff]  }
 0x749   :  { %8215 = vmatprep.subr.bf16.mxu0 %v11273_v54  ;;  %8338 = vmatprep.subr.bf16.mxu1 %v11276_v55  ;;  %11594 = vpow2.f32 %v6394_v43  ;;  %v6373_v54 = vmax.f32 %v13851_v29, 0.0  ;;  %v11325_v55 = vld [vmem:[%s14540_s12 + $0x6c8] ss:$28 sps:$4 sm:$0xff]  }
 0x74a   :  { %v11336_v29 = vld [vmem:[%s14540_s12 + $0x70c] ss:$28 sps:$4 sm:$0xff]  }
 0x74b   :  { %v11360_v43 = vld [vmem:[%s14540_s12 + $0x7ec] ss:$28 sps:$4 sm:$0xff]  }
 0x74c   :  { %8216 = vmatpush1.bf16.msra.mxu0 %v11271_v56  ;;  %8339 = vmatpush1.bf16.msra.mxu1 %v11274_v24  ;;  %v11328_v56 = vld [vmem:[%s14540_s12 + $0x6d0] ss:$28 sps:$4 sm:$0xff]  }
 0x74d   :  { %8217 = vmatprep.subr.bf16.mxu0 %v11279_v60  ;;  %8340 = vmatprep.subr.bf16.mxu1 %v11282_v5  ;;  %v11593_v37 = vpop.eup %11592  ;;  %v11333_v5 = vld [vmem:[%s14540_s12 + $0x704] ss:$28 sps:$4 sm:$0xff]  }
 0x74e   :  { %v6416_v44 = vmul.f32 0.6931472, %v11593_v37 }
 0x750   :  { %8218 = vmatpush1.bf16.msra.mxu0 %v11277_v31  ;;  %8341 = vmatpush1.bf16.msra.mxu1 %v11280_v9  ;;  %v6422_v52 = vsel %vm6421_vm11, %v6419_v45, %v6416_v44  ;;  %v11331_v31 = vld [vmem:[%s14540_s12 + $0x700] ss:$28 sps:$4 sm:$0xff]   ;;  %v11334_v9 = vld [vmem:[%s14540_s12 + $0x708] ss:$28 sps:$4 sm:$0xff]   ;;  %v11368_v44 = vld [vmem:[%s14540_s12 + $0x1d8] ss:$28 sps:$4 sm:$0xff]  }
 0x751   :  { %8219 = vmatprep.subr.bf16.mxu0 %v11285_v27  ;;  %8342 = vmatprep.subr.bf16.mxu1 %v11288_v15  ;;  %v6443_v24 = vadd.f32 %v6422_v52, %v6373_v54  ;;  %v11339_v15 = vld [vmem:[%s14540_s12 + $0x73c] ss:$28 sps:$4 sm:$0xff]   ;;  %v11377_v52 = vld [vmem:[%s14540_s12 + $0x84] ss:$28 sps:$4 sm:$0xff]  }
 0x752   :  { %v11378_v54 = vld [vmem:[%s14540_s12 + $0x248] ss:$28 sps:$4 sm:$0xff]  }
 0x753   :  { %v14013_v50 = vpop.eup %11594  ;;  %v14035_v27 = vpack.c.bf16 %v6443_v24, %v6443_v24  ;;  %v11383_v24 = vld [vmem:[%s14540_s12 + $0x280] ss:$28 sps:$4 sm:$0xff]  }
 0x754   :  { %8220 = vmatpush1.bf16.msra.mxu0 %v11283_v1  ;;  %8343 = vmatpush1.bf16.msra.mxu1 %v11286_v58  ;;  %v6432_v60 = vadd.f32 1.0, %v14013_v50  ;;  %v11342_v1 = vld [vmem:[%s14540_s12 + $0x744] ss:$28 sps:$4 sm:$0xff]   ;;  %v11337_v58 = vld [vmem:[%s14540_s12 + $0x738] ss:$28 sps:$4 sm:$0xff]   ;;  %v6435_v6 = vmul.f32 -0.5, %v14013_v50 }
 0x755   :  { %8221 = vmatprep.subr.bf16.mxu0 %v11291_v62  ;;  %8344 = vmatprep.subr.bf16.mxu1 %v11294_v3  ;;  %v11340_v62 = vld [vmem:[%s14540_s12 + $0x740] ss:$28 sps:$4 sm:$0xff]   ;;  %v11345_v3 = vld [vmem:[%s14540_s12 + $0x774] ss:$28 sps:$4 sm:$0xff]  }
 0x756   :  { %11596 = vlog2.f32 %v6432_v60  ;;  %v11380_v60 = vld [vmem:[%s14540_s12 + $0xb8] ss:$28 sps:$4 sm:$0xff]  }
 0x758   :  { %8222 = vmatpush1.bf16.msra.mxu0 %v11289_v61  ;;  %8345 = vmatpush1.bf16.msra.mxu1 %v11292_v7  ;;  %v11343_v61 = vld [vmem:[%s14540_s12 + $0x770] ss:$28 sps:$4 sm:$0xff]   ;;  %v11346_v7 = vld [vmem:[%s14540_s12 + $0x778] ss:$28 sps:$4 sm:$0xff]  }
 0x759   :  { %8223 = vmatprep.subr.bf16.mxu0 %v11297_v10  ;;  %8346 = vmatprep.subr.bf16.mxu1 %v11300_v20  ;;  %v11354_v10 = vld [vmem:[%s14540_s12 + $0x7b4] ss:$28 sps:$4 sm:$0xff]  }
 0x75c   :  { %8224 = vmatpush1.bf16.msra.mxu0 %v11295_v21  ;;  %8347 = vmatpush1.bf16.msra.mxu1 %v11298_v53  ;;  %v6436_v21 = vadd.f32 1.0, %v6435_v6  ;;  %v11352_v53 = vld [vmem:[%s14540_s12 + $0x7b0] ss:$28 sps:$4 sm:$0xff]   ;;  %v11398_v6 = vld [vmem:[%s14540_s12 + $0x328] ss:$28 sps:$4 sm:$0xff]  }
 0x75d   :  { %8225 = vmatprep.subr.bf16.mxu0 %v11303_v34  ;;  %8348 = vmatprep.subr.bf16.mxu1 %v11306_v0  ;;  %v11357_v34 = vld [vmem:[%s14540_s12 + $0x7e4] ss:$28 sps:$4 sm:$0xff]   ;;  %v6438_v0 = vand.u32 2147483647, %v14013_v50 }
 0x75f   :  { %vm6439_vm12 = vcmp.lt.f32.partialorder %v6438_v0, 0.0004427343  ;;  %v11409_v0 = vld [vmem:[%s14540_s12 + $0x398] ss:$28 sps:$4 sm:$0xff]  }
 0x760   :  { %8226 = vmatpush1.bf16.msra.mxu0 %v11301_v25  ;;  %8349 = vmatpush1.bf16.msra.mxu1 %v11304_v49  ;;  %v11597_v20 = vpop.eup %11596  ;;  %v6747_v25 = vld [vmem:[%s14540_s12 + $0x818] sm:$0xff] }
 0x761   :  { %8227 = vmatprep.subr.bf16.mxu0 %v11309_v57  ;;  %8350 = vmatprep.subr.bf16.mxu1 %v11312_v32  ;;  %v6434_v49 = vmul.f32 0.6931472, %v11597_v20  ;;  %v6748_v57 = vld [vmem:[%s14540_s12 + $0x820] sm:$0xff]  ;;  %v6437_v32 = vmul.f32 %v14013_v50, %v6436_v21  ;;  %v11374_v50 = vld [vmem:[%s14540_s12 + $0x50] ss:$28 sps:$4 sm:$0xff]  }
 0x762   :  { %v9719_v37 = vcombine.low %v6748_v57, %v6748_v57  ;;  %v11400_v20 = vld [vmem:[%s14540_s12 + $0x198] ss:$28 sps:$4 sm:$0xff]  }
 0x763   :  { %v6440_v18 = vsel %vm6439_vm12, %v6437_v32, %v6434_v49  ;;  %v11407_v21 = vld [vmem:[%s14540_s12 + $0x1d4] ss:$28 sps:$4 sm:$0xff]   ;;  %v11410_v49 = vld [vmem:[%s14540_s12 + $0x208] ss:$28 sps:$4 sm:$0xff]  }
 0x764   :  { %8228 = vmatpush1.bf16.msra.mxu0 %v11307_v36  ;;  %8351 = vmatpush1.bf16.msra.mxu1 %v11310_v63  ;;  %v11358_v36 = vld [vmem:[%s14540_s12 + $0x7e8] ss:$28 sps:$4 sm:$0xff]   ;;  %v9718_v63 = vcombine.high %v6747_v25, %v6747_v25 }
 0x765   :  { %8229 = vmatprep.subr.bf16.mxu0 %v11315_v35  ;;  %8352 = vmatprep.subr.bf16.mxu1 %v11318_v30  ;;  %v9720_v35 = vcombine.high %v6748_v57, %v6748_v57  ;;  %v9717_v30 = vcombine.low %v6747_v25, %v6747_v25  ;;  %v11413_v25 = vld [vmem:[%s14540_s12 + $0x590] ss:$28 sps:$4 sm:$0xff]   ;;  %v11417_v32 = vld [vmem:[%s14540_s12 + $0x244] ss:$28 sps:$4 sm:$0xff]  }
 0x766   :  { %v11414_v57 = vld [vmem:[%s14540_s12 + $0x3d0] ss:$28 sps:$4 sm:$0xff]  }
 0x767   :  { %v8142_v40 = vsel %vm3492_vm7, %v9717_v30, 0  ;;  %v11423_v30 = vld [vmem:[%s14540_s12 + $0x600] ss:$28 sps:$4 sm:$0xff]  }
 0x768   :  { %8230 = vmatpush1.bf16.msra.mxu0 %v11313_v46  ;;  %8353 = vmatpush1.bf16.msra.mxu1 %v11316_v38  ;;  %v6375_v46 = vmax.f32 %v13884_v39, 0.0  ;;  %v11365_v39 = vld [vmem:[%s14540_s12 + $0x10] ss:$28 sps:$4 sm:$0xff]  }
 0x769   :  { %8231 = vmatprep.subr.bf16.mxu0 %v11321_v41  ;;  %8354 = vmatprep.subr.bf16.mxu1 %v11324_v42  ;;  %v8148_v41 = vsel %vm3492_vm7, %v9719_v37, 0  ;;  %v11367_v42 = vld [vmem:[%s14540_s12 + $0x14] ss:$28 sps:$4 sm:$0xff]  }
 0x76a   :  { %v6445_v38 = vadd.f32 %v6440_v18, %v6375_v46  ;;  %v11420_v37 = vld [vmem:[%s14540_s12 + $0x278] ss:$28 sps:$4 sm:$0xff]   ;;  %v11424_v18 = vld [vmem:[%s14540_s12 + $0x440] ss:$28 sps:$4 sm:$0xff]  }
 0x76b   :  { %v11427_v46 = vld [vmem:[%s14540_s12 + $0x2b4] ss:$28 sps:$4 sm:$0xff]  }
 0x76c   :  { %8232 = vmatpush1.bf16.msra.mxu0 %v11319_v47  ;;  %8355 = vmatpush1.bf16.msra.mxu1 %v11322_v48  ;;  %v14112_v45 = vpack.c.bf16 %v6445_v38, %v6445_v38  ;;  %v11369_v47 = vld [vmem:[%s14540_s12 + $0x18] ss:$28 sps:$4 sm:$0xff]   ;;  %v11372_v48 = vld [vmem:[%s14540_s12 + $0x4c] ss:$28 sps:$4 sm:$0xff]  }
 0x76d   :  { %8233 = vmatprep.subr.bf16.mxu0 %v11327_v14  ;;  %8356 = vmatprep.subr.bf16.mxu1 %v11330_v26  ;;  %v11373_v14 = vld [vmem:[%s14540_s12 + $0x210] ss:$28 sps:$4 sm:$0xff]   ;;  %v11370_v26 = vld [vmem:[%s14540_s12 + $0x48] ss:$28 sps:$4 sm:$0xff]   ;;  %v11428_v38 = vld [vmem:[%s14540_s12 + $0x638] ss:$28 sps:$4 sm:$0xff]  }
 0x770   :  { %8234 = vmatpush1.bf16.msra.mxu0 %v11325_v55  ;;  %8357 = vmatpush1.bf16.msra.mxu1 %v11328_v56  ;;  %v11375_v55 = vld [vmem:[%s14540_s12 + $0x80] ss:$28 sps:$4 sm:$0xff]  }
 0x771   :  { %8244 = vmatprep.subr.bf16.mxu0 %v11333_v5  ;;  %8367 = vmatprep.subr.bf16.mxu1 %v11336_v29  ;;  %v11382_v56 = vld [vmem:[%s14540_s12 + $0xbc] ss:$28 sps:$4 sm:$0xff]   ;;  %v11387_v29 = vld [vmem:[%s14540_s12 + $0xf4] ss:$28 sps:$4 sm:$0xff]  }
 0x772   :  { %v11384_v5 = vld [vmem:[%s14540_s12 + $0xc0] ss:$28 sps:$4 sm:$0xff]  }
 0x773   :  { %8236 = vmatmul.mubr.bf16.vlgmr.msra.gmra.mrb[40].mxu0 %v14035_v27  ;;  %8359 = vmatmul.mubr.bf16.vlgmr.msra.gmra.mrb[52].mxu1 %v14035_v27 }
 0x774   :  { %8245 = vmatpush1.bf16.msra.mxu0 %v11331_v31  ;;  %8368 = vmatpush1.bf16.msra.mxu1 %v11334_v9  ;;  %v11388_v31 = vld [vmem:[%s14540_s12 + $0x2b8] ss:$28 sps:$4 sm:$0xff]   ;;  %v11385_v9 = vld [vmem:[%s14540_s12 + $0xf0] ss:$28 sps:$4 sm:$0xff]  }
 0x775   :  { %8246 = vmatprep.subr.bf16.mxu0 %v11339_v15  ;;  %8369 = vmatprep.subr.bf16.mxu1 %v11342_v1  ;;  %v11389_v15 = vld [vmem:[%s14540_s12 + $0xf8] ss:$28 sps:$4 sm:$0xff]   ;;  %v11392_v1 = vld [vmem:[%s14540_s12 + $0x12c] ss:$28 sps:$4 sm:$0xff]  }
 0x776   :  { %8276 = vmatprep.mubr.bf16.mxu0 %v11701_v22  ;;  %8399 = vmatprep.mubr.bf16.mxu1 %v11701_v22 }
 0x778   :  { %8247 = vmatpush1.bf16.msra.mxu0 %v11337_v58  ;;  %8370 = vmatpush1.bf16.msra.mxu1 %v11340_v62  ;;  %v11393_v58 = vld [vmem:[%s14540_s12 + $0x2f0] ss:$28 sps:$4 sm:$0xff]   ;;  %v11390_v62 = vld [vmem:[%s14540_s12 + $0x128] ss:$28 sps:$4 sm:$0xff]  }
 0x779   :  { %8248 = vmatprep.subr.bf16.mxu0 %v11345_v3  ;;  %8371 = vmatprep.subr.bf16.mxu1 %v11348_v4  ;;  %v11394_v3 = vld [vmem:[%s14540_s12 + $0x130] ss:$28 sps:$4 sm:$0xff]   ;;  %v11397_v4 = vld [vmem:[%s14540_s12 + $0x164] ss:$28 sps:$4 sm:$0xff]  }
 0x77c   :  { %8249 = vmatpush1.bf16.msra.mxu0 %v11343_v61  ;;  %8372 = vmatpush1.bf16.msra.mxu1 %v11346_v7  ;;  %v11395_v61 = vld [vmem:[%s14540_s12 + $0x160] ss:$28 sps:$4 sm:$0xff]   ;;  %v11399_v7 = vld [vmem:[%s14540_s12 + $0x168] ss:$28 sps:$4 sm:$0xff]  }
 0x77d   :  { %8250 = vmatprep.subr.bf16.mxu0 %v11351_v8  ;;  %8373 = vmatprep.subr.bf16.mxu1 %v11354_v10  ;;  %v11402_v8 = vld [vmem:[%s14540_s12 + $0x19c] ss:$28 sps:$4 sm:$0xff]  }
 0x77e   :  { %v11403_v10 = vld [vmem:[%s14540_s12 + $0x360] ss:$28 sps:$4 sm:$0xff]  }
 0x780   :  { %8251 = vmatpush1.bf16.msra.mxu0 %v11349_v2  ;;  %8374 = vmatpush1.bf16.msra.mxu1 %v11352_v53  ;;  %v11404_v2 = vld [vmem:[%s14540_s12 + $0x1a0] ss:$28 sps:$4 sm:$0xff]   ;;  %v11408_v53 = vld [vmem:[%s14540_s12 + $0x558] ss:$28 sps:$4 sm:$0xff]  }
 0x781   :  { %8252 = vmatprep.subr.bf16.mxu0 %v11357_v34  ;;  %8375 = vmatprep.subr.bf16.mxu1 %v11360_v43  ;;  %v11405_v34 = vld [vmem:[%s14540_s12 + $0x1d0] ss:$28 sps:$4 sm:$0xff]  }
 0x782   :  { %v11412_v43 = vld [vmem:[%s14540_s12 + $0x20c] ss:$28 sps:$4 sm:$0xff]  }
 0x784   :  { %8253 = vmatpush1.bf16.msra.mxu0 %v11355_v33  ;;  %8376 = vmatpush1.bf16.msra.mxu1 %v11358_v36  ;;  %v11418_v33 = vld [vmem:[%s14540_s12 + $0x5c8] ss:$28 sps:$4 sm:$0xff]   ;;  %v11415_v36 = vld [vmem:[%s14540_s12 + $0x240] ss:$28 sps:$4 sm:$0xff]  }
 0x785   :  { %9724 = vmatprep.subr.msk.bf16.mxu0 %vm3492_vm7, %v9718_v63  ;;  %9726 = vmatprep.subr.msk.bf16.mxu1 %vm3492_vm7, %v9720_v35  ;;  %v11419_v63 = vld [vmem:[%s14540_s12 + $0x408] ss:$28 sps:$4 sm:$0xff]   ;;  %v11422_v35 = vld [vmem:[%s14540_s12 + $0x27c] ss:$28 sps:$4 sm:$0xff]  }
 0x788   :  { %8255 = vmatpush1.bf16.msra.mxu0 %v8142_v40  ;;  %8378 = vmatpush1.bf16.msra.mxu1 %v8148_v41  ;;  %v11425_v40 = vld [vmem:[%s14540_s12 + $0x2b0] ss:$28 sps:$4 sm:$0xff]   ;;  %v11429_v41 = vld [vmem:[%s14540_s12 + $0x478] ss:$28 sps:$4 sm:$0xff]  }
 0x789   :  { %8408 = vmatprep.subr.bf16.mxu0 %v11367_v42  ;;  %9957 = vmatprep.subr.bf16.mxu1 %v11368_v44  ;;  %v11432_v42 = vld [vmem:[%s14540_s12 + $0x2ec] ss:$28 sps:$4 sm:$0xff]  }
 0x78a   :  { %v11433_v44 = vld [vmem:[%s14540_s12 + $0x670] ss:$28 sps:$4 sm:$0xff]  }
 0x78b   :  { %9725 = vmatmul.mubr.msk.bf16.vlgmr.msra.gmra.mrb[40].mxu0 %vm3488_vm8, %v14112_v45  ;;  %9727 = vmatmul.mubr.msk.bf16.vlgmr.msra.gmra.mrb[52].mxu1 %vm3488_vm8, %v14112_v45 }
 0x78c   :  { %8409 = vmatpush1.bf16.msra.mxu0 %v11365_v39  ;;  %8440 = vmatprep.mubr.bf16.mxu0 %v13812_v11  ;;  %v11430_v39 = vld [vmem:[%s14540_s12 + $0x2e8] ss:$28 sps:$4 sm:$0xff]  }
 0x78d   :  { %9958 = vmatpush3.bf16.msra.mxu1 %v11369_v47  ;;  %8563 = vmatprep.mubr.bf16.mxu1 %v13812_v11  ;;  %v11379_v11 = vld [vmem:[%s14540_s12 + $0x88] ss:$28 sps:$4 sm:$0xff]   ;;  %v11434_v47 = vld [vmem:[%s14540_s12 + $0x4b0] ss:$28 sps:$4 sm:$0xff]  }
 0x78e   :  { %8410 = vmatprep.subr.bf16.mxu0 %v11372_v48  ;;  %9959 = vmatprep.subr.bf16.mxu1 %v11373_v14  ;;  %v11437_v48 = vld [vmem:[%s14540_s12 + $0x324] ss:$28 sps:$4 sm:$0xff]  }
 0x78f   :  { %v11438_v14 = vld [vmem:[%s14540_s12 + $0x6a8] ss:$28 sps:$4 sm:$0xff]  }
 0x790   :  { %8411 = vmatpush1.bf16.msra.mxu0 %v11370_v26  ;;  %v11435_v26 = vld [vmem:[%s14540_s12 + $0x320] ss:$28 sps:$4 sm:$0xff]  }
 0x791   :  { %9960 = vmatpush3.bf16.msra.mxu1 %v11374_v50  ;;  %8412 = vmatprep.subr.bf16.mxu0 %v11377_v52  ;;  %v11439_v50 = vld [vmem:[%s14540_s12 + $0x4e8] ss:$28 sps:$4 sm:$0xff]   ;;  %v11442_v52 = vld [vmem:[%s14540_s12 + $0x35c] ss:$28 sps:$4 sm:$0xff]  }
 0x792   :  { %9961 = vmatprep.subr.bf16.mxu1 %v11378_v54  ;;  %v11443_v54 = vld [vmem:[%s14540_s12 + $0x6e0] ss:$28 sps:$4 sm:$0xff]  }
 0x794   :  { %8413 = vmatpush1.bf16.msra.mxu0 %v11375_v55  ;;  %v11440_v55 = vld [vmem:[%s14540_s12 + $0x358] ss:$28 sps:$4 sm:$0xff]  }
 0x795   :  { %9962 = vmatpush3.bf16.msra.mxu1 %v11379_v11  ;;  %8414 = vmatprep.subr.bf16.mxu0 %v11382_v56  ;;  %v11444_v11 = vld [vmem:[%s14540_s12 + $0x520] ss:$28 sps:$4 sm:$0xff]   ;;  %v11447_v56 = vld [vmem:[%s14540_s12 + $0x394] ss:$28 sps:$4 sm:$0xff]  }
 0x796   :  { %9963 = vmatprep.subr.bf16.mxu1 %v11383_v24  ;;  %v11445_v24 = vld [vmem:[%s14540_s12 + $0x390] ss:$28 sps:$4 sm:$0xff]  }
 0x798   :  { %8415 = vmatpush1.bf16.msra.mxu0 %v11380_v60  ;;  %v11448_v60 = vld [vmem:[%s14540_s12 + $0x718] ss:$28 sps:$4 sm:$0xff]  }
 0x799   :  { %9964 = vmatpush3.bf16.msra.mxu1 %v11384_v5  ;;  %8416 = vmatprep.subr.bf16.mxu0 %v11387_v29  ;;  %v11451_v5 = vld [vmem:[%s14540_s12 + $0x3cc] ss:$28 sps:$4 sm:$0xff]  }
 0x79a   :  { %9965 = vmatprep.subr.bf16.mxu1 %v11388_v31  ;;  %v11449_v29 = vld [vmem:[%s14540_s12 + $0x3c8] ss:$28 sps:$4 sm:$0xff]   ;;  %v11452_v31 = vld [vmem:[%s14540_s12 + $0x750] ss:$28 sps:$4 sm:$0xff]  }
 0x79c   :  { %8417 = vmatpush1.bf16.msra.mxu0 %v11385_v9  ;;  %v11455_v9 = vld [vmem:[%s14540_s12 + $0x404] ss:$28 sps:$4 sm:$0xff]  }
 0x79d   :  { %9966 = vmatpush3.bf16.msra.mxu1 %v11389_v15  ;;  %8418 = vmatprep.subr.bf16.mxu0 %v11392_v1  ;;  %v11459_v15 = vld [vmem:[%s14540_s12 + $0x43c] ss:$28 sps:$4 sm:$0xff]  }
 0x79e   :  { %9967 = vmatprep.subr.bf16.mxu1 %v11393_v58  ;;  %v11457_v1 = vld [vmem:[%s14540_s12 + $0x438] ss:$28 sps:$4 sm:$0xff]   ;;  %v11460_v58 = vld [vmem:[%s14540_s12 + $0x7c0] ss:$28 sps:$4 sm:$0xff]  }
 0x7a0   :  { %8419 = vmatpush1.bf16.msra.mxu0 %v11390_v62  ;;  %v11463_v62 = vld [vmem:[%s14540_s12 + $0x474] ss:$28 sps:$4 sm:$0xff]  }
 0x7a1   :  { %9968 = vmatpush3.bf16.msra.mxu1 %v11394_v3  ;;  %8420 = vmatprep.subr.bf16.mxu0 %v11397_v4  ;;  %v11461_v3 = vld [vmem:[%s14540_s12 + $0x470] ss:$28 sps:$4 sm:$0xff]   ;;  %v11464_v4 = vld [vmem:[%s14540_s12 + $0x7f8] ss:$28 sps:$4 sm:$0xff]  }
 0x7a2   :  { %9969 = vmatprep.subr.bf16.mxu1 %v11398_v6  ;;  %v11467_v6 = vld [vmem:[%s14540_s12 + $0x4ac] ss:$28 sps:$4 sm:$0xff]  }
 0x7a4   :  { %8421 = vmatpush1.bf16.msra.mxu0 %v11395_v61  ;;  %v11468_v61 = vld [vmem:[%s14540_s12 + $0x830] ss:$0 sps:$4 sm:$0xff]  }
 0x7a5   :  { %9970 = vmatpush3.bf16.msra.mxu1 %v11399_v7  ;;  %8422 = vmatprep.subr.bf16.mxu0 %v11402_v8  ;;  %v11465_v7 = vld [vmem:[%s14540_s12 + $0x4a8] ss:$28 sps:$4 sm:$0xff]  }
 0x7a6   :  { %9971 = vmatprep.subr.bf16.mxu1 %v11403_v10  ;;  %v11471_v8 = vld [vmem:[%s14540_s12 + $0x4e4] ss:$28 sps:$4 sm:$0xff]   ;;  %v8160_v10 = vsel %vm3492_vm7, %v11468_v61, 0 }
 0x7a8   :  { %8423 = vmatpush1.bf16.msra.mxu0 %v11400_v20  ;;  %v11469_v20 = vld [vmem:[%s14540_s12 + $0x4e0] ss:$28 sps:$4 sm:$0xff]  }
 0x7a9   :  { %9972 = vmatpush3.bf16.msra.mxu1 %v11404_v2  ;;  %8424 = vmatprep.subr.bf16.mxu0 %v11407_v21  ;;  %v11474_v2 = vld [vmem:[%s14540_s12 + $0x51c] ss:$28 sps:$4 sm:$0xff]   ;;  %v11477_v21 = vld [vmem:[%s14540_s12 + $0x554] ss:$28 sps:$4 sm:$0xff]  }
 0x7aa   :  { %9979 = vmatprep.subr.bf16.mxu1 %v11408_v53  ;;  %v11475_v53 = vld [vmem:[%s14540_s12 + $0x550] ss:$28 sps:$4 sm:$0xff]  }
 0x7ac   :  { %8564 = vmatmul.mubr.bf16.vlgmr.msra.gmra.mrb[56].mxu1 %v13820_v13  ;;  %8425 = vmatpush1.bf16.msra.mxu0 %v11405_v34  ;;  %v11480_v34 = vld [vmem:[%s14540_s12 + $0x58c] ss:$28 sps:$4 sm:$0xff]  }
 0x7ad   :  { %9980 = vmatpush3.bf16.msra.mxu1 %v11409_v0  ;;  %8603 = vmatprep.mubr.bf16.mxu1 %v13830_v23  ;;  %v11478_v0 = vld [vmem:[%s14540_s12 + $0x588] ss:$28 sps:$4 sm:$0xff]  }
 0x7ae   :  { %8426 = vmatprep.subr.bf16.mxu0 %v11412_v43  ;;  %9981 = vmatprep.subr.bf16.mxu1 %v11413_v25  ;;  %v11483_v43 = vld [vmem:[%s14540_s12 + $0x5c4] ss:$28 sps:$4 sm:$0xff]  }
 0x7af   :  { %v11481_v25 = vld [vmem:[%s14540_s12 + $0x5c0] ss:$28 sps:$4 sm:$0xff]  }
 0x7b0   :  { %8427 = vmatpush1.bf16.msra.mxu0 %v11410_v49  ;;  %v11486_v49 = vld [vmem:[%s14540_s12 + $0x5fc] ss:$28 sps:$4 sm:$0xff]  }
 0x7b1   :  { %9982 = vmatpush3.bf16.msra.mxu1 %v11414_v57  ;;  %8428 = vmatprep.subr.bf16.mxu0 %v11417_v32  ;;  %v11484_v57 = vld [vmem:[%s14540_s12 + $0x5f8] ss:$28 sps:$4 sm:$0xff]  }
 0x7b2   :  { %9983 = vmatprep.subr.bf16.mxu1 %v11418_v33  ;;  %v11489_v32 = vld [vmem:[%s14540_s12 + $0x634] ss:$28 sps:$4 sm:$0xff]  }
 0x7b3   :  { %v11487_v33 = vld [vmem:[%s14540_s12 + $0x630] ss:$28 sps:$4 sm:$0xff]  }
 0x7b4   :  { %8429 = vmatpush1.bf16.msra.mxu0 %v11415_v36  ;;  %v11492_v36 = vld [vmem:[%s14540_s12 + $0x66c] ss:$28 sps:$4 sm:$0xff]  }
 0x7b5   :  { %9984 = vmatpush3.bf16.msra.mxu1 %v11419_v63  ;;  %8430 = vmatprep.subr.bf16.mxu0 %v11422_v35  ;;  %v11490_v63 = vld [vmem:[%s14540_s12 + $0x668] ss:$28 sps:$4 sm:$0xff]  }
 0x7b6   :  { %9985 = vmatprep.subr.bf16.mxu1 %v11423_v30  ;;  %v11495_v35 = vld [vmem:[%s14540_s12 + $0x6a4] ss:$28 sps:$4 sm:$0xff]  }
 0x7b7   :  { %v11493_v30 = vld [vmem:[%s14540_s12 + $0x6a0] ss:$28 sps:$4 sm:$0xff]  }
 0x7b8   :  { %8431 = vmatpush1.bf16.msra.mxu0 %v11420_v37  ;;  %v11498_v37 = vld [vmem:[%s14540_s12 + $0x6dc] ss:$28 sps:$4 sm:$0xff]  }
 0x7b9   :  { %9986 = vmatpush3.bf16.msra.mxu1 %v11424_v18  ;;  %8432 = vmatprep.subr.bf16.mxu0 %v11427_v46  ;;  %v11496_v18 = vld [vmem:[%s14540_s12 + $0x6d8] ss:$28 sps:$4 sm:$0xff]  }
 0x7ba   :  { %9987 = vmatprep.subr.bf16.mxu1 %v11428_v38  ;;  %v11501_v46 = vld [vmem:[%s14540_s12 + $0x714] ss:$28 sps:$4 sm:$0xff]  }
 0x7bb   :  { %v11499_v38 = vld [vmem:[%s14540_s12 + $0x710] ss:$28 sps:$4 sm:$0xff]  }
 0x7bc   :  { %8433 = vmatpush1.bf16.msra.mxu0 %v11425_v40  ;;  %v11504_v40 = vld [vmem:[%s14540_s12 + $0x74c] ss:$28 sps:$4 sm:$0xff]  }
 0x7bd   :  { %9988 = vmatpush3.bf16.msra.mxu1 %v11429_v41  ;;  %8434 = vmatprep.subr.bf16.mxu0 %v11432_v42  ;;  %v11502_v41 = vld [vmem:[%s14540_s12 + $0x748] ss:$28 sps:$4 sm:$0xff]  }
 0x7be   :  { %9989 = vmatprep.subr.bf16.mxu1 %v11433_v44  ;;  %v11507_v42 = vld [vmem:[%s14540_s12 + $0x784] ss:$28 sps:$4 sm:$0xff]  }
 0x7bf   :  { %v11505_v44 = vld [vmem:[%s14540_s12 + $0x780] ss:$28 sps:$4 sm:$0xff]  }
 0x7c0   :  { %8435 = vmatpush1.bf16.msra.mxu0 %v11430_v39  ;;  %v11513_v39 = vld [vmem:[%s14540_s12 + $0x7f4] ss:$28 sps:$4 sm:$0xff]  }
 0x7c1   :  { %9990 = vmatpush3.bf16.msra.mxu1 %v11434_v47  ;;  %8436 = vmatprep.subr.bf16.mxu0 %v11437_v48  ;;  %v6749_v47 = vld [vmem:[%s14540_s12 + $0x828] sm:$0xff] }
 0x7c2   :  { %9991 = vmatprep.subr.bf16.mxu1 %v11438_v14  ;;  %v11511_v48 = vld [vmem:[%s14540_s12 + $0x7f0] ss:$28 sps:$4 sm:$0xff]   ;;  %v9722_v14 = vcombine.high %v6749_v47, %v6749_v47 }
 0x7c4   :  { %8437 = vmatpush1.bf16.msra.mxu0 %v11435_v26  ;;  %v9721_v26 = vcombine.low %v6749_v47, %v6749_v47 }
 0x7c5   :  { %9992 = vmatpush3.bf16.msra.mxu1 %v11439_v50  ;;  %8438 = vmatprep.subr.bf16.mxu0 %v11442_v52  ;;  %v14475_v52 = vld [vmem:[%s14541_s13] sm:$0x7f] }
 0x7c6   :  { %9993 = vmatprep.subr.bf16.mxu1 %v11443_v54  ;;  %v8154_v50 = vsel %vm3492_vm7, %v9721_v26, 0  ;;  %v6756_v54 = vrot.slane %v14475_v52, %v12807_v16 }
 0x7c8   :  { %8439 = vmatpush1.bf16.msra.mxu0 %v11440_v55  ;;  %v6764_v55 = vrot.slane %v14475_v52, %v12855_v28 }
 0x7c9   :  { %9994 = vmatpush3.bf16.msra.mxu1 %v11444_v11  ;;  %8449 = vmatprep.subr.bf16.mxu0 %v11447_v56  ;;  %v6760_v11 = vrot.slane %v14475_v52, %v12810_v17  ;;  %v6768_v56 = vrot.slane %v14475_v52, %v12813_v19 }
 0x7ca   :  { %10074 = vmatprep.subr.bf16.mxu1 %v11702_v59 }
 0x7cb   :  { %8441 = vmatmul.mubr.bf16.vlgmr.msra.gmra.mrb[44].mxu0 %v13820_v13  ;;  %v11453_v13 = vld [vmem:[%s14540_s12 + $0x400] ss:$28 sps:$4 sm:$0xff]  }
 0x7cc   :  { %8604 = vmatmul.mubr.bf16.vlgmr.msra.gmra.mrb[60].mxu1 %v14035_v27  ;;  %8450 = vmatpush1.bf16.msra.mxu0 %v11445_v24 }
 0x7cd   :  { %8481 = vmatprep.mubr.bf16.mxu0 %v13830_v23  ;;  %10075 = vmatpush3.bf16.msra.mxu1 %v11448_v60  ;;  %v11456_v23 = vld [vmem:[%s14540_s12 + $0x788] ss:$28 sps:$4 sm:$0xff]  }
 0x7ce   :  { %8451 = vmatprep.subr.bf16.mxu0 %v11451_v5  ;;  %10076 = vmatprep.subr.bf16.mxu1 %v11702_v59 }
 0x7cf   :  { %10086 = vmatprep.mubr.msk.bf16.mxu1 %vm11703_vm1, %v11702_v59 }
 0x7d0   :  { %8452 = vmatpush1.bf16.msra.mxu0 %v11449_v29 }
 0x7d1   :  { %10077 = vmatpush3.bf16.msra.mxu1 %v11452_v31  ;;  %8453 = vmatprep.subr.bf16.mxu0 %v11455_v9 }
 0x7d2   :  { %10078 = vmatprep.subr.bf16.mxu1 %v11702_v59 }
 0x7d4   :  { %8454 = vmatpush1.bf16.msra.mxu0 %v11453_v13 }
 0x7d5   :  { %10079 = vmatpush3.bf16.msra.mxu1 %v11456_v23  ;;  %8455 = vmatprep.subr.bf16.mxu0 %v11459_v15 }
 0x7d6   :  { %10080 = vmatprep.subr.bf16.mxu1 %v11702_v59 }
 0x7d8   :  { %8456 = vmatpush1.bf16.msra.mxu0 %v11457_v1 }
 0x7d9   :  { %10081 = vmatpush3.bf16.msra.mxu1 %v11460_v58  ;;  %8457 = vmatprep.subr.bf16.mxu0 %v11463_v62 }
 0x7da   :  { %10082 = vmatprep.subr.bf16.mxu1 %v11702_v59 }
 0x7dc   :  { %8458 = vmatpush1.bf16.msra.mxu0 %v11461_v3 }
 0x7dd   :  { %10083 = vmatpush3.bf16.msra.mxu1 %v11464_v4  ;;  %8459 = vmatprep.subr.bf16.mxu0 %v11467_v6 }
 0x7de   :  { %10084 = vmatprep.subr.bf16.mxu1 %v11702_v59  ;;  %v11472_v59 = vld [vmem:[%s14540_s12 + $0x518] ss:$28 sps:$4 sm:$0xff]  }
 0x7e0   :  { %8460 = vmatpush1.bf16.msra.mxu0 %v11465_v7 }
 0x7e1   :  { %10085 = vmatpush3.bf16.msra.mxu1 %v8160_v10  ;;  %8461 = vmatprep.subr.bf16.mxu0 %v11471_v8 }
 0x7e4   :  { %10087 = vmatmul.mubr.msk.bf16.vlgmr.msra.gmra.mrb[64].mxu1 %vm3488_vm8, %v14112_v45  ;;  %8462 = vmatpush1.bf16.msra.mxu0 %v11469_v20 }
 0x7e5   :  { %8463 = vmatprep.subr.bf16.mxu0 %v11474_v2 }
 0x7e8   :  { %8464 = vmatpush1.bf16.msra.mxu0 %v11472_v59 }
 0x7e9   :  { %8465 = vmatprep.subr.bf16.mxu0 %v11477_v21 }
 0x7ec   :  { %8466 = vmatpush1.bf16.msra.mxu0 %v11475_v53 }
 0x7ed   :  { %8467 = vmatprep.subr.bf16.mxu0 %v11480_v34 }
 0x7f0   :  { %8468 = vmatpush1.bf16.msra.mxu0 %v11478_v0 }
 0x7f1   :  { %8469 = vmatprep.subr.bf16.mxu0 %v11483_v43 }
 0x7f4   :  { %8470 = vmatpush1.bf16.msra.mxu0 %v11481_v25 }
 0x7f5   :  { %8471 = vmatprep.subr.bf16.mxu0 %v11486_v49 }
 0x7f8   :  { %8472 = vmatpush1.bf16.msra.mxu0 %v11484_v57 }
 0x7f9   :  { %8473 = vmatprep.subr.bf16.mxu0 %v11489_v32 }
 0x7fc   :  { %8474 = vmatpush1.bf16.msra.mxu0 %v11487_v33 }
 0x7fd   :  { %8475 = vmatprep.subr.bf16.mxu0 %v11492_v36 }
 0x800   :  { %8476 = vmatpush1.bf16.msra.mxu0 %v11490_v63 }
 0x801   :  { %8477 = vmatprep.subr.bf16.mxu0 %v11495_v35 }
 0x804   :  { %8478 = vmatpush1.bf16.msra.mxu0 %v11493_v30 }
 0x805   :  { %8479 = vmatprep.subr.bf16.mxu0 %v11498_v37 }
 0x808   :  { %8480 = vmatpush1.bf16.msra.mxu0 %v11496_v18 }
 0x809   :  { %8490 = vmatprep.subr.bf16.mxu0 %v11501_v46 }
 0x80b   :  { %8482 = vmatmul.mubr.bf16.vlgmr.msra.gmra.mrb[44].mxu0 %v14035_v27  ;;  %v11510_v27 = vld [vmem:[%s14540_s12 + $0x7bc] ss:$28 sps:$4 sm:$0xff]  }
 0x80c   :  { %8491 = vmatpush1.bf16.msra.mxu0 %v11499_v38  ;;  %8522 = vmatprep.mubr.bf16.mxu0 %v11701_v22  ;;  %v11508_v22 = vld [vmem:[%s14540_s12 + $0x7b8] ss:$28 sps:$4 sm:$0xff]   ;;  %s11705_s12 = smov [#allocation6]  }
 0x80d   :  { %8492 = vmatprep.subr.bf16.mxu0 %v11504_v40  ;;  %s8737_s13 = sshll.u32 %s11705_s12, 4  ;;  %s8738_s13 = int_to_ptr.vmem [resolvable:$true] %s8737_s13 }
 0x80e   :  { %s11648_s28 = scalar_lea.vmem %s8738_s13, 128  ;;  %p11653_p9 = scmp.lt.s32.totalorder %s8738_s13, %s8738_s13 }
 0x80f   :  { %p11649_p8 = scmp.ne.s32.totalorder %s8738_s13, %s11648_s28  ;;  %p11654_p10 = scmp.lt.s32.totalorder %s11648_s28, %s11648_s28 }
 0x810   :  { %8493 = vmatpush1.bf16.msra.mxu0 %v11502_v41 }
 0x811   :  { %8494 = vmatprep.subr.bf16.mxu0 %v11507_v42  ;;  %p11655_p11 = por %p11654_p10, %p11653_p9 }
 0x813   :  { %p11656_p12 = pnand %p11655_p11, %p11649_p8 }
 0x814   :  { %8495 = vmatpush1.bf16.msra.mxu0 %v11505_v44 }
 0x815   :  { %8496 = vmatprep.subr.bf16.mxu0 %v11510_v27  ;;  %v6779_v27 = vsub.s32 6, %v12799_v12 }
 0x818   :  { %8497 = vmatpush1.bf16.msra.mxu0 %v11508_v22  ;;  %v6780_v22 = vrot.slane %v14475_v52, %v6779_v27 }
 0x819   :  { %8498 = vmatprep.subr.bf16.mxu0 %v11513_v39 }
 0x81c   :  { %8499 = vmatpush1.bf16.msra.mxu0 %v11511_v48 }
 0x81d   :  { %9728 = vmatprep.subr.msk.bf16.mxu0 %vm3492_vm7, %v9722_v14 }
 0x820   :  { %8501 = vmatpush1.bf16.msra.mxu0 %v8154_v50 }
 0x823   :  { %9729 = vmatmul.mubr.msk.bf16.vlgmr.msra.gmra.mrb[44].mxu0 %vm3488_vm8, %v14112_v45 }
 0x85e   :  { %v8278_v24 = vpop.f32.mrb[40].mxu0  ;;  %v8401_v60 = vpop.f32.mrb[52].mxu1 }
 0x85f   :  { %v10104_v45 = vadd.f32 %v8278_v24, %v6756_v54  ;;  %v10106_v5 = vadd.f32 %v8401_v60, %v6764_v55  ;;  %v8280_v29 = vpop.f32.mrb[41].mxu0  ;;  %v8403_v31 = vpop.f32.mrb[53].mxu1 }
 0x860   :  { %v10105_v9 = vadd.f32 %v8280_v29, %v6760_v11  ;;  %v10107_v13 = vadd.f32 %v8403_v31, %v6768_v56  ;;  %v8282_v23 = vpop.f32.mrb[42].mxu0  ;;  %v8405_v15 = vpop.f32.mrb[54].mxu1 }
 0x861   :  { %vm8651_vm1 = vcmp.ge.f32.partialorder %v10104_v45, 0.0  ;;  %v8658_v16 = vsub.f32 0.0, %v10104_v45  ;;  %vm8653_vm7 = vcmp.ge.f32.partialorder %v10106_v5, 0.0  ;;  %v8660_v28 = vsub.f32 0.0, %v10106_v5  ;;  %v8283_v1 = vpop.f32.mrb[43].mxu0  ;;  %v8406_v58 = vpop.f32.mrb[55].mxu1 }
 0x862   :  { %vm8652_vm8 = vcmp.ge.f32.partialorder %v10105_v9, 0.0  ;;  %v8659_v17 = vsub.f32 0.0, %v10105_v9  ;;  %vm8654_vm13 = vcmp.ge.f32.partialorder %v10107_v13, 0.0  ;;  %v8661_v19 = vsub.f32 0.0, %v10107_v13 }
 0x863   :  { %v8665_v62 = vsel %vm8651_vm1, %v8658_v16, %v10104_v45  ;;  %v8667_v3 = vsel %vm8653_vm7, %v8660_v28, %v10106_v5 }
 0x864   :  { %v8672_v4 = vmul.f32 1.442695, %v8665_v62  ;;  %v8676_v6 = vmul.f32 1.442695, %v8667_v3  ;;  %v8666_v61 = vsel %vm8652_vm8, %v8659_v17, %v10105_v9  ;;  %v8668_v7 = vsel %vm8654_vm13, %v8661_v19, %v10107_v13 }
 0x865   :  { %v8674_v8 = vmul.f32 1.442695, %v8666_v61  ;;  %v8678_v10 = vmul.f32 1.442695, %v8668_v7 }
 0x866   :  { %11598 = vpow2.f32 %v8672_v4 }
 0x867   :  { %11600 = vpow2.f32 %v8676_v6 }
 0x868   :  { %11602 = vpow2.f32 %v8674_v8 }
 0x869   :  { %11604 = vpow2.f32 %v8678_v10 }
 0x870   :  { %v11599_v20 = vpop.eup %11598 }
 0x871   :  { %v11601_v2 = vpop.eup %11600  ;;  %v8686_v59 = vadd.f32 1.0, %v11599_v20 }
 0x872   :  { %v11603_v21 = vpop.eup %11602  ;;  %v8688_v53 = vadd.f32 1.0, %v11601_v2 }
 0x873   :  { %v11605_v34 = vpop.eup %11604  ;;  %11606 = vrcp.f32 %v8686_v59  ;;  %v8687_v0 = vadd.f32 1.0, %v11603_v21 }
 0x874   :  { %11608 = vrcp.f32 %v8688_v53  ;;  %v8689_v43 = vadd.f32 1.0, %v11605_v34 }
 0x875   :  { %11610 = vrcp.f32 %v8687_v0 }
 0x876   :  { %11612 = vrcp.f32 %v8689_v43 }
 0x87d   :  { %v11607_v25 = vpop.eup %11606 }
 0x87e   :  { %v11609_v49 = vpop.eup %11608  ;;  %v8700_v57 = vmul.f32 %v11607_v25, %v11599_v20 }
 0x87f   :  { %v11611_v32 = vpop.eup %11610  ;;  %v8702_v33 = vmul.f32 %v11609_v49, %v11601_v2  ;;  %v9973_v36 = vpop.f32.mrb[56].mxu1 }
 0x880   :  { %v11613_v63 = vpop.eup %11612  ;;  %v8707_v35 = vsel %vm8651_vm1, %v11607_v25, %v8700_v57  ;;  %v8701_v30 = vmul.f32 %v11611_v32, %v11603_v21  ;;  %v9974_v37 = vpop.f32.mrb[57].mxu1 }
 0x881   :  { %8714 = vst [vmem:[#allocation5] sm:$0xff] %v8707_v35  ;;  %v8709_v18 = vsel %vm8653_vm7, %v11609_v49, %v8702_v33  ;;  %v8703_v46 = vmul.f32 %v11613_v63, %v11605_v34  ;;  %v9975_v38 = vadd.f32 %v9974_v37, %v9973_v36  ;;  %v9976_v40 = vpop.f32.mrb[58].mxu1 }
 0x882   :  { %8716 = vst [vmem:[#allocation5 + $0x10] sm:$0xff] %v8709_v18  ;;  %v8708_v41 = vsel %vm8652_vm8, %v11611_v32, %v8701_v30  ;;  %v9977_v42 = vpop.f32.mrb[59].mxu1 }
 0x883   :  { %8715 = vst [vmem:[#allocation5 + $0x8] sm:$0xff] %v8708_v41  ;;  %v8710_v44 = vsel %vm8654_vm13, %v11613_v63, %v8703_v46 }
 0x884   :  { %8717 = vst [vmem:[#allocation5 + $0x18] sm:$0xff] %v8710_v44 }
 0x885   :  { %11659 = shalt.err (!%p11656_p12)
}
 0x886   :  { %s11660_s8 = scalar_lea.hbm %s14543_s15, 128 }
 0x887   :  { %p11661_p13 = scmp.ne.s32.totalorder %s14543_s15, %s11660_s8  ;;  %p11664_p0 = scmp.lt.u32.totalorder %s11660_s8, %s14543_s15 }
 0x889   :  { %p11666_p1 = pnand %p11664_p0, %p11661_p13 }
 0x88b   :  { %11669 = shalt.err (!%p11666_p1)
}
 0x88c   :  { %8740 = dma.vmem_to_hbm [thread:$0]  %s8738_s13, 128, %s14543_s15, [#allocation7]   ;;  %v8566_v48 = vadd.f32 %v9975_v38, %v6780_v22  ;;  %v6775_v16 = vsub.s32 5, %v12799_v12  ;;  %v6772_v28 = vrot.slane %v14475_v52, %v12833_v51 }
 0x88d   :  { %s11706_s15 = smov [#allocation5]  }
 0x88e   :  { %v6776_v1 = vrot.slane %v14475_v52, %v6775_v16  ;;  %s8727_s17 = sshll.u32 %s11706_s15, 4  ;;  %s8728_s17 = int_to_ptr.vmem [resolvable:$true] %s8727_s17 }
 0x88f   :  { %s11670_s18 = scalar_lea.vmem %s8728_s17, 896  ;;  %p11675_p3 = scmp.lt.s32.totalorder %s8728_s17, %s8728_s17 }
 0x890   :  { %p11671_p2 = scmp.ne.s32.totalorder %s8728_s17, %s11670_s18  ;;  %p11676_p4 = scmp.lt.s32.totalorder %s11670_s18, %s11670_s18 }
 0x892   :  { %p11677_p5 = por %p11676_p4, %p11675_p3 }
 0x894   :  { %p11678_p6 = pnand %p11677_p5, %p11671_p2 }
 0x89f   :  { %v9995_v39 = vpop.f32.mrb[60].mxu1 }
 0x8a0   :  { %v9996_v47 = vpop.f32.mrb[61].mxu1 }
 0x8a1   :  { %v9997_v14 = vadd.f32 %v9996_v47, %v9995_v39  ;;  %v9998_v26 = vpop.f32.mrb[62].mxu1 }
 0x8a2   :  { %v9999_v50 = vpop.f32.mrb[63].mxu1 }
 0x8a3   :  { %v8606_v54 = vadd.f32 %v9997_v14, %v8566_v48 }
 0x8b7   :  { %v8645_v55 = vpop.f32.mrb[64].mxu1 }
 0x8b8   :  { %v8646_v11 = vadd.f32 %v8645_v55, %v8606_v54  ;;  %v10088_v56 = vpop.f32.mrb[65].mxu1 }
 0x8b9   :  { %v8648_v24 = vpop.f32.mrb[66].mxu1 }
 0x8ba   :  { %vm8657_vm14 = vcmp.ge.f32.partialorder %v8646_v11, 0.0  ;;  %v8664_v60 = vsub.f32 0.0, %v8646_v11  ;;  %v10089_v45 = vpop.f32.mrb[67].mxu1 }
 0x8bc   :  { %v8671_v5 = vsel %vm8657_vm14, %v8664_v60, %v8646_v11 }
 0x8bd   :  { %v8684_v29 = vmul.f32 1.442695, %v8671_v5 }
 0x8bf   :  { %11614 = vpow2.f32 %v8684_v29 }
 0x8c9   :  { %v11615_v31 = vpop.eup %11614 }
 0x8ca   :  { %v8692_v9 = vadd.f32 1.0, %v11615_v31 }
 0x8cc   :  { %11616 = vrcp.f32 %v8692_v9 }
 0x8d6   :  { %v11617_v13 = vpop.eup %11616 }
 0x8d7   :  { %v8706_v23 = vmul.f32 %v11617_v13, %v11615_v31 }
 0x8d9   :  { %v8713_v15 = vsel %vm8657_vm14, %v11617_v13, %v8706_v23 }
 0x8da   :  { %8720 = vst.msk [vmem:[#allocation5 + $0x30] sm:$0xff] %vm1689_vm0, %v8713_v15 }
 0x8f6   :  { %v8524_v58 = vpop.f32.mrb[44].mxu0 }
 0x8f7   :  { %v10108_v17 = vadd.f32 %v8524_v58, %v6772_v28  ;;  %v8526_v19 = vpop.f32.mrb[45].mxu0 }
 0x8f8   :  { %v10109_v62 = vadd.f32 %v8526_v19, %v6776_v1  ;;  %v8528_v3 = vpop.f32.mrb[46].mxu0 }
 0x8f9   :  { %vm8655_vm15 = vcmp.ge.f32.partialorder %v10108_v17, 0.0  ;;  %v8662_v4 = vsub.f32 0.0, %v10108_v17  ;;  %v8529_v6 = vpop.f32.mrb[47].mxu0 }
 0x8fa   :  { %vm8656_vm2 = vcmp.ge.f32.partialorder %v10109_v62, 0.0  ;;  %v8663_v61 = vsub.f32 0.0, %v10109_v62 }
 0x8fb   :  { %v8669_v7 = vsel %vm8655_vm15, %v8662_v4, %v10108_v17 }
 0x8fc   :  { %v8680_v8 = vmul.f32 1.442695, %v8669_v7  ;;  %v8670_v12 = vsel %vm8656_vm2, %v8663_v61, %v10109_v62 }
 0x8fd   :  { %v8682_v10 = vmul.f32 1.442695, %v8670_v12 }
 0x8fe   :  { %11618 = vpow2.f32 %v8680_v8 }
 0x8ff   :  { %11620 = vpow2.f32 %v8682_v10 }
 0x908   :  { %v11619_v51 = vpop.eup %11618 }
 0x909   :  { %v11621_v52 = vpop.eup %11620  ;;  %v8690_v20 = vadd.f32 1.0, %v11619_v51 }
 0x90a   :  { %v8691_v2 = vadd.f32 1.0, %v11621_v52 }
 0x90b   :  { %11622 = vrcp.f32 %v8690_v20 }
 0x90c   :  { %11624 = vrcp.f32 %v8691_v2 }
 0x915   :  { %v11623_v59 = vpop.eup %11622 }
 0x916   :  { %v11625_v21 = vpop.eup %11624  ;;  %v8704_v53 = vmul.f32 %v11623_v59, %v11619_v51 }
 0x917   :  { %v8705_v34 = vmul.f32 %v11625_v21, %v11621_v52 }
 0x918   :  { %v8711_v0 = vsel %vm8655_vm15, %v11623_v59, %v8704_v53 }
 0x919   :  { %8718 = vst [vmem:[#allocation5 + $0x20] sm:$0xff] %v8711_v0  ;;  %v8712_v43 = vsel %vm8656_vm2, %v11625_v21, %v8705_v34 }
 0x91a   :  { %8719 = vst [vmem:[#allocation5 + $0x28] sm:$0xff] %v8712_v43 }
 0x91b   :  { %11681 = shalt.err (!%p11678_p6)
}
 0x91c   :  { %s11682_s22 = scalar_lea.hbm %s14542_s14, 896 }
 0x91d   :  { %p11683_p7 = scmp.ne.s32.totalorder %s14542_s14, %s11682_s22  ;;  %p11686_p8 = scmp.lt.u32.totalorder %s11682_s22, %s14542_s14 }
 0x91f   :  { %p11688_p9 = pnand %p11686_p8, %p11683_p7 }
 0x921   :  { %11691 = shalt.err (!%p11688_p9)
}
 0x922   :  { %8730 = dma.vmem_to_hbm [thread:$0]  %s8728_s17, 896, %s14542_s14, [#allocation4]  }
 0x923   :  { %11694 = dma.done.wait [#allocation4], 896  }
 0x924   :  { %11695 = vsyncadd [#allocation4], 4294966400 }
 0x925   :  { %11696 = dma.done.wait [#allocation7], 128  }
 0x926   :  { %11697 = vsyncadd [#allocation7], 4294967168 }
 0x927   :  { %8747 = vsyncpa [#allocation3], 1 }
 0x928   :  { %8748 = vsyncpa [#allocation4], 1 }
 0x929   :  { %8749 = vsyncpa [#allocation7], 1 }

// kernel: tpu_custom_call.1
= control target key start
LH: loop header
LB: loop body
LE: loop exit
PB: predicated region body
PF: predicated region fallthrough
CT: control target
= control target key end

     0   :  { %21 = vsyncpa [#allocation3], 0  ;;  %s14528_s0 = inlined_call_operand.vmem [shape: bf16[8,784], index: 0, kind: input, shape index: {}]   ;;  %s14529_s1 = inlined_call_operand.vmem [shape: f32[8,64], index: 1, kind: input, shape index: {}]   ;;  %s14530_s2 = inlined_call_operand.vmem [shape: bf16[784,600], index: 2, kind: input, shape index: {}]   ;;  %s14531_s3 = inlined_call_operand.vmem [shape: f32[1,600], index: 3, kind: input, shape index: {}]   ;;  %s14532_s4 = inlined_call_operand.vmem [shape: bf16[600,600], index: 4, kind: input, shape index: {}]   ;;  %s14533_s5 = inlined_call_operand.vmem [shape: f32[1,600], index: 5, kind: input, shape index: {}]   ;;  %s14534_s6 = inlined_call_operand.vmem [shape: bf16[600,128], index: 6, kind: input, shape index: {}]   ;;  %s14535_s7 = inlined_call_operand.vmem [shape: f32[1,128], index: 7, kind: input, shape index: {}]   ;;  %s14536_s8 = inlined_call_operand.vmem [shape: bf16[64,600], index: 8, kind: input, shape index: {}]   ;;  %s14537_s9 = inlined_call_operand.vmem [shape: f32[1,600], index: 9, kind: input, shape index: {}]   ;;  %s14538_s10 = inlined_call_operand.hbm [shape: bf16[600,600], index: 10, kind: input, shape index: {}]   ;;  %s14539_s11 = inlined_call_operand.vmem [shape: f32[1,600], index: 11, kind: input, shape index: {}]   ;;  %s14540_s12 = inlined_call_operand.vmem [shape: bf16[600,784], index: 12, kind: input, shape index: {}]   ;;  %s14541_s13 = inlined_call_operand.vmem [shape: f32[1,784], index: 13, kind: input, shape index: {}]   ;;  %s14542_s14 = inlined_call_operand.hbm [shape: f32[8,784], index: 14, kind: output, shape index: {0}]   ;;  %s14543_s15 = inlined_call_operand.hbm [shape: f32[8,128], index: 15, kind: output, shape index: {1}]  }
   0x1   :  { %22 = vsyncpa [#allocation4], 0 }
   0x2   :  { %23 = vsyncpa [#allocation7], 0  ;;  %s11698_s18 = smov [#allocation2]   ;;  %s11626_s22 = scalar_lea.hbm %s14538_s10, 24000 }
   0x3   :  { %s49_s19 = sshll.u32 %s11698_s18, 4  ;;  %p11627_p0 = scmp.ne.s32.totalorder %s14538_s10, %s11626_s22  ;;  %s50_s19 = int_to_ptr.vmem [resolvable:$true] %s49_s19 }
   0x4   :  { %p11630_p1 = scmp.lt.u32.totalorder %s11626_s22, %s14538_s10 }
   0x6   :  { %p11632_p2 = pnand %p11630_p1, %p11627_p0 }
   0x8   :  { %11635 = shalt.err (!%p11632_p2)
}
   0x9   :  { %s11636_s27 = scalar_lea.vmem %s50_s19, 24000  ;;  %p11641_p4 = scmp.lt.s32.totalorder %s50_s19, %s50_s19 }
   0xa   :  { %p11637_p3 = scmp.ne.s32.totalorder %s50_s19, %s11636_s27  ;;  %p11642_p5 = scmp.lt.s32.totalorder %s11636_s27, %s11636_s27 }
   0xc   :  { %p11643_p6 = por %p11642_p5, %p11641_p4 }
   0xe   :  { %p11644_p7 = pnand %p11643_p6, %p11637_p3 }
  0x10   :  { %11647 = shalt.err (!%p11644_p7)
}
  0x11   :  { %s11699_s28 = smov 320   ;;  %s11700_s29 = smov 20  }
  0x12   :  { %55 = dma.hbm_to_vmem [thread:$0]  %s14538_s10, 24000, %s50_s19, [#allocation3], %s11699_s28, %s11699_s28, %s11700_s29  }
  0x13   :  { %11692 = dma.done.wait [#allocation3], 24000  }
  0x14   :  { %11693 = vsyncadd [#allocation3], 4294943296  ;;  %v10195_v0 = vld [vmem:[%s14530_s2 + $0x4] ss:$20 sps:$4 sm:$0xff]   ;;  %v10197_v1 = vld [vmem:[%s14530_s2 + $0xc] ss:$20 sps:$4 sm:$0xff]  }
  0x15   :  { %1693 = vmatprep.subr.bf16.mxu0 %v10195_v0  ;;  %v10199_v2 = vld [vmem:[%s14530_s2] ss:$20 sps:$4 sm:$0xff]   ;;  %v10200_v3 = vld [vmem:[%s14530_s2 + $0x8] ss:$20 sps:$4 sm:$0xff]   ;;  %1857 = vmatprep.subr.bf16.mxu1 %v10197_v1  ;;  %v10206_v7 = vld [vmem:[%s14530_s2 + $0x30] ss:$20 sps:$4 sm:$0xff]  }
  0x16   :  { %v10201_v4 = vld [vmem:[%s14530_s2 + $0x2c] ss:$20 sps:$4 sm:$0xff]   ;;  %1694 = vmatpush1.bf16.msra.mxu0 %v10199_v2  ;;  %1858 = vmatpush1.bf16.msra.mxu1 %v10200_v3  ;;  %v10203_v5 = vld [vmem:[%s14530_s2 + $0x34] ss:$20 sps:$4 sm:$0xff]   ;;  %v10209_v9 = vld [vmem:[%s14530_s2 + $0x5c] ss:$20 sps:$4 sm:$0xff]  }
  0x17   :  { %v10205_v6 = vld [vmem:[%s14530_s2 + $0x28] ss:$20 sps:$4 sm:$0xff]   ;;  %1695 = vmatprep.subr.bf16.mxu0 %v10201_v4  ;;  %1859 = vmatprep.subr.bf16.mxu1 %v10203_v5  ;;  %v10211_v10 = vld [vmem:[%s14530_s2 + $0x50] ss:$20 sps:$4 sm:$0xff]   ;;  %v10212_v11 = vld [vmem:[%s14530_s2 + $0x58] ss:$20 sps:$4 sm:$0xff]  }
  0x18   :  { %v10207_v8 = vld [vmem:[%s14530_s2 + $0x54] ss:$20 sps:$4 sm:$0xff]   ;;  %v10213_v12 = vld [vmem:[%s14530_s2 + $0x7c] ss:$20 sps:$4 sm:$0xff]   ;;  %v10215_v13 = vld [vmem:[%s14530_s2 + $0x84] ss:$20 sps:$4 sm:$0xff]  }
  0x19   :  { %v10217_v14 = vld [vmem:[%s14530_s2 + $0x78] ss:$20 sps:$4 sm:$0xff]   ;;  %v10218_v15 = vld [vmem:[%s14530_s2 + $0x80] ss:$20 sps:$4 sm:$0xff]   ;;  %v10224_v19 = vld [vmem:[%s14530_s2 + $0xa8] ss:$20 sps:$4 sm:$0xff]  }
  0x1a   :  { %1696 = vmatpush1.bf16.msra.mxu0 %v10205_v6  ;;  %1860 = vmatpush1.bf16.msra.mxu1 %v10206_v7  ;;  %v10219_v16 = vld [vmem:[%s14530_s2 + $0xa4] ss:$20 sps:$4 sm:$0xff]   ;;  %v10221_v17 = vld [vmem:[%s14530_s2 + $0xac] ss:$20 sps:$4 sm:$0xff]   ;;  %v10227_v21 = vld [vmem:[%s14530_s2 + $0xd4] ss:$20 sps:$4 sm:$0xff]  }
  0x1b   :  { %1697 = vmatprep.subr.bf16.mxu0 %v10207_v8  ;;  %1861 = vmatprep.subr.bf16.mxu1 %v10209_v9  ;;  %v10223_v18 = vld [vmem:[%s14530_s2 + $0xa0] ss:$20 sps:$4 sm:$0xff]   ;;  %v10229_v22 = vld [vmem:[%s14530_s2 + $0xc8] ss:$20 sps:$4 sm:$0xff]   ;;  %v10230_v23 = vld [vmem:[%s14530_s2 + $0xd0] ss:$20 sps:$4 sm:$0xff]  }
  0x1c   :  { %v10225_v20 = vld [vmem:[%s14530_s2 + $0xcc] ss:$20 sps:$4 sm:$0xff]   ;;  %v10231_v24 = vld [vmem:[%s14530_s2 + $0xf4] ss:$20 sps:$4 sm:$0xff]   ;;  %v10233_v25 = vld [vmem:[%s14530_s2 + $0xfc] ss:$20 sps:$4 sm:$0xff]  }
  0x1d   :  { %v10235_v26 = vld [vmem:[%s14530_s2 + $0xf0] ss:$20 sps:$4 sm:$0xff]   ;;  %v10236_v27 = vld [vmem:[%s14530_s2 + $0xf8] ss:$20 sps:$4 sm:$0xff]   ;;  %v10242_v31 = vld [vmem:[%s14530_s2 + $0x120] ss:$20 sps:$4 sm:$0xff]  }
  0x1e   :  { %1698 = vmatpush1.bf16.msra.mxu0 %v10211_v10  ;;  %1862 = vmatpush1.bf16.msra.mxu1 %v10212_v11  ;;  %v10237_v28 = vld [vmem:[%s14530_s2 + $0x11c] ss:$20 sps:$4 sm:$0xff]   ;;  %v10239_v29 = vld [vmem:[%s14530_s2 + $0x124] ss:$20 sps:$4 sm:$0xff]   ;;  %v10245_v33 = vld [vmem:[%s14530_s2 + $0x14c] ss:$20 sps:$4 sm:$0xff]  }
  0x1f   :  { %1699 = vmatprep.subr.bf16.mxu0 %v10213_v12  ;;  %1863 = vmatprep.subr.bf16.mxu1 %v10215_v13  ;;  %v10241_v30 = vld [vmem:[%s14530_s2 + $0x118] ss:$20 sps:$4 sm:$0xff]   ;;  %v10247_v34 = vld [vmem:[%s14530_s2 + $0x140] ss:$20 sps:$4 sm:$0xff]   ;;  %v10248_v35 = vld [vmem:[%s14530_s2 + $0x148] ss:$20 sps:$4 sm:$0xff]  }
  0x20   :  { %v10243_v32 = vld [vmem:[%s14530_s2 + $0x144] ss:$20 sps:$4 sm:$0xff]   ;;  %v10249_v36 = vld [vmem:[%s14530_s2 + $0x16c] ss:$20 sps:$4 sm:$0xff]   ;;  %v10251_v37 = vld [vmem:[%s14530_s2 + $0x174] ss:$20 sps:$4 sm:$0xff]  }
  0x21   :  { %v10253_v38 = vld [vmem:[%s14530_s2 + $0x168] ss:$20 sps:$4 sm:$0xff]   ;;  %v10254_v39 = vld [vmem:[%s14530_s2 + $0x170] ss:$20 sps:$4 sm:$0xff]   ;;  %v10260_v43 = vld [vmem:[%s14530_s2 + $0x198] ss:$20 sps:$4 sm:$0xff]  }
  0x22   :  { %1700 = vmatpush1.bf16.msra.mxu0 %v10217_v14  ;;  %1864 = vmatpush1.bf16.msra.mxu1 %v10218_v15  ;;  %v10255_v40 = vld [vmem:[%s14530_s2 + $0x194] ss:$20 sps:$4 sm:$0xff]   ;;  %v10257_v41 = vld [vmem:[%s14530_s2 + $0x19c] ss:$20 sps:$4 sm:$0xff]   ;;  %v10263_v45 = vld [vmem:[%s14530_s2 + $0x1c4] ss:$20 sps:$4 sm:$0xff]  }
  0x23   :  { %1701 = vmatprep.subr.bf16.mxu0 %v10219_v16  ;;  %1865 = vmatprep.subr.bf16.mxu1 %v10221_v17  ;;  %v10259_v42 = vld [vmem:[%s14530_s2 + $0x190] ss:$20 sps:$4 sm:$0xff]   ;;  %v10265_v47 = vld [vmem:[%s14530_s2 + $0x1b8] ss:$20 sps:$4 sm:$0xff]   ;;  %v10266_v49 = vld [vmem:[%s14530_s2 + $0x1c0] ss:$20 sps:$4 sm:$0xff]  }
  0x24   :  { %v10261_v44 = vld [vmem:[%s14530_s2 + $0x1bc] ss:$20 sps:$4 sm:$0xff]   ;;  %v66_v46 = vld [vmem:[%s14528_s0] sm:$0xff]  ;;  %v10275_v55 = vld [vmem:[%s14530_s2 + $0x214] ss:$20 sps:$4 sm:$0xff]   ;;  %vm1689_vm0 = vcmask 130048  }
  0x25   :  { %v11943_v48 = vcombine.high %v66_v46, %v66_v46  ;;  %v10267_v50 = vld [vmem:[%s14530_s2 + $0x1e4] ss:$20 sps:$4 sm:$0xff]   ;;  %v10269_v51 = vld [vmem:[%s14530_s2 + $0x1ec] ss:$20 sps:$4 sm:$0xff]   ;;  %v10272_v53 = vld [vmem:[%s14530_s2 + $0x1e8] ss:$20 sps:$4 sm:$0xff]   ;;  %v12007_v5 = vcombine.low %v66_v46, %v66_v46 }
  0x26   :  { %1702 = vmatpush1.bf16.msra.mxu0 %v10223_v18  ;;  %1866 = vmatpush1.bf16.msra.mxu1 %v10224_v19  ;;  %v10271_v52 = vld [vmem:[%s14530_s2 + $0x1e0] ss:$20 sps:$4 sm:$0xff]   ;;  %v10277_v56 = vld [vmem:[%s14530_s2 + $0x208] ss:$20 sps:$4 sm:$0xff]   ;;  %v10278_v57 = vld [vmem:[%s14530_s2 + $0x210] ss:$20 sps:$4 sm:$0xff]  }
  0x27   :  { %1703 = vmatprep.subr.bf16.mxu0 %v10225_v20  ;;  %1867 = vmatprep.subr.bf16.mxu1 %v10227_v21  ;;  %v10273_v54 = vld [vmem:[%s14530_s2 + $0x20c] ss:$20 sps:$4 sm:$0xff]   ;;  %v10279_v58 = vld [vmem:[%s14530_s2 + $0x234] ss:$20 sps:$4 sm:$0xff]   ;;  %v10281_v59 = vld [vmem:[%s14530_s2 + $0x23c] ss:$20 sps:$4 sm:$0xff]  }
  0x28   :  { %1725 = vmatprep.mubr.bf16.mxu0 %v11943_v48  ;;  %1889 = vmatprep.mubr.bf16.mxu1 %v11943_v48  ;;  %v10283_v60 = vld [vmem:[%s14530_s2 + $0x230] ss:$20 sps:$4 sm:$0xff]   ;;  %v10284_v61 = vld [vmem:[%s14530_s2 + $0x238] ss:$20 sps:$4 sm:$0xff]   ;;  %v10290_v1 = vld [vmem:[%s14530_s2 + $0x260] ss:$20 sps:$4 sm:$0xff]  }
  0x29   :  { %v10285_v62 = vld [vmem:[%s14530_s2 + $0x25c] ss:$20 sps:$4 sm:$0xff]   ;;  %v10287_v63 = vld [vmem:[%s14530_s2 + $0x264] ss:$20 sps:$4 sm:$0xff]   ;;  %v10297_v3 = vld [vmem:[%s14530_s2 + $0x28c] ss:$20 sps:$4 sm:$0xff]  }
  0x2a   :  { %1704 = vmatpush1.bf16.msra.mxu0 %v10229_v22  ;;  %1868 = vmatpush1.bf16.msra.mxu1 %v10230_v23  ;;  %v10289_v0 = vld [vmem:[%s14530_s2 + $0x258] ss:$20 sps:$4 sm:$0xff]   ;;  %v10292_v4 = vld [vmem:[%s14530_s2 + $0x280] ss:$20 sps:$4 sm:$0xff]   ;;  %v10295_v6 = vld [vmem:[%s14530_s2 + $0x288] ss:$20 sps:$4 sm:$0xff]  }
  0x2b   :  { %1705 = vmatprep.subr.bf16.mxu0 %v10231_v24  ;;  %1869 = vmatprep.subr.bf16.mxu1 %v10233_v25  ;;  %v10294_v2 = vld [vmem:[%s14530_s2 + $0x284] ss:$20 sps:$4 sm:$0xff]   ;;  %v10301_v7 = vld [vmem:[%s14530_s2 + $0x2ac] ss:$20 sps:$4 sm:$0xff]   ;;  %v10304_v8 = vld [vmem:[%s14530_s2 + $0x2b4] ss:$20 sps:$4 sm:$0xff]  }
  0x2c   :  { %v10299_v9 = vld [vmem:[%s14530_s2 + $0x2a8] ss:$20 sps:$4 sm:$0xff]   ;;  %v10302_v10 = vld [vmem:[%s14530_s2 + $0x2b0] ss:$20 sps:$4 sm:$0xff]   ;;  %v10308_v14 = vld [vmem:[%s14530_s2 + $0x2d8] ss:$20 sps:$4 sm:$0xff]  }
  0x2d   :  { %v10307_v11 = vld [vmem:[%s14530_s2 + $0x2d4] ss:$20 sps:$4 sm:$0xff]   ;;  %v10310_v12 = vld [vmem:[%s14530_s2 + $0x2dc] ss:$20 sps:$4 sm:$0xff]   ;;  %v10316_v16 = vld [vmem:[%s14530_s2 + $0x304] ss:$20 sps:$4 sm:$0xff]  }
  0x2e   :  { %1706 = vmatpush1.bf16.msra.mxu0 %v10235_v26  ;;  %1870 = vmatpush1.bf16.msra.mxu1 %v10236_v27  ;;  %v10305_v13 = vld [vmem:[%s14530_s2 + $0x2d0] ss:$20 sps:$4 sm:$0xff]   ;;  %v10311_v17 = vld [vmem:[%s14530_s2 + $0x2f8] ss:$20 sps:$4 sm:$0xff]   ;;  %v10314_v18 = vld [vmem:[%s14530_s2 + $0x300] ss:$20 sps:$4 sm:$0xff]  }
  0x2f   :  { %1707 = vmatprep.subr.bf16.mxu0 %v10237_v28  ;;  %1871 = vmatprep.subr.bf16.mxu1 %v10239_v29  ;;  %v10313_v15 = vld [vmem:[%s14530_s2 + $0x2fc] ss:$20 sps:$4 sm:$0xff]   ;;  %v10319_v19 = vld [vmem:[%s14530_s2 + $0x324] ss:$20 sps:$4 sm:$0xff]   ;;  %v10322_v20 = vld [vmem:[%s14530_s2 + $0x32c] ss:$20 sps:$4 sm:$0xff]  }
  0x30   :  { %v10317_v21 = vld [vmem:[%s14530_s2 + $0x320] ss:$20 sps:$4 sm:$0xff]   ;;  %v10320_v22 = vld [vmem:[%s14530_s2 + $0x328] ss:$20 sps:$4 sm:$0xff]   ;;  %v10326_v26 = vld [vmem:[%s14530_s2 + $0x350] ss:$20 sps:$4 sm:$0xff]  }
  0x31   :  { %v10325_v23 = vld [vmem:[%s14530_s2 + $0x34c] ss:$20 sps:$4 sm:$0xff]   ;;  %v10328_v24 = vld [vmem:[%s14530_s2 + $0x354] ss:$20 sps:$4 sm:$0xff]   ;;  %v10334_v28 = vld [vmem:[%s14530_s2 + $0x37c] ss:$20 sps:$4 sm:$0xff]  }
  0x32   :  { %1708 = vmatpush1.bf16.msra.mxu0 %v10241_v30  ;;  %1872 = vmatpush1.bf16.msra.mxu1 %v10242_v31  ;;  %v10323_v25 = vld [vmem:[%s14530_s2 + $0x348] ss:$20 sps:$4 sm:$0xff]   ;;  %v10329_v31 = vld [vmem:[%s14530_s2 + $0x370] ss:$20 sps:$4 sm:$0xff]   ;;  %vm11703_vm1 = vmmov 0   ;;  %vm3492_vm7 = vcmask 1043456  }
  0x33   :  { %1709 = vmatprep.subr.bf16.mxu0 %v10243_v32  ;;  %1873 = vmatprep.subr.bf16.mxu1 %v10245_v33  ;;  %v10331_v27 = vld [vmem:[%s14530_s2 + $0x374] ss:$20 sps:$4 sm:$0xff]   ;;  %v10332_v32 = vld [vmem:[%s14530_s2 + $0x378] ss:$20 sps:$4 sm:$0xff]   ;;  %v10337_v33 = vld [vmem:[%s14530_s2 + $0x39c] ss:$20 sps:$4 sm:$0xff]  }
  0x34   :  { %v12083_v29 = vld [vmem:[%s14528_s0 + $0x8] sm:$0xff]  ;;  %v10358_v46 = vld [vmem:[%s14530_s2 + $0x41c] ss:$20 sps:$4 sm:$0xff]   ;;  %vm3488_vm8 = vcmask 719872   ;;  %s11704_s21 = smov 64   ;;  %vm4554_vm14 = vcmask 523264  }
  0x35   :  { %v12087_v30 = vcombine.high %v12083_v29, %v12083_v29 }
  0x36   :  { %1710 = vmatpush1.bf16.msra.mxu0 %v10247_v34  ;;  %1874 = vmatpush1.bf16.msra.mxu1 %v10248_v35  ;;  %v10340_v34 = vld [vmem:[%s14530_s2 + $0x3a4] ss:$20 sps:$4 sm:$0xff]  }
  0x37   :  { %1711 = vmatprep.subr.bf16.mxu0 %v10249_v36  ;;  %1875 = vmatprep.subr.bf16.mxu1 %v10251_v37  ;;  %v10335_v35 = vld [vmem:[%s14530_s2 + $0x398] ss:$20 sps:$4 sm:$0xff]   ;;  %v10338_v36 = vld [vmem:[%s14530_s2 + $0x3a0] ss:$20 sps:$4 sm:$0xff]  }
  0x38   :  { %v10343_v37 = vld [vmem:[%s14530_s2 + $0x3c4] ss:$20 sps:$4 sm:$0xff]  }
  0x3a   :  { %1712 = vmatpush1.bf16.msra.mxu0 %v10253_v38  ;;  %1876 = vmatpush1.bf16.msra.mxu1 %v10254_v39  ;;  %v10346_v38 = vld [vmem:[%s14530_s2 + $0x3cc] ss:$20 sps:$4 sm:$0xff]  }
  0x3b   :  { %1713 = vmatprep.subr.bf16.mxu0 %v10255_v40  ;;  %1877 = vmatprep.subr.bf16.mxu1 %v10257_v41  ;;  %v10341_v39 = vld [vmem:[%s14530_s2 + $0x3c0] ss:$20 sps:$4 sm:$0xff]   ;;  %v10344_v40 = vld [vmem:[%s14530_s2 + $0x3c8] ss:$20 sps:$4 sm:$0xff]  }
  0x3c   :  { %v10349_v41 = vld [vmem:[%s14530_s2 + $0x3ec] ss:$20 sps:$4 sm:$0xff]  }
  0x3e   :  { %1714 = vmatpush1.bf16.msra.mxu0 %v10259_v42  ;;  %1878 = vmatpush1.bf16.msra.mxu1 %v10260_v43  ;;  %v10352_v42 = vld [vmem:[%s14530_s2 + $0x3f4] ss:$20 sps:$4 sm:$0xff]  }
  0x3f   :  { %1715 = vmatprep.subr.bf16.mxu0 %v10261_v44  ;;  %1879 = vmatprep.subr.bf16.mxu1 %v10263_v45  ;;  %v10347_v43 = vld [vmem:[%s14530_s2 + $0x3e8] ss:$20 sps:$4 sm:$0xff]   ;;  %v10350_v44 = vld [vmem:[%s14530_s2 + $0x3f0] ss:$20 sps:$4 sm:$0xff]  }
  0x40   :  { %v10355_v45 = vld [vmem:[%s14530_s2 + $0x414] ss:$20 sps:$4 sm:$0xff]  }
  0x42   :  { %1716 = vmatpush1.bf16.msra.mxu0 %v10265_v47  ;;  %1880 = vmatpush1.bf16.msra.mxu1 %v10266_v49  ;;  %v10353_v47 = vld [vmem:[%s14530_s2 + $0x410] ss:$20 sps:$4 sm:$0xff]   ;;  %v10356_v49 = vld [vmem:[%s14530_s2 + $0x418] ss:$20 sps:$4 sm:$0xff]  }
  0x43   :  { %1717 = vmatprep.subr.bf16.mxu0 %v10267_v50  ;;  %1881 = vmatprep.subr.bf16.mxu1 %v10269_v51  ;;  %v10361_v50 = vld [vmem:[%s14530_s2 + $0x43c] ss:$20 sps:$4 sm:$0xff]   ;;  %v10364_v51 = vld [vmem:[%s14530_s2 + $0x444] ss:$20 sps:$4 sm:$0xff]  }
  0x46   :  { %1718 = vmatpush1.bf16.msra.mxu0 %v10271_v52  ;;  %1882 = vmatpush1.bf16.msra.mxu1 %v10272_v53  ;;  %v10359_v52 = vld [vmem:[%s14530_s2 + $0x438] ss:$20 sps:$4 sm:$0xff]   ;;  %v10362_v53 = vld [vmem:[%s14530_s2 + $0x440] ss:$20 sps:$4 sm:$0xff]  }
  0x47   :  { %1719 = vmatprep.subr.bf16.mxu0 %v10273_v54  ;;  %1883 = vmatprep.subr.bf16.mxu1 %v10275_v55  ;;  %v10367_v54 = vld [vmem:[%s14530_s2 + $0x464] ss:$20 sps:$4 sm:$0xff]   ;;  %v10370_v55 = vld [vmem:[%s14530_s2 + $0x46c] ss:$20 sps:$4 sm:$0xff]  }
  0x4a   :  { %1720 = vmatpush1.bf16.msra.mxu0 %v10277_v56  ;;  %1884 = vmatpush1.bf16.msra.mxu1 %v10278_v57  ;;  %v10365_v56 = vld [vmem:[%s14530_s2 + $0x460] ss:$20 sps:$4 sm:$0xff]   ;;  %v10368_v57 = vld [vmem:[%s14530_s2 + $0x468] ss:$20 sps:$4 sm:$0xff]  }
  0x4b   :  { %1721 = vmatprep.subr.bf16.mxu0 %v10279_v58  ;;  %1885 = vmatprep.subr.bf16.mxu1 %v10281_v59  ;;  %v10373_v58 = vld [vmem:[%s14530_s2 + $0x48c] ss:$20 sps:$4 sm:$0xff]   ;;  %v10376_v59 = vld [vmem:[%s14530_s2 + $0x494] ss:$20 sps:$4 sm:$0xff]  }
  0x4e   :  { %1722 = vmatpush1.bf16.msra.mxu0 %v10283_v60  ;;  %1886 = vmatpush1.bf16.msra.mxu1 %v10284_v61  ;;  %v10371_v60 = vld [vmem:[%s14530_s2 + $0x488] ss:$20 sps:$4 sm:$0xff]   ;;  %v10374_v61 = vld [vmem:[%s14530_s2 + $0x490] ss:$20 sps:$4 sm:$0xff]  }
  0x4f   :  { %1723 = vmatprep.subr.bf16.mxu0 %v10285_v62  ;;  %1887 = vmatprep.subr.bf16.mxu1 %v10287_v63  ;;  %v10379_v62 = vld [vmem:[%s14530_s2 + $0x4b4] ss:$20 sps:$4 sm:$0xff]   ;;  %v10382_v63 = vld [vmem:[%s14530_s2 + $0x4bc] ss:$20 sps:$4 sm:$0xff]  }
  0x52   :  { %1724 = vmatpush1.bf16.msra.mxu0 %v10289_v0  ;;  %1888 = vmatpush1.bf16.msra.mxu1 %v10290_v1  ;;  %v10377_v0 = vld [vmem:[%s14530_s2 + $0x4b0] ss:$20 sps:$4 sm:$0xff]   ;;  %v10380_v1 = vld [vmem:[%s14530_s2 + $0x4b8] ss:$20 sps:$4 sm:$0xff]  }
  0x53   :  { %1734 = vmatprep.subr.bf16.mxu0 %v10294_v2  ;;  %1898 = vmatprep.subr.bf16.mxu1 %v10297_v3  ;;  %v10385_v2 = vld [vmem:[%s14530_s2 + $0x4dc] ss:$20 sps:$4 sm:$0xff]   ;;  %v10388_v3 = vld [vmem:[%s14530_s2 + $0x4e4] ss:$20 sps:$4 sm:$0xff]  }
  0x55   :  { %1726 = vmatmul.mubr.bf16.vlgmr.msra.gmra.mrb[0].mxu0 %v12007_v5  ;;  %1890 = vmatmul.mubr.bf16.vlgmr.msra.gmra.mrb[0].mxu1 %v12007_v5 }
  0x56   :  { %1735 = vmatpush1.bf16.msra.mxu0 %v10292_v4  ;;  %1899 = vmatpush1.bf16.msra.mxu1 %v10295_v6  ;;  %v10383_v4 = vld [vmem:[%s14530_s2 + $0x4d8] ss:$20 sps:$4 sm:$0xff]   ;;  %v10386_v6 = vld [vmem:[%s14530_s2 + $0x4e0] ss:$20 sps:$4 sm:$0xff]  }
  0x57   :  { %1736 = vmatprep.subr.bf16.mxu0 %v10301_v7  ;;  %1900 = vmatprep.subr.bf16.mxu1 %v10304_v8  ;;  %v10393_v7 = vld [vmem:[%s14530_s2 + $0x504] ss:$20 sps:$4 sm:$0xff]   ;;  %v10396_v8 = vld [vmem:[%s14530_s2 + $0x50c] ss:$20 sps:$4 sm:$0xff]  }
  0x58   :  { %1766 = vmatprep.mubr.bf16.mxu0 %v12087_v30  ;;  %1930 = vmatprep.mubr.bf16.mxu1 %v12087_v30 }
  0x5a   :  { %1737 = vmatpush1.bf16.msra.mxu0 %v10299_v9  ;;  %1901 = vmatpush1.bf16.msra.mxu1 %v10302_v10  ;;  %v12213_v9 = vcombine.low %v12083_v29, %v12083_v29  ;;  %v10391_v10 = vld [vmem:[%s14530_s2 + $0x500] ss:$20 sps:$4 sm:$0xff]   ;;  %v10418_v29 = vld [vmem:[%s14530_s2 + $0x5a8] ss:$20 sps:$4 sm:$0xff]  }
  0x5b   :  { %1738 = vmatprep.subr.bf16.mxu0 %v10307_v11  ;;  %1902 = vmatprep.subr.bf16.mxu1 %v10310_v12  ;;  %v10394_v11 = vld [vmem:[%s14530_s2 + $0x508] ss:$20 sps:$4 sm:$0xff]   ;;  %v10399_v12 = vld [vmem:[%s14530_s2 + $0x52c] ss:$20 sps:$4 sm:$0xff]  }
  0x5e   :  { %1739 = vmatpush1.bf16.msra.mxu0 %v10305_v13  ;;  %1903 = vmatpush1.bf16.msra.mxu1 %v10308_v14  ;;  %v12227_v13 = vld [vmem:[%s14528_s0 + $0x10] sm:$0xff] }
  0x5f   :  { %1740 = vmatprep.subr.bf16.mxu0 %v10313_v15  ;;  %1904 = vmatprep.subr.bf16.mxu1 %v10316_v16  ;;  %v10402_v14 = vld [vmem:[%s14530_s2 + $0x534] ss:$20 sps:$4 sm:$0xff]   ;;  %v12234_v15 = vcombine.high %v12227_v13, %v12227_v13 }
  0x60   :  { %v10397_v16 = vld [vmem:[%s14530_s2 + $0x528] ss:$20 sps:$4 sm:$0xff]  }
  0x62   :  { %1741 = vmatpush1.bf16.msra.mxu0 %v10311_v17  ;;  %1905 = vmatpush1.bf16.msra.mxu1 %v10314_v18  ;;  %v10400_v17 = vld [vmem:[%s14530_s2 + $0x530] ss:$20 sps:$4 sm:$0xff]   ;;  %v10405_v18 = vld [vmem:[%s14530_s2 + $0x554] ss:$20 sps:$4 sm:$0xff]  }
  0x63   :  { %1742 = vmatprep.subr.bf16.mxu0 %v10319_v19  ;;  %1906 = vmatprep.subr.bf16.mxu1 %v10322_v20  ;;  %v10408_v19 = vld [vmem:[%s14530_s2 + $0x55c] ss:$20 sps:$4 sm:$0xff]  }
  0x64   :  { %v10403_v20 = vld [vmem:[%s14530_s2 + $0x550] ss:$20 sps:$4 sm:$0xff]  }
  0x66   :  { %1743 = vmatpush1.bf16.msra.mxu0 %v10317_v21  ;;  %1907 = vmatpush1.bf16.msra.mxu1 %v10320_v22  ;;  %v10406_v21 = vld [vmem:[%s14530_s2 + $0x558] ss:$20 sps:$4 sm:$0xff]   ;;  %v10411_v22 = vld [vmem:[%s14530_s2 + $0x57c] ss:$20 sps:$4 sm:$0xff]  }
  0x67   :  { %1744 = vmatprep.subr.bf16.mxu0 %v10325_v23  ;;  %1908 = vmatprep.subr.bf16.mxu1 %v10328_v24  ;;  %v10414_v23 = vld [vmem:[%s14530_s2 + $0x584] ss:$20 sps:$4 sm:$0xff]  }
  0x68   :  { %v10409_v24 = vld [vmem:[%s14530_s2 + $0x578] ss:$20 sps:$4 sm:$0xff]  }
  0x6a   :  { %1745 = vmatpush1.bf16.msra.mxu0 %v10323_v25  ;;  %1909 = vmatpush1.bf16.msra.mxu1 %v10326_v26  ;;  %v10412_v25 = vld [vmem:[%s14530_s2 + $0x580] ss:$20 sps:$4 sm:$0xff]   ;;  %v10417_v26 = vld [vmem:[%s14530_s2 + $0x5a4] ss:$20 sps:$4 sm:$0xff]  }
  0x6b   :  { %1746 = vmatprep.subr.bf16.mxu0 %v10331_v27  ;;  %1910 = vmatprep.subr.bf16.mxu1 %v10334_v28  ;;  %v10420_v27 = vld [vmem:[%s14530_s2 + $0x5ac] ss:$20 sps:$4 sm:$0xff]  }
  0x6c   :  { %v10415_v28 = vld [vmem:[%s14530_s2 + $0x5a0] ss:$20 sps:$4 sm:$0xff]  }
  0x6e   :  { %1747 = vmatpush1.bf16.msra.mxu0 %v10329_v31  ;;  %1911 = vmatpush1.bf16.msra.mxu1 %v10332_v32  ;;  %v10423_v31 = vld [vmem:[%s14530_s2 + $0x5cc] ss:$20 sps:$4 sm:$0xff]   ;;  %v10426_v32 = vld [vmem:[%s14530_s2 + $0x5d4] ss:$20 sps:$4 sm:$0xff]  }
  0x6f   :  { %1748 = vmatprep.subr.bf16.mxu0 %v10337_v33  ;;  %1912 = vmatprep.subr.bf16.mxu1 %v10340_v34  ;;  %v10421_v33 = vld [vmem:[%s14530_s2 + $0x5c8] ss:$20 sps:$4 sm:$0xff]   ;;  %v10424_v34 = vld [vmem:[%s14530_s2 + $0x5d0] ss:$20 sps:$4 sm:$0xff]  }
  0x72   :  { %1749 = vmatpush1.bf16.msra.mxu0 %v10335_v35  ;;  %1913 = vmatpush1.bf16.msra.mxu1 %v10338_v36  ;;  %v10429_v35 = vld [vmem:[%s14530_s2 + $0x5f4] ss:$20 sps:$4 sm:$0xff]   ;;  %v10432_v36 = vld [vmem:[%s14530_s2 + $0x5fc] ss:$20 sps:$4 sm:$0xff]  }
  0x73   :  { %1750 = vmatprep.subr.bf16.mxu0 %v10343_v37  ;;  %1914 = vmatprep.subr.bf16.mxu1 %v10346_v38  ;;  %v10427_v37 = vld [vmem:[%s14530_s2 + $0x5f0] ss:$20 sps:$4 sm:$0xff]   ;;  %v10430_v38 = vld [vmem:[%s14530_s2 + $0x5f8] ss:$20 sps:$4 sm:$0xff]  }
  0x76   :  { %1751 = vmatpush1.bf16.msra.mxu0 %v10341_v39  ;;  %1915 = vmatpush1.bf16.msra.mxu1 %v10344_v40  ;;  %v10435_v39 = vld [vmem:[%s14530_s2 + $0x61c] ss:$20 sps:$4 sm:$0xff]   ;;  %v10438_v40 = vld [vmem:[%s14530_s2 + $0x624] ss:$20 sps:$4 sm:$0xff]  }
  0x77   :  { %1752 = vmatprep.subr.bf16.mxu0 %v10349_v41  ;;  %1916 = vmatprep.subr.bf16.mxu1 %v10352_v42  ;;  %v10433_v41 = vld [vmem:[%s14530_s2 + $0x618] ss:$20 sps:$4 sm:$0xff]   ;;  %v10436_v42 = vld [vmem:[%s14530_s2 + $0x620] ss:$20 sps:$4 sm:$0xff]  }
  0x7a   :  { %1753 = vmatpush1.bf16.msra.mxu0 %v10347_v43  ;;  %1917 = vmatpush1.bf16.msra.mxu1 %v10350_v44  ;;  %v10441_v43 = vld [vmem:[%s14530_s2 + $0x644] ss:$20 sps:$4 sm:$0xff]   ;;  %v10444_v44 = vld [vmem:[%s14530_s2 + $0x64c] ss:$20 sps:$4 sm:$0xff]  }
  0x7b   :  { %1754 = vmatprep.subr.bf16.mxu0 %v10355_v45  ;;  %1918 = vmatprep.subr.bf16.mxu1 %v10358_v46  ;;  %v10439_v45 = vld [vmem:[%s14530_s2 + $0x640] ss:$20 sps:$4 sm:$0xff]   ;;  %v10442_v46 = vld [vmem:[%s14530_s2 + $0x648] ss:$20 sps:$4 sm:$0xff]  }
  0x7e   :  { %1755 = vmatpush1.bf16.msra.mxu0 %v10353_v47  ;;  %1919 = vmatpush1.bf16.msra.mxu1 %v10356_v49  ;;  %v10447_v47 = vld [vmem:[%s14530_s2 + $0x66c] ss:$20 sps:$4 sm:$0xff]   ;;  %v10450_v49 = vld [vmem:[%s14530_s2 + $0x674] ss:$20 sps:$4 sm:$0xff]  }
  0x7f   :  { %1756 = vmatprep.subr.bf16.mxu0 %v10361_v50  ;;  %1920 = vmatprep.subr.bf16.mxu1 %v10364_v51  ;;  %v10445_v50 = vld [vmem:[%s14530_s2 + $0x668] ss:$20 sps:$4 sm:$0xff]   ;;  %v10448_v51 = vld [vmem:[%s14530_s2 + $0x670] ss:$20 sps:$4 sm:$0xff]  }
  0x82   :  { %1757 = vmatpush1.bf16.msra.mxu0 %v10359_v52  ;;  %1921 = vmatpush1.bf16.msra.mxu1 %v10362_v53  ;;  %v10453_v52 = vld [vmem:[%s14530_s2 + $0x694] ss:$20 sps:$4 sm:$0xff]   ;;  %v10456_v53 = vld [vmem:[%s14530_s2 + $0x69c] ss:$20 sps:$4 sm:$0xff]  }
  0x83   :  { %1758 = vmatprep.subr.bf16.mxu0 %v10367_v54  ;;  %1922 = vmatprep.subr.bf16.mxu1 %v10370_v55  ;;  %v10451_v54 = vld [vmem:[%s14530_s2 + $0x690] ss:$20 sps:$4 sm:$0xff]   ;;  %v10454_v55 = vld [vmem:[%s14530_s2 + $0x698] ss:$20 sps:$4 sm:$0xff]  }
  0x86   :  { %1759 = vmatpush1.bf16.msra.mxu0 %v10365_v56  ;;  %1923 = vmatpush1.bf16.msra.mxu1 %v10368_v57  ;;  %v10459_v56 = vld [vmem:[%s14530_s2 + $0x6bc] ss:$20 sps:$4 sm:$0xff]   ;;  %v10462_v57 = vld [vmem:[%s14530_s2 + $0x6c4] ss:$20 sps:$4 sm:$0xff]  }
  0x87   :  { %1760 = vmatprep.subr.bf16.mxu0 %v10373_v58  ;;  %1924 = vmatprep.subr.bf16.mxu1 %v10376_v59  ;;  %v10457_v58 = vld [vmem:[%s14530_s2 + $0x6b8] ss:$20 sps:$4 sm:$0xff]   ;;  %v10460_v59 = vld [vmem:[%s14530_s2 + $0x6c0] ss:$20 sps:$4 sm:$0xff]  }
  0x8a   :  { %1761 = vmatpush1.bf16.msra.mxu0 %v10371_v60  ;;  %1925 = vmatpush1.bf16.msra.mxu1 %v10374_v61  ;;  %v10465_v60 = vld [vmem:[%s14530_s2 + $0x6e4] ss:$20 sps:$4 sm:$0xff]   ;;  %v10468_v61 = vld [vmem:[%s14530_s2 + $0x6ec] ss:$20 sps:$4 sm:$0xff]  }
  0x8b   :  { %1762 = vmatprep.subr.bf16.mxu0 %v10379_v62  ;;  %1926 = vmatprep.subr.bf16.mxu1 %v10382_v63  ;;  %v10463_v62 = vld [vmem:[%s14530_s2 + $0x6e0] ss:$20 sps:$4 sm:$0xff]   ;;  %v10466_v63 = vld [vmem:[%s14530_s2 + $0x6e8] ss:$20 sps:$4 sm:$0xff]  }
  0x8e   :  { %1763 = vmatpush1.bf16.msra.mxu0 %v10377_v0  ;;  %1927 = vmatpush1.bf16.msra.mxu1 %v10380_v1  ;;  %v10471_v0 = vld [vmem:[%s14530_s2 + $0x70c] ss:$20 sps:$4 sm:$0xff]   ;;  %v10474_v1 = vld [vmem:[%s14530_s2 + $0x714] ss:$20 sps:$4 sm:$0xff]  }
  0x8f   :  { %1764 = vmatprep.subr.bf16.mxu0 %v10385_v2  ;;  %1928 = vmatprep.subr.bf16.mxu1 %v10388_v3  ;;  %v10469_v2 = vld [vmem:[%s14530_s2 + $0x708] ss:$20 sps:$4 sm:$0xff]   ;;  %v10472_v3 = vld [vmem:[%s14530_s2 + $0x710] ss:$20 sps:$4 sm:$0xff]  }
  0x92   :  { %1765 = vmatpush1.bf16.msra.mxu0 %v10383_v4  ;;  %1929 = vmatpush1.bf16.msra.mxu1 %v10386_v6  ;;  %v10477_v4 = vld [vmem:[%s14530_s2 + $0x734] ss:$20 sps:$4 sm:$0xff]   ;;  %v10480_v6 = vld [vmem:[%s14530_s2 + $0x73c] ss:$20 sps:$4 sm:$0xff]  }
  0x93   :  { %1775 = vmatprep.subr.bf16.mxu0 %v10393_v7  ;;  %1939 = vmatprep.subr.bf16.mxu1 %v10396_v8  ;;  %v10475_v7 = vld [vmem:[%s14530_s2 + $0x730] ss:$20 sps:$4 sm:$0xff]   ;;  %v10478_v8 = vld [vmem:[%s14530_s2 + $0x738] ss:$20 sps:$4 sm:$0xff]  }
  0x95   :  { %1767 = vmatmul.mubr.bf16.vlgmr.msra.gmra.mrb[0].mxu0 %v12213_v9  ;;  %1931 = vmatmul.mubr.bf16.vlgmr.msra.gmra.mrb[0].mxu1 %v12213_v9 }
  0x96   :  { %1776 = vmatpush1.bf16.msra.mxu0 %v10391_v10  ;;  %1940 = vmatpush1.bf16.msra.mxu1 %v10394_v11  ;;  %v10483_v10 = vld [vmem:[%s14530_s2 + $0x75c] ss:$20 sps:$4 sm:$0xff]   ;;  %v10486_v11 = vld [vmem:[%s14530_s2 + $0x764] ss:$20 sps:$4 sm:$0xff]  }
  0x97   :  { %1777 = vmatprep.subr.bf16.mxu0 %v10399_v12  ;;  %1941 = vmatprep.subr.bf16.mxu1 %v10402_v14  ;;  %v10481_v12 = vld [vmem:[%s14530_s2 + $0x758] ss:$20 sps:$4 sm:$0xff]   ;;  %v10484_v14 = vld [vmem:[%s14530_s2 + $0x760] ss:$20 sps:$4 sm:$0xff]  }
  0x98   :  { %1807 = vmatprep.mubr.bf16.mxu0 %v12234_v15  ;;  %1971 = vmatprep.mubr.bf16.mxu1 %v12234_v15 }
  0x9a   :  { %1778 = vmatpush1.bf16.msra.mxu0 %v10397_v16  ;;  %1942 = vmatpush1.bf16.msra.mxu1 %v10400_v17  ;;  %v10491_v16 = vld [vmem:[%s14530_s2 + $0x784] ss:$20 sps:$4 sm:$0xff]   ;;  %v10494_v17 = vld [vmem:[%s14530_s2 + $0x78c] ss:$20 sps:$4 sm:$0xff]  }
  0x9b   :  { %1779 = vmatprep.subr.bf16.mxu0 %v10405_v18  ;;  %1943 = vmatprep.subr.bf16.mxu1 %v10408_v19  ;;  %v12422_v18 = vcombine.low %v12227_v13, %v12227_v13  ;;  %v10489_v19 = vld [vmem:[%s14530_s2 + $0x780] ss:$20 sps:$4 sm:$0xff]   ;;  %v10510_v13 = vld [vmem:[%s14530_s2 + $0x3d0] ss:$20 sps:$4 sm:$0xff]  }
  0x9e   :  { %1780 = vmatpush1.bf16.msra.mxu0 %v10403_v20  ;;  %1944 = vmatpush1.bf16.msra.mxu1 %v10406_v21  ;;  %v10492_v20 = vld [vmem:[%s14530_s2 + $0x788] ss:$20 sps:$4 sm:$0xff]   ;;  %v10495_v21 = vld [vmem:[%s14530_s2 + $0x150] ss:$20 sps:$4 sm:$0xff]  }
  0x9f   :  { %1781 = vmatprep.subr.bf16.mxu0 %v10411_v22  ;;  %1945 = vmatprep.subr.bf16.mxu1 %v10414_v23  ;;  %v11701_v22 = vmov 0   ;;  %v12443_v23 = vld [vmem:[%s14528_s0 + $0x18] ss:$0 sps:$4 sm:$0xff]  }
  0xa2   :  { %1782 = vmatpush1.bf16.msra.mxu0 %v10409_v24  ;;  %1946 = vmatpush1.bf16.msra.mxu1 %v10412_v25  ;;  %v10497_v24 = vld [vmem:[%s14530_s2 + $0x10] ss:$20 sps:$4 sm:$0xff]  }
  0xa3   :  { %1783 = vmatprep.subr.bf16.mxu0 %v10417_v26  ;;  %1947 = vmatprep.subr.bf16.mxu1 %v10420_v27  ;;  %v10511_v25 = vld [vmem:[%s14530_s2 + $0x290] ss:$20 sps:$4 sm:$0xff]   ;;  %v10498_v26 = vld [vmem:[%s14530_s2 + $0x178] ss:$20 sps:$4 sm:$0xff]  }
  0xa4   :  { %v10514_v27 = vld [vmem:[%s14530_s2 + $0x3f8] ss:$20 sps:$4 sm:$0xff]  }
  0xa6   :  { %1784 = vmatpush1.bf16.msra.mxu0 %v10415_v28  ;;  %1948 = vmatpush1.bf16.msra.mxu1 %v10418_v29  ;;  %v10499_v28 = vld [vmem:[%s14530_s2 + $0x38] ss:$20 sps:$4 sm:$0xff]  }
  0xa7   :  { %1785 = vmatprep.subr.bf16.mxu0 %v10423_v31  ;;  %1949 = vmatprep.subr.bf16.mxu1 %v10426_v32  ;;  %v10515_v29 = vld [vmem:[%s14530_s2 + $0x2b8] ss:$20 sps:$4 sm:$0xff]   ;;  %v10500_v31 = vld [vmem:[%s14530_s2 + $0x1a0] ss:$20 sps:$4 sm:$0xff]  }
  0xa8   :  { %v10517_v32 = vld [vmem:[%s14530_s2 + $0x420] ss:$20 sps:$4 sm:$0xff]  }
  0xaa   :  { %1786 = vmatpush1.bf16.msra.mxu0 %v10421_v33  ;;  %1950 = vmatpush1.bf16.msra.mxu1 %v10424_v34  ;;  %v10501_v33 = vld [vmem:[%s14530_s2 + $0x60] ss:$20 sps:$4 sm:$0xff]  }
  0xab   :  { %1787 = vmatprep.subr.bf16.mxu0 %v10429_v35  ;;  %1951 = vmatprep.subr.bf16.mxu1 %v10432_v36  ;;  %v10519_v34 = vld [vmem:[%s14530_s2 + $0x2e0] ss:$20 sps:$4 sm:$0xff]   ;;  %v10502_v35 = vld [vmem:[%s14530_s2 + $0x1c8] ss:$20 sps:$4 sm:$0xff]  }
  0xac   :  { %v10521_v36 = vld [vmem:[%s14530_s2 + $0x448] ss:$20 sps:$4 sm:$0xff]  }
  0xae   :  { %1788 = vmatpush1.bf16.msra.mxu0 %v10427_v37  ;;  %1952 = vmatpush1.bf16.msra.mxu1 %v10430_v38  ;;  %v10504_v37 = vld [vmem:[%s14530_s2 + $0x1f0] ss:$20 sps:$4 sm:$0xff]  }
  0xaf   :  { %1789 = vmatprep.subr.bf16.mxu0 %v10435_v39  ;;  %1953 = vmatprep.subr.bf16.mxu1 %v10438_v40  ;;  %v10525_v38 = vld [vmem:[%s14530_s2 + $0x470] ss:$20 sps:$4 sm:$0xff]  }
  0xb0   :  { %v10505_v39 = vld [vmem:[%s14530_s2 + $0xb0] ss:$20 sps:$4 sm:$0xff]  }
  0xb1   :  { %v10527_v40 = vld [vmem:[%s14530_s2 + $0x330] ss:$20 sps:$4 sm:$0xff]  }
  0xb2   :  { %1790 = vmatpush1.bf16.msra.mxu0 %v10433_v41  ;;  %1954 = vmatpush1.bf16.msra.mxu1 %v10436_v42  ;;  %v10506_v41 = vld [vmem:[%s14530_s2 + $0x218] ss:$20 sps:$4 sm:$0xff]  }
  0xb3   :  { %1791 = vmatprep.subr.bf16.mxu0 %v10441_v43  ;;  %1955 = vmatprep.subr.bf16.mxu1 %v10444_v44  ;;  %v10529_v42 = vld [vmem:[%s14530_s2 + $0x498] ss:$20 sps:$4 sm:$0xff]  }
  0xb4   :  { %v10507_v43 = vld [vmem:[%s14530_s2 + $0xd8] ss:$20 sps:$4 sm:$0xff]  }
  0xb5   :  { %v10531_v44 = vld [vmem:[%s14530_s2 + $0x358] ss:$20 sps:$4 sm:$0xff]  }
  0xb6   :  { %1792 = vmatpush1.bf16.msra.mxu0 %v10439_v45  ;;  %1956 = vmatpush1.bf16.msra.mxu1 %v10442_v46  ;;  %v10508_v45 = vld [vmem:[%s14530_s2 + $0x240] ss:$20 sps:$4 sm:$0xff]  }
  0xb7   :  { %1793 = vmatprep.subr.bf16.mxu0 %v10447_v47  ;;  %1957 = vmatprep.subr.bf16.mxu1 %v10450_v49  ;;  %v10533_v46 = vld [vmem:[%s14530_s2 + $0x4c0] ss:$20 sps:$4 sm:$0xff]  }
  0xb8   :  { %v10509_v47 = vld [vmem:[%s14530_s2 + $0x100] ss:$20 sps:$4 sm:$0xff]  }
  0xb9   :  { %v10535_v49 = vld [vmem:[%s14530_s2 + $0x380] ss:$20 sps:$4 sm:$0xff]  }
  0xba   :  { %1794 = vmatpush1.bf16.msra.mxu0 %v10445_v50  ;;  %1958 = vmatpush1.bf16.msra.mxu1 %v10448_v51  ;;  %v10512_v50 = vld [vmem:[%s14530_s2 + $0x268] ss:$20 sps:$4 sm:$0xff]  }
  0xbb   :  { %1795 = vmatprep.subr.bf16.mxu0 %v10453_v52  ;;  %1959 = vmatprep.subr.bf16.mxu1 %v10456_v53  ;;  %v10537_v51 = vld [vmem:[%s14530_s2 + $0x4e8] ss:$20 sps:$4 sm:$0xff]  }
  0xbc   :  { %v10513_v52 = vld [vmem:[%s14530_s2 + $0x128] ss:$20 sps:$4 sm:$0xff]  }
  0xbd   :  { %v10539_v53 = vld [vmem:[%s14530_s2 + $0x3a8] ss:$20 sps:$4 sm:$0xff]  }
  0xbe   :  { %1796 = vmatpush1.bf16.msra.mxu0 %v10451_v54  ;;  %1960 = vmatpush1.bf16.msra.mxu1 %v10454_v55  ;;  %v10516_v54 = vld [vmem:[%s14530_s2 + $0x650] ss:$20 sps:$4 sm:$0xff]  }
  0xbf   :  { %1797 = vmatprep.subr.bf16.mxu0 %v10459_v56  ;;  %1961 = vmatprep.subr.bf16.mxu1 %v10462_v57  ;;  %v10518_v55 = vld [vmem:[%s14530_s2 + $0x510] ss:$20 sps:$4 sm:$0xff]   ;;  %v10520_v56 = vld [vmem:[%s14530_s2 + $0x678] ss:$20 sps:$4 sm:$0xff]  }
  0xc0   :  { %v10544_v57 = vld [vmem:[%s14530_s2 + $0x790] ss:$20 sps:$4 sm:$0xff]  }
  0xc2   :  { %1798 = vmatpush1.bf16.msra.mxu0 %v10457_v58  ;;  %1962 = vmatpush1.bf16.msra.mxu1 %v10460_v59  ;;  %v10547_v58 = vld [vmem:[%s14532_s4 + $0x4] ss:$20 sps:$4 sm:$0xff]   ;;  %v11702_v59 = vmov 0.0  }
  0xc3   :  { %1799 = vmatprep.subr.bf16.mxu0 %v10465_v60  ;;  %1963 = vmatprep.subr.bf16.mxu1 %v10468_v61  ;;  %v10522_v60 = vld [vmem:[%s14530_s2 + $0x538] ss:$20 sps:$4 sm:$0xff]   ;;  %v10524_v61 = vld [vmem:[%s14530_s2 + $0x6a0] ss:$20 sps:$4 sm:$0xff]  }
  0xc6   :  { %1800 = vmatpush1.bf16.msra.mxu0 %v10463_v62  ;;  %1964 = vmatpush1.bf16.msra.mxu1 %v10466_v63  ;;  %v10526_v62 = vld [vmem:[%s14530_s2 + $0x560] ss:$20 sps:$4 sm:$0xff]   ;;  %v10530_v63 = vld [vmem:[%s14530_s2 + $0x588] ss:$20 sps:$4 sm:$0xff]  }
  0xc7   :  { %1801 = vmatprep.subr.bf16.mxu0 %v10471_v0  ;;  %1965 = vmatprep.subr.bf16.mxu1 %v10474_v1  ;;  %v10551_v0 = vld [vmem:[%s14532_s4 + $0x28] ss:$20 sps:$4 sm:$0xff]   ;;  %v10532_v1 = vld [vmem:[%s14530_s2 + $0x6f0] ss:$20 sps:$4 sm:$0xff]  }
  0xca   :  { %1802 = vmatpush1.bf16.msra.mxu0 %v10469_v2  ;;  %1966 = vmatpush1.bf16.msra.mxu1 %v10472_v3  ;;  %v10559_v2 = vld [vmem:[%s14532_s4 + $0x54] ss:$20 sps:$4 sm:$0xff]   ;;  %v10534_v3 = vld [vmem:[%s14530_s2 + $0x5b0] ss:$20 sps:$4 sm:$0xff]  }
  0xcb   :  { %1803 = vmatprep.subr.bf16.mxu0 %v10477_v4  ;;  %1967 = vmatprep.subr.bf16.mxu1 %v10480_v6  ;;  %v10557_v4 = vld [vmem:[%s14532_s4 + $0x50] ss:$20 sps:$4 sm:$0xff]   ;;  %v10536_v6 = vld [vmem:[%s14530_s2 + $0x718] ss:$20 sps:$4 sm:$0xff]  }
  0xce   :  { %1804 = vmatpush1.bf16.msra.mxu0 %v10475_v7  ;;  %1968 = vmatpush1.bf16.msra.mxu1 %v10478_v8  ;;  %v10565_v7 = vld [vmem:[%s14532_s4 + $0x7c] ss:$20 sps:$4 sm:$0xff]   ;;  %v10538_v8 = vld [vmem:[%s14530_s2 + $0x5d8] ss:$20 sps:$4 sm:$0xff]  }
  0xcf   :  { %1805 = vmatprep.subr.bf16.mxu0 %v10483_v10  ;;  %1969 = vmatprep.subr.bf16.mxu1 %v10486_v11  ;;  %v10563_v10 = vld [vmem:[%s14532_s4 + $0x78] ss:$20 sps:$4 sm:$0xff]   ;;  %v10540_v11 = vld [vmem:[%s14530_s2 + $0x740] ss:$20 sps:$4 sm:$0xff]  }
  0xd2   :  { %1806 = vmatpush1.bf16.msra.mxu0 %v10481_v12  ;;  %1970 = vmatpush1.bf16.msra.mxu1 %v10484_v14  ;;  %v10571_v12 = vld [vmem:[%s14532_s4 + $0xa4] ss:$20 sps:$4 sm:$0xff]   ;;  %v10541_v14 = vld [vmem:[%s14530_s2 + $0x600] ss:$20 sps:$4 sm:$0xff]  }
  0xd3   :  { %1816 = vmatprep.subr.bf16.mxu0 %v10491_v16  ;;  %1980 = vmatprep.subr.bf16.mxu1 %v10494_v17  ;;  %v10569_v16 = vld [vmem:[%s14532_s4 + $0xa0] ss:$20 sps:$4 sm:$0xff]   ;;  %v10542_v17 = vld [vmem:[%s14530_s2 + $0x768] ss:$20 sps:$4 sm:$0xff]  }
  0xd5   :  { %1808 = vmatmul.mubr.bf16.vlgmr.msra.gmra.mrb[0].mxu0 %v12422_v18  ;;  %1972 = vmatmul.mubr.bf16.vlgmr.msra.gmra.mrb[0].mxu1 %v12422_v18 }
  0xd6   :  { %1817 = vmatpush1.bf16.msra.mxu0 %v10489_v19  ;;  %1981 = vmatpush1.bf16.msra.mxu1 %v10492_v20  ;;  %v10577_v19 = vld [vmem:[%s14532_s4 + $0xcc] ss:$20 sps:$4 sm:$0xff]   ;;  %v10543_v20 = vld [vmem:[%s14530_s2 + $0x628] ss:$20 sps:$4 sm:$0xff]  }
  0xd7   :  { %1848 = vmatprep.mubr.bf16.mxu0 %v11701_v22  ;;  %2012 = vmatprep.mubr.bf16.mxu1 %v11701_v22 }
  0xd8   :  { %9731 = vmatprep.subr.bf16.mxu0 %v10495_v21  ;;  %9753 = vmatprep.subr.bf16.mxu1 %v10510_v13  ;;  %v10575_v21 = vld [vmem:[%s14532_s4 + $0xc8] ss:$20 sps:$4 sm:$0xff]   ;;  %v10550_v13 = vld [vmem:[%s14532_s4 + $0xc] ss:$20 sps:$4 sm:$0xff]  }
  0xe1   :  { %9002 = vmatmul.mubr.msk.bf16.vlgmr.msra.gmra.mrb[0].mxu0 %vm1689_vm0, %v12443_v23  ;;  %9003 = vmatmul.mubr.msk.bf16.vlgmr.msra.gmra.mrb[0].mxu1 %vm1689_vm0, %v12443_v23 }
  0xe2   :  { %9732 = vmatpush3.bf16.msra.mxu0 %v10497_v24  ;;  %9754 = vmatpush3.bf16.msra.mxu1 %v10511_v25  ;;  %v10556_v24 = vld [vmem:[%s14532_s4 + $0x34] ss:$20 sps:$4 sm:$0xff]   ;;  %v10554_v25 = vld [vmem:[%s14532_s4 + $0x30] ss:$20 sps:$4 sm:$0xff]  }
  0xe3   :  { %9733 = vmatprep.subr.bf16.mxu0 %v10498_v26  ;;  %9755 = vmatprep.subr.bf16.mxu1 %v10514_v27  ;;  %v10562_v26 = vld [vmem:[%s14532_s4 + $0x5c] ss:$20 sps:$4 sm:$0xff]   ;;  %v10560_v27 = vld [vmem:[%s14532_s4 + $0x58] ss:$20 sps:$4 sm:$0xff]  }
  0xe4   :  { %2053 = vmatprep.mubr.bf16.mxu0 %v11943_v48  ;;  %2093 = vmatprep.mubr.bf16.mxu1 %v12087_v30  ;;  %v10503_v48 = vld [vmem:[%s14530_s2 + $0x88] ss:$20 sps:$4 sm:$0xff]  }
  0xe5   :  { %v10523_v30 = vld [vmem:[%s14530_s2 + $0x308] ss:$20 sps:$4 sm:$0xff]  }
  0xe6   :  { %9734 = vmatpush3.bf16.msra.mxu0 %v10499_v28  ;;  %9756 = vmatpush3.bf16.msra.mxu1 %v10515_v29  ;;  %v10568_v28 = vld [vmem:[%s14532_s4 + $0x84] ss:$20 sps:$4 sm:$0xff]   ;;  %v10574_v29 = vld [vmem:[%s14532_s4 + $0xac] ss:$20 sps:$4 sm:$0xff]  }
  0xe7   :  { %9735 = vmatprep.subr.bf16.mxu0 %v10500_v31  ;;  %9757 = vmatprep.subr.bf16.mxu1 %v10517_v32  ;;  %v10572_v31 = vld [vmem:[%s14532_s4 + $0xa8] ss:$20 sps:$4 sm:$0xff]  }
  0xe8   :  { %v10580_v32 = vld [vmem:[%s14532_s4 + $0xd4] ss:$20 sps:$4 sm:$0xff]  }
  0xea   :  { %9736 = vmatpush3.bf16.msra.mxu0 %v10501_v33  ;;  %9758 = vmatpush3.bf16.msra.mxu1 %v10519_v34  ;;  %v10578_v33 = vld [vmem:[%s14532_s4 + $0xd0] ss:$20 sps:$4 sm:$0xff]   ;;  %v10583_v34 = vld [vmem:[%s14532_s4 + $0xf4] ss:$20 sps:$4 sm:$0xff]  }
  0xeb   :  { %9737 = vmatprep.subr.bf16.mxu0 %v10502_v35  ;;  %9759 = vmatprep.subr.bf16.mxu1 %v10521_v36  ;;  %v10586_v35 = vld [vmem:[%s14532_s4 + $0xfc] ss:$20 sps:$4 sm:$0xff]  }
  0xec   :  { %v10581_v36 = vld [vmem:[%s14532_s4 + $0xf0] ss:$20 sps:$4 sm:$0xff]  }
  0xee   :  { %9738 = vmatpush3.bf16.msra.mxu0 %v10503_v48  ;;  %9760 = vmatpush3.bf16.msra.mxu1 %v10523_v30  ;;  %v10584_v48 = vld [vmem:[%s14532_s4 + $0xf8] ss:$20 sps:$4 sm:$0xff]   ;;  %v10589_v30 = vld [vmem:[%s14532_s4 + $0x11c] ss:$20 sps:$4 sm:$0xff]  }
  0xef   :  { %9739 = vmatprep.subr.bf16.mxu0 %v10504_v37  ;;  %9761 = vmatprep.subr.bf16.mxu1 %v10525_v38  ;;  %v10592_v37 = vld [vmem:[%s14532_s4 + $0x124] ss:$20 sps:$4 sm:$0xff]  }
  0xf0   :  { %v10587_v38 = vld [vmem:[%s14532_s4 + $0x118] ss:$20 sps:$4 sm:$0xff]  }
  0xf2   :  { %9740 = vmatpush3.bf16.msra.mxu0 %v10505_v39  ;;  %9762 = vmatpush3.bf16.msra.mxu1 %v10527_v40  ;;  %v10590_v39 = vld [vmem:[%s14532_s4 + $0x120] ss:$20 sps:$4 sm:$0xff]   ;;  %v10595_v40 = vld [vmem:[%s14532_s4 + $0x144] ss:$20 sps:$4 sm:$0xff]  }
  0xf3   :  { %9741 = vmatprep.subr.bf16.mxu0 %v10506_v41  ;;  %9763 = vmatprep.subr.bf16.mxu1 %v10529_v42  ;;  %v10598_v41 = vld [vmem:[%s14532_s4 + $0x14c] ss:$20 sps:$4 sm:$0xff]  }
  0xf4   :  { %v10593_v42 = vld [vmem:[%s14532_s4 + $0x140] ss:$20 sps:$4 sm:$0xff]  }
  0xf6   :  { %9742 = vmatpush3.bf16.msra.mxu0 %v10507_v43  ;;  %9764 = vmatpush3.bf16.msra.mxu1 %v10531_v44  ;;  %v10596_v43 = vld [vmem:[%s14532_s4 + $0x148] ss:$20 sps:$4 sm:$0xff]   ;;  %v10601_v44 = vld [vmem:[%s14532_s4 + $0x16c] ss:$20 sps:$4 sm:$0xff]  }
  0xf7   :  { %9743 = vmatprep.subr.bf16.mxu0 %v10508_v45  ;;  %9765 = vmatprep.subr.bf16.mxu1 %v10533_v46  ;;  %v10604_v45 = vld [vmem:[%s14532_s4 + $0x174] ss:$20 sps:$4 sm:$0xff]  }
  0xf8   :  { %v10599_v46 = vld [vmem:[%s14532_s4 + $0x168] ss:$20 sps:$4 sm:$0xff]  }
  0xfa   :  { %9744 = vmatpush3.bf16.msra.mxu0 %v10509_v47  ;;  %9766 = vmatpush3.bf16.msra.mxu1 %v10535_v49  ;;  %v10602_v47 = vld [vmem:[%s14532_s4 + $0x170] ss:$20 sps:$4 sm:$0xff]   ;;  %v10607_v49 = vld [vmem:[%s14532_s4 + $0x194] ss:$20 sps:$4 sm:$0xff]  }
  0xfb   :  { %9745 = vmatprep.subr.bf16.mxu0 %v10512_v50  ;;  %9767 = vmatprep.subr.bf16.mxu1 %v10537_v51  ;;  %v10610_v50 = vld [vmem:[%s14532_s4 + $0x19c] ss:$20 sps:$4 sm:$0xff]  }
  0xfc   :  { %v10605_v51 = vld [vmem:[%s14532_s4 + $0x190] ss:$20 sps:$4 sm:$0xff]  }
  0xfe   :  { %9746 = vmatpush3.bf16.msra.mxu0 %v10513_v52  ;;  %9768 = vmatpush3.bf16.msra.mxu1 %v10539_v53  ;;  %v10608_v52 = vld [vmem:[%s14532_s4 + $0x198] ss:$20 sps:$4 sm:$0xff]   ;;  %v10613_v53 = vld [vmem:[%s14532_s4 + $0x1bc] ss:$20 sps:$4 sm:$0xff]  }
  0xff   :  { %9775 = vmatprep.subr.bf16.mxu0 %v10516_v54  ;;  %10008 = vmatprep.subr.bf16.mxu1 %v11702_v59  ;;  %v10616_v54 = vld [vmem:[%s14532_s4 + $0x1c4] ss:$20 sps:$4 sm:$0xff]  }
 0x101   :  { %2054 = vmatmul.mubr.bf16.vlgmr.msra.gmra.mrb[4].mxu0 %v12007_v5  ;;  %2094 = vmatmul.mubr.bf16.vlgmr.msra.gmra.mrb[4].mxu1 %v12213_v9  ;;  %v10545_v5 = vld [vmem:[%s14532_s4] ss:$20 sps:$4 sm:$0xff]   ;;  %v10528_v9 = vld [vmem:[%s14530_s2 + $0x6c8] ss:$20 sps:$4 sm:$0xff]  }
 0x102   :  { %9776 = vmatpush3.bf16.msra.mxu0 %v10518_v55  ;;  %2133 = vmatprep.mubr.bf16.mxu0 %v12234_v15  ;;  %v10553_v15 = vld [vmem:[%s14532_s4 + $0x2c] ss:$20 sps:$4 sm:$0xff]  }
 0x103   :  { %9777 = vmatprep.subr.bf16.mxu0 %v10520_v56  ;;  %10009 = vmatpush3.bf16.msra.mxu1 %v10544_v57  ;;  %v10611_v55 = vld [vmem:[%s14532_s4 + $0x1b8] ss:$20 sps:$4 sm:$0xff]   ;;  %v10614_v56 = vld [vmem:[%s14532_s4 + $0x1c0] ss:$20 sps:$4 sm:$0xff]  }
 0x104   :  { %10010 = vmatprep.mubr.msk.bf16.mxu1 %vm11703_vm1, %v11702_v59  ;;  %3508 = vmatprep.subr.bf16.mxu1 %v10547_v58  ;;  %v10619_v57 = vld [vmem:[%s14532_s4 + $0x1e4] ss:$20 sps:$4 sm:$0xff]   ;;  %v10622_v58 = vld [vmem:[%s14532_s4 + $0x1ec] ss:$20 sps:$4 sm:$0xff]  }
 0x106   :  { %9778 = vmatpush3.bf16.msra.mxu0 %v10522_v60  ;;  %v10617_v60 = vld [vmem:[%s14532_s4 + $0x1e0] ss:$20 sps:$4 sm:$0xff]  }
 0x107   :  { %9779 = vmatprep.subr.bf16.mxu0 %v10524_v61  ;;  %v10620_v61 = vld [vmem:[%s14532_s4 + $0x1e8] ss:$20 sps:$4 sm:$0xff]  }
 0x109   :  { %10011 = vmatmul.mubr.msk.bf16.vlgmr.msra.gmra.mrb[8].mxu1 %vm1689_vm0, %v12443_v23  ;;  %v10548_v23 = vld [vmem:[%s14532_s4 + $0x8] ss:$20 sps:$4 sm:$0xff]  }
 0x10a   :  { %9780 = vmatpush3.bf16.msra.mxu0 %v10526_v62  ;;  %3509 = vmatpush1.bf16.msra.mxu1 %v10545_v5  ;;  %v10625_v62 = vld [vmem:[%s14532_s4 + $0x20c] ss:$20 sps:$4 sm:$0xff]   ;;  %v10628_v5 = vld [vmem:[%s14532_s4 + $0x214] ss:$20 sps:$4 sm:$0xff]  }
 0x10b   :  { %9781 = vmatprep.subr.bf16.mxu0 %v10528_v9  ;;  %3510 = vmatprep.subr.bf16.mxu1 %v10553_v15  ;;  %v10623_v9 = vld [vmem:[%s14532_s4 + $0x208] ss:$20 sps:$4 sm:$0xff]   ;;  %v10626_v15 = vld [vmem:[%s14532_s4 + $0x210] ss:$20 sps:$4 sm:$0xff]  }
 0x10e   :  { %9782 = vmatpush3.bf16.msra.mxu0 %v10530_v63  ;;  %3511 = vmatpush1.bf16.msra.mxu1 %v10551_v0  ;;  %v10631_v63 = vld [vmem:[%s14532_s4 + $0x234] ss:$20 sps:$4 sm:$0xff]   ;;  %v10634_v0 = vld [vmem:[%s14532_s4 + $0x23c] ss:$20 sps:$4 sm:$0xff]  }
 0x10f   :  { %9783 = vmatprep.subr.bf16.mxu0 %v10532_v1  ;;  %3512 = vmatprep.subr.bf16.mxu1 %v10559_v2  ;;  %v10629_v1 = vld [vmem:[%s14532_s4 + $0x230] ss:$20 sps:$4 sm:$0xff]   ;;  %v10632_v2 = vld [vmem:[%s14532_s4 + $0x238] ss:$20 sps:$4 sm:$0xff]  }
 0x112   :  { %9784 = vmatpush3.bf16.msra.mxu0 %v10534_v3  ;;  %3513 = vmatpush1.bf16.msra.mxu1 %v10557_v4  ;;  %v10637_v3 = vld [vmem:[%s14532_s4 + $0x25c] ss:$20 sps:$4 sm:$0xff]   ;;  %v10640_v4 = vld [vmem:[%s14532_s4 + $0x264] ss:$20 sps:$4 sm:$0xff]  }
 0x113   :  { %9785 = vmatprep.subr.bf16.mxu0 %v10536_v6  ;;  %3514 = vmatprep.subr.bf16.mxu1 %v10565_v7  ;;  %v10635_v6 = vld [vmem:[%s14532_s4 + $0x258] ss:$20 sps:$4 sm:$0xff]   ;;  %v10638_v7 = vld [vmem:[%s14532_s4 + $0x260] ss:$20 sps:$4 sm:$0xff]  }
 0x116   :  { %9786 = vmatpush3.bf16.msra.mxu0 %v10538_v8  ;;  %3515 = vmatpush1.bf16.msra.mxu1 %v10563_v10  ;;  %v10643_v8 = vld [vmem:[%s14532_s4 + $0x284] ss:$20 sps:$4 sm:$0xff]   ;;  %v10646_v10 = vld [vmem:[%s14532_s4 + $0x28c] ss:$20 sps:$4 sm:$0xff]  }
 0x117   :  { %9787 = vmatprep.subr.bf16.mxu0 %v10540_v11  ;;  %3516 = vmatprep.subr.bf16.mxu1 %v10571_v12  ;;  %v366_v11 = vlaneseq }
 0x119   :  { %v12799_v12 = vshrl.u32 %v366_v11, 7 }
 0x11a   :  { %9788 = vmatpush3.bf16.msra.mxu0 %v10541_v14  ;;  %3517 = vmatpush1.bf16.msra.mxu1 %v10569_v16  ;;  %v12804_v14 = vld [vmem:[%s14531_s3] sm:$0x1f] }
 0x11b   :  { %9789 = vmatprep.subr.bf16.mxu0 %v10542_v17  ;;  %3518 = vmatprep.subr.bf16.mxu1 %v10577_v19  ;;  %v12807_v16 = vsub.s32 0, %v12799_v12  ;;  %v12810_v17 = vsub.s32 1, %v12799_v12  ;;  %v12813_v19 = vsub.s32 3, %v12799_v12 }
 0x11e   :  { %9790 = vmatpush3.bf16.msra.mxu0 %v10543_v20  ;;  %3519 = vmatpush1.bf16.msra.mxu1 %v10575_v21  ;;  %v369_v20 = vrot.slane %v12804_v14, %v12807_v16  ;;  %v373_v21 = vrot.slane %v12804_v14, %v12810_v17 }
 0x11f   :  { %3631 = vmatprep.subr.bf16.mxu0 %v10550_v13  ;;  %3520 = vmatprep.subr.bf16.mxu1 %v10583_v34  ;;  %v381_v13 = vrot.slane %v12804_v14, %v12813_v19 }
 0x121   :  { %2134 = vmatmul.mubr.bf16.vlgmr.msra.gmra.mrb[8].mxu0 %v12422_v18  ;;  %v10566_v18 = vld [vmem:[%s14532_s4 + $0x80] ss:$20 sps:$4 sm:$0xff]  }
 0x122   :  { %3632 = vmatpush1.bf16.msra.mxu0 %v10548_v23  ;;  %3521 = vmatpush1.bf16.msra.mxu1 %v10581_v36 }
 0x123   :  { %3633 = vmatprep.subr.bf16.mxu0 %v10556_v24  ;;  %3522 = vmatprep.subr.bf16.mxu1 %v10589_v30 }
 0x126   :  { %3634 = vmatpush1.bf16.msra.mxu0 %v10554_v25  ;;  %3523 = vmatpush1.bf16.msra.mxu1 %v10587_v38 }
 0x127   :  { %3635 = vmatprep.subr.bf16.mxu0 %v10562_v26  ;;  %3524 = vmatprep.subr.bf16.mxu1 %v10595_v40 }
 0x12a   :  { %3636 = vmatpush1.bf16.msra.mxu0 %v10560_v27  ;;  %3525 = vmatpush1.bf16.msra.mxu1 %v10593_v42 }
 0x12b   :  { %3637 = vmatprep.subr.bf16.mxu0 %v10568_v28  ;;  %3526 = vmatprep.subr.bf16.mxu1 %v10601_v44 }
 0x12e   :  { %3638 = vmatpush1.bf16.msra.mxu0 %v10566_v18  ;;  %3527 = vmatpush1.bf16.msra.mxu1 %v10599_v46 }
 0x12f   :  { %3639 = vmatprep.subr.bf16.mxu0 %v10574_v29  ;;  %3528 = vmatprep.subr.bf16.mxu1 %v10607_v49 }
 0x132   :  { %3640 = vmatpush1.bf16.msra.mxu0 %v10572_v31  ;;  %3529 = vmatpush1.bf16.msra.mxu1 %v10605_v51  ;;  %v12833_v51 = vsub.s32 4, %v12799_v12 }
 0x133   :  { %3641 = vmatprep.subr.bf16.mxu0 %v10580_v32  ;;  %3530 = vmatprep.subr.bf16.mxu1 %v10613_v53 }
 0x136   :  { %3642 = vmatpush1.bf16.msra.mxu0 %v10578_v33  ;;  %3531 = vmatpush1.bf16.msra.mxu1 %v10611_v55 }
 0x137   :  { %3643 = vmatprep.subr.bf16.mxu0 %v10586_v35  ;;  %3532 = vmatprep.subr.bf16.mxu1 %v10619_v57 }
 0x13a   :  { %3644 = vmatpush1.bf16.msra.mxu0 %v10584_v48  ;;  %3533 = vmatpush1.bf16.msra.mxu1 %v10617_v60  ;;  %v385_v60 = vrot.slane %v12804_v14, %v12833_v51 }
 0x13b   :  { %3645 = vmatprep.subr.bf16.mxu0 %v10592_v37  ;;  %3534 = vmatprep.subr.bf16.mxu1 %v10625_v62 }
 0x13e   :  { %3646 = vmatpush1.bf16.msra.mxu0 %v10590_v39  ;;  %3535 = vmatpush1.bf16.msra.mxu1 %v10623_v9 }
 0x13f   :  { %3647 = vmatprep.subr.bf16.mxu0 %v10598_v41  ;;  %3536 = vmatprep.subr.bf16.mxu1 %v10631_v63 }
 0x142   :  { %3648 = vmatpush1.bf16.msra.mxu0 %v10596_v43  ;;  %3537 = vmatpush1.bf16.msra.mxu1 %v10629_v1 }
 0x143   :  { %3649 = vmatprep.subr.bf16.mxu0 %v10604_v45  ;;  %3538 = vmatprep.subr.bf16.mxu1 %v10637_v3 }
 0x146   :  { %3650 = vmatpush1.bf16.msra.mxu0 %v10602_v47  ;;  %3539 = vmatpush1.bf16.msra.mxu1 %v10635_v6 }
 0x147   :  { %3651 = vmatprep.subr.bf16.mxu0 %v10610_v50  ;;  %3549 = vmatprep.subr.bf16.mxu1 %v10643_v8 }
 0x14a   :  { %3652 = vmatpush1.bf16.msra.mxu0 %v10608_v52 }
 0x14b   :  { %3653 = vmatprep.subr.bf16.mxu0 %v10616_v54  ;;  %v10661_v54 = vld [vmem:[%s14532_s4 + $0x2fc] ss:$20 sps:$4 sm:$0xff]  }
 0x14e   :  { %3654 = vmatpush1.bf16.msra.mxu0 %v10614_v56 }
 0x14f   :  { %3655 = vmatprep.subr.bf16.mxu0 %v10622_v58 }
 0x152   :  { %3656 = vmatpush1.bf16.msra.mxu0 %v10620_v61 }
 0x153   :  { %3657 = vmatprep.subr.bf16.mxu0 %v10628_v5 }
 0x156   :  { %3658 = vmatpush1.bf16.msra.mxu0 %v10626_v15 }
 0x157   :  { %3659 = vmatprep.subr.bf16.mxu0 %v10634_v0 }
 0x15a   :  { %3660 = vmatpush1.bf16.msra.mxu0 %v10632_v2 }
 0x15b   :  { %3661 = vmatprep.subr.bf16.mxu0 %v10640_v4 }
 0x15e   :  { %3662 = vmatpush1.bf16.msra.mxu0 %v10638_v7 }
 0x15f   :  { %3672 = vmatprep.subr.bf16.mxu0 %v10646_v10 }
 0x1b4   :  { %v1850_v23 = vpop.f32.mrb[0].mxu0  ;;  %v12821_v24 = vpop.f32.mrb[0].mxu1 }
 0x1b5   :  { %v12823_v25 = vadd.f32 %v1850_v23, %v369_v20  ;;  %v1852_v26 = vpop.f32.mrb[1].mxu0  ;;  %v2016_v27 = vpop.f32.mrb[1].mxu1 }
 0x1b6   :  { %v12825_v28 = vadd.f32 %v1852_v26, %v373_v21  ;;  %v12827_v18 = vadd.f32 %v2016_v27, %v381_v13  ;;  %v1854_v29 = vpop.f32.mrb[2].mxu0  ;;  %v2018_v31 = vpop.f32.mrb[2].mxu1 }
 0x1b7   :  { %v2186_v32 = vand.u32 2147483647, %v12823_v25  ;;  %v1855_v36 = vpop.f32.mrb[3].mxu0  ;;  %v2019_v48 = vpop.f32.mrb[3].mxu1  ;;  %v2181_v62 = vmax.f32 %v12823_v25, 0.0 }
 0x1b8   :  { %v2187_v33 = vand.u32 2147483647, %v12825_v28  ;;  %v2189_v34 = vand.u32 2147483647, %v12827_v18  ;;  %v2182_v23 = vmax.f32 %v12825_v28, 0.0  ;;  %v12855_v28 = vsub.s32 2, %v12799_v12 }
 0x1b9   :  { %v2191_v35 = vsub.f32 0.0, %v2186_v32  ;;  %v2184_v32 = vmax.f32 %v12827_v18, 0.0  ;;  %v10649_v18 = vld [vmem:[%s14532_s4 + $0x2ac] ss:$20 sps:$4 sm:$0xff]  }
 0x1ba   :  { %v2192_v30 = vsub.f32 0.0, %v2187_v33  ;;  %v2194_v37 = vsub.f32 0.0, %v2189_v34  ;;  %v10641_v34 = vld [vmem:[%s14532_s4 + $0x280] ss:$20 sps:$4 sm:$0xff]  }
 0x1bb   :  { %v2196_v38 = vmul.f32 1.442695, %v2191_v35  ;;  %v10644_v35 = vld [vmem:[%s14532_s4 + $0x288] ss:$20 sps:$4 sm:$0xff]  }
 0x1bc   :  { %v2198_v39 = vmul.f32 1.442695, %v2192_v30  ;;  %v2202_v40 = vmul.f32 1.442695, %v2194_v37 }
 0x1bd   :  { %11516 = vpow2.f32 %v2196_v38 }
 0x1be   :  { %11518 = vpow2.f32 %v2198_v39 }
 0x1bf   :  { %11520 = vpow2.f32 %v2202_v40  ;;  %v10652_v40 = vld [vmem:[%s14532_s4 + $0x2b4] ss:$20 sps:$4 sm:$0xff]  }
 0x1c7   :  { %v11517_v41 = vpop.eup %11516 }
 0x1c8   :  { %v2206_v42 = vadd.f32 1.0, %v11517_v41  ;;  %v11519_v43 = vpop.eup %11518  ;;  %v2209_v47 = vmul.f32 -0.5, %v11517_v41  ;;  %v2212_v49 = vand.u32 2147483647, %v11517_v41 }
 0x1c9   :  { %v11521_v44 = vpop.eup %11520  ;;  %v2215_v45 = vadd.f32 1.0, %v11519_v43  ;;  %v2218_v50 = vmul.f32 -0.5, %v11519_v43  ;;  %v2221_v57 = vand.u32 2147483647, %v11519_v43 }
 0x1ca   :  { %11522 = vlog2.f32 %v2206_v42  ;;  %v2233_v46 = vadd.f32 1.0, %v11521_v44  ;;  %v2210_v52 = vadd.f32 1.0, %v2209_v47  ;;  %v2236_v53 = vmul.f32 -0.5, %v11521_v44  ;;  %v10647_v42 = vld [vmem:[%s14532_s4 + $0x2a8] ss:$20 sps:$4 sm:$0xff]  }
 0x1cb   :  { %11524 = vlog2.f32 %v2215_v45  ;;  %vm12835_vm2 = vcmp.lt.f32.partialorder %v2212_v49, 0.0004427343  ;;  %v2219_v55 = vadd.f32 1.0, %v2218_v50  ;;  %v2239_v2 = vand.u32 2147483647, %v11521_v44 }
 0x1cc   :  { %11526 = vlog2.f32 %v2233_v46  ;;  %v2211_v9 = vmul.f32 %v11517_v41, %v2210_v52  ;;  %v2237_v15 = vadd.f32 1.0, %v2236_v53  ;;  %vm2222_vm3 = vcmp.lt.f32.partialorder %v2221_v57, 0.0004427343  ;;  %v10655_v49 = vld [vmem:[%s14532_s4 + $0x2d4] ss:$20 sps:$4 sm:$0xff]  }
 0x1cd   :  { %v2220_v11 = vmul.f32 %v11519_v43, %v2219_v55  ;;  %vm2240_vm4 = vcmp.lt.f32.partialorder %v2239_v2, 0.0004427343  ;;  %v10650_v43 = vld [vmem:[%s14532_s4 + $0x2b0] ss:$20 sps:$4 sm:$0xff]   ;;  %v377_v45 = vrot.slane %v12804_v14, %v12855_v28  ;;  %v10656_v52 = vld [vmem:[%s14532_s4 + $0x2d8] ss:$20 sps:$4 sm:$0xff]  }
 0x1ce   :  { %v2238_v31 = vmul.f32 %v11521_v44, %v2237_v15  ;;  %v10658_v14 = vld [vmem:[%s14532_s4 + $0x2dc] ss:$20 sps:$4 sm:$0xff]   ;;  %v10664_v55 = vld [vmem:[%s14532_s4 + $0x304] ss:$20 sps:$4 sm:$0xff]   ;;  %v10676_v15 = vld [vmem:[%s14532_s4 + $0x354] ss:$20 sps:$4 sm:$0xff]  }
 0x1cf   :  { %v10653_v50 = vld [vmem:[%s14532_s4 + $0x2d0] ss:$20 sps:$4 sm:$0xff]   ;;  %v12898_v53 = vadd.f32 %v12821_v24, %v377_v45  ;;  %v10662_v24 = vld [vmem:[%s14532_s4 + $0x300] ss:$20 sps:$4 sm:$0xff]  }
 0x1d0   :  { %v10679_v2 = vld [vmem:[%s14532_s4 + $0x374] ss:$20 sps:$4 sm:$0xff]   ;;  %v10709_v45 = vld [vmem:[%s14532_s4 + $0x43c] ss:$20 sps:$4 sm:$0xff]  }
 0x1d1   :  { %v2188_v57 = vand.u32 2147483647, %v12898_v53 }
 0x1d4   :  { %v11523_v56 = vpop.eup %11522  ;;  %v9747_v58 = vpop.f32.mrb[4].mxu0 }
 0x1d5   :  { %v9769_v61 = vpop.f32.mrb[4].mxu1  ;;  %v2208_v5 = vmul.f32 0.6931472, %v11523_v56  ;;  %v9748_v63 = vpop.f32.mrb[5].mxu0  ;;  %v10659_v56 = vld [vmem:[%s14532_s4 + $0x2f8] ss:$20 sps:$4 sm:$0xff]  }
 0x1d6   :  { %v9770_v0 = vpop.f32.mrb[5].mxu1  ;;  %v11525_v1 = vpop.eup %11524  ;;  %v9749_v3 = vadd.f32 %v9748_v63, %v9747_v58  ;;  %v10667_v58 = vld [vmem:[%s14532_s4 + $0x324] ss:$20 sps:$4 sm:$0xff]   ;;  %v10671_v63 = vld [vmem:[%s14532_s4 + $0x348] ss:$20 sps:$4 sm:$0xff]  }
 0x1d7   :  { %v9750_v4 = vpop.f32.mrb[6].mxu0  ;;  %v9771_v6 = vadd.f32 %v9770_v0, %v9769_v61  ;;  %v9772_v7 = vpop.f32.mrb[6].mxu1  ;;  %v2214_v8 = vsel %vm12835_vm2, %v2211_v9, %v2208_v5  ;;  %v2217_v10 = vmul.f32 0.6931472, %v11525_v1  ;;  %v10665_v61 = vld [vmem:[%s14532_s4 + $0x320] ss:$20 sps:$4 sm:$0xff]  }
 0x1d8   :  { %v9751_v20 = vpop.f32.mrb[7].mxu0  ;;  %v9773_v21 = vpop.f32.mrb[7].mxu1  ;;  %v2056_v25 = vadd.f32 %v9749_v3, %v385_v60  ;;  %v2251_v26 = vadd.f32 %v2214_v8, %v2181_v62  ;;  %v10670_v60 = vld [vmem:[%s14532_s4 + $0x32c] ss:$20 sps:$4 sm:$0xff]   ;;  %v10668_v62 = vld [vmem:[%s14532_s4 + $0x328] ss:$20 sps:$4 sm:$0xff]  }
 0x1d9   :  { %v11527_v13 = vpop.eup %11526  ;;  %v2223_v27 = vsel %vm2222_vm3, %v2220_v11, %v2217_v10  ;;  %v2193_v5 = vsub.f32 0.0, %v2188_v57  ;;  %v10673_v9 = vld [vmem:[%s14532_s4 + $0x34c] ss:$20 sps:$4 sm:$0xff]   ;;  %v10674_v0 = vld [vmem:[%s14532_s4 + $0x350] ss:$20 sps:$4 sm:$0xff]  }
 0x1da   :  { %v2235_v29 = vmul.f32 0.6931472, %v11527_v13  ;;  %v2252_v33 = vadd.f32 %v2223_v27, %v2182_v23  ;;  %v12852_v36 = vadd.f32 %v9771_v6, %v2056_v25  ;;  %v12864_v39 = vpack.c.bf16 %v2251_v26, %v2251_v26  ;;  %v10682_v3 = vld [vmem:[%s14532_s4 + $0x37c] ss:$20 sps:$4 sm:$0xff]   ;;  %v10680_v6 = vld [vmem:[%s14532_s4 + $0x378] ss:$20 sps:$4 sm:$0xff]  }
 0x1db   :  { %v2200_v1 = vmul.f32 1.442695, %v2193_v5  ;;  %v10677_v4 = vld [vmem:[%s14532_s4 + $0x370] ss:$20 sps:$4 sm:$0xff]   ;;  %v10683_v21 = vld [vmem:[%s14532_s4 + $0x398] ss:$20 sps:$4 sm:$0xff]  }
 0x1dc   :  { %v2241_v48 = vsel %vm2240_vm4, %v2238_v31, %v2235_v29  ;;  %v12857_v30 = vpack.c.bf16 %v2252_v33, %v2252_v33  ;;  %v12862_v38 = vpop.f32.mrb[8].mxu1  ;;  %v10685_v7 = vld [vmem:[%s14532_s4 + $0x39c] ss:$20 sps:$4 sm:$0xff]   ;;  %v10688_v11 = vld [vmem:[%s14532_s4 + $0x3a4] ss:$20 sps:$4 sm:$0xff]  }
 0x1dd   :  { %v2254_v37 = vadd.f32 %v2241_v48, %v2184_v32  ;;  %v10012_v41 = vpop.f32.mrb[9].mxu1  ;;  %11528 = vpow2.f32 %v2200_v1  ;;  %v10686_v13 = vld [vmem:[%s14532_s4 + $0x3a0] ss:$20 sps:$4 sm:$0xff]   ;;  %v10691_v25 = vld [vmem:[%s14532_s4 + $0x3c4] ss:$20 sps:$4 sm:$0xff]  }
 0x1de   :  { %3540 = vmatprep.mubr.bf16.mxu1 %v12857_v30  ;;  %3663 = vmatprep.mubr.bf16.mxu0 %v12857_v30  ;;  %v2178_v44 = vpop.f32.mrb[10].mxu1  ;;  %v10694_v29 = vld [vmem:[%s14532_s4 + $0x3cc] ss:$20 sps:$4 sm:$0xff]   ;;  %v10692_v33 = vld [vmem:[%s14532_s4 + $0x3c8] ss:$20 sps:$4 sm:$0xff]  }
 0x1df   :  { %3541 = vmatmul.mubr.bf16.vlgmr.msra.gmra.mrb[12].mxu1 %v12864_v39  ;;  %3664 = vmatmul.mubr.bf16.vlgmr.msra.gmra.mrb[12].mxu0 %v12864_v39  ;;  %v12881_v46 = vpack.c.bf16 %v2254_v37, %v2254_v37  ;;  %v10013_v47 = vpop.f32.mrb[11].mxu1  ;;  %v10689_v32 = vld [vmem:[%s14532_s4 + $0x3c0] ss:$20 sps:$4 sm:$0xff]   ;;  %v10695_v37 = vld [vmem:[%s14532_s4 + $0x3e8] ss:$20 sps:$4 sm:$0xff]  }
 0x1e0   :  { %3550 = vmatpush1.bf16.msra.mxu1 %v10641_v34  ;;  %3673 = vmatpush1.bf16.msra.mxu0 %v10644_v35  ;;  %v10697_v34 = vld [vmem:[%s14532_s4 + $0x3ec] ss:$20 sps:$4 sm:$0xff]   ;;  %v10700_v35 = vld [vmem:[%s14532_s4 + $0x3f4] ss:$20 sps:$4 sm:$0xff]   ;;  %v10706_v41 = vld [vmem:[%s14532_s4 + $0x41c] ss:$20 sps:$4 sm:$0xff]  }
 0x1e1   :  { %3581 = vmatprep.mubr.bf16.mxu1 %v12881_v46  ;;  %3704 = vmatprep.mubr.bf16.mxu0 %v12881_v46  ;;  %v10712_v47 = vld [vmem:[%s14532_s4 + $0x444] ss:$20 sps:$4 sm:$0xff]   ;;  %v10721_v57 = vld [vmem:[%s14532_s4 + $0x48c] ss:$20 sps:$4 sm:$0xff]  }
 0x1e2   :  { %3551 = vmatprep.subr.bf16.mxu1 %v10649_v18  ;;  %3674 = vmatprep.subr.bf16.mxu0 %v10652_v40  ;;  %v10698_v18 = vld [vmem:[%s14532_s4 + $0x3f0] ss:$20 sps:$4 sm:$0xff]  }
 0x1e3   :  { %v10725_v1 = vld [vmem:[%s14532_s4 + $0x4b0] ss:$20 sps:$4 sm:$0xff]  }
 0x1e4   :  { %3552 = vmatpush1.bf16.msra.mxu1 %v10647_v42  ;;  %3675 = vmatpush1.bf16.msra.mxu0 %v10650_v43  ;;  %v10701_v42 = vld [vmem:[%s14532_s4 + $0x410] ss:$20 sps:$4 sm:$0xff]   ;;  %v10704_v43 = vld [vmem:[%s14532_s4 + $0x418] ss:$20 sps:$4 sm:$0xff]  }
 0x1e5   :  { %3553 = vmatprep.subr.bf16.mxu1 %v10655_v49  ;;  %3676 = vmatprep.subr.bf16.mxu0 %v10658_v14  ;;  %v10707_v49 = vld [vmem:[%s14532_s4 + $0x438] ss:$20 sps:$4 sm:$0xff]   ;;  %v10710_v14 = vld [vmem:[%s14532_s4 + $0x440] ss:$20 sps:$4 sm:$0xff]  }
 0x1e8   :  { %3554 = vmatpush1.bf16.msra.mxu1 %v10653_v50  ;;  %3677 = vmatpush1.bf16.msra.mxu0 %v10656_v52  ;;  %v10715_v52 = vld [vmem:[%s14532_s4 + $0x464] ss:$20 sps:$4 sm:$0xff]  }
 0x1e9   :  { %3555 = vmatprep.subr.bf16.mxu1 %v10661_v54  ;;  %3678 = vmatprep.subr.bf16.mxu0 %v10664_v55  ;;  %v10718_v54 = vld [vmem:[%s14532_s4 + $0x46c] ss:$20 sps:$4 sm:$0xff]  }
 0x1ea   :  { %v10713_v55 = vld [vmem:[%s14532_s4 + $0x460] ss:$20 sps:$4 sm:$0xff]  }
 0x1ec   :  { %3556 = vmatpush1.bf16.msra.mxu1 %v10659_v56  ;;  %3679 = vmatpush1.bf16.msra.mxu0 %v10662_v24  ;;  %v10716_v56 = vld [vmem:[%s14532_s4 + $0x468] ss:$20 sps:$4 sm:$0xff]  }
 0x1ed   :  { %3557 = vmatprep.subr.bf16.mxu1 %v10667_v58  ;;  %3680 = vmatprep.subr.bf16.mxu0 %v10670_v60  ;;  %v10724_v58 = vld [vmem:[%s14532_s4 + $0x494] ss:$20 sps:$4 sm:$0xff]  }
 0x1f0   :  { %3558 = vmatpush1.bf16.msra.mxu1 %v10665_v61  ;;  %3681 = vmatpush1.bf16.msra.mxu0 %v10668_v62  ;;  %v10719_v61 = vld [vmem:[%s14532_s4 + $0x488] ss:$20 sps:$4 sm:$0xff]   ;;  %v10722_v62 = vld [vmem:[%s14532_s4 + $0x490] ss:$20 sps:$4 sm:$0xff]  }
 0x1f1   :  { %3559 = vmatprep.subr.bf16.mxu1 %v10673_v9  ;;  %3682 = vmatprep.subr.bf16.mxu0 %v10676_v15  ;;  %v10727_v15 = vld [vmem:[%s14532_s4 + $0x4b4] ss:$20 sps:$4 sm:$0xff]  }
 0x1f4   :  { %3560 = vmatpush1.bf16.msra.mxu1 %v10671_v63  ;;  %3683 = vmatpush1.bf16.msra.mxu0 %v10674_v0  ;;  %v9791_v8 = vpop.f32.mrb[8].mxu0  ;;  %v10730_v63 = vld [vmem:[%s14532_s4 + $0x4bc] ss:$20 sps:$4 sm:$0xff]  }
 0x1f5   :  { %v9792_v10 = vpop.f32.mrb[9].mxu0  ;;  %3561 = vmatprep.subr.bf16.mxu1 %v10679_v2  ;;  %3684 = vmatprep.subr.bf16.mxu0 %v10682_v3  ;;  %v10728_v2 = vld [vmem:[%s14532_s4 + $0x4b8] ss:$20 sps:$4 sm:$0xff]   ;;  %v10733_v3 = vld [vmem:[%s14532_s4 + $0x4dc] ss:$20 sps:$4 sm:$0xff]  }
 0x1f6   :  { %v9793_v20 = vadd.f32 %v9792_v10, %v9791_v8  ;;  %v9794_v23 = vpop.f32.mrb[10].mxu0  ;;  %v10731_v10 = vld [vmem:[%s14532_s4 + $0x4d8] ss:$20 sps:$4 sm:$0xff]  }
 0x1f7   :  { %v9795_v26 = vpop.f32.mrb[11].mxu0 }
 0x1f8   :  { %3562 = vmatpush1.bf16.msra.mxu1 %v10677_v4  ;;  %3685 = vmatpush1.bf16.msra.mxu0 %v10680_v6  ;;  %v2136_v27 = vadd.f32 %v9793_v20, %v12852_v36  ;;  %v11529_v36 = vpop.eup %11528  ;;  %v10736_v4 = vld [vmem:[%s14532_s4 + $0x4e4] ss:$20 sps:$4 sm:$0xff]   ;;  %v2183_v20 = vmax.f32 %v12898_v53, 0.0  ;;  %v10737_v26 = vld [vmem:[%s14532_s4 + $0x500] ss:$20 sps:$4 sm:$0xff]  }
 0x1f9   :  { %3563 = vmatprep.subr.bf16.mxu1 %v10685_v7  ;;  %3686 = vmatprep.subr.bf16.mxu0 %v10688_v11  ;;  %v2224_v40 = vadd.f32 1.0, %v11529_v36  ;;  %v2227_v24 = vmul.f32 -0.5, %v11529_v36  ;;  %v2230_v9 = vand.u32 2147483647, %v11529_v36  ;;  %v10734_v11 = vld [vmem:[%s14532_s4 + $0x4e0] ss:$20 sps:$4 sm:$0xff]  }
 0x1fa   :  { %v12969_v31 = vadd.f32 %v12862_v38, %v2136_v27  ;;  %v10703_v38 = vld [vmem:[%s14532_s4 + $0x414] ss:$20 sps:$4 sm:$0xff]   ;;  %v10741_v53 = vld [vmem:[%s14532_s4 + $0x290] ss:$20 sps:$4 sm:$0xff]   ;;  %v10744_v27 = vld [vmem:[%s14532_s4 + $0x52c] ss:$20 sps:$4 sm:$0xff]  }
 0x1fb   :  { %11530 = vlog2.f32 %v2224_v40  ;;  %v2228_v5 = vadd.f32 1.0, %v2227_v24  ;;  %vm2231_vm5 = vcmp.lt.f32.partialorder %v2230_v9, 0.0004427343  ;;  %v10752_v40 = vld [vmem:[%s14532_s4 + $0x578] ss:$20 sps:$4 sm:$0xff]  }
 0x1fc   :  { %3564 = vmatpush1.bf16.msra.mxu1 %v10683_v21  ;;  %3687 = vmatpush1.bf16.msra.mxu0 %v10686_v13  ;;  %v2190_v48 = vand.u32 2147483647, %v12969_v31  ;;  %v10739_v21 = vld [vmem:[%s14532_s4 + $0x504] ss:$20 sps:$4 sm:$0xff]   ;;  %v10766_v9 = vld [vmem:[%s14532_s4 + $0x508] ss:$20 sps:$4 sm:$0xff]  }
 0x1fd   :  { %3565 = vmatprep.subr.bf16.mxu1 %v10691_v25  ;;  %3688 = vmatprep.subr.bf16.mxu0 %v10694_v29  ;;  %v2229_v6 = vmul.f32 %v11529_v36, %v2228_v5  ;;  %v10740_v13 = vld [vmem:[%s14532_s4 + $0x3d0] ss:$20 sps:$4 sm:$0xff]   ;;  %v10745_v29 = vld [vmem:[%s14532_s4 + $0x3f8] ss:$20 sps:$4 sm:$0xff]   ;;  %v10750_v36 = vld [vmem:[%s14532_s4 + $0x420] ss:$20 sps:$4 sm:$0xff]  }
 0x1fe   :  { %v2195_v44 = vsub.f32 0.0, %v2190_v48  ;;  %v10747_v48 = vld [vmem:[%s14532_s4 + $0x550] ss:$20 sps:$4 sm:$0xff]   ;;  %v10768_v5 = vld [vmem:[%s14532_s4 + $0x50c] ss:$20 sps:$4 sm:$0xff]  }
 0x200   :  { %3566 = vmatpush1.bf16.msra.mxu1 %v10689_v32  ;;  %3689 = vmatpush1.bf16.msra.mxu0 %v10692_v33  ;;  %v2204_v50 = vmul.f32 1.442695, %v2195_v44  ;;  %v10742_v33 = vld [vmem:[%s14532_s4 + $0x528] ss:$20 sps:$4 sm:$0xff]  }
 0x201   :  { %3567 = vmatprep.subr.bf16.mxu1 %v10697_v34  ;;  %3690 = vmatprep.subr.bf16.mxu0 %v10700_v35  ;;  %v10746_v34 = vld [vmem:[%s14532_s4 + $0x2b8] ss:$20 sps:$4 sm:$0xff]   ;;  %v10749_v35 = vld [vmem:[%s14532_s4 + $0x554] ss:$20 sps:$4 sm:$0xff]  }
 0x202   :  { %11532 = vpow2.f32 %v2204_v50 }
 0x204   :  { %3568 = vmatpush1.bf16.msra.mxu1 %v10695_v37  ;;  %3691 = vmatpush1.bf16.msra.mxu0 %v10698_v18  ;;  %v10751_v37 = vld [vmem:[%s14532_s4 + $0x2e0] ss:$20 sps:$4 sm:$0xff]   ;;  %v10754_v18 = vld [vmem:[%s14532_s4 + $0x57c] ss:$20 sps:$4 sm:$0xff]  }
 0x205   :  { %3569 = vmatprep.subr.bf16.mxu1 %v10703_v38  ;;  %3692 = vmatprep.subr.bf16.mxu0 %v10706_v41  ;;  %v11531_v60 = vpop.eup %11530  ;;  %v10756_v41 = vld [vmem:[%s14532_s4 + $0x308] ss:$20 sps:$4 sm:$0xff]  }
 0x206   :  { %v2226_v0 = vmul.f32 0.6931472, %v11531_v60  ;;  %v10765_v60 = vld [vmem:[%s14532_s4 + $0x358] ss:$20 sps:$4 sm:$0xff]  }
 0x208   :  { %3570 = vmatpush1.bf16.msra.mxu1 %v10701_v42  ;;  %3693 = vmatpush1.bf16.msra.mxu0 %v10704_v43  ;;  %v2232_v8 = vsel %vm2231_vm5, %v2229_v6, %v2226_v0  ;;  %v10773_v0 = vld [vmem:[%s14532_s4 + $0x534] ss:$20 sps:$4 sm:$0xff]   ;;  %v10776_v6 = vld [vmem:[%s14532_s4 + $0x558] ss:$20 sps:$4 sm:$0xff]  }
 0x209   :  { %3571 = vmatprep.subr.bf16.mxu1 %v10709_v45  ;;  %3694 = vmatprep.subr.bf16.mxu0 %v10712_v47  ;;  %v2253_v23 = vadd.f32 %v2232_v8, %v2183_v20  ;;  %v10759_v45 = vld [vmem:[%s14532_s4 + $0x5a4] ss:$20 sps:$4 sm:$0xff]   ;;  %v10779_v8 = vld [vmem:[%s14532_s4 + $0x580] ss:$20 sps:$4 sm:$0xff]   ;;  %v10782_v20 = vld [vmem:[%s14532_s4 + $0x5a8] ss:$20 sps:$4 sm:$0xff]  }
 0x20a   :  { %v10760_v47 = vld [vmem:[%s14532_s4 + $0x470] ss:$20 sps:$4 sm:$0xff]  }
 0x20b   :  { %v13081_v32 = vpack.c.bf16 %v2253_v23, %v2253_v23 }
 0x20c   :  { %3572 = vmatpush1.bf16.msra.mxu1 %v10707_v49  ;;  %3695 = vmatpush1.bf16.msra.mxu0 %v10710_v14  ;;  %v11533_v7 = vpop.eup %11532  ;;  %v2483_v14 = vld [vmem:[%s14532_s4 + $0x5c8] sm:$0xff] }
 0x20d   :  { %3573 = vmatprep.subr.bf16.mxu1 %v10715_v52  ;;  %3696 = vmatprep.subr.bf16.mxu0 %v10718_v54  ;;  %v2242_v25 = vadd.f32 1.0, %v11533_v7  ;;  %v2245_v38 = vmul.f32 -0.5, %v11533_v7  ;;  %v2248_v44 = vand.u32 2147483647, %v11533_v7  ;;  %v10757_v52 = vld [vmem:[%s14532_s4 + $0x5a0] ss:$20 sps:$4 sm:$0xff]   ;;  %v9190_v24 = vcombine.low %v2483_v14, %v2483_v14 }
 0x20e   :  { %v10761_v54 = vld [vmem:[%s14532_s4 + $0x330] ss:$20 sps:$4 sm:$0xff]  }
 0x20f   :  { %11534 = vlog2.f32 %v2242_v25  ;;  %v2246_v43 = vadd.f32 1.0, %v2245_v38  ;;  %vm2249_vm6 = vcmp.lt.f32.partialorder %v2248_v44, 0.0004427343  ;;  %v10787_v25 = vld [vmem:[%s14532_s4 + $0x150] ss:$20 sps:$4 sm:$0xff]  }
 0x210   :  { %3574 = vmatpush1.bf16.msra.mxu1 %v10713_v55  ;;  %3697 = vmatpush1.bf16.msra.mxu0 %v10716_v56  ;;  %v9191_v55 = vcombine.high %v2483_v14, %v2483_v14  ;;  %v10763_v56 = vld [vmem:[%s14532_s4 + $0x498] ss:$20 sps:$4 sm:$0xff]   ;;  %v10802_v38 = vld [vmem:[%s14532_s4 + $0x128] ss:$20 sps:$4 sm:$0xff]  }
 0x211   :  { %3575 = vmatprep.subr.bf16.mxu1 %v10721_v57  ;;  %3698 = vmatprep.subr.bf16.mxu0 %v10724_v58  ;;  %v2247_v50 = vmul.f32 %v11533_v7, %v2246_v43  ;;  %v2185_v58 = vmax.f32 %v12969_v31, 0.0  ;;  %v10769_v31 = vld [vmem:[%s14532_s4 + $0x4c0] ss:$20 sps:$4 sm:$0xff]   ;;  %v10781_v7 = vld [vmem:[%s14532_s4 + $0x584] ss:$20 sps:$4 sm:$0xff]   ;;  %v10811_v14 = vld [vmem:[%s14534_s6 + $0x48] sm:$0xff]  }
 0x212   :  { %v10807_v43 = vld [vmem:[%s14532_s4 + $0x5b0] ss:$20 sps:$4 sm:$0xff]   ;;  %v10808_v44 = vld [vmem:[%s14532_s4 + $0x5d8] ss:$0 sps:$4 sm:$0xff]  }
 0x214   :  { %3576 = vmatpush1.bf16.msra.mxu1 %v10719_v61  ;;  %3699 = vmatpush1.bf16.msra.mxu0 %v10722_v62  ;;  %v3494_v62 = vsel %vm3492_vm7, %v9190_v24, 0  ;;  %v10817_v24 = vld [vmem:[%s14534_s6 + $0x60] sm:$0xff]  }
 0x215   :  { %3577 = vmatprep.subr.bf16.mxu1 %v10727_v15  ;;  %3700 = vmatprep.subr.bf16.mxu0 %v10730_v63  ;;  %v10770_v15 = vld [vmem:[%s14532_s4 + $0x380] ss:$20 sps:$4 sm:$0xff]  }
 0x218   :  { %3578 = vmatpush1.bf16.msra.mxu1 %v10725_v1  ;;  %3701 = vmatpush1.bf16.msra.mxu0 %v10728_v2  ;;  %v10774_v1 = vld [vmem:[%s14532_s4 + $0x4e8] ss:$20 sps:$4 sm:$0xff]   ;;  %v10771_v2 = vld [vmem:[%s14532_s4 + $0x530] ss:$20 sps:$4 sm:$0xff]  }
 0x219   :  { %3579 = vmatprep.subr.bf16.mxu1 %v10733_v3  ;;  %3702 = vmatprep.subr.bf16.mxu0 %v10736_v4  ;;  %v11535_v42 = vpop.eup %11534  ;;  %v10775_v3 = vld [vmem:[%s14532_s4 + $0x3a8] ss:$20 sps:$4 sm:$0xff]  }
 0x21a   :  { %v2244_v49 = vmul.f32 0.6931472, %v11535_v42  ;;  %v10778_v4 = vld [vmem:[%s14532_s4 + $0x55c] ss:$20 sps:$4 sm:$0xff]   ;;  %v10805_v42 = vld [vmem:[%s14532_s4 + $0x560] ss:$20 sps:$4 sm:$0xff]  }
 0x21c   :  { %3580 = vmatpush1.bf16.msra.mxu1 %v10731_v10  ;;  %3703 = vmatpush1.bf16.msra.mxu0 %v10734_v11  ;;  %v2250_v57 = vsel %vm2249_vm6, %v2247_v50, %v2244_v49  ;;  %v10784_v10 = vld [vmem:[%s14532_s4 + $0x5ac] ss:$20 sps:$4 sm:$0xff]   ;;  %v2484_v11 = vld [vmem:[%s14532_s4 + $0x5d0] sm:$0xff] }
 0x21d   :  { %3590 = vmatprep.subr.bf16.mxu1 %v10739_v21  ;;  %9821 = vmatprep.subr.bf16.mxu0 %v10740_v13  ;;  %v2255_v61 = vadd.f32 %v2250_v57, %v2185_v58  ;;  %v9193_v21 = vcombine.high %v2484_v11, %v2484_v11  ;;  %v9192_v13 = vcombine.low %v2484_v11, %v2484_v11  ;;  %v10810_v49 = vld [vmem:[%s14534_s6] sm:$0xff]   ;;  %v10812_v50 = vld [vmem:[%s14534_s6 + $0x8] sm:$0xff]   ;;  %v10837_v11 = vld [vmem:[%s14534_s6 + $0xf0] sm:$0xff]  }
 0x21e   :  { %v10818_v57 = vld [vmem:[%s14534_s6 + $0x20] sm:$0xff]   ;;  %v10819_v58 = vld [vmem:[%s14534_s6 + $0x68] sm:$0xff]  }
 0x21f   :  { %3582 = vmatmul.mubr.bf16.vlgmr.msra.gmra.mrb[12].mxu1 %v13081_v32  ;;  %3705 = vmatmul.mubr.bf16.vlgmr.msra.gmra.mrb[12].mxu0 %v13081_v32  ;;  %v13153_v63 = vpack.c.bf16 %v2255_v61, %v2255_v61  ;;  %v3500_v23 = vsel %vm3492_vm7, %v9192_v13, 0  ;;  %v10821_v61 = vld [vmem:[%s14534_s6 + $0x70] sm:$0xff]   ;;  %v10840_v13 = vld [vmem:[%s14534_s6 + $0xb8] sm:$0xff]  }
 0x220   :  { %3591 = vmatpush1.bf16.msra.mxu1 %v10737_v26  ;;  %9822 = vmatpush3.bf16.msra.mxu0 %v10741_v53  ;;  %v10788_v26 = vld [vmem:[%s14532_s4 + $0x10] ss:$20 sps:$4 sm:$0xff]   ;;  %v10789_v53 = vld [vmem:[%s14532_s4 + $0x178] ss:$20 sps:$4 sm:$0xff]  }
 0x221   :  { %3826 = vmatprep.mubr.bf16.mxu0 %v12881_v46  ;;  %3592 = vmatprep.subr.bf16.mxu1 %v10744_v27  ;;  %v10755_v46 = vld [vmem:[%s14532_s4 + $0x448] ss:$20 sps:$4 sm:$0xff]   ;;  %v10790_v27 = vld [vmem:[%s14532_s4 + $0x38] ss:$20 sps:$4 sm:$0xff]  }
 0x222   :  { %9823 = vmatprep.subr.bf16.mxu0 %v10745_v29  ;;  %3622 = vmatprep.mubr.bf16.mxu1 %v11701_v22  ;;  %v10791_v29 = vld [vmem:[%s14532_s4 + $0x1a0] ss:$20 sps:$4 sm:$0xff]  }
 0x224   :  { %3593 = vmatpush1.bf16.msra.mxu1 %v10742_v33  ;;  %9824 = vmatpush3.bf16.msra.mxu0 %v10746_v34  ;;  %v10793_v33 = vld [vmem:[%s14532_s4 + $0x1c8] ss:$20 sps:$4 sm:$0xff]   ;;  %v10795_v34 = vld [vmem:[%s14532_s4 + $0x1f0] ss:$20 sps:$4 sm:$0xff]  }
 0x225   :  { %3594 = vmatprep.subr.bf16.mxu1 %v10749_v35  ;;  %9825 = vmatprep.subr.bf16.mxu0 %v10750_v36  ;;  %v10796_v35 = vld [vmem:[%s14532_s4 + $0xb0] ss:$20 sps:$4 sm:$0xff]   ;;  %v10797_v36 = vld [vmem:[%s14532_s4 + $0x218] ss:$20 sps:$4 sm:$0xff]  }
 0x228   :  { %3595 = vmatpush1.bf16.msra.mxu1 %v10747_v48  ;;  %9826 = vmatpush3.bf16.msra.mxu0 %v10751_v37  ;;  %v10798_v48 = vld [vmem:[%s14532_s4 + $0xd8] ss:$20 sps:$4 sm:$0xff]   ;;  %v10799_v37 = vld [vmem:[%s14532_s4 + $0x240] ss:$20 sps:$4 sm:$0xff]  }
 0x229   :  { %3596 = vmatprep.subr.bf16.mxu1 %v10754_v18  ;;  %9827 = vmatprep.subr.bf16.mxu0 %v10755_v46  ;;  %v10800_v18 = vld [vmem:[%s14532_s4 + $0x100] ss:$20 sps:$4 sm:$0xff]   ;;  %v10801_v46 = vld [vmem:[%s14532_s4 + $0x268] ss:$20 sps:$4 sm:$0xff]  }
 0x22c   :  { %3597 = vmatpush1.bf16.msra.mxu1 %v10752_v40  ;;  %9828 = vmatpush3.bf16.msra.mxu0 %v10756_v41  ;;  %v10803_v40 = vld [vmem:[%s14532_s4 + $0x510] ss:$20 sps:$4 sm:$0xff]   ;;  %v10804_v41 = vld [vmem:[%s14532_s4 + $0x538] ss:$20 sps:$4 sm:$0xff]  }
 0x22d   :  { %3598 = vmatprep.subr.bf16.mxu1 %v10759_v45  ;;  %9829 = vmatprep.subr.bf16.mxu0 %v10760_v47  ;;  %v3506_v45 = vsel %vm3492_vm7, %v10808_v44, 0  ;;  %v10809_v47 = vld [vmem:[%s14534_s6 + $0x40] sm:$0xff]  }
 0x230   :  { %3599 = vmatpush1.bf16.msra.mxu1 %v10757_v52  ;;  %9830 = vmatpush3.bf16.msra.mxu0 %v10761_v54  ;;  %v10813_v52 = vld [vmem:[%s14534_s6 + $0x50] sm:$0xff]  }
 0x231   :  { %9195 = vmatprep.subr.msk.bf16.mxu1 %vm3492_vm7, %v9191_v55  ;;  %9831 = vmatprep.subr.bf16.mxu0 %v10763_v56  ;;  %v10814_v54 = vld [vmem:[%s14534_s6 + $0x10] sm:$0xff]   ;;  %v10815_v55 = vld [vmem:[%s14534_s6 + $0x58] sm:$0xff]  }
 0x232   :  { %v10816_v56 = vld [vmem:[%s14534_s6 + $0x18] sm:$0xff]  }
 0x234   :  { %3601 = vmatpush1.bf16.msra.mxu1 %v3494_v62  ;;  %9832 = vmatpush3.bf16.msra.mxu0 %v10765_v60  ;;  %v10820_v60 = vld [vmem:[%s14534_s6 + $0x28] sm:$0xff]   ;;  %v10822_v62 = vld [vmem:[%s14534_s6 + $0xc0] sm:$0xff]  }
 0x235   :  { %3713 = vmatprep.subr.bf16.mxu1 %v10768_v5  ;;  %9833 = vmatprep.subr.bf16.mxu0 %v10769_v31  ;;  %v10823_v5 = vld [vmem:[%s14534_s6 + $0x30] sm:$0xff]   ;;  %v10824_v31 = vld [vmem:[%s14534_s6 + $0x80] sm:$0xff]  }
 0x237   :  { %9196 = vmatmul.mubr.msk.bf16.vlgmr.msra.gmra.mrb[12].mxu1 %vm3488_vm8, %v13153_v63 }
 0x238   :  { %3714 = vmatpush1.bf16.msra.mxu1 %v10766_v9  ;;  %9834 = vmatpush3.bf16.msra.mxu0 %v10770_v15  ;;  %v10825_v9 = vld [vmem:[%s14534_s6 + $0x78] sm:$0xff]   ;;  %v10826_v15 = vld [vmem:[%s14534_s6 + $0xc8] sm:$0xff]  }
 0x239   :  { %3715 = vmatprep.subr.bf16.mxu1 %v10773_v0  ;;  %9835 = vmatprep.subr.bf16.mxu0 %v10774_v1  ;;  %v10828_v0 = vld [vmem:[%s14534_s6 + $0x88] sm:$0xff]   ;;  %v10829_v1 = vld [vmem:[%s14534_s6 + $0xd0] sm:$0xff]  }
 0x23a   :  { %3745 = vmatprep.mubr.bf16.mxu1 %v11701_v22 }
 0x23c   :  { %3716 = vmatpush1.bf16.msra.mxu1 %v10771_v2  ;;  %9836 = vmatpush3.bf16.msra.mxu0 %v10775_v3  ;;  %v10830_v2 = vld [vmem:[%s14534_s6 + $0x90] sm:$0xff]   ;;  %v10831_v3 = vld [vmem:[%s14534_s6 + $0xd8] sm:$0xff]  }
 0x23d   :  { %3717 = vmatprep.subr.bf16.mxu1 %v10778_v4  ;;  %9850 = vmatprep.subr.bf16.mxu0 %v10809_v47  ;;  %v10832_v4 = vld [vmem:[%s14534_s6 + $0x98] sm:$0xff]  }
 0x23f   :  { %3827 = vmatmul.mubr.bf16.vlgmr.msra.gmra.mrb[16].mxu0 %v13081_v32  ;;  %v10792_v32 = vld [vmem:[%s14532_s4 + $0x60] ss:$20 sps:$4 sm:$0xff]  }
 0x240   :  { %3718 = vmatpush1.bf16.msra.mxu1 %v10776_v6  ;;  %9851 = vmatpush3.bf16.msra.mxu0 %v10810_v49  ;;  %v10833_v6 = vld [vmem:[%s14534_s6 + $0xe0] sm:$0xff]  }
 0x241   :  { %3719 = vmatprep.subr.bf16.mxu1 %v10781_v7  ;;  %9852 = vmatprep.subr.bf16.mxu0 %v10811_v14  ;;  %v10834_v7 = vld [vmem:[%s14534_s6 + $0xa0] sm:$0xff]  }
 0x244   :  { %3720 = vmatpush1.bf16.msra.mxu1 %v10779_v8  ;;  %9853 = vmatpush3.bf16.msra.mxu0 %v10812_v50  ;;  %v10835_v8 = vld [vmem:[%s14534_s6 + $0xe8] sm:$0xff]  }
 0x245   :  { %3721 = vmatprep.subr.bf16.mxu1 %v10784_v10  ;;  %9854 = vmatprep.subr.bf16.mxu0 %v10813_v52  ;;  %v10836_v10 = vld [vmem:[%s14534_s6 + $0xa8] sm:$0xff]  }
 0x248   :  { %3722 = vmatpush1.bf16.msra.mxu1 %v10782_v20  ;;  %9855 = vmatpush3.bf16.msra.mxu0 %v10814_v54  ;;  %v10838_v20 = vld [vmem:[%s14534_s6 + $0xb0] sm:$0xff]  }
 0x249   :  { %9197 = vmatprep.subr.msk.bf16.mxu1 %vm3492_vm7, %v9193_v21  ;;  %9856 = vmatprep.subr.bf16.mxu0 %v10815_v55  ;;  %v10839_v21 = vld [vmem:[%s14534_s6 + $0xf8] sm:$0xff]  }
 0x24c   :  { %3724 = vmatpush1.bf16.msra.mxu1 %v3500_v23  ;;  %9857 = vmatpush3.bf16.msra.mxu0 %v10816_v56 }
 0x24d   :  { %9799 = vmatprep.subr.bf16.mxu1 %v10787_v25  ;;  %9858 = vmatprep.subr.bf16.mxu0 %v10817_v24 }
 0x24f   :  { %9198 = vmatmul.mubr.msk.bf16.vlgmr.msra.gmra.mrb[16].mxu1 %vm3488_vm8, %v13153_v63 }
 0x250   :  { %9800 = vmatpush3.bf16.msra.mxu1 %v10788_v26  ;;  %3786 = vmatprep.mubr.bf16.mxu1 %v12857_v30  ;;  %v10794_v30 = vld [vmem:[%s14532_s4 + $0x88] ss:$20 sps:$4 sm:$0xff]  }
 0x251   :  { %9801 = vmatprep.subr.bf16.mxu1 %v10789_v53  ;;  %9859 = vmatpush3.bf16.msra.mxu0 %v10818_v57 }
 0x252   :  { %9860 = vmatprep.subr.bf16.mxu0 %v10819_v58 }
 0x254   :  { %9802 = vmatpush3.bf16.msra.mxu1 %v10790_v27  ;;  %v13375_v27 = vld [vmem:[%s14533_s5] sm:$0x1f] }
 0x255   :  { %9803 = vmatprep.subr.bf16.mxu1 %v10791_v29  ;;  %9861 = vmatpush3.bf16.msra.mxu0 %v10820_v60  ;;  %v2491_v29 = vrot.slane %v13375_v27, %v12807_v16  ;;  %v2499_v49 = vrot.slane %v13375_v27, %v12855_v28  ;;  %v2503_v50 = vrot.slane %v13375_v27, %v12813_v19 }
 0x256   :  { %9862 = vmatprep.subr.bf16.mxu0 %v10821_v61 }
 0x258   :  { %9804 = vmatpush3.bf16.msra.mxu1 %v10792_v32  ;;  %v2495_v32 = vrot.slane %v13375_v27, %v12810_v17 }
 0x259   :  { %9805 = vmatprep.subr.bf16.mxu1 %v10793_v33  ;;  %9863 = vmatpush3.bf16.msra.mxu0 %v10823_v5 }
 0x25a   :  { %9864 = vmatprep.subr.bf16.mxu0 %v10825_v9 }
 0x25c   :  { %9806 = vmatpush3.bf16.msra.mxu1 %v10794_v30 }
 0x25d   :  { %9807 = vmatprep.subr.bf16.mxu1 %v10795_v34 }
 0x260   :  { %9808 = vmatpush3.bf16.msra.mxu1 %v10796_v35 }
 0x261   :  { %9809 = vmatprep.subr.bf16.mxu1 %v10797_v36 }
 0x264   :  { %9810 = vmatpush3.bf16.msra.mxu1 %v10798_v48 }
 0x265   :  { %9811 = vmatprep.subr.bf16.mxu1 %v10799_v37 }
 0x268   :  { %9812 = vmatpush3.bf16.msra.mxu1 %v10800_v18 }
 0x269   :  { %9813 = vmatprep.subr.bf16.mxu1 %v10801_v46 }
 0x26c   :  { %9814 = vmatpush3.bf16.msra.mxu1 %v10802_v38 }
 0x26d   :  { %10014 = vmatprep.subr.bf16.mxu1 %v11702_v59 }
 0x26f   :  { %3787 = vmatmul.mubr.bf16.vlgmr.msra.gmra.mrb[20].mxu1 %v12864_v39  ;;  %v10806_v39 = vld [vmem:[%s14532_s4 + $0x588] ss:$20 sps:$4 sm:$0xff]  }
 0x270   :  { %10015 = vmatpush3.bf16.msra.mxu1 %v10803_v40  ;;  %10026 = vmatprep.mubr.msk.bf16.mxu1 %vm11703_vm1, %v11702_v59 }
 0x271   :  { %10016 = vmatprep.subr.bf16.mxu1 %v11702_v59 }
 0x274   :  { %10017 = vmatpush3.bf16.msra.mxu1 %v10804_v41 }
 0x275   :  { %10018 = vmatprep.subr.bf16.mxu1 %v11702_v59 }
 0x278   :  { %10019 = vmatpush3.bf16.msra.mxu1 %v10805_v42 }
 0x279   :  { %10020 = vmatprep.subr.bf16.mxu1 %v11702_v59 }
 0x27c   :  { %10021 = vmatpush3.bf16.msra.mxu1 %v10806_v39 }
 0x27d   :  { %10022 = vmatprep.subr.bf16.mxu1 %v11702_v59 }
 0x280   :  { %10023 = vmatpush3.bf16.msra.mxu1 %v10807_v43 }
 0x281   :  { %10024 = vmatprep.subr.bf16.mxu1 %v11702_v59 }
 0x284   :  { %10025 = vmatpush3.bf16.msra.mxu1 %v3506_v45 }
 0x285   :  { %9872 = vmatprep.subr.bf16.mxu1 %v10822_v62 }
 0x287   :  { %10027 = vmatmul.mubr.msk.bf16.vlgmr.msra.gmra.mrb[24].mxu1 %vm3488_vm8, %v13153_v63  ;;  %v10827_v63 = vld [vmem:[%s14534_s6 + $0x38] sm:$0xff]  }
 0x288   :  { %9873 = vmatpush3.bf16.msra.mxu1 %v10824_v31  ;;  %9865 = vmatpush3.bf16.msra.mxu0 %v10827_v63 }
 0x289   :  { %9874 = vmatprep.subr.bf16.mxu1 %v10826_v15  ;;  %10030 = vmatprep.subr.bf16.mxu0 %v11702_v59 }
 0x28c   :  { %9875 = vmatpush3.bf16.msra.mxu1 %v10828_v0 }
 0x28d   :  { %9876 = vmatprep.subr.bf16.mxu1 %v10829_v1 }
 0x290   :  { %9877 = vmatpush3.bf16.msra.mxu1 %v10830_v2 }
 0x291   :  { %9878 = vmatprep.subr.bf16.mxu1 %v10831_v3 }
 0x294   :  { %9879 = vmatpush3.bf16.msra.mxu1 %v10832_v4 }
 0x295   :  { %9880 = vmatprep.subr.bf16.mxu1 %v10833_v6 }
 0x298   :  { %9881 = vmatpush3.bf16.msra.mxu1 %v10834_v7 }
 0x299   :  { %9882 = vmatprep.subr.bf16.mxu1 %v10835_v8 }
 0x29c   :  { %9883 = vmatpush3.bf16.msra.mxu1 %v10836_v10 }
 0x29d   :  { %9884 = vmatprep.subr.bf16.mxu1 %v10837_v11 }
 0x2a0   :  { %9885 = vmatpush3.bf16.msra.mxu1 %v10838_v20 }
 0x2a1   :  { %9886 = vmatprep.subr.bf16.mxu1 %v10839_v21 }
 0x2a4   :  { %9887 = vmatpush3.bf16.msra.mxu1 %v10840_v13 }
 0x2f2   :  { %v3706_v23 = vpop.f32.mrb[12].mxu0 }
 0x2f3   :  { %v3708_v25 = vpop.f32.mrb[13].mxu0  ;;  %v10096_v55 = vadd.f32 %v3706_v23, %v2499_v49 }
 0x2f4   :  { %v3710_v26 = vpop.f32.mrb[14].mxu0  ;;  %v10098_v56 = vadd.f32 %v3708_v25, %v2503_v50  ;;  %v2507_v50 = vrot.slane %v13375_v27, %v12833_v51 }
 0x2f5   :  { %v3711_v53 = vpop.f32.mrb[15].mxu0 }
 0x30a   :  { %v3624_v33 = vpop.f32.mrb[12].mxu1 }
 0x30b   :  { %v10094_v30 = vadd.f32 %v3624_v33, %v2491_v29  ;;  %v3626_v34 = vpop.f32.mrb[13].mxu1 }
 0x30c   :  { %v10095_v35 = vadd.f32 %v3626_v34, %v2495_v32  ;;  %v3628_v36 = vpop.f32.mrb[14].mxu1  ;;  %v10841_v34 = vld [vmem:[%s14534_s6 + $0x100] sm:$0xff]  }
 0x30d   :  { %v3879_v48 = vand.u32 2147483647, %v10094_v30  ;;  %v3629_v37 = vpop.f32.mrb[15].mxu1  ;;  %v3874_v11 = vmax.f32 %v10094_v30, 0.0 }
 0x30e   :  { %v3880_v18 = vand.u32 2147483647, %v10095_v35  ;;  %v3875_v26 = vmax.f32 %v10095_v35, 0.0 }
 0x30f   :  { %v3884_v46 = vsub.f32 0.0, %v3879_v48  ;;  %v10842_v48 = vld [vmem:[%s14534_s6 + $0x108] sm:$0xff]  }
 0x310   :  { %v3885_v38 = vsub.f32 0.0, %v3880_v18 }
 0x311   :  { %v3889_v40 = vmul.f32 1.442695, %v3884_v46  ;;  %v10843_v46 = vld [vmem:[%s14534_s6 + $0x110] sm:$0xff]  }
 0x312   :  { %v3891_v41 = vmul.f32 1.442695, %v3885_v38  ;;  %v9837_v42 = vpop.f32.mrb[16].mxu0 }
 0x313   :  { %11536 = vpow2.f32 %v3889_v40  ;;  %v9838_v39 = vpop.f32.mrb[17].mxu0 }
 0x314   :  { %11538 = vpow2.f32 %v3891_v41  ;;  %v13381_v43 = vadd.f32 %v9838_v39, %v9837_v42  ;;  %v9840_v44 = vpop.f32.mrb[18].mxu0  ;;  %v10844_v41 = vld [vmem:[%s14534_s6 + $0x118] sm:$0xff]  }
 0x315   :  { %v9841_v45 = vpop.f32.mrb[19].mxu0 }
 0x31d   :  { %v11537_v47 = vpop.eup %11536 }
 0x31e   :  { %v11539_v14 = vpop.eup %11538  ;;  %v3899_v52 = vadd.f32 1.0, %v11537_v47  ;;  %v3902_v57 = vmul.f32 -0.5, %v11537_v47  ;;  %v3905_v1 = vand.u32 2147483647, %v11537_v47 }
 0x31f   :  { %v3908_v54 = vadd.f32 1.0, %v11539_v14  ;;  %v3911_v5 = vmul.f32 -0.5, %v11539_v14  ;;  %v3914_v6 = vand.u32 2147483647, %v11539_v14 }
 0x320   :  { %11540 = vlog2.f32 %v3899_v52  ;;  %v3903_v63 = vadd.f32 1.0, %v3902_v57  ;;  %vm3906_vm9 = vcmp.lt.f32.partialorder %v3905_v1, 0.0004427343  ;;  %v10846_v52 = vld [vmem:[%s14534_s6 + $0x128] ss:$0 sps:$4 sm:$0xff]  }
 0x321   :  { %11542 = vlog2.f32 %v3908_v54  ;;  %v3912_v3 = vadd.f32 1.0, %v3911_v5  ;;  %vm3915_vm10 = vcmp.lt.f32.partialorder %v3914_v6, 0.0004427343 }
 0x322   :  { %v3747_v24 = vpop.f32.mrb[16].mxu1  ;;  %v3904_v21 = vmul.f32 %v11537_v47, %v3903_v63  ;;  %v10845_v47 = vld [vmem:[%s14534_s6 + $0x120] sm:$0xff]  }
 0x323   :  { %v13387_v58 = vadd.f32 %v10096_v55, %v3747_v24  ;;  %v3749_v60 = vpop.f32.mrb[17].mxu1  ;;  %v3913_v23 = vmul.f32 %v11539_v14, %v3912_v3 }
 0x324   :  { %v13389_v61 = vadd.f32 %v10098_v56, %v3749_v60  ;;  %v3751_v62 = vpop.f32.mrb[18].mxu1 }
 0x325   :  { %v3881_v31 = vand.u32 2147483647, %v13387_v58  ;;  %v3752_v9 = vpop.f32.mrb[19].mxu1  ;;  %v3876_v55 = vmax.f32 %v13387_v58, 0.0  ;;  %v4265_v58 = vsel %vm3492_vm7, %v10846_v52, 0 }
 0x326   :  { %v3882_v15 = vand.u32 2147483647, %v13389_v61  ;;  %v3877_v27 = vmax.f32 %v13389_v61, 0.0 }
 0x327   :  { %v3886_v0 = vsub.f32 0.0, %v3881_v31 }
 0x328   :  { %v3887_v2 = vsub.f32 0.0, %v3882_v15 }
 0x329   :  { %v3893_v4 = vmul.f32 1.442695, %v3886_v0 }
 0x32a   :  { %v11541_v7 = vpop.eup %11540  ;;  %v3895_v8 = vmul.f32 1.442695, %v3887_v2 }
 0x32b   :  { %v11543_v10 = vpop.eup %11542  ;;  %v3901_v20 = vmul.f32 0.6931472, %v11541_v7  ;;  %11544 = vpow2.f32 %v3893_v4 }
 0x32c   :  { %11546 = vpow2.f32 %v3895_v8  ;;  %v3910_v13 = vmul.f32 0.6931472, %v11543_v10 }
 0x32d   :  { %v3907_v25 = vsel %vm3906_vm9, %v3904_v21, %v3901_v20 }
 0x32e   :  { %v3944_v53 = vadd.f32 %v3907_v25, %v3874_v11  ;;  %v3916_v29 = vsel %vm3915_vm10, %v3913_v23, %v3910_v13 }
 0x32f   :  { %v3945_v32 = vadd.f32 %v3916_v29, %v3875_v26 }
 0x330   :  { %v3949_v36 = vpack.c.bf16 %v3944_v53, %v3944_v53 }
 0x331   :  { %v3950_v33 = vpack.c.bf16 %v3945_v32, %v3945_v32 }
 0x333   :  { %4299 = vmatprep.mubr.bf16.mxu0 %v3950_v33 }
 0x334   :  { %4300 = vmatmul.mubr.bf16.vlgmr.msra.gmra.mrb[20].mxu0 %v3949_v36 }
 0x335   :  { %v11545_v30 = vpop.eup %11544  ;;  %10031 = vmatpush3.bf16.msra.mxu0 %v10841_v34  ;;  %10042 = vmatprep.mubr.msk.bf16.mxu0 %vm11703_vm1, %v11702_v59 }
 0x336   :  { %v11547_v35 = vpop.eup %11546  ;;  %v3917_v37 = vadd.f32 1.0, %v11545_v30  ;;  %10032 = vmatprep.subr.bf16.mxu0 %v11702_v59  ;;  %v3920_v38 = vmul.f32 -0.5, %v11545_v30  ;;  %v3923_v39 = vand.u32 2147483647, %v11545_v30 }
 0x337   :  { %v3926_v18 = vadd.f32 1.0, %v11547_v35  ;;  %v3929_v40 = vmul.f32 -0.5, %v11547_v35  ;;  %v3932_v45 = vand.u32 2147483647, %v11547_v35 }
 0x338   :  { %11548 = vlog2.f32 %v3917_v37  ;;  %v3921_v42 = vadd.f32 1.0, %v3920_v38  ;;  %vm3924_vm11 = vcmp.lt.f32.partialorder %v3923_v39, 0.0004427343  ;;  %v10849_v37 = vld [vmem:[%s14536_s8 + $0x4] ss:$20 sps:$4 sm:$0xff]  }
 0x339   :  { %11550 = vlog2.f32 %v3926_v18  ;;  %10033 = vmatpush3.bf16.msra.mxu0 %v10842_v48  ;;  %v3930_v44 = vadd.f32 1.0, %v3929_v40  ;;  %vm3933_vm12 = vcmp.lt.f32.partialorder %v3932_v45, 0.0004427343  ;;  %v10850_v18 = vld [vmem:[%s14536_s8 + $0x10] ss:$20 sps:$4 sm:$0xff]   ;;  %4558 = vmatprep.subr.bf16.mxu1 %v10849_v37 }
 0x33a   :  { %10034 = vmatprep.subr.bf16.mxu0 %v11702_v59  ;;  %v3922_v24 = vmul.f32 %v11545_v30, %v3921_v42  ;;  %v10854_v38 = vld [vmem:[%s14536_s8 + $0x38] ss:$20 sps:$4 sm:$0xff]   ;;  %v10851_v40 = vld [vmem:[%s14536_s8 + $0x28] ss:$20 sps:$4 sm:$0xff]   ;;  %v10855_v42 = vld [vmem:[%s14536_s8 + $0x50] ss:$20 sps:$4 sm:$0xff]  }
 0x33b   :  { %v3931_v31 = vmul.f32 %v11547_v35, %v3930_v44  ;;  %v10847_v35 = vld [vmem:[%s14536_s8] ss:$20 sps:$4 sm:$0xff]  }
 0x33c   :  { %v10883_v37 = vld [vmem:[#allocation2 + $0x2c] ss:$20 sps:$4 sm:$0xff]  }
 0x33d   :  { %10035 = vmatpush3.bf16.msra.mxu0 %v10843_v46  ;;  %v10853_v46 = vld [vmem:[%s14536_s8 + $0x2c] ss:$20 sps:$4 sm:$0xff]  }
 0x33e   :  { %10036 = vmatprep.subr.bf16.mxu0 %v11702_v59 }
 0x341   :  { %10037 = vmatpush3.bf16.msra.mxu0 %v10844_v41  ;;  %v10857_v41 = vld [vmem:[%s14536_s8 + $0x54] ss:$20 sps:$4 sm:$0xff]  }
 0x342   :  { %v11549_v49 = vpop.eup %11548  ;;  %v9815_v14 = vpop.f32.mrb[20].mxu1  ;;  %10038 = vmatprep.subr.bf16.mxu0 %v11702_v59 }
 0x343   :  { %v11551_v54 = vpop.eup %11550  ;;  %v3919_v56 = vmul.f32 0.6931472, %v11549_v49  ;;  %v9816_v57 = vpop.f32.mrb[21].mxu1 }
 0x344   :  { %v9817_v60 = vadd.f32 %v9816_v57, %v9815_v14  ;;  %v9818_v62 = vpop.f32.mrb[22].mxu1  ;;  %v3928_v5 = vmul.f32 0.6931472, %v11551_v54  ;;  %v9200_v14 = vld [vmem:[%s14535_s7] ss:$0 sm:$0xff] }
 0x345   :  { %v3925_v9 = vsel %vm3924_vm11, %v3922_v24, %v3919_v56  ;;  %v9819_v15 = vpop.f32.mrb[23].mxu1  ;;  %10039 = vmatpush3.bf16.msra.mxu0 %v10845_v47 }
 0x346   :  { %v3946_v63 = vadd.f32 %v3925_v9, %v3876_v55  ;;  %v3789_v0 = vadd.f32 %v9817_v60, %v2507_v50  ;;  %v3934_v1 = vsel %vm3933_vm12, %v3931_v31, %v3928_v5  ;;  %10040 = vmatprep.subr.bf16.mxu0 %v11702_v59  ;;  %v10858_v15 = vld [vmem:[%s14536_s8 + $0x60] ss:$20 sps:$4 sm:$0xff]  }
 0x347   :  { %v3947_v2 = vadd.f32 %v3934_v1, %v3877_v27  ;;  %v10859_v1 = vld [vmem:[%s14536_s8 + $0x78] ss:$20 sps:$4 sm:$0xff]  }
 0x348   :  { %v3829_v3 = vadd.f32 %v13381_v43, %v3789_v0  ;;  %v3951_v6 = vpack.c.bf16 %v3946_v63, %v3946_v63  ;;  %v10861_v0 = vld [vmem:[%s14536_s8 + $0x7c] ss:$20 sps:$4 sm:$0xff]  }
 0x349   :  { %v3952_v4 = vpack.c.bf16 %v3947_v2, %v3947_v2  ;;  %10041 = vmatpush3.bf16.msra.mxu0 %v4265_v58  ;;  %v10862_v58 = vld [vmem:[%s14536_s8 + $0x88] ss:$20 sps:$4 sm:$0xff]   ;;  %v10865_v2 = vld [vmem:[%s14536_s8 + $0xc] ss:$20 sps:$4 sm:$0xff]  }
 0x34a   :  { %10046 = vmatprep.subr.bf16.mxu0 %v11702_v59 }
 0x34b   :  { %4339 = vmatprep.mubr.bf16.mxu1 %v3952_v4  ;;  %v10880_v4 = vld [vmem:[#allocation2 + $0xc] ss:$20 sps:$4 sm:$0xff]  }
 0x34c   :  { %4340 = vmatmul.mubr.bf16.vlgmr.msra.gmra.mrb[28].mxu1 %v3951_v6  ;;  %v4388_v6 = vld [vmem:[%s14529_s1] sm:$0xff] }
 0x34d   :  { %4590 = vmatprep.mubr.bf16.mxu1 %v11701_v22  ;;  %4559 = vmatpush1.bf16.msra.mxu1 %v10847_v35  ;;  %v10875_v35 = vld [vmem:[#allocation2] ss:$20 sps:$4 sm:$0xff]  }
 0x34e   :  { %4560 = vmatprep.subr.bf16.mxu1 %v10853_v46  ;;  %v10910_v46 = vld [vmem:[#allocation2 + $0xd4] ss:$20 sps:$4 sm:$0xff]  }
 0x351   :  { %4561 = vmatpush1.bf16.msra.mxu1 %v10851_v40  ;;  %v10889_v40 = vld [vmem:[#allocation2 + $0x54] ss:$20 sps:$4 sm:$0xff]  }
 0x352   :  { %4562 = vmatprep.subr.bf16.mxu1 %v10857_v41  ;;  %v10908_v41 = vld [vmem:[#allocation2 + $0xd0] ss:$20 sps:$4 sm:$0xff]  }
 0x355   :  { %4563 = vmatpush1.bf16.msra.mxu1 %v10855_v42  ;;  %v10887_v42 = vld [vmem:[#allocation2 + $0x50] ss:$20 sps:$4 sm:$0xff]  }
 0x356   :  { %4564 = vmatprep.subr.bf16.mxu1 %v10861_v0  ;;  %v10932_v0 = vld [vmem:[#allocation2 + $0x170] ss:$20 sps:$4 sm:$0xff]  }
 0x359   :  { %4565 = vmatpush1.bf16.msra.mxu1 %v10859_v1  ;;  %v10937_v1 = vld [vmem:[#allocation2 + $0x194] ss:$20 sps:$4 sm:$0xff]  }
 0x35a   :  { %v3868_v61 = vpop.f32.mrb[24].mxu1  ;;  %4599 = vmatprep.subr.bf16.mxu1 %v10865_v2  ;;  %v10935_v2 = vld [vmem:[#allocation2 + $0x190] ss:$20 sps:$4 sm:$0xff]  }
 0x35b   :  { %v3869_v7 = vadd.f32 %v3868_v61, %v3829_v3  ;;  %v10028_v8 = vpop.f32.mrb[25].mxu1 }
 0x35c   :  { %v3871_v10 = vpop.f32.mrb[26].mxu1 }
 0x35d   :  { %v3883_v11 = vand.u32 2147483647, %v3869_v7  ;;  %v10029_v20 = vpop.f32.mrb[27].mxu1  ;;  %v3878_v34 = vmax.f32 %v3869_v7, 0.0  ;;  %v10863_v10 = vld [vmem:[%s14536_s8 + $0x8] ss:$20 sps:$4 sm:$0xff]  }
 0x35e   :  { %v10868_v20 = vld [vmem:[%s14536_s8 + $0x34] ss:$20 sps:$4 sm:$0xff]  }
 0x35f   :  { %v3888_v21 = vsub.f32 0.0, %v3883_v11 }
 0x361   :  { %v3897_v13 = vmul.f32 1.442695, %v3888_v21  ;;  %v10878_v21 = vld [vmem:[#allocation2 + $0x8] ss:$20 sps:$4 sm:$0xff]  }
 0x363   :  { %11552 = vpow2.f32 %v3897_v13  ;;  %v10886_v13 = vld [vmem:[#allocation2 + $0x34] ss:$20 sps:$4 sm:$0xff]  }
 0x36d   :  { %v11553_v23 = vpop.eup %11552 }
 0x36e   :  { %v3935_v43 = vadd.f32 1.0, %v11553_v23  ;;  %v3938_v25 = vmul.f32 -0.5, %v11553_v23  ;;  %v3941_v53 = vand.u32 2147483647, %v11553_v23 }
 0x370   :  { %11554 = vlog2.f32 %v3935_v43  ;;  %v3939_v26 = vadd.f32 1.0, %v3938_v25  ;;  %vm3942_vm13 = vcmp.lt.f32.partialorder %v3941_v53, 0.0004427343  ;;  %v10871_v43 = vld [vmem:[%s14536_s8 + $0x5c] ss:$20 sps:$4 sm:$0xff]  }
 0x371   :  { %v10884_v25 = vld [vmem:[#allocation2 + $0x30] ss:$20 sps:$4 sm:$0xff]   ;;  %v10869_v53 = vld [vmem:[%s14536_s8 + $0x58] ss:$20 sps:$4 sm:$0xff]  }
 0x372   :  { %v3940_v33 = vmul.f32 %v11553_v23, %v3939_v26  ;;  %v10866_v23 = vld [vmem:[%s14536_s8 + $0x30] ss:$20 sps:$4 sm:$0xff]  }
 0x373   :  { %v10892_v26 = vld [vmem:[#allocation2 + $0x5c] ss:$20 sps:$4 sm:$0xff]  }
 0x37a   :  { %v11555_v29 = vpop.eup %11554 }
 0x37b   :  { %v3937_v32 = vmul.f32 0.6931472, %v11555_v29  ;;  %v10874_v29 = vld [vmem:[%s14536_s8 + $0x84] ss:$20 sps:$4 sm:$0xff]  }
 0x37d   :  { %v3943_v36 = vsel %vm3942_vm13, %v3940_v33, %v3937_v32  ;;  %v10890_v32 = vld [vmem:[#allocation2 + $0x58] ss:$20 sps:$4 sm:$0xff]  }
 0x37e   :  { %v3948_v30 = vadd.f32 %v3943_v36, %v3878_v34  ;;  %v10898_v33 = vld [vmem:[#allocation2 + $0x84] ss:$20 sps:$4 sm:$0xff]   ;;  %v10872_v34 = vld [vmem:[%s14536_s8 + $0x80] ss:$20 sps:$4 sm:$0xff]  }
 0x37f   :  { %v10877_v36 = vld [vmem:[#allocation2 + $0x4] ss:$20 sps:$4 sm:$0xff]  }
 0x380   :  { %v3953_v48 = vpack.c.bf16 %v3948_v30, %v3948_v30  ;;  %v10896_v30 = vld [vmem:[#allocation2 + $0x80] ss:$20 sps:$4 sm:$0xff]  }
 0x382   :  { %10043 = vmatmul.mubr.msk.bf16.vlgmr.msra.gmra.mrb[24].mxu0 %vm3488_vm8, %v3953_v48  ;;  %v10904_v48 = vld [vmem:[#allocation2 + $0xac] ss:$20 sps:$4 sm:$0xff]  }
 0x383   :  { %10054 = vmatprep.mubr.msk.bf16.mxu0 %vm11703_vm1, %v11702_v59  ;;  %10047 = vmatpush3.bf16.msra.mxu0 %v10850_v18  ;;  %v10902_v18 = vld [vmem:[#allocation2 + $0xa8] ss:$20 sps:$4 sm:$0xff]  }
 0x384   :  { %10048 = vmatprep.subr.bf16.mxu0 %v11702_v59 }
 0x387   :  { %10049 = vmatpush3.bf16.msra.mxu0 %v10854_v38  ;;  %v10881_v38 = vld [vmem:[#allocation2 + $0x28] ss:$20 sps:$4 sm:$0xff]  }
 0x388   :  { %10050 = vmatprep.subr.bf16.mxu0 %v11702_v59 }
 0x38b   :  { %10051 = vmatpush3.bf16.msra.mxu0 %v10858_v15  ;;  %v10934_v15 = vld [vmem:[#allocation2 + $0x174] ss:$20 sps:$4 sm:$0xff]  }
 0x38c   :  { %10052 = vmatprep.subr.bf16.mxu0 %v11702_v59 }
 0x38f   :  { %10053 = vmatpush3.bf16.msra.mxu0 %v10862_v58  ;;  %v10940_v58 = vld [vmem:[#allocation2 + $0x19c] ss:$20 sps:$4 sm:$0xff]  }
 0x390   :  { %6128 = vmatprep.subr.bf16.mxu0 %v10880_v4  ;;  %v10943_v4 = vld [vmem:[#allocation2 + $0x1bc] ss:$20 sps:$4 sm:$0xff]  }
 0x407   :  { %v9866_v39 = vpop.f32.mrb[20].mxu0 }
 0x408   :  { %v9867_v44 = vpop.f32.mrb[21].mxu0 }
 0x409   :  { %v9868_v45 = vadd.f32 %v9867_v44, %v9866_v39  ;;  %v9869_v47 = vpop.f32.mrb[22].mxu0  ;;  %v10895_v39 = vld [vmem:[#allocation2 + $0x7c] ss:$20 sps:$4 sm:$0xff]   ;;  %v10893_v44 = vld [vmem:[#allocation2 + $0x78] ss:$20 sps:$4 sm:$0xff]  }
 0x40a   :  { %v9870_v49 = vpop.f32.mrb[23].mxu0  ;;  %v10899_v47 = vld [vmem:[#allocation2 + $0xa0] ss:$20 sps:$4 sm:$0xff]  }
 0x40b   :  { %v4302_v54 = vadd.f32 %v9868_v45, %v9200_v14  ;;  %v10901_v45 = vld [vmem:[#allocation2 + $0xa4] ss:$20 sps:$4 sm:$0xff]   ;;  %v10907_v49 = vld [vmem:[#allocation2 + $0xcc] ss:$20 sps:$4 sm:$0xff]   ;;  %v10905_v14 = vld [vmem:[#allocation2 + $0xc8] ss:$20 sps:$4 sm:$0xff]  }
 0x41f   :  { %v9888_v50 = vpop.f32.mrb[28].mxu1 }
 0x420   :  { %v9889_v52 = vpop.f32.mrb[29].mxu1 }
 0x421   :  { %v9890_v55 = vadd.f32 %v9889_v52, %v9888_v50  ;;  %v9891_v56 = vpop.f32.mrb[30].mxu1  ;;  %v10913_v50 = vld [vmem:[#allocation2 + $0xf4] ss:$20 sps:$4 sm:$0xff]   ;;  %v10916_v52 = vld [vmem:[#allocation2 + $0xfc] ss:$20 sps:$4 sm:$0xff]  }
 0x422   :  { %v9892_v24 = vpop.f32.mrb[31].mxu1  ;;  %v10919_v56 = vld [vmem:[#allocation2 + $0x11c] ss:$20 sps:$4 sm:$0xff]  }
 0x423   :  { %v4342_v57 = vadd.f32 %v9890_v55, %v4302_v54  ;;  %v10911_v54 = vld [vmem:[#allocation2 + $0xf0] ss:$20 sps:$4 sm:$0xff]   ;;  %v10914_v55 = vld [vmem:[#allocation2 + $0xf8] ss:$20 sps:$4 sm:$0xff]  }
 0x424   :  { %v10922_v24 = vld [vmem:[#allocation2 + $0x124] ss:$20 sps:$4 sm:$0xff]  }
 0x455   :  { %v4381_v60 = vpop.f32.mrb[24].mxu0 }
 0x456   :  { %v4382_v62 = vadd.f32 %v4381_v60, %v4342_v57  ;;  %v10044_v5 = vpop.f32.mrb[25].mxu0  ;;  %v10917_v57 = vld [vmem:[#allocation2 + $0x118] ss:$20 sps:$4 sm:$0xff]   ;;  %v10920_v60 = vld [vmem:[#allocation2 + $0x120] ss:$20 sps:$4 sm:$0xff]  }
 0x457   :  { %v4384_v31 = vpop.f32.mrb[26].mxu0  ;;  %v10928_v5 = vld [vmem:[#allocation2 + $0x14c] ss:$20 sps:$4 sm:$0xff]  }
 0x458   :  { %v4389_v9 = vmul.f32 0.5, %v4382_v62  ;;  %4387 = vst [vmem:[#allocation6] sm:$0xff] %v4382_v62  ;;  %v10045_v27 = vpop.f32.mrb[27].mxu0  ;;  %v10923_v31 = vld [vmem:[#allocation2 + $0x140] ss:$20 sps:$4 sm:$0xff]  }
 0x459   :  { %v10931_v27 = vld [vmem:[#allocation2 + $0x16c] ss:$20 sps:$4 sm:$0xff]  }
 0x45a   :  { %v4390_v63 = vmul.f32 1.442695, %v4389_v9  ;;  %v10926_v9 = vld [vmem:[#allocation2 + $0x148] ss:$20 sps:$4 sm:$0xff]  }
 0x45c   :  { %11556 = vpow2.f32 %v4390_v63  ;;  %v10929_v63 = vld [vmem:[#allocation2 + $0x168] ss:$20 sps:$4 sm:$0xff]  }
 0x466   :  { %v11557_v3 = vpop.eup %11556 }
 0x467   :  { %4393 = vrot.lane.b32.xlu0 %v11557_v3, %s11704_s21  ;;  %v10938_v3 = vld [vmem:[#allocation2 + $0x198] ss:$20 sps:$4 sm:$0xff]  }
 0x4d9   :  { %v4394_v61 = vpop.permute.xlu0 %4393 }
 0x4da   :  { %v4396_v7 = vmul.f32 %v4394_v61, %v4388_v6  ;;  %v10946_v6 = vld [vmem:[#allocation2 + $0x1c4] ss:$20 sps:$4 sm:$0xff]  }
 0x4db   :  { %v10941_v61 = vld [vmem:[#allocation2 + $0x1b8] ss:$20 sps:$4 sm:$0xff]  }
 0x4dc   :  { %v4397_v8 = vadd.f32 %v4396_v7, %v4382_v62  ;;  %v10925_v62 = vld [vmem:[#allocation2 + $0x144] ss:$20 sps:$4 sm:$0xff]   ;;  %v10944_v7 = vld [vmem:[#allocation2 + $0x1c0] ss:$20 sps:$4 sm:$0xff]  }
 0x4de   :  { %v4398_v11 = vpack.c.bf16 %v4397_v8, %v4397_v8  ;;  %v10949_v8 = vld [vmem:[#allocation2 + $0x1e4] ss:$20 sps:$4 sm:$0xff]  }
 0x4e0   :  { %9260 = vmatmul.mubr.msk.bf16.vlgmr.msra.gmra.mrb[32].mxu1 %vm4554_vm14, %v4398_v11  ;;  %10055 = vmatmul.mubr.msk.bf16.vlgmr.msra.gmra.mrb[28].mxu0 %vm4554_vm14, %v4398_v11 }
 0x4e1   :  { %4600 = vmatpush1.bf16.msra.mxu1 %v10863_v10  ;;  %4631 = vmatprep.mubr.bf16.mxu1 %v11701_v22  ;;  %v10952_v10 = vld [vmem:[#allocation2 + $0x1ec] ss:$20 sps:$4 sm:$0xff]  }
 0x4e2   :  { %4601 = vmatprep.subr.bf16.mxu1 %v10868_v20  ;;  %6129 = vmatpush1.bf16.msra.mxu0 %v10878_v21  ;;  %v10950_v20 = vld [vmem:[#allocation2 + $0x1e8] ss:$20 sps:$4 sm:$0xff]   ;;  %v10955_v21 = vld [vmem:[#allocation2 + $0x20c] ss:$20 sps:$4 sm:$0xff]  }
 0x4e3   :  { %6130 = vmatprep.subr.bf16.mxu0 %v10886_v13  ;;  %v10958_v13 = vld [vmem:[#allocation2 + $0x214] ss:$20 sps:$4 sm:$0xff]  }
 0x4e5   :  { %4602 = vmatpush1.bf16.msra.mxu1 %v10866_v23  ;;  %v10953_v23 = vld [vmem:[#allocation2 + $0x208] ss:$20 sps:$4 sm:$0xff]  }
 0x4e6   :  { %4603 = vmatprep.subr.bf16.mxu1 %v10871_v43  ;;  %6131 = vmatpush1.bf16.msra.mxu0 %v10884_v25  ;;  %v10956_v43 = vld [vmem:[#allocation2 + $0x210] ss:$20 sps:$4 sm:$0xff]   ;;  %v10961_v25 = vld [vmem:[#allocation2 + $0x234] ss:$20 sps:$4 sm:$0xff]  }
 0x4e7   :  { %6132 = vmatprep.subr.bf16.mxu0 %v10892_v26  ;;  %v10964_v26 = vld [vmem:[#allocation2 + $0x23c] ss:$20 sps:$4 sm:$0xff]  }
 0x4e9   :  { %4604 = vmatpush1.bf16.msra.mxu1 %v10869_v53  ;;  %v10959_v53 = vld [vmem:[#allocation2 + $0x230] ss:$20 sps:$4 sm:$0xff]  }
 0x4ea   :  { %4605 = vmatprep.subr.bf16.mxu1 %v10874_v29  ;;  %6133 = vmatpush1.bf16.msra.mxu0 %v10890_v32  ;;  %v10962_v29 = vld [vmem:[#allocation2 + $0x238] ss:$20 sps:$4 sm:$0xff]   ;;  %v10967_v32 = vld [vmem:[#allocation2 + $0x25c] ss:$20 sps:$4 sm:$0xff]  }
 0x4eb   :  { %6134 = vmatprep.subr.bf16.mxu0 %v10898_v33  ;;  %v10970_v33 = vld [vmem:[#allocation2 + $0x264] ss:$20 sps:$4 sm:$0xff]  }
 0x4ed   :  { %4606 = vmatpush1.bf16.msra.mxu1 %v10872_v34  ;;  %v10965_v34 = vld [vmem:[#allocation2 + $0x258] ss:$20 sps:$4 sm:$0xff]  }
 0x4ee   :  { %6005 = vmatprep.subr.bf16.mxu1 %v10877_v36  ;;  %6135 = vmatpush1.bf16.msra.mxu0 %v10896_v30  ;;  %v10968_v36 = vld [vmem:[#allocation2 + $0x260] ss:$20 sps:$4 sm:$0xff]   ;;  %v10973_v30 = vld [vmem:[#allocation2 + $0x284] ss:$20 sps:$4 sm:$0xff]  }
 0x4ef   :  { %6136 = vmatprep.subr.bf16.mxu0 %v10904_v48  ;;  %v10976_v48 = vld [vmem:[#allocation2 + $0x28c] ss:$20 sps:$4 sm:$0xff]  }
 0x4f0   :  { %9261 = vmatmul.mubr.msk.bf16.vlgmr.msra.gmra.mrb[36].mxu1 %vm4554_vm14, %v4398_v11  ;;  %v10947_v11 = vld [vmem:[#allocation2 + $0x1e0] ss:$20 sps:$4 sm:$0xff]  }
 0x4f1   :  { %6006 = vmatpush1.bf16.msra.mxu1 %v10875_v35  ;;  %v13505_v35 = vld [vmem:[%s14537_s9] sm:$0x1f] }
 0x4f2   :  { %6007 = vmatprep.subr.bf16.mxu1 %v10883_v37  ;;  %6137 = vmatpush1.bf16.msra.mxu0 %v10902_v18  ;;  %v4428_v37 = vrot.slane %v13505_v35, %v12807_v16  ;;  %v4432_v18 = vrot.slane %v13505_v35, %v12810_v17 }
 0x4f3   :  { %6138 = vmatprep.subr.bf16.mxu0 %v10910_v46 }
 0x4f5   :  { %6008 = vmatpush1.bf16.msra.mxu1 %v10881_v38 }
 0x4f6   :  { %6009 = vmatprep.subr.bf16.mxu1 %v10889_v40  ;;  %6139 = vmatpush1.bf16.msra.mxu0 %v10908_v41 }
 0x4f7   :  { %6140 = vmatprep.subr.bf16.mxu0 %v10916_v52 }
 0x4f9   :  { %6010 = vmatpush1.bf16.msra.mxu1 %v10887_v42 }
 0x4fa   :  { %6011 = vmatprep.subr.bf16.mxu1 %v10895_v39  ;;  %6141 = vmatpush1.bf16.msra.mxu0 %v10914_v55 }
 0x4fb   :  { %6142 = vmatprep.subr.bf16.mxu0 %v10922_v24  ;;  %v4440_v24 = vrot.slane %v13505_v35, %v12813_v19 }
 0x4fd   :  { %6012 = vmatpush1.bf16.msra.mxu1 %v10893_v44 }
 0x4fe   :  { %6013 = vmatprep.subr.bf16.mxu1 %v10901_v45  ;;  %6143 = vmatpush1.bf16.msra.mxu0 %v10920_v60 }
 0x4ff   :  { %6144 = vmatprep.subr.bf16.mxu0 %v10928_v5 }
 0x501   :  { %6014 = vmatpush1.bf16.msra.mxu1 %v10899_v47 }
 0x502   :  { %6015 = vmatprep.subr.bf16.mxu1 %v10907_v49  ;;  %6145 = vmatpush1.bf16.msra.mxu0 %v10926_v9 }
 0x503   :  { %6146 = vmatprep.subr.bf16.mxu0 %v10934_v15 }
 0x505   :  { %6016 = vmatpush1.bf16.msra.mxu1 %v10905_v14 }
 0x506   :  { %6017 = vmatprep.subr.bf16.mxu1 %v10913_v50  ;;  %6147 = vmatpush1.bf16.msra.mxu0 %v10932_v0 }
 0x507   :  { %6148 = vmatprep.subr.bf16.mxu0 %v10940_v58 }
 0x509   :  { %6018 = vmatpush1.bf16.msra.mxu1 %v10911_v54 }
 0x50a   :  { %6019 = vmatprep.subr.bf16.mxu1 %v10919_v56  ;;  %6149 = vmatpush1.bf16.msra.mxu0 %v10938_v3 }
 0x50b   :  { %6150 = vmatprep.subr.bf16.mxu0 %v10946_v6 }
 0x50d   :  { %6020 = vmatpush1.bf16.msra.mxu1 %v10917_v57 }
 0x50e   :  { %6021 = vmatprep.subr.bf16.mxu1 %v10925_v62  ;;  %6151 = vmatpush1.bf16.msra.mxu0 %v10944_v7 }
 0x50f   :  { %6152 = vmatprep.subr.bf16.mxu0 %v10952_v10 }
 0x511   :  { %6022 = vmatpush1.bf16.msra.mxu1 %v10923_v31 }
 0x512   :  { %6023 = vmatprep.subr.bf16.mxu1 %v10931_v27  ;;  %6153 = vmatpush1.bf16.msra.mxu0 %v10950_v20 }
 0x513   :  { %6154 = vmatprep.subr.bf16.mxu0 %v10958_v13 }
 0x515   :  { %6024 = vmatpush1.bf16.msra.mxu1 %v10929_v63 }
 0x516   :  { %6025 = vmatprep.subr.bf16.mxu1 %v10937_v1  ;;  %6155 = vmatpush1.bf16.msra.mxu0 %v10956_v43 }
 0x517   :  { %6156 = vmatprep.subr.bf16.mxu0 %v10964_v26 }
 0x519   :  { %6026 = vmatpush1.bf16.msra.mxu1 %v10935_v2 }
 0x51a   :  { %6027 = vmatprep.subr.bf16.mxu1 %v10943_v4  ;;  %6157 = vmatpush1.bf16.msra.mxu0 %v10962_v29 }
 0x51b   :  { %6158 = vmatprep.subr.bf16.mxu0 %v10970_v33 }
 0x51d   :  { %6028 = vmatpush1.bf16.msra.mxu1 %v10941_v61 }
 0x51e   :  { %6029 = vmatprep.subr.bf16.mxu1 %v10949_v8  ;;  %6159 = vmatpush1.bf16.msra.mxu0 %v10968_v36  ;;  %v10971_v36 = vld [vmem:[#allocation2 + $0x280] ss:$20 sps:$4 sm:$0xff]  }
 0x51f   :  { %6169 = vmatprep.subr.bf16.mxu0 %v10976_v48 }
 0x521   :  { %6030 = vmatpush1.bf16.msra.mxu1 %v10947_v11 }
 0x522   :  { %6031 = vmatprep.subr.bf16.mxu1 %v10955_v21 }
 0x525   :  { %6032 = vmatpush1.bf16.msra.mxu1 %v10953_v23 }
 0x526   :  { %6033 = vmatprep.subr.bf16.mxu1 %v10961_v25 }
 0x529   :  { %6034 = vmatpush1.bf16.msra.mxu1 %v10959_v53 }
 0x52a   :  { %6035 = vmatprep.subr.bf16.mxu1 %v10967_v32 }
 0x52d   :  { %6036 = vmatpush1.bf16.msra.mxu1 %v10965_v34 }
 0x52e   :  { %6046 = vmatprep.subr.bf16.mxu1 %v10973_v30  ;;  %v10974_v30 = vld [vmem:[#allocation2 + $0x288] ss:$20 sps:$4 sm:$0xff]  }
 0x5b3   :  { %v4592_v46 = vpop.f32.mrb[32].mxu1  ;;  %v13511_v38 = vpop.f32.mrb[28].mxu0 }
 0x5b4   :  { %v4593_v40 = vadd.f32 %v4592_v46, %v4428_v37  ;;  %v4594_v41 = vpop.f32.mrb[33].mxu1  ;;  %v10056_v42 = vpop.f32.mrb[29].mxu0  ;;  %v10979_v37 = vld [vmem:[#allocation2 + $0x2ac] ss:$20 sps:$4 sm:$0xff]  }
 0x5b5   :  { %v4595_v39 = vadd.f32 %v4594_v41, %v4432_v18  ;;  %v4596_v44 = vpop.f32.mrb[34].mxu1  ;;  %v4677_v45 = vpop.f32.mrb[30].mxu0  ;;  %v10982_v18 = vld [vmem:[#allocation2 + $0x2b4] ss:$20 sps:$4 sm:$0xff]   ;;  %v10980_v42 = vld [vmem:[#allocation2 + $0x2b0] ss:$20 sps:$4 sm:$0xff]  }
 0x5b6   :  { %v4685_v47 = vand.u32 2147483647, %v4593_v40  ;;  %v4597_v14 = vpop.f32.mrb[35].mxu1  ;;  %v10057_v50 = vpop.f32.mrb[31].mxu0  ;;  %v4680_v13 = vmax.f32 %v4593_v40, 0.0  ;;  %v4436_v40 = vrot.slane %v13505_v35, %v12855_v28 }
 0x5b7   :  { %v4686_v49 = vand.u32 2147483647, %v4595_v39  ;;  %v4681_v26 = vmax.f32 %v4595_v39, 0.0  ;;  %v10977_v41 = vld [vmem:[#allocation2 + $0x2a8] ss:$20 sps:$4 sm:$0xff]  }
 0x5b8   :  { %v4690_v52 = vsub.f32 0.0, %v4685_v47  ;;  %v10985_v39 = vld [vmem:[#allocation2 + $0x2d4] ss:$20 sps:$4 sm:$0xff]   ;;  %v10988_v44 = vld [vmem:[#allocation2 + $0x2dc] ss:$20 sps:$4 sm:$0xff]  }
 0x5b9   :  { %v4691_v54 = vsub.f32 0.0, %v4686_v49  ;;  %v10983_v14 = vld [vmem:[#allocation2 + $0x2d0] ss:$20 sps:$4 sm:$0xff]   ;;  %v10986_v50 = vld [vmem:[#allocation2 + $0x2d8] ss:$20 sps:$4 sm:$0xff]  }
 0x5ba   :  { %v4695_v55 = vmul.f32 1.442695, %v4690_v52 }
 0x5bb   :  { %v4697_v56 = vmul.f32 1.442695, %v4691_v54  ;;  %v10991_v54 = vld [vmem:[#allocation2 + $0x2fc] ss:$20 sps:$4 sm:$0xff]  }
 0x5bc   :  { %11558 = vpow2.f32 %v4695_v55  ;;  %v10994_v55 = vld [vmem:[#allocation2 + $0x304] ss:$20 sps:$4 sm:$0xff]  }
 0x5bd   :  { %11560 = vpow2.f32 %v4697_v56 }
 0x5c3   :  { %v4633_v57 = vpop.f32.mrb[36].mxu1 }
 0x5c4   :  { %v4635_v60 = vpop.f32.mrb[37].mxu1  ;;  %v13528_v49 = vadd.f32 %v4633_v57, %v4436_v40  ;;  %v10989_v57 = vld [vmem:[#allocation2 + $0x2f8] ss:$20 sps:$4 sm:$0xff]   ;;  %v11036_v40 = vld [vmem:[#allocation2 + $0x41c] ss:$20 sps:$4 sm:$0xff]  }
 0x5c5   :  { %v13515_v62 = vadd.f32 %v4635_v60, %v4440_v24  ;;  %v4637_v5 = vpop.f32.mrb[38].mxu1 }
 0x5c6   :  { %v11559_v31 = vpop.eup %11558  ;;  %v4638_v9 = vpop.f32.mrb[39].mxu1  ;;  %v4687_v5 = vand.u32 2147483647, %v13528_v49 }
 0x5c7   :  { %v4705_v27 = vadd.f32 1.0, %v11559_v31  ;;  %v11561_v15 = vpop.eup %11560  ;;  %v4688_v63 = vand.u32 2147483647, %v13515_v62  ;;  %v4708_v58 = vmul.f32 -0.5, %v11559_v31  ;;  %v4711_v6 = vand.u32 2147483647, %v11559_v31 }
 0x5c8   :  { %v4714_v1 = vadd.f32 1.0, %v11561_v15  ;;  %v4717_v3 = vmul.f32 -0.5, %v11561_v15  ;;  %v4720_v11 = vand.u32 2147483647, %v11561_v15  ;;  %v4683_v60 = vmax.f32 %v13515_v62, 0.0 }
 0x5c9   :  { %11562 = vlog2.f32 %v4705_v27  ;;  %v4693_v0 = vsub.f32 0.0, %v4688_v63  ;;  %v4709_v4 = vadd.f32 1.0, %v4708_v58  ;;  %vm4712_vm15 = vcmp.lt.f32.partialorder %v4711_v6, 0.0004427343  ;;  %v11000_v63 = vld [vmem:[#allocation2 + $0x32c] ss:$20 sps:$4 sm:$0xff]  }
 0x5ca   :  { %11564 = vlog2.f32 %v4714_v1  ;;  %v4718_v8 = vadd.f32 1.0, %v4717_v3  ;;  %vm4721_vm2 = vcmp.lt.f32.partialorder %v4720_v11, 0.0004427343  ;;  %v4692_v1 = vsub.f32 0.0, %v4687_v5  ;;  %v10995_v58 = vld [vmem:[#allocation2 + $0x320] ss:$20 sps:$4 sm:$0xff]  }
 0x5cb   :  { %v4701_v2 = vmul.f32 1.442695, %v4693_v0  ;;  %v4710_v10 = vmul.f32 %v11559_v31, %v4709_v4  ;;  %v10992_v31 = vld [vmem:[#allocation2 + $0x300] ss:$20 sps:$4 sm:$0xff]   ;;  %v10998_v62 = vld [vmem:[#allocation2 + $0x328] ss:$20 sps:$4 sm:$0xff]  }
 0x5cc   :  { %v4719_v43 = vmul.f32 %v11561_v15, %v4718_v8  ;;  %v10997_v15 = vld [vmem:[#allocation2 + $0x324] ss:$20 sps:$4 sm:$0xff]   ;;  %v11006_v3 = vld [vmem:[#allocation2 + $0x354] ss:$20 sps:$4 sm:$0xff]   ;;  %v4699_v4 = vmul.f32 1.442695, %v4692_v1 }
 0x5cd   :  { %11566 = vpow2.f32 %v4701_v2  ;;  %v11003_v2 = vld [vmem:[#allocation2 + $0x34c] ss:$20 sps:$4 sm:$0xff]   ;;  %v11001_v6 = vld [vmem:[#allocation2 + $0x348] ss:$20 sps:$4 sm:$0xff]  }
 0x5ce   :  { %v11012_v8 = vld [vmem:[#allocation2 + $0x37c] ss:$20 sps:$4 sm:$0xff]   ;;  %v11010_v11 = vld [vmem:[#allocation2 + $0x378] ss:$20 sps:$4 sm:$0xff]   ;;  %v11054_v5 = vld [vmem:[#allocation2 + $0x494] ss:$20 sps:$4 sm:$0xff]  }
 0x5cf   :  { %v11060_v1 = vld [vmem:[#allocation2 + $0x4bc] ss:$20 sps:$4 sm:$0xff]  }
 0x5d3   :  { %v11563_v61 = vpop.eup %11562 }
 0x5d4   :  { %v4707_v7 = vmul.f32 0.6931472, %v11563_v61  ;;  %v11565_v20 = vpop.eup %11564  ;;  %v11004_v61 = vld [vmem:[#allocation2 + $0x350] ss:$20 sps:$4 sm:$0xff]  }
 0x5d5   :  { %v4716_v23 = vmul.f32 0.6931472, %v11565_v20  ;;  %v11015_v20 = vld [vmem:[#allocation2 + $0x39c] ss:$20 sps:$4 sm:$0xff]  }
 0x5d6   :  { %v4713_v21 = vsel %vm4712_vm15, %v4710_v10, %v4707_v7  ;;  %v11009_v7 = vld [vmem:[#allocation2 + $0x374] ss:$20 sps:$4 sm:$0xff]   ;;  %v11007_v10 = vld [vmem:[#allocation2 + $0x370] ss:$20 sps:$4 sm:$0xff]  }
 0x5d7   :  { %v11567_v25 = vpop.eup %11566  ;;  %v4750_v53 = vadd.f32 %v4713_v21, %v4680_v13  ;;  %v4722_v29 = vsel %vm4721_vm2, %v4719_v43, %v4716_v23  ;;  %v11018_v21 = vld [vmem:[#allocation2 + $0x3a4] ss:$20 sps:$4 sm:$0xff]   ;;  %v4444_v13 = vrot.slane %v13505_v35, %v12833_v51  ;;  %v11016_v43 = vld [vmem:[#allocation2 + $0x3a0] ss:$20 sps:$4 sm:$0xff]  }
 0x5d8   :  { %v4732_v32 = vadd.f32 1.0, %v11567_v25  ;;  %v4751_v33 = vadd.f32 %v4722_v29, %v4681_v26  ;;  %v4735_v46 = vmul.f32 -0.5, %v11567_v25  ;;  %v4738_v47 = vand.u32 2147483647, %v11567_v25  ;;  %v11013_v23 = vld [vmem:[#allocation2 + $0x398] ss:$20 sps:$4 sm:$0xff]  }
 0x5d9   :  { %v13520_v48 = vpack.c.bf16 %v4750_v53, %v4750_v53  ;;  %v11024_v26 = vld [vmem:[#allocation2 + $0x3cc] ss:$20 sps:$4 sm:$0xff]   ;;  %v13539_v53 = vadd.f32 %v13511_v38, %v4444_v13  ;;  %v11033_v38 = vld [vmem:[#allocation2 + $0x414] ss:$20 sps:$4 sm:$0xff]   ;;  %v11069_v13 = vld [vmem:[#allocation2 + $0x504] ss:$20 sps:$4 sm:$0xff]  }
 0x5da   :  { %11568 = vlog2.f32 %v4732_v32  ;;  %v13518_v34 = vpack.c.bf16 %v4751_v33, %v4751_v33  ;;  %v4736_v45 = vadd.f32 1.0, %v4735_v46  ;;  %vm4739_vm3 = vcmp.lt.f32.partialorder %v4738_v47, 0.0004427343  ;;  %v11019_v29 = vld [vmem:[#allocation2 + $0x3c0] ss:$20 sps:$4 sm:$0xff]  }
 0x5db   :  { %11570 = vpow2.f32 %v4699_v4  ;;  %v11022_v32 = vld [vmem:[#allocation2 + $0x3c8] ss:$20 sps:$4 sm:$0xff]   ;;  %v11027_v33 = vld [vmem:[#allocation2 + $0x3ec] ss:$20 sps:$4 sm:$0xff]  }
 0x5dc   :  { %6037 = vmatprep.mubr.bf16.mxu1 %v13518_v34  ;;  %6160 = vmatprep.mubr.bf16.mxu0 %v13518_v34  ;;  %v4737_v24 = vmul.f32 %v11567_v25, %v4736_v45  ;;  %v11021_v25 = vld [vmem:[#allocation2 + $0x3c4] ss:$20 sps:$4 sm:$0xff]   ;;  %v11063_v4 = vld [vmem:[#allocation2 + $0x4dc] ss:$20 sps:$4 sm:$0xff]  }
 0x5dd   :  { %6038 = vmatmul.mubr.bf16.vlgmr.msra.gmra.mrb[40].mxu1 %v13520_v48  ;;  %6161 = vmatmul.mubr.bf16.vlgmr.msra.gmra.mrb[32].mxu0 %v13520_v48  ;;  %v11042_v45 = vld [vmem:[#allocation2 + $0x444] ss:$20 sps:$4 sm:$0xff]  }
 0x5de   :  { %6047 = vmatpush1.bf16.msra.mxu1 %v10971_v36  ;;  %6170 = vmatpush1.bf16.msra.mxu0 %v10974_v30  ;;  %v11030_v36 = vld [vmem:[#allocation2 + $0x3f4] ss:$20 sps:$4 sm:$0xff]   ;;  %v4689_v30 = vand.u32 2147483647, %v13539_v53 }
 0x5df   :  { %6048 = vmatprep.subr.bf16.mxu1 %v10979_v37  ;;  %6171 = vmatprep.subr.bf16.mxu0 %v10982_v18  ;;  %v11025_v37 = vld [vmem:[#allocation2 + $0x3e8] ss:$20 sps:$4 sm:$0xff]   ;;  %v11028_v18 = vld [vmem:[#allocation2 + $0x3f0] ss:$20 sps:$4 sm:$0xff]  }
 0x5e2   :  { %6049 = vmatpush1.bf16.msra.mxu1 %v10977_v41  ;;  %6172 = vmatpush1.bf16.msra.mxu0 %v10980_v42  ;;  %v4694_v41 = vsub.f32 0.0, %v4689_v30  ;;  %v11031_v42 = vld [vmem:[#allocation2 + $0x410] ss:$20 sps:$4 sm:$0xff]  }
 0x5e3   :  { %6050 = vmatprep.subr.bf16.mxu1 %v10985_v39  ;;  %6173 = vmatprep.subr.bf16.mxu0 %v10988_v44  ;;  %v11034_v39 = vld [vmem:[#allocation2 + $0x418] ss:$20 sps:$4 sm:$0xff]   ;;  %v11039_v44 = vld [vmem:[#allocation2 + $0x43c] ss:$20 sps:$4 sm:$0xff]  }
 0x5e4   :  { %v11569_v52 = vpop.eup %11568  ;;  %v4703_v47 = vmul.f32 1.442695, %v4694_v41  ;;  %v11085_v41 = vld [vmem:[#allocation2 + $0x578] ss:$20 sps:$4 sm:$0xff]  }
 0x5e5   :  { %v4734_v56 = vmul.f32 0.6931472, %v11569_v52  ;;  %v11571_v35 = vpop.eup %11570  ;;  %v11045_v52 = vld [vmem:[#allocation2 + $0x464] ss:$20 sps:$4 sm:$0xff]  }
 0x5e6   :  { %6051 = vmatpush1.bf16.msra.mxu1 %v10983_v14  ;;  %6174 = vmatpush1.bf16.msra.mxu0 %v10986_v50  ;;  %v4723_v46 = vadd.f32 1.0, %v11571_v35  ;;  %v11037_v14 = vld [vmem:[#allocation2 + $0x438] ss:$20 sps:$4 sm:$0xff]   ;;  %v11040_v50 = vld [vmem:[#allocation2 + $0x440] ss:$20 sps:$4 sm:$0xff]  }
 0x5e7   :  { %v4740_v9 = vsel %vm4739_vm3, %v4737_v24, %v4734_v56  ;;  %6052 = vmatprep.subr.bf16.mxu1 %v10991_v54  ;;  %6175 = vmatprep.subr.bf16.mxu0 %v10994_v55  ;;  %v11048_v54 = vld [vmem:[#allocation2 + $0x46c] ss:$20 sps:$4 sm:$0xff]   ;;  %v4726_v55 = vmul.f32 -0.5, %v11571_v35  ;;  %v11046_v24 = vld [vmem:[#allocation2 + $0x468] ss:$20 sps:$4 sm:$0xff]  }
 0x5e8   :  { %v4753_v27 = vadd.f32 %v4740_v9, %v4683_v60  ;;  %11572 = vlog2.f32 %v4723_v46  ;;  %v11043_v56 = vld [vmem:[#allocation2 + $0x460] ss:$20 sps:$4 sm:$0xff]   ;;  %v11049_v9 = vld [vmem:[#allocation2 + $0x488] ss:$20 sps:$4 sm:$0xff]  }
 0x5e9   :  { %11574 = vpow2.f32 %v4703_v47  ;;  %v11051_v60 = vld [vmem:[#allocation2 + $0x48c] ss:$20 sps:$4 sm:$0xff]   ;;  %v11087_v46 = vld [vmem:[#allocation2 + $0x57c] ss:$20 sps:$4 sm:$0xff]  }
 0x5ea   :  { %v13532_v0 = vpack.c.bf16 %v4753_v27, %v4753_v27  ;;  %6053 = vmatpush1.bf16.msra.mxu1 %v10989_v57  ;;  %6176 = vmatpush1.bf16.msra.mxu0 %v10992_v31  ;;  %v4727_v31 = vadd.f32 1.0, %v4726_v55  ;;  %v11052_v27 = vld [vmem:[#allocation2 + $0x490] ss:$20 sps:$4 sm:$0xff]   ;;  %v11096_v47 = vld [vmem:[#allocation2 + $0x5ac] ss:$20 sps:$4 sm:$0xff]  }
 0x5eb   :  { %6054 = vmatprep.subr.bf16.mxu1 %v10997_v15  ;;  %6177 = vmatprep.subr.bf16.mxu0 %v11000_v63  ;;  %v4729_v15 = vand.u32 2147483647, %v11571_v35  ;;  %v11057_v63 = vld [vmem:[#allocation2 + $0x4b4] ss:$20 sps:$4 sm:$0xff]  }
 0x5ec   :  { %6078 = vmatprep.mubr.bf16.mxu1 %v13532_v0  ;;  %6201 = vmatprep.mubr.bf16.mxu0 %v13532_v0  ;;  %v11091_v55 = vld [vmem:[#allocation2 + $0x5a0] ss:$20 sps:$4 sm:$0xff]  }
 0x5ed   :  { %vm4730_vm4 = vcmp.lt.f32.partialorder %v4729_v15, 0.0004427343 }
 0x5ee   :  { %6055 = vmatpush1.bf16.msra.mxu1 %v10995_v58  ;;  %6178 = vmatpush1.bf16.msra.mxu0 %v10998_v62  ;;  %v4728_v62 = vmul.f32 %v11571_v35, %v4727_v31  ;;  %v11084_v35 = vld [vmem:[#allocation2 + $0x55c] ss:$20 sps:$4 sm:$0xff]  }
 0x5ef   :  { %6056 = vmatprep.subr.bf16.mxu1 %v11003_v2  ;;  %6179 = vmatprep.subr.bf16.mxu0 %v11006_v3  ;;  %v11055_v2 = vld [vmem:[#allocation2 + $0x4b0] ss:$20 sps:$4 sm:$0xff]   ;;  %v11058_v3 = vld [vmem:[#allocation2 + $0x4b8] ss:$20 sps:$4 sm:$0xff]  }
 0x5f2   :  { %6057 = vmatpush1.bf16.msra.mxu1 %v11001_v6  ;;  %6180 = vmatpush1.bf16.msra.mxu0 %v11004_v61  ;;  %v11573_v57 = vpop.eup %11572  ;;  %v11066_v6 = vld [vmem:[#allocation2 + $0x4e4] ss:$20 sps:$4 sm:$0xff]  }
 0x5f3   :  { %6058 = vmatprep.subr.bf16.mxu1 %v11009_v7  ;;  %6181 = vmatprep.subr.bf16.mxu0 %v11012_v8  ;;  %v4725_v58 = vmul.f32 0.6931472, %v11573_v57  ;;  %v13542_v61 = vpop.eup %11574  ;;  %v4682_v8 = vmax.f32 %v13528_v49, 0.0  ;;  %v11075_v49 = vld [vmem:[#allocation2 + $0x52c] ss:$20 sps:$4 sm:$0xff]  }
 0x5f4   :  { %v4744_v30 = vmul.f32 -0.5, %v13542_v61 }
 0x5f5   :  { %v4731_v7 = vsel %vm4730_vm4, %v4728_v62, %v4725_v58  ;;  %v11102_v58 = vld [vmem:[#allocation2 + $0x3d0] ss:$20 sps:$4 sm:$0xff]  }
 0x5f6   :  { %6059 = vmatpush1.bf16.msra.mxu1 %v11007_v10  ;;  %6182 = vmatpush1.bf16.msra.mxu0 %v11010_v11  ;;  %v11061_v10 = vld [vmem:[#allocation2 + $0x4d8] ss:$20 sps:$4 sm:$0xff]   ;;  %v11064_v11 = vld [vmem:[#allocation2 + $0x4e0] ss:$20 sps:$4 sm:$0xff]   ;;  %v11103_v62 = vld [vmem:[#allocation2 + $0x10] ss:$20 sps:$4 sm:$0xff]  }
 0x5f7   :  { %6060 = vmatprep.subr.bf16.mxu1 %v11015_v20  ;;  %6183 = vmatprep.subr.bf16.mxu0 %v11018_v21  ;;  %v4741_v20 = vadd.f32 1.0, %v13542_v61  ;;  %v4752_v21 = vadd.f32 %v4731_v7, %v4682_v8  ;;  %v11109_v7 = vld [vmem:[#allocation2 + $0x1a0] ss:$20 sps:$4 sm:$0xff]  }
 0x5f8   :  { %v11110_v8 = vld [vmem:[#allocation2 + $0x420] ss:$20 sps:$4 sm:$0xff]  }
 0x5f9   :  { %11576 = vlog2.f32 %v4741_v20  ;;  %v11113_v20 = vld [vmem:[#allocation2 + $0x1c8] ss:$20 sps:$4 sm:$0xff]  }
 0x5fa   :  { %6061 = vmatpush1.bf16.msra.mxu1 %v11013_v23  ;;  %6184 = vmatpush1.bf16.msra.mxu0 %v11016_v43  ;;  %v11072_v23 = vld [vmem:[#allocation2 + $0x50c] ss:$20 sps:$4 sm:$0xff]  }
 0x5fb   :  { %6062 = vmatprep.subr.bf16.mxu1 %v11021_v25  ;;  %6185 = vmatprep.subr.bf16.mxu0 %v11024_v26  ;;  %v11067_v43 = vld [vmem:[#allocation2 + $0x500] ss:$20 sps:$4 sm:$0xff]   ;;  %v11070_v25 = vld [vmem:[#allocation2 + $0x508] ss:$20 sps:$4 sm:$0xff]   ;;  %v13546_v26 = vpack.c.bf16 %v4752_v21, %v4752_v21 }
 0x5fc   :  { %v11114_v21 = vld [vmem:[#allocation2 + $0x448] ss:$20 sps:$4 sm:$0xff]  }
 0x5fe   :  { %6063 = vmatpush1.bf16.msra.mxu1 %v11019_v29  ;;  %6186 = vmatpush1.bf16.msra.mxu0 %v11022_v32  ;;  %v11078_v29 = vld [vmem:[#allocation2 + $0x534] ss:$20 sps:$4 sm:$0xff]  }
 0x5ff   :  { %6064 = vmatprep.subr.bf16.mxu1 %v11027_v33  ;;  %6187 = vmatprep.subr.bf16.mxu0 %v11030_v36  ;;  %v11073_v32 = vld [vmem:[#allocation2 + $0x528] ss:$20 sps:$4 sm:$0xff]   ;;  %v11076_v33 = vld [vmem:[#allocation2 + $0x530] ss:$20 sps:$4 sm:$0xff]  }
 0x600   :  { %v11081_v36 = vld [vmem:[#allocation2 + $0x554] ss:$20 sps:$4 sm:$0xff]  }
 0x602   :  { %6065 = vmatpush1.bf16.msra.mxu1 %v11025_v37  ;;  %6188 = vmatpush1.bf16.msra.mxu0 %v11028_v18  ;;  %v11079_v37 = vld [vmem:[#allocation2 + $0x550] ss:$20 sps:$4 sm:$0xff]   ;;  %v11082_v18 = vld [vmem:[#allocation2 + $0x558] ss:$20 sps:$4 sm:$0xff]  }
 0x603   :  { %6066 = vmatprep.subr.bf16.mxu1 %v11033_v38  ;;  %6189 = vmatprep.subr.bf16.mxu0 %v11036_v40  ;;  %v11090_v38 = vld [vmem:[#allocation2 + $0x584] ss:$20 sps:$4 sm:$0xff]   ;;  %v11577_v40 = vpop.eup %11576 }
 0x606   :  { %6067 = vmatpush1.bf16.msra.mxu1 %v11031_v42  ;;  %6190 = vmatpush1.bf16.msra.mxu0 %v11034_v39  ;;  %v4745_v42 = vadd.f32 1.0, %v4744_v30  ;;  %v11088_v39 = vld [vmem:[#allocation2 + $0x580] ss:$20 sps:$4 sm:$0xff]  }
 0x607   :  { %6068 = vmatprep.subr.bf16.mxu1 %v11039_v44  ;;  %6191 = vmatprep.subr.bf16.mxu0 %v11042_v45  ;;  %v11093_v44 = vld [vmem:[#allocation2 + $0x5a4] ss:$20 sps:$4 sm:$0xff]   ;;  %v4747_v45 = vand.u32 2147483647, %v13542_v61  ;;  %v11127_v30 = vld [vmem:[#allocation2 + $0x100] ss:$20 sps:$4 sm:$0xff]  }
 0x609   :  { %vm4748_vm5 = vcmp.lt.f32.partialorder %v4747_v45, 0.0004427343  ;;  %v11134_v45 = vld [vmem:[#allocation2 + $0x538] ss:$20 sps:$4 sm:$0xff]  }
 0x60a   :  { %6069 = vmatpush1.bf16.msra.mxu1 %v11037_v14  ;;  %6192 = vmatpush1.bf16.msra.mxu0 %v11040_v50  ;;  %v4982_v14 = vld [vmem:[#allocation2 + $0x5c8] sm:$0xff]  ;;  %v4743_v50 = vmul.f32 0.6931472, %v11577_v40 }
 0x60b   :  { %6070 = vmatprep.subr.bf16.mxu1 %v11045_v52  ;;  %6193 = vmatprep.subr.bf16.mxu0 %v11048_v54  ;;  %v4983_v52 = vld [vmem:[#allocation2 + $0x5d0] sm:$0xff]  ;;  %v4746_v54 = vmul.f32 %v13542_v61, %v4745_v42  ;;  %v11108_v61 = vld [vmem:[#allocation2 + $0x2b8] ss:$20 sps:$4 sm:$0xff]   ;;  %v11132_v40 = vld [vmem:[#allocation2 + $0x3a8] ss:$20 sps:$4 sm:$0xff]  }
 0x60c   :  { %v9450_v57 = vcombine.low %v4983_v52, %v4983_v52  ;;  %v11133_v42 = vld [vmem:[#allocation2 + $0x510] ss:$20 sps:$4 sm:$0xff]  }
 0x60d   :  { %v4749_v31 = vsel %vm4748_vm5, %v4746_v54, %v4743_v50  ;;  %v11159_v50 = vld [vmem:[%s14540_s12 + $0xac] ss:$28 sps:$4 sm:$0xff]  }
 0x60e   :  { %6071 = vmatpush1.bf16.msra.mxu1 %v11043_v56  ;;  %6194 = vmatpush1.bf16.msra.mxu0 %v11046_v24  ;;  %v11094_v56 = vld [vmem:[#allocation2 + $0x5a8] ss:$20 sps:$4 sm:$0xff]   ;;  %v9449_v24 = vcombine.high %v4982_v14, %v4982_v14 }
 0x60f   :  { %6072 = vmatprep.subr.bf16.mxu1 %v11051_v60  ;;  %6195 = vmatprep.subr.bf16.mxu0 %v11054_v5  ;;  %v9451_v60 = vcombine.high %v4983_v52, %v4983_v52  ;;  %v9448_v5 = vcombine.low %v4982_v14, %v4982_v14  ;;  %v11135_v14 = vld [vmem:[#allocation2 + $0x560] ss:$20 sps:$4 sm:$0xff]   ;;  %v11136_v52 = vld [vmem:[#allocation2 + $0x588] ss:$20 sps:$4 sm:$0xff]  }
 0x610   :  { %v11157_v54 = vld [vmem:[%s14540_s12 + $0xa8] ss:$28 sps:$4 sm:$0xff]  }
 0x611   :  { %v5991_v15 = vsel %vm3492_vm7, %v9448_v5, 0  ;;  %v11171_v5 = vld [vmem:[%s14540_s12 + $0x11c] ss:$28 sps:$4 sm:$0xff]  }
 0x612   :  { %6073 = vmatpush1.bf16.msra.mxu1 %v11049_v9  ;;  %6196 = vmatpush1.bf16.msra.mxu0 %v11052_v27  ;;  %v4684_v9 = vmax.f32 %v13539_v53, 0.0  ;;  %v11104_v53 = vld [vmem:[#allocation2 + $0x290] ss:$20 sps:$4 sm:$0xff]  }
 0x613   :  { %6074 = vmatprep.subr.bf16.mxu1 %v11057_v63  ;;  %6197 = vmatprep.subr.bf16.mxu0 %v11060_v1  ;;  %v5997_v63 = vsel %vm3492_vm7, %v9450_v57, 0  ;;  %v11101_v1 = vld [vmem:[#allocation2 + $0x150] ss:$20 sps:$4 sm:$0xff]  }
 0x614   :  { %v4754_v27 = vadd.f32 %v4749_v31, %v4684_v9  ;;  %v11144_v31 = vld [vmem:[%s14540_s12 + $0xc] ss:$28 sps:$4 sm:$0xff]   ;;  %v11169_v9 = vld [vmem:[%s14540_s12 + $0x118] ss:$28 sps:$4 sm:$0xff]  }
 0x616   :  { %6075 = vmatpush1.bf16.msra.mxu1 %v11055_v2  ;;  %6198 = vmatpush1.bf16.msra.mxu0 %v11058_v3  ;;  %v13560_v2 = vpack.c.bf16 %v4754_v27, %v4754_v27  ;;  %v11105_v3 = vld [vmem:[#allocation2 + $0x178] ss:$20 sps:$4 sm:$0xff]   ;;  %v11142_v27 = vld [vmem:[%s14540_s12 + $0x8] ss:$28 sps:$4 sm:$0xff]  }
 0x617   :  { %6076 = vmatprep.subr.bf16.mxu1 %v11063_v4  ;;  %6199 = vmatprep.subr.bf16.mxu0 %v11066_v6  ;;  %v11106_v4 = vld [vmem:[#allocation2 + $0x3f8] ss:$20 sps:$4 sm:$0xff]  }
 0x618   :  { %v11107_v6 = vld [vmem:[#allocation2 + $0x38] ss:$20 sps:$4 sm:$0xff]  }
 0x61a   :  { %6077 = vmatpush1.bf16.msra.mxu1 %v11061_v10  ;;  %6200 = vmatpush1.bf16.msra.mxu0 %v11064_v11  ;;  %v11111_v10 = vld [vmem:[#allocation2 + $0x60] ss:$20 sps:$4 sm:$0xff]  }
 0x61b   :  { %6087 = vmatprep.subr.bf16.mxu1 %v11069_v13  ;;  %6210 = vmatprep.subr.bf16.mxu0 %v11072_v23  ;;  %v11112_v11 = vld [vmem:[#allocation2 + $0x2e0] ss:$20 sps:$4 sm:$0xff]   ;;  %v11115_v13 = vld [vmem:[#allocation2 + $0x88] ss:$20 sps:$4 sm:$0xff]   ;;  %v11117_v23 = vld [vmem:[#allocation2 + $0x1f0] ss:$20 sps:$4 sm:$0xff]  }
 0x61d   :  { %6079 = vmatmul.mubr.bf16.vlgmr.msra.gmra.mrb[40].mxu1 %v13546_v26  ;;  %6202 = vmatmul.mubr.bf16.vlgmr.msra.gmra.mrb[32].mxu0 %v13546_v26 }
 0x61e   :  { %6088 = vmatpush1.bf16.msra.mxu1 %v11067_v43  ;;  %6211 = vmatpush1.bf16.msra.mxu0 %v11070_v25  ;;  %v11119_v43 = vld [vmem:[#allocation2 + $0xb0] ss:$20 sps:$4 sm:$0xff]  }
 0x61f   :  { %6089 = vmatprep.subr.bf16.mxu1 %v11075_v49  ;;  %6212 = vmatprep.subr.bf16.mxu0 %v11078_v29  ;;  %v11120_v25 = vld [vmem:[#allocation2 + $0x330] ss:$20 sps:$4 sm:$0xff]   ;;  %v11121_v49 = vld [vmem:[#allocation2 + $0x218] ss:$20 sps:$4 sm:$0xff]  }
 0x620   :  { %6119 = vmatprep.mubr.bf16.mxu1 %v11701_v22  ;;  %6242 = vmatprep.mubr.bf16.mxu0 %v11701_v22  ;;  %v11122_v29 = vld [vmem:[#allocation2 + $0x498] ss:$20 sps:$4 sm:$0xff]  }
 0x622   :  { %6090 = vmatpush1.bf16.msra.mxu1 %v11073_v32  ;;  %6213 = vmatpush1.bf16.msra.mxu0 %v11076_v33  ;;  %v11123_v32 = vld [vmem:[#allocation2 + $0xd8] ss:$20 sps:$4 sm:$0xff]  }
 0x623   :  { %6091 = vmatprep.subr.bf16.mxu1 %v11081_v36  ;;  %6214 = vmatprep.subr.bf16.mxu0 %v11084_v35  ;;  %v11124_v33 = vld [vmem:[#allocation2 + $0x358] ss:$20 sps:$4 sm:$0xff]   ;;  %v11125_v36 = vld [vmem:[#allocation2 + $0x240] ss:$20 sps:$4 sm:$0xff]  }
 0x624   :  { %v11126_v35 = vld [vmem:[#allocation2 + $0x4c0] ss:$20 sps:$4 sm:$0xff]  }
 0x626   :  { %6092 = vmatpush1.bf16.msra.mxu1 %v11079_v37  ;;  %6215 = vmatpush1.bf16.msra.mxu0 %v11082_v18  ;;  %v11128_v37 = vld [vmem:[#allocation2 + $0x380] ss:$20 sps:$4 sm:$0xff]   ;;  %v11129_v18 = vld [vmem:[#allocation2 + $0x268] ss:$20 sps:$4 sm:$0xff]  }
 0x627   :  { %6093 = vmatprep.subr.bf16.mxu1 %v11087_v46  ;;  %6216 = vmatprep.subr.bf16.mxu0 %v11090_v38  ;;  %v11130_v46 = vld [vmem:[#allocation2 + $0x4e8] ss:$20 sps:$4 sm:$0xff]  }
 0x628   :  { %v11131_v38 = vld [vmem:[#allocation2 + $0x128] ss:$20 sps:$4 sm:$0xff]  }
 0x62a   :  { %6094 = vmatpush1.bf16.msra.mxu1 %v11085_v41  ;;  %6217 = vmatpush1.bf16.msra.mxu0 %v11088_v39  ;;  %v11141_v41 = vld [vmem:[%s14540_s12 + $0x4] ss:$28 sps:$4 sm:$0xff]  }
 0x62b   :  { %6095 = vmatprep.subr.bf16.mxu1 %v11093_v44  ;;  %6218 = vmatprep.subr.bf16.mxu0 %v11096_v47  ;;  %v11139_v39 = vld [vmem:[%s14540_s12] ss:$28 sps:$4 sm:$0xff]   ;;  %v11145_v47 = vld [vmem:[%s14540_s12 + $0x38] ss:$28 sps:$4 sm:$0xff]  }
 0x62c   :  { %v11147_v44 = vld [vmem:[%s14540_s12 + $0x3c] ss:$28 sps:$4 sm:$0xff]  }
 0x62e   :  { %6096 = vmatpush1.bf16.msra.mxu1 %v11091_v55  ;;  %6219 = vmatpush1.bf16.msra.mxu0 %v11094_v56  ;;  %v11165_v55 = vld [vmem:[%s14540_s12 + $0xe4] ss:$28 sps:$4 sm:$0xff]  }
 0x62f   :  { %9453 = vmatprep.subr.msk.bf16.mxu1 %vm3492_vm7, %v9449_v24  ;;  %9455 = vmatprep.subr.msk.bf16.mxu0 %vm3492_vm7, %v9451_v60  ;;  %v11137_v56 = vld [vmem:[#allocation2 + $0x5b0] ss:$20 sps:$4 sm:$0xff]   ;;  %v11138_v24 = vld [vmem:[#allocation2 + $0x5d8] ss:$0 sps:$4 sm:$0xff]   ;;  %v11163_v60 = vld [vmem:[%s14540_s12 + $0xe0] ss:$28 sps:$4 sm:$0xff]  }
 0x630   :  { %v6003_v57 = vsel %vm3492_vm7, %v11138_v24, 0  ;;  %v11232_v24 = vld [vmem:[%s14540_s12 + $0x350] ss:$28 sps:$4 sm:$0xff]  }
 0x632   :  { %6098 = vmatpush1.bf16.msra.mxu1 %v5991_v15  ;;  %6221 = vmatpush1.bf16.msra.mxu0 %v5997_v63  ;;  %v11150_v15 = vld [vmem:[%s14540_s12 + $0x44] ss:$28 sps:$4 sm:$0xff]  }
 0x633   :  { %9906 = vmatprep.subr.bf16.mxu1 %v11101_v1  ;;  %9928 = vmatprep.subr.bf16.mxu0 %v11102_v58  ;;  %v11148_v63 = vld [vmem:[%s14540_s12 + $0x40] ss:$28 sps:$4 sm:$0xff]   ;;  %v11154_v58 = vld [vmem:[%s14540_s12 + $0x78] ss:$28 sps:$4 sm:$0xff]  }
 0x634   :  { %v11156_v1 = vld [vmem:[%s14540_s12 + $0x7c] ss:$28 sps:$4 sm:$0xff]  }
 0x635   :  { %9454 = vmatmul.mubr.msk.bf16.vlgmr.msra.gmra.mrb[40].mxu1 %vm3488_vm8, %v13560_v2  ;;  %9456 = vmatmul.mubr.msk.bf16.vlgmr.msra.gmra.mrb[32].mxu0 %vm3488_vm8, %v13560_v2 }
 0x636   :  { %9907 = vmatpush3.bf16.msra.mxu1 %v11103_v62  ;;  %6283 = vmatprep.mubr.bf16.mxu1 %v13518_v34  ;;  %v11116_v34 = vld [vmem:[#allocation2 + $0x308] ss:$20 sps:$4 sm:$0xff]   ;;  %v11162_v62 = vld [vmem:[%s14540_s12 + $0xb4] ss:$28 sps:$4 sm:$0xff]  }
 0x637   :  { %9929 = vmatpush3.bf16.msra.mxu0 %v11104_v53  ;;  %6323 = vmatprep.mubr.bf16.mxu0 %v13532_v0  ;;  %v11118_v0 = vld [vmem:[#allocation2 + $0x470] ss:$20 sps:$4 sm:$0xff]   ;;  %v11168_v53 = vld [vmem:[%s14540_s12 + $0xec] ss:$28 sps:$4 sm:$0xff]  }
 0x638   :  { %9908 = vmatprep.subr.bf16.mxu1 %v11105_v3  ;;  %9930 = vmatprep.subr.bf16.mxu0 %v11106_v4  ;;  %v11166_v3 = vld [vmem:[%s14540_s12 + $0xe8] ss:$28 sps:$4 sm:$0xff]  }
 0x639   :  { %v11174_v4 = vld [vmem:[%s14540_s12 + $0x124] ss:$28 sps:$4 sm:$0xff]  }
 0x63a   :  { %9909 = vmatpush3.bf16.msra.mxu1 %v11107_v6  ;;  %v11172_v6 = vld [vmem:[%s14540_s12 + $0x120] ss:$28 sps:$4 sm:$0xff]  }
 0x63b   :  { %9931 = vmatpush3.bf16.msra.mxu0 %v11108_v61  ;;  %9910 = vmatprep.subr.bf16.mxu1 %v11109_v7  ;;  %v11177_v61 = vld [vmem:[%s14540_s12 + $0x154] ss:$28 sps:$4 sm:$0xff]   ;;  %v11180_v7 = vld [vmem:[%s14540_s12 + $0x15c] ss:$28 sps:$4 sm:$0xff]  }
 0x63c   :  { %9932 = vmatprep.subr.bf16.mxu0 %v11110_v8  ;;  %v11175_v8 = vld [vmem:[%s14540_s12 + $0x150] ss:$28 sps:$4 sm:$0xff]  }
 0x63e   :  { %9911 = vmatpush3.bf16.msra.mxu1 %v11111_v10  ;;  %v11178_v10 = vld [vmem:[%s14540_s12 + $0x158] ss:$28 sps:$4 sm:$0xff]  }
 0x63f   :  { %9933 = vmatpush3.bf16.msra.mxu0 %v11112_v11  ;;  %9912 = vmatprep.subr.bf16.mxu1 %v11113_v20  ;;  %v11183_v11 = vld [vmem:[%s14540_s12 + $0x18c] ss:$28 sps:$4 sm:$0xff]   ;;  %v11186_v20 = vld [vmem:[%s14540_s12 + $0x194] ss:$28 sps:$4 sm:$0xff]  }
 0x640   :  { %9934 = vmatprep.subr.bf16.mxu0 %v11114_v21  ;;  %v11181_v21 = vld [vmem:[%s14540_s12 + $0x188] ss:$28 sps:$4 sm:$0xff]  }
 0x642   :  { %9913 = vmatpush3.bf16.msra.mxu1 %v11115_v13  ;;  %v11184_v13 = vld [vmem:[%s14540_s12 + $0x190] ss:$28 sps:$4 sm:$0xff]  }
 0x643   :  { %9935 = vmatpush3.bf16.msra.mxu0 %v11116_v34  ;;  %9914 = vmatprep.subr.bf16.mxu1 %v11117_v23  ;;  %v11189_v34 = vld [vmem:[%s14540_s12 + $0x1c4] ss:$28 sps:$4 sm:$0xff]   ;;  %v11192_v23 = vld [vmem:[%s14540_s12 + $0x1cc] ss:$28 sps:$4 sm:$0xff]  }
 0x644   :  { %9936 = vmatprep.subr.bf16.mxu0 %v11118_v0  ;;  %v11187_v0 = vld [vmem:[%s14540_s12 + $0x1c0] ss:$28 sps:$4 sm:$0xff]  }
 0x646   :  { %9915 = vmatpush3.bf16.msra.mxu1 %v11119_v43  ;;  %v11190_v43 = vld [vmem:[%s14540_s12 + $0x1c8] ss:$28 sps:$4 sm:$0xff]  }
 0x647   :  { %9937 = vmatpush3.bf16.msra.mxu0 %v11120_v25  ;;  %9916 = vmatprep.subr.bf16.mxu1 %v11121_v49  ;;  %v11195_v25 = vld [vmem:[%s14540_s12 + $0x1fc] ss:$28 sps:$4 sm:$0xff]   ;;  %v11198_v49 = vld [vmem:[%s14540_s12 + $0x204] ss:$28 sps:$4 sm:$0xff]  }
 0x648   :  { %9938 = vmatprep.subr.bf16.mxu0 %v11122_v29  ;;  %v11193_v29 = vld [vmem:[%s14540_s12 + $0x1f8] ss:$28 sps:$4 sm:$0xff]  }
 0x64a   :  { %9917 = vmatpush3.bf16.msra.mxu1 %v11123_v32  ;;  %v11196_v32 = vld [vmem:[%s14540_s12 + $0x200] ss:$28 sps:$4 sm:$0xff]  }
 0x64b   :  { %9939 = vmatpush3.bf16.msra.mxu0 %v11124_v33  ;;  %9918 = vmatprep.subr.bf16.mxu1 %v11125_v36  ;;  %v11201_v33 = vld [vmem:[%s14540_s12 + $0x234] ss:$28 sps:$4 sm:$0xff]   ;;  %v11204_v36 = vld [vmem:[%s14540_s12 + $0x23c] ss:$28 sps:$4 sm:$0xff]  }
 0x64c   :  { %9940 = vmatprep.subr.bf16.mxu0 %v11126_v35  ;;  %v11199_v35 = vld [vmem:[%s14540_s12 + $0x230] ss:$28 sps:$4 sm:$0xff]  }
 0x64e   :  { %9919 = vmatpush3.bf16.msra.mxu1 %v11127_v30  ;;  %v11202_v30 = vld [vmem:[%s14540_s12 + $0x238] ss:$28 sps:$4 sm:$0xff]  }
 0x64f   :  { %9941 = vmatpush3.bf16.msra.mxu0 %v11128_v37  ;;  %9920 = vmatprep.subr.bf16.mxu1 %v11129_v18  ;;  %v11207_v37 = vld [vmem:[%s14540_s12 + $0x26c] ss:$28 sps:$4 sm:$0xff]   ;;  %v11210_v18 = vld [vmem:[%s14540_s12 + $0x274] ss:$28 sps:$4 sm:$0xff]  }
 0x650   :  { %9942 = vmatprep.subr.bf16.mxu0 %v11130_v46  ;;  %v11205_v46 = vld [vmem:[%s14540_s12 + $0x268] ss:$28 sps:$4 sm:$0xff]  }
 0x652   :  { %9921 = vmatpush3.bf16.msra.mxu1 %v11131_v38  ;;  %v11208_v38 = vld [vmem:[%s14540_s12 + $0x270] ss:$28 sps:$4 sm:$0xff]  }
 0x653   :  { %9943 = vmatpush3.bf16.msra.mxu0 %v11132_v40  ;;  %10058 = vmatprep.subr.bf16.mxu1 %v11702_v59  ;;  %v11213_v40 = vld [vmem:[%s14540_s12 + $0x2a4] ss:$28 sps:$4 sm:$0xff]  }
 0x654   :  { %8162 = vmatprep.subr.bf16.mxu0 %v11141_v41  ;;  %v11216_v41 = vld [vmem:[%s14540_s12 + $0x2ac] ss:$28 sps:$4 sm:$0xff]  }
 0x655   :  { %6284 = vmatmul.mubr.bf16.vlgmr.msra.gmra.mrb[44].mxu1 %v13520_v48  ;;  %v11153_v48 = vld [vmem:[%s14540_s12 + $0x74] ss:$28 sps:$4 sm:$0xff]  }
 0x656   :  { %6324 = vmatmul.mubr.bf16.vlgmr.msra.gmra.mrb[36].mxu0 %v13546_v26  ;;  %10059 = vmatpush3.bf16.msra.mxu1 %v11133_v42  ;;  %v11151_v26 = vld [vmem:[%s14540_s12 + $0x70] ss:$28 sps:$4 sm:$0xff]   ;;  %v11211_v42 = vld [vmem:[%s14540_s12 + $0x2a0] ss:$28 sps:$4 sm:$0xff]  }
 0x657   :  { %10060 = vmatprep.subr.bf16.mxu1 %v11702_v59  ;;  %10070 = vmatprep.mubr.msk.bf16.mxu1 %vm11703_vm1, %v11702_v59 }
 0x658   :  { %8163 = vmatpush1.bf16.msra.mxu0 %v11139_v39  ;;  %v11214_v39 = vld [vmem:[%s14540_s12 + $0x2a8] ss:$28 sps:$4 sm:$0xff]  }
 0x659   :  { %8164 = vmatprep.subr.bf16.mxu0 %v11147_v44  ;;  %v11219_v44 = vld [vmem:[%s14540_s12 + $0x2dc] ss:$28 sps:$4 sm:$0xff]  }
 0x65a   :  { %10061 = vmatpush3.bf16.msra.mxu1 %v11134_v45  ;;  %v11222_v45 = vld [vmem:[%s14540_s12 + $0x2e4] ss:$28 sps:$4 sm:$0xff]  }
 0x65b   :  { %10062 = vmatprep.subr.bf16.mxu1 %v11702_v59 }
 0x65c   :  { %8165 = vmatpush1.bf16.msra.mxu0 %v11145_v47  ;;  %v11217_v47 = vld [vmem:[%s14540_s12 + $0x2d8] ss:$28 sps:$4 sm:$0xff]  }
 0x65d   :  { %8166 = vmatprep.subr.bf16.mxu0 %v11153_v48  ;;  %v11220_v48 = vld [vmem:[%s14540_s12 + $0x2e0] ss:$28 sps:$4 sm:$0xff]  }
 0x65e   :  { %10063 = vmatpush3.bf16.msra.mxu1 %v11135_v14  ;;  %v11225_v14 = vld [vmem:[%s14540_s12 + $0x314] ss:$28 sps:$4 sm:$0xff]  }
 0x65f   :  { %10064 = vmatprep.subr.bf16.mxu1 %v11702_v59 }
 0x660   :  { %8167 = vmatpush1.bf16.msra.mxu0 %v11151_v26  ;;  %v11228_v26 = vld [vmem:[%s14540_s12 + $0x31c] ss:$28 sps:$4 sm:$0xff]  }
 0x661   :  { %8168 = vmatprep.subr.bf16.mxu0 %v11159_v50  ;;  %v11223_v50 = vld [vmem:[%s14540_s12 + $0x310] ss:$28 sps:$4 sm:$0xff]  }
 0x662   :  { %10065 = vmatpush3.bf16.msra.mxu1 %v11136_v52  ;;  %v11226_v52 = vld [vmem:[%s14540_s12 + $0x318] ss:$28 sps:$4 sm:$0xff]  }
 0x663   :  { %10066 = vmatprep.subr.bf16.mxu1 %v11702_v59 }
 0x664   :  { %8169 = vmatpush1.bf16.msra.mxu0 %v11157_v54  ;;  %v11231_v54 = vld [vmem:[%s14540_s12 + $0x34c] ss:$28 sps:$4 sm:$0xff]  }
 0x665   :  { %8170 = vmatprep.subr.bf16.mxu0 %v11165_v55  ;;  %v11234_v55 = vld [vmem:[%s14540_s12 + $0x354] ss:$28 sps:$4 sm:$0xff]  }
 0x666   :  { %10067 = vmatpush3.bf16.msra.mxu1 %v11137_v56  ;;  %v11229_v56 = vld [vmem:[%s14540_s12 + $0x348] ss:$28 sps:$4 sm:$0xff]  }
 0x667   :  { %10068 = vmatprep.subr.bf16.mxu1 %v11702_v59 }
 0x668   :  { %8171 = vmatpush1.bf16.msra.mxu0 %v11163_v60  ;;  %v11237_v60 = vld [vmem:[%s14540_s12 + $0x384] ss:$28 sps:$4 sm:$0xff]  }
 0x669   :  { %8172 = vmatprep.subr.bf16.mxu0 %v11171_v5  ;;  %v11240_v5 = vld [vmem:[%s14540_s12 + $0x38c] ss:$28 sps:$4 sm:$0xff]  }
 0x66a   :  { %10069 = vmatpush3.bf16.msra.mxu1 %v6003_v57  ;;  %v13782_v57 = vld [vmem:[%s14539_s11] sm:$0x1f] }
 0x66b   :  { %8285 = vmatprep.subr.bf16.mxu1 %v11144_v31  ;;  %v4990_v31 = vrot.slane %v13782_v57, %v12807_v16 }
 0x66c   :  { %8173 = vmatpush1.bf16.msra.mxu0 %v11169_v9  ;;  %v4994_v9 = vrot.slane %v13782_v57, %v12810_v17 }
 0x66d   :  { %10071 = vmatmul.mubr.msk.bf16.vlgmr.msra.gmra.mrb[48].mxu1 %vm3488_vm8, %v13560_v2  ;;  %v11160_v2 = vld [vmem:[%s14540_s12 + $0xb0] ss:$28 sps:$4 sm:$0xff]   ;;  %8174 = vmatprep.subr.bf16.mxu0 %v11177_v61 }
 0x66e   :  { %8286 = vmatpush1.bf16.msra.mxu1 %v11142_v27  ;;  %v5002_v27 = vrot.slane %v13782_v57, %v12813_v19 }
 0x66f   :  { %8287 = vmatprep.subr.bf16.mxu1 %v11150_v15 }
 0x670   :  { %8175 = vmatpush1.bf16.msra.mxu0 %v11175_v8 }
 0x671   :  { %8176 = vmatprep.subr.bf16.mxu0 %v11183_v11 }
 0x672   :  { %8288 = vmatpush1.bf16.msra.mxu1 %v11148_v63 }
 0x673   :  { %8289 = vmatprep.subr.bf16.mxu1 %v11156_v1 }
 0x674   :  { %8177 = vmatpush1.bf16.msra.mxu0 %v11181_v21 }
 0x675   :  { %8178 = vmatprep.subr.bf16.mxu0 %v11189_v34 }
 0x676   :  { %8290 = vmatpush1.bf16.msra.mxu1 %v11154_v58 }
 0x677   :  { %8291 = vmatprep.subr.bf16.mxu1 %v11162_v62 }
 0x678   :  { %8179 = vmatpush1.bf16.msra.mxu0 %v11187_v0 }
 0x679   :  { %8180 = vmatprep.subr.bf16.mxu0 %v11195_v25 }
 0x67a   :  { %8292 = vmatpush1.bf16.msra.mxu1 %v11160_v2 }
 0x67b   :  { %8293 = vmatprep.subr.bf16.mxu1 %v11168_v53 }
 0x67c   :  { %8181 = vmatpush1.bf16.msra.mxu0 %v11193_v29 }
 0x67d   :  { %8182 = vmatprep.subr.bf16.mxu0 %v11201_v33 }
 0x67e   :  { %8294 = vmatpush1.bf16.msra.mxu1 %v11166_v3 }
 0x67f   :  { %8295 = vmatprep.subr.bf16.mxu1 %v11174_v4 }
 0x680   :  { %8183 = vmatpush1.bf16.msra.mxu0 %v11199_v35 }
 0x681   :  { %8184 = vmatprep.subr.bf16.mxu0 %v11207_v37 }
 0x682   :  { %8296 = vmatpush1.bf16.msra.mxu1 %v11172_v6 }
 0x683   :  { %8297 = vmatprep.subr.bf16.mxu1 %v11180_v7 }
 0x684   :  { %8185 = vmatpush1.bf16.msra.mxu0 %v11205_v46 }
 0x685   :  { %8186 = vmatprep.subr.bf16.mxu0 %v11213_v40 }
 0x686   :  { %8298 = vmatpush1.bf16.msra.mxu1 %v11178_v10 }
 0x687   :  { %8299 = vmatprep.subr.bf16.mxu1 %v11186_v20 }
 0x688   :  { %8187 = vmatpush1.bf16.msra.mxu0 %v11211_v42 }
 0x689   :  { %8188 = vmatprep.subr.bf16.mxu0 %v11219_v44 }
 0x68a   :  { %8300 = vmatpush1.bf16.msra.mxu1 %v11184_v13 }
 0x68b   :  { %8301 = vmatprep.subr.bf16.mxu1 %v11192_v23 }
 0x68c   :  { %8189 = vmatpush1.bf16.msra.mxu0 %v11217_v47 }
 0x68d   :  { %8190 = vmatprep.subr.bf16.mxu0 %v11225_v14 }
 0x68e   :  { %8302 = vmatpush1.bf16.msra.mxu1 %v11190_v43 }
 0x68f   :  { %8303 = vmatprep.subr.bf16.mxu1 %v11198_v49 }
 0x690   :  { %8191 = vmatpush1.bf16.msra.mxu0 %v11223_v50 }
 0x691   :  { %8192 = vmatprep.subr.bf16.mxu0 %v11231_v54 }
 0x692   :  { %8304 = vmatpush1.bf16.msra.mxu1 %v11196_v32 }
 0x693   :  { %8305 = vmatprep.subr.bf16.mxu1 %v11204_v36 }
 0x694   :  { %8193 = vmatpush1.bf16.msra.mxu0 %v11229_v56 }
 0x695   :  { %8203 = vmatprep.subr.bf16.mxu0 %v11237_v60 }
 0x696   :  { %8306 = vmatpush1.bf16.msra.mxu1 %v11202_v30 }
 0x697   :  { %8307 = vmatprep.subr.bf16.mxu1 %v11210_v18 }
 0x69a   :  { %8308 = vmatpush1.bf16.msra.mxu1 %v11208_v38 }
 0x69b   :  { %8309 = vmatprep.subr.bf16.mxu1 %v11216_v41  ;;  %v5006_v41 = vrot.slane %v13782_v57, %v12833_v51 }
 0x69e   :  { %8310 = vmatpush1.bf16.msra.mxu1 %v11214_v39 }
 0x69f   :  { %8311 = vmatprep.subr.bf16.mxu1 %v11222_v45 }
 0x6a2   :  { %8312 = vmatpush1.bf16.msra.mxu1 %v11220_v48 }
 0x6a3   :  { %8313 = vmatprep.subr.bf16.mxu1 %v11228_v26 }
 0x6a6   :  { %8314 = vmatpush1.bf16.msra.mxu1 %v11226_v52 }
 0x6a7   :  { %8315 = vmatprep.subr.bf16.mxu1 %v11234_v55 }
 0x6aa   :  { %8316 = vmatpush1.bf16.msra.mxu1 %v11232_v24 }
 0x6ab   :  { %8326 = vmatprep.subr.bf16.mxu1 %v11240_v5 }
 0x708   :  { %v6121_v15 = vpop.f32.mrb[40].mxu1  ;;  %v13790_v63 = vpop.f32.mrb[32].mxu0 }
 0x709   :  { %v13792_v1 = vadd.f32 %v6121_v15, %v4990_v31  ;;  %v6123_v58 = vpop.f32.mrb[41].mxu1  ;;  %v6246_v62 = vpop.f32.mrb[33].mxu0 }
 0x70a   :  { %v13794_v2 = vadd.f32 %v6123_v58, %v4994_v9  ;;  %v13796_v53 = vadd.f32 %v6246_v62, %v5002_v27  ;;  %v6125_v3 = vpop.f32.mrb[42].mxu1  ;;  %v6248_v4 = vpop.f32.mrb[34].mxu0 }
 0x70b   :  { %v6376_v6 = vand.u32 2147483647, %v13792_v1  ;;  %v6126_v10 = vpop.f32.mrb[43].mxu1  ;;  %v6249_v11 = vpop.f32.mrb[35].mxu0  ;;  %v6371_v42 = vmax.f32 %v13792_v1, 0.0 }
 0x70c   :  { %v6377_v61 = vand.u32 2147483647, %v13794_v2  ;;  %v6379_v7 = vand.u32 2147483647, %v13796_v53  ;;  %v6372_v15 = vmax.f32 %v13794_v2, 0.0 }
 0x70d   :  { %v6381_v8 = vsub.f32 0.0, %v6376_v6  ;;  %v11235_v2 = vld [vmem:[%s14540_s12 + $0x380] ss:$28 sps:$4 sm:$0xff]  }
 0x70e   :  { %v6382_v20 = vsub.f32 0.0, %v6377_v61  ;;  %v6384_v21 = vsub.f32 0.0, %v6379_v7  ;;  %v6374_v7 = vmax.f32 %v13796_v53, 0.0  ;;  %v11243_v53 = vld [vmem:[%s14540_s12 + $0x3bc] ss:$28 sps:$4 sm:$0xff]  }
 0x70f   :  { %v6386_v13 = vmul.f32 1.442695, %v6381_v8 }
 0x710   :  { %v6388_v34 = vmul.f32 1.442695, %v6382_v20  ;;  %v6392_v23 = vmul.f32 1.442695, %v6384_v21  ;;  %v11238_v21 = vld [vmem:[%s14540_s12 + $0x388] ss:$28 sps:$4 sm:$0xff]  }
 0x711   :  { %11578 = vpow2.f32 %v6386_v13 }
 0x712   :  { %11580 = vpow2.f32 %v6388_v34  ;;  %v11246_v34 = vld [vmem:[%s14540_s12 + $0x3c4] ss:$28 sps:$4 sm:$0xff]  }
 0x713   :  { %11582 = vpow2.f32 %v6392_v23 }
 0x71b   :  { %v11579_v0 = vpop.eup %11578 }
 0x71c   :  { %v6396_v43 = vadd.f32 1.0, %v11579_v0  ;;  %v11581_v25 = vpop.eup %11580  ;;  %v6399_v33 = vmul.f32 -0.5, %v11579_v0  ;;  %v6402_v37 = vand.u32 2147483647, %v11579_v0 }
 0x71d   :  { %v11583_v49 = vpop.eup %11582  ;;  %v6405_v29 = vadd.f32 1.0, %v11581_v25  ;;  %v6408_v36 = vmul.f32 -0.5, %v11581_v25  ;;  %v6411_v38 = vand.u32 2147483647, %v11581_v25 }
 0x71e   :  { %11584 = vlog2.f32 %v6396_v43  ;;  %v6423_v32 = vadd.f32 1.0, %v11583_v49  ;;  %v6400_v35 = vadd.f32 1.0, %v6399_v33  ;;  %v6426_v30 = vmul.f32 -0.5, %v11583_v49  ;;  %v11241_v43 = vld [vmem:[%s14540_s12 + $0x3b8] ss:$28 sps:$4 sm:$0xff]  }
 0x71f   :  { %11586 = vlog2.f32 %v6405_v29  ;;  %v6409_v18 = vadd.f32 1.0, %v6408_v36  ;;  %vm13804_vm6 = vcmp.lt.f32.partialorder %v6402_v37, 0.0004427343  ;;  %v6429_v50 = vand.u32 2147483647, %v11583_v49 }
 0x720   :  { %11588 = vlog2.f32 %v6423_v32  ;;  %v6401_v44 = vmul.f32 %v11579_v0, %v6400_v35  ;;  %v6427_v45 = vadd.f32 1.0, %v6426_v30  ;;  %vm6412_vm9 = vcmp.lt.f32.partialorder %v6411_v38, 0.0004427343  ;;  %v11247_v32 = vld [vmem:[%s14540_s12 + $0x3f0] ss:$28 sps:$4 sm:$0xff]  }
 0x721   :  { %v6410_v60 = vmul.f32 %v11581_v25, %v6409_v18  ;;  %vm6430_vm10 = vcmp.lt.f32.partialorder %v6429_v50, 0.0004427343  ;;  %v4998_v0 = vrot.slane %v13782_v57, %v12855_v28  ;;  %v11244_v25 = vld [vmem:[%s14540_s12 + $0x3c0] ss:$28 sps:$4 sm:$0xff]   ;;  %v11250_v33 = vld [vmem:[%s14540_s12 + $0x3f8] ss:$28 sps:$4 sm:$0xff]  }
 0x722   :  { %v6428_v6 = vmul.f32 %v11583_v49, %v6427_v45  ;;  %v11249_v49 = vld [vmem:[%s14540_s12 + $0x3f4] ss:$28 sps:$4 sm:$0xff]   ;;  %v11252_v57 = vld [vmem:[%s14540_s12 + $0x3fc] ss:$28 sps:$4 sm:$0xff]   ;;  %v11255_v36 = vld [vmem:[%s14540_s12 + $0x42c] ss:$28 sps:$4 sm:$0xff]  }
 0x723   :  { %v13851_v29 = vadd.f32 %v13790_v63, %v4998_v0  ;;  %v11258_v63 = vld [vmem:[%s14540_s12 + $0x434] ss:$28 sps:$4 sm:$0xff]   ;;  %v11253_v30 = vld [vmem:[%s14540_s12 + $0x428] ss:$28 sps:$4 sm:$0xff]   ;;  %v11267_v45 = vld [vmem:[%s14540_s12 + $0x49c] ss:$28 sps:$4 sm:$0xff]  }
 0x724   :  { %v11256_v37 = vld [vmem:[%s14540_s12 + $0x430] ss:$28 sps:$4 sm:$0xff]   ;;  %v11261_v18 = vld [vmem:[%s14540_s12 + $0x464] ss:$28 sps:$4 sm:$0xff]   ;;  %v11265_v50 = vld [vmem:[%s14540_s12 + $0x498] ss:$28 sps:$4 sm:$0xff]  }
 0x725   :  { %v6378_v35 = vand.u32 2147483647, %v13851_v29  ;;  %v11306_v0 = vld [vmem:[%s14540_s12 + $0x5f4] ss:$28 sps:$4 sm:$0xff]  }
 0x727   :  { %v6383_v38 = vsub.f32 0.0, %v6378_v35  ;;  %v11315_v35 = vld [vmem:[%s14540_s12 + $0x65c] ss:$28 sps:$4 sm:$0xff]  }
 0x728   :  { %v11585_v46 = vpop.eup %11584  ;;  %v9922_v40 = vpop.f32.mrb[44].mxu1 }
 0x729   :  { %v6398_v39 = vmul.f32 0.6931472, %v11585_v46  ;;  %v9944_v47 = vpop.f32.mrb[36].mxu0  ;;  %v9923_v48 = vpop.f32.mrb[45].mxu1  ;;  %v11264_v46 = vld [vmem:[%s14540_s12 + $0x46c] ss:$28 sps:$4 sm:$0xff]  }
 0x72a   :  { %v11587_v14 = vpop.eup %11586  ;;  %v9924_v52 = vadd.f32 %v9923_v48, %v9922_v40  ;;  %v9945_v54 = vpop.f32.mrb[37].mxu0  ;;  %v6390_v26 = vmul.f32 1.442695, %v6383_v38  ;;  %v11316_v38 = vld [vmem:[%s14540_s12 + $0x660] ss:$28 sps:$4 sm:$0xff]  }
 0x72b   :  { %v9925_v55 = vpop.f32.mrb[46].mxu1  ;;  %v6404_v56 = vsel %vm13804_vm6, %v6401_v44, %v6398_v39  ;;  %v6407_v24 = vmul.f32 0.6931472, %v11587_v14  ;;  %v9946_v5 = vadd.f32 %v9945_v54, %v9944_v47  ;;  %v9947_v31 = vpop.f32.mrb[38].mxu0  ;;  %v11270_v47 = vld [vmem:[%s14540_s12 + $0x4a4] ss:$28 sps:$4 sm:$0xff]  }
 0x72c   :  { %v9926_v9 = vpop.f32.mrb[47].mxu1  ;;  %v11589_v27 = vpop.eup %11588  ;;  %v6286_v1 = vadd.f32 %v9924_v52, %v5006_v41  ;;  %v6441_v62 = vadd.f32 %v6404_v56, %v6371_v42  ;;  %v11259_v41 = vld [vmem:[%s14540_s12 + $0x460] ss:$28 sps:$4 sm:$0xff]   ;;  %v11262_v42 = vld [vmem:[%s14540_s12 + $0x468] ss:$28 sps:$4 sm:$0xff]   ;;  %11590 = vpow2.f32 %v6390_v26 }
 0x72d   :  { %v9948_v58 = vpop.f32.mrb[39].mxu0  ;;  %v6413_v3 = vsel %vm6412_vm9, %v6410_v60, %v6407_v24  ;;  %v6425_v4 = vmul.f32 0.6931472, %v11589_v27  ;;  %v11268_v52 = vld [vmem:[%s14540_s12 + $0x4a0] ss:$28 sps:$4 sm:$0xff]  }
 0x72e   :  { %v6442_v61 = vadd.f32 %v6413_v3, %v6372_v15  ;;  %v6326_v8 = vadd.f32 %v9946_v5, %v6286_v1  ;;  %v13820_v13 = vpack.c.bf16 %v6441_v62, %v6441_v62  ;;  %v11273_v54 = vld [vmem:[%s14540_s12 + $0x4d4] ss:$28 sps:$4 sm:$0xff]   ;;  %v11276_v55 = vld [vmem:[%s14540_s12 + $0x4dc] ss:$28 sps:$4 sm:$0xff]   ;;  %v11279_v60 = vld [vmem:[%s14540_s12 + $0x50c] ss:$28 sps:$4 sm:$0xff]  }
 0x72f   :  { %v6431_v10 = vsel %vm6430_vm10, %v6428_v6, %v6425_v4  ;;  %v11271_v56 = vld [vmem:[%s14540_s12 + $0x4d0] ss:$28 sps:$4 sm:$0xff]   ;;  %v11274_v24 = vld [vmem:[%s14540_s12 + $0x4d8] ss:$28 sps:$4 sm:$0xff]   ;;  %v11277_v31 = vld [vmem:[%s14540_s12 + $0x508] ss:$28 sps:$4 sm:$0xff]  }
 0x730   :  { %v13812_v11 = vpack.c.bf16 %v6442_v61, %v6442_v61  ;;  %v6444_v20 = vadd.f32 %v6431_v10, %v6374_v7  ;;  %v11282_v5 = vld [vmem:[%s14540_s12 + $0x514] ss:$28 sps:$4 sm:$0xff]   ;;  %v11285_v27 = vld [vmem:[%s14540_s12 + $0x544] ss:$28 sps:$4 sm:$0xff]   ;;  %v11288_v15 = vld [vmem:[%s14540_s12 + $0x54c] ss:$28 sps:$4 sm:$0xff]  }
 0x731   :  { %v11280_v9 = vld [vmem:[%s14540_s12 + $0x510] ss:$28 sps:$4 sm:$0xff]   ;;  %v11283_v1 = vld [vmem:[%s14540_s12 + $0x540] ss:$28 sps:$4 sm:$0xff]   ;;  %v11286_v58 = vld [vmem:[%s14540_s12 + $0x548] ss:$28 sps:$4 sm:$0xff]  }
 0x732   :  { %8194 = vmatprep.mubr.bf16.mxu0 %v13812_v11  ;;  %8317 = vmatprep.mubr.bf16.mxu1 %v13812_v11  ;;  %v13830_v23 = vpack.c.bf16 %v6444_v20, %v6444_v20  ;;  %v11291_v62 = vld [vmem:[%s14540_s12 + $0x57c] ss:$28 sps:$4 sm:$0xff]   ;;  %v11294_v3 = vld [vmem:[%s14540_s12 + $0x584] ss:$28 sps:$4 sm:$0xff]   ;;  %v11297_v10 = vld [vmem:[%s14540_s12 + $0x5b4] ss:$28 sps:$4 sm:$0xff]  }
 0x733   :  { %8195 = vmatmul.mubr.bf16.vlgmr.msra.gmra.mrb[40].mxu0 %v13820_v13  ;;  %8318 = vmatmul.mubr.bf16.vlgmr.msra.gmra.mrb[52].mxu1 %v13820_v13  ;;  %v11289_v61 = vld [vmem:[%s14540_s12 + $0x578] ss:$28 sps:$4 sm:$0xff]   ;;  %v11292_v7 = vld [vmem:[%s14540_s12 + $0x580] ss:$28 sps:$4 sm:$0xff]  }
 0x734   :  { %8204 = vmatpush1.bf16.msra.mxu0 %v11235_v2  ;;  %8327 = vmatpush1.bf16.msra.mxu1 %v11238_v21  ;;  %v11300_v20 = vld [vmem:[%s14540_s12 + $0x5bc] ss:$28 sps:$4 sm:$0xff]   ;;  %v11295_v21 = vld [vmem:[%s14540_s12 + $0x5b0] ss:$28 sps:$4 sm:$0xff]  }
 0x735   :  { %8235 = vmatprep.mubr.bf16.mxu0 %v13830_v23  ;;  %8358 = vmatprep.mubr.bf16.mxu1 %v13830_v23  ;;  %v11330_v26 = vld [vmem:[%s14540_s12 + $0x6d4] ss:$28 sps:$4 sm:$0xff]  }
 0x736   :  { %8205 = vmatprep.subr.bf16.mxu0 %v11243_v53  ;;  %8328 = vmatprep.subr.bf16.mxu1 %v11246_v34  ;;  %v11591_v4 = vpop.eup %11590  ;;  %v11298_v53 = vld [vmem:[%s14540_s12 + $0x5b8] ss:$28 sps:$4 sm:$0xff]   ;;  %v11303_v34 = vld [vmem:[%s14540_s12 + $0x5ec] ss:$28 sps:$4 sm:$0xff]  }
 0x738   :  { %8206 = vmatpush1.bf16.msra.mxu0 %v11241_v43  ;;  %8329 = vmatpush1.bf16.msra.mxu1 %v11244_v25  ;;  %v11301_v25 = vld [vmem:[%s14540_s12 + $0x5e8] ss:$28 sps:$4 sm:$0xff]  }
 0x739   :  { %8207 = vmatprep.subr.bf16.mxu0 %v11249_v49  ;;  %8330 = vmatprep.subr.bf16.mxu1 %v11252_v57  ;;  %v11304_v49 = vld [vmem:[%s14540_s12 + $0x5f0] ss:$28 sps:$4 sm:$0xff]   ;;  %v11309_v57 = vld [vmem:[%s14540_s12 + $0x624] ss:$28 sps:$4 sm:$0xff]  }
 0x73c   :  { %8208 = vmatpush1.bf16.msra.mxu0 %v11247_v32  ;;  %8331 = vmatpush1.bf16.msra.mxu1 %v11250_v33  ;;  %v11312_v32 = vld [vmem:[%s14540_s12 + $0x62c] ss:$28 sps:$4 sm:$0xff]   ;;  %v6417_v33 = vmul.f32 -0.5, %v11591_v4 }
 0x73d   :  { %8209 = vmatprep.subr.bf16.mxu0 %v11255_v36  ;;  %8332 = vmatprep.subr.bf16.mxu1 %v11258_v63  ;;  %v11307_v36 = vld [vmem:[%s14540_s12 + $0x620] ss:$28 sps:$4 sm:$0xff]   ;;  %v11310_v63 = vld [vmem:[%s14540_s12 + $0x628] ss:$28 sps:$4 sm:$0xff]  }
 0x740   :  { %8210 = vmatpush1.bf16.msra.mxu0 %v11253_v30  ;;  %8333 = vmatpush1.bf16.msra.mxu1 %v11256_v37  ;;  %v6365_v40 = vpop.f32.mrb[48].mxu1  ;;  %v11318_v30 = vld [vmem:[%s14540_s12 + $0x664] ss:$28 sps:$4 sm:$0xff]  }
 0x741   :  { %v13884_v39 = vadd.f32 %v6365_v40, %v6326_v8  ;;  %v10072_v44 = vpop.f32.mrb[49].mxu1  ;;  %8211 = vmatprep.subr.bf16.mxu0 %v11261_v18  ;;  %8334 = vmatprep.subr.bf16.mxu1 %v11264_v46  ;;  %v6414_v8 = vadd.f32 1.0, %v11591_v4  ;;  %v6418_v18 = vadd.f32 1.0, %v6417_v33  ;;  %v11313_v46 = vld [vmem:[%s14540_s12 + $0x658] ss:$28 sps:$4 sm:$0xff]  }
 0x742   :  { %v6368_v48 = vpop.f32.mrb[50].mxu1  ;;  %v6420_v40 = vand.u32 2147483647, %v11591_v4  ;;  %v11355_v33 = vld [vmem:[%s14540_s12 + $0x7e0] ss:$28 sps:$4 sm:$0xff]  }
 0x743   :  { %v10073_v14 = vpop.f32.mrb[51].mxu1  ;;  %v6380_v6 = vand.u32 2147483647, %v13884_v39  ;;  %11592 = vlog2.f32 %v6414_v8  ;;  %v11322_v48 = vld [vmem:[%s14540_s12 + $0x698] ss:$28 sps:$4 sm:$0xff]  }
 0x744   :  { %8212 = vmatpush1.bf16.msra.mxu0 %v11259_v41  ;;  %8335 = vmatpush1.bf16.msra.mxu1 %v11262_v42  ;;  %v11321_v41 = vld [vmem:[%s14540_s12 + $0x694] ss:$28 sps:$4 sm:$0xff]   ;;  %v11324_v42 = vld [vmem:[%s14540_s12 + $0x69c] ss:$28 sps:$4 sm:$0xff]   ;;  %vm6421_vm11 = vcmp.lt.f32.partialorder %v6420_v40, 0.0004427343 }
 0x745   :  { %8213 = vmatprep.subr.bf16.mxu0 %v11267_v45  ;;  %8336 = vmatprep.subr.bf16.mxu1 %v11270_v47  ;;  %v6385_v2 = vsub.f32 0.0, %v6380_v6  ;;  %v6419_v45 = vmul.f32 %v11591_v4, %v6418_v18  ;;  %v11319_v47 = vld [vmem:[%s14540_s12 + $0x690] ss:$28 sps:$4 sm:$0xff]   ;;  %v11348_v4 = vld [vmem:[%s14540_s12 + $0x77c] ss:$28 sps:$4 sm:$0xff]  }
 0x746   :  { %v11327_v14 = vld [vmem:[%s14540_s12 + $0x6cc] ss:$28 sps:$4 sm:$0xff]  }
 0x747   :  { %v6394_v43 = vmul.f32 1.442695, %v6385_v2  ;;  %v11351_v8 = vld [vmem:[%s14540_s12 + $0x7ac] ss:$28 sps:$4 sm:$0xff]  }
 0x748   :  { %8214 = vmatpush1.bf16.msra.mxu0 %v11265_v50  ;;  %8337 = vmatpush1.bf16.msra.mxu1 %v11268_v52  ;;  %v11349_v2 = vld [vmem:[%s14540_s12 + $0x7a8] ss:$28 sps:$4 sm:$0xff]  }
 0x749   :  { %8215 = vmatprep.subr.bf16.mxu0 %v11273_v54  ;;  %8338 = vmatprep.subr.bf16.mxu1 %v11276_v55  ;;  %11594 = vpow2.f32 %v6394_v43  ;;  %v6373_v54 = vmax.f32 %v13851_v29, 0.0  ;;  %v11325_v55 = vld [vmem:[%s14540_s12 + $0x6c8] ss:$28 sps:$4 sm:$0xff]  }
 0x74a   :  { %v11336_v29 = vld [vmem:[%s14540_s12 + $0x70c] ss:$28 sps:$4 sm:$0xff]  }
 0x74b   :  { %v11360_v43 = vld [vmem:[%s14540_s12 + $0x7ec] ss:$28 sps:$4 sm:$0xff]  }
 0x74c   :  { %8216 = vmatpush1.bf16.msra.mxu0 %v11271_v56  ;;  %8339 = vmatpush1.bf16.msra.mxu1 %v11274_v24  ;;  %v11328_v56 = vld [vmem:[%s14540_s12 + $0x6d0] ss:$28 sps:$4 sm:$0xff]  }
 0x74d   :  { %8217 = vmatprep.subr.bf16.mxu0 %v11279_v60  ;;  %8340 = vmatprep.subr.bf16.mxu1 %v11282_v5  ;;  %v11593_v37 = vpop.eup %11592  ;;  %v11333_v5 = vld [vmem:[%s14540_s12 + $0x704] ss:$28 sps:$4 sm:$0xff]  }
 0x74e   :  { %v6416_v44 = vmul.f32 0.6931472, %v11593_v37 }
 0x750   :  { %8218 = vmatpush1.bf16.msra.mxu0 %v11277_v31  ;;  %8341 = vmatpush1.bf16.msra.mxu1 %v11280_v9  ;;  %v6422_v52 = vsel %vm6421_vm11, %v6419_v45, %v6416_v44  ;;  %v11331_v31 = vld [vmem:[%s14540_s12 + $0x700] ss:$28 sps:$4 sm:$0xff]   ;;  %v11334_v9 = vld [vmem:[%s14540_s12 + $0x708] ss:$28 sps:$4 sm:$0xff]   ;;  %v11368_v44 = vld [vmem:[%s14540_s12 + $0x1d8] ss:$28 sps:$4 sm:$0xff]  }
 0x751   :  { %8219 = vmatprep.subr.bf16.mxu0 %v11285_v27  ;;  %8342 = vmatprep.subr.bf16.mxu1 %v11288_v15  ;;  %v6443_v24 = vadd.f32 %v6422_v52, %v6373_v54  ;;  %v11339_v15 = vld [vmem:[%s14540_s12 + $0x73c] ss:$28 sps:$4 sm:$0xff]   ;;  %v11377_v52 = vld [vmem:[%s14540_s12 + $0x84] ss:$28 sps:$4 sm:$0xff]  }
 0x752   :  { %v11378_v54 = vld [vmem:[%s14540_s12 + $0x248] ss:$28 sps:$4 sm:$0xff]  }
 0x753   :  { %v14013_v50 = vpop.eup %11594  ;;  %v14035_v27 = vpack.c.bf16 %v6443_v24, %v6443_v24  ;;  %v11383_v24 = vld [vmem:[%s14540_s12 + $0x280] ss:$28 sps:$4 sm:$0xff]  }
 0x754   :  { %8220 = vmatpush1.bf16.msra.mxu0 %v11283_v1  ;;  %8343 = vmatpush1.bf16.msra.mxu1 %v11286_v58  ;;  %v6432_v60 = vadd.f32 1.0, %v14013_v50  ;;  %v11342_v1 = vld [vmem:[%s14540_s12 + $0x744] ss:$28 sps:$4 sm:$0xff]   ;;  %v11337_v58 = vld [vmem:[%s14540_s12 + $0x738] ss:$28 sps:$4 sm:$0xff]   ;;  %v6435_v6 = vmul.f32 -0.5, %v14013_v50 }
 0x755   :  { %8221 = vmatprep.subr.bf16.mxu0 %v11291_v62  ;;  %8344 = vmatprep.subr.bf16.mxu1 %v11294_v3  ;;  %v11340_v62 = vld [vmem:[%s14540_s12 + $0x740] ss:$28 sps:$4 sm:$0xff]   ;;  %v11345_v3 = vld [vmem:[%s14540_s12 + $0x774] ss:$28 sps:$4 sm:$0xff]  }
 0x756   :  { %11596 = vlog2.f32 %v6432_v60  ;;  %v11380_v60 = vld [vmem:[%s14540_s12 + $0xb8] ss:$28 sps:$4 sm:$0xff]  }
 0x758   :  { %8222 = vmatpush1.bf16.msra.mxu0 %v11289_v61  ;;  %8345 = vmatpush1.bf16.msra.mxu1 %v11292_v7  ;;  %v11343_v61 = vld [vmem:[%s14540_s12 + $0x770] ss:$28 sps:$4 sm:$0xff]   ;;  %v11346_v7 = vld [vmem:[%s14540_s12 + $0x778] ss:$28 sps:$4 sm:$0xff]  }
 0x759   :  { %8223 = vmatprep.subr.bf16.mxu0 %v11297_v10  ;;  %8346 = vmatprep.subr.bf16.mxu1 %v11300_v20  ;;  %v11354_v10 = vld [vmem:[%s14540_s12 + $0x7b4] ss:$28 sps:$4 sm:$0xff]  }
 0x75c   :  { %8224 = vmatpush1.bf16.msra.mxu0 %v11295_v21  ;;  %8347 = vmatpush1.bf16.msra.mxu1 %v11298_v53  ;;  %v6436_v21 = vadd.f32 1.0, %v6435_v6  ;;  %v11352_v53 = vld [vmem:[%s14540_s12 + $0x7b0] ss:$28 sps:$4 sm:$0xff]   ;;  %v11398_v6 = vld [vmem:[%s14540_s12 + $0x328] ss:$28 sps:$4 sm:$0xff]  }
 0x75d   :  { %8225 = vmatprep.subr.bf16.mxu0 %v11303_v34  ;;  %8348 = vmatprep.subr.bf16.mxu1 %v11306_v0  ;;  %v11357_v34 = vld [vmem:[%s14540_s12 + $0x7e4] ss:$28 sps:$4 sm:$0xff]   ;;  %v6438_v0 = vand.u32 2147483647, %v14013_v50 }
 0x75f   :  { %vm6439_vm12 = vcmp.lt.f32.partialorder %v6438_v0, 0.0004427343  ;;  %v11409_v0 = vld [vmem:[%s14540_s12 + $0x398] ss:$28 sps:$4 sm:$0xff]  }
 0x760   :  { %8226 = vmatpush1.bf16.msra.mxu0 %v11301_v25  ;;  %8349 = vmatpush1.bf16.msra.mxu1 %v11304_v49  ;;  %v11597_v20 = vpop.eup %11596  ;;  %v6747_v25 = vld [vmem:[%s14540_s12 + $0x818] sm:$0xff] }
 0x761   :  { %8227 = vmatprep.subr.bf16.mxu0 %v11309_v57  ;;  %8350 = vmatprep.subr.bf16.mxu1 %v11312_v32  ;;  %v6434_v49 = vmul.f32 0.6931472, %v11597_v20  ;;  %v6748_v57 = vld [vmem:[%s14540_s12 + $0x820] sm:$0xff]  ;;  %v6437_v32 = vmul.f32 %v14013_v50, %v6436_v21  ;;  %v11374_v50 = vld [vmem:[%s14540_s12 + $0x50] ss:$28 sps:$4 sm:$0xff]  }
 0x762   :  { %v9719_v37 = vcombine.low %v6748_v57, %v6748_v57  ;;  %v11400_v20 = vld [vmem:[%s14540_s12 + $0x198] ss:$28 sps:$4 sm:$0xff]  }
 0x763   :  { %v6440_v18 = vsel %vm6439_vm12, %v6437_v32, %v6434_v49  ;;  %v11407_v21 = vld [vmem:[%s14540_s12 + $0x1d4] ss:$28 sps:$4 sm:$0xff]   ;;  %v11410_v49 = vld [vmem:[%s14540_s12 + $0x208] ss:$28 sps:$4 sm:$0xff]  }
 0x764   :  { %8228 = vmatpush1.bf16.msra.mxu0 %v11307_v36  ;;  %8351 = vmatpush1.bf16.msra.mxu1 %v11310_v63  ;;  %v11358_v36 = vld [vmem:[%s14540_s12 + $0x7e8] ss:$28 sps:$4 sm:$0xff]   ;;  %v9718_v63 = vcombine.high %v6747_v25, %v6747_v25 }
 0x765   :  { %8229 = vmatprep.subr.bf16.mxu0 %v11315_v35  ;;  %8352 = vmatprep.subr.bf16.mxu1 %v11318_v30  ;;  %v9720_v35 = vcombine.high %v6748_v57, %v6748_v57  ;;  %v9717_v30 = vcombine.low %v6747_v25, %v6747_v25  ;;  %v11413_v25 = vld [vmem:[%s14540_s12 + $0x590] ss:$28 sps:$4 sm:$0xff]   ;;  %v11417_v32 = vld [vmem:[%s14540_s12 + $0x244] ss:$28 sps:$4 sm:$0xff]  }
 0x766   :  { %v11414_v57 = vld [vmem:[%s14540_s12 + $0x3d0] ss:$28 sps:$4 sm:$0xff]  }
 0x767   :  { %v8142_v40 = vsel %vm3492_vm7, %v9717_v30, 0  ;;  %v11423_v30 = vld [vmem:[%s14540_s12 + $0x600] ss:$28 sps:$4 sm:$0xff]  }
 0x768   :  { %8230 = vmatpush1.bf16.msra.mxu0 %v11313_v46  ;;  %8353 = vmatpush1.bf16.msra.mxu1 %v11316_v38  ;;  %v6375_v46 = vmax.f32 %v13884_v39, 0.0  ;;  %v11365_v39 = vld [vmem:[%s14540_s12 + $0x10] ss:$28 sps:$4 sm:$0xff]  }
 0x769   :  { %8231 = vmatprep.subr.bf16.mxu0 %v11321_v41  ;;  %8354 = vmatprep.subr.bf16.mxu1 %v11324_v42  ;;  %v8148_v41 = vsel %vm3492_vm7, %v9719_v37, 0  ;;  %v11367_v42 = vld [vmem:[%s14540_s12 + $0x14] ss:$28 sps:$4 sm:$0xff]  }
 0x76a   :  { %v6445_v38 = vadd.f32 %v6440_v18, %v6375_v46  ;;  %v11420_v37 = vld [vmem:[%s14540_s12 + $0x278] ss:$28 sps:$4 sm:$0xff]   ;;  %v11424_v18 = vld [vmem:[%s14540_s12 + $0x440] ss:$28 sps:$4 sm:$0xff]  }
 0x76b   :  { %v11427_v46 = vld [vmem:[%s14540_s12 + $0x2b4] ss:$28 sps:$4 sm:$0xff]  }
 0x76c   :  { %8232 = vmatpush1.bf16.msra.mxu0 %v11319_v47  ;;  %8355 = vmatpush1.bf16.msra.mxu1 %v11322_v48  ;;  %v14112_v45 = vpack.c.bf16 %v6445_v38, %v6445_v38  ;;  %v11369_v47 = vld [vmem:[%s14540_s12 + $0x18] ss:$28 sps:$4 sm:$0xff]   ;;  %v11372_v48 = vld [vmem:[%s14540_s12 + $0x4c] ss:$28 sps:$4 sm:$0xff]  }
 0x76d   :  { %8233 = vmatprep.subr.bf16.mxu0 %v11327_v14  ;;  %8356 = vmatprep.subr.bf16.mxu1 %v11330_v26  ;;  %v11373_v14 = vld [vmem:[%s14540_s12 + $0x210] ss:$28 sps:$4 sm:$0xff]   ;;  %v11370_v26 = vld [vmem:[%s14540_s12 + $0x48] ss:$28 sps:$4 sm:$0xff]   ;;  %v11428_v38 = vld [vmem:[%s14540_s12 + $0x638] ss:$28 sps:$4 sm:$0xff]  }
 0x770   :  { %8234 = vmatpush1.bf16.msra.mxu0 %v11325_v55  ;;  %8357 = vmatpush1.bf16.msra.mxu1 %v11328_v56  ;;  %v11375_v55 = vld [vmem:[%s14540_s12 + $0x80] ss:$28 sps:$4 sm:$0xff]  }
 0x771   :  { %8244 = vmatprep.subr.bf16.mxu0 %v11333_v5  ;;  %8367 = vmatprep.subr.bf16.mxu1 %v11336_v29  ;;  %v11382_v56 = vld [vmem:[%s14540_s12 + $0xbc] ss:$28 sps:$4 sm:$0xff]   ;;  %v11387_v29 = vld [vmem:[%s14540_s12 + $0xf4] ss:$28 sps:$4 sm:$0xff]  }
 0x772   :  { %v11384_v5 = vld [vmem:[%s14540_s12 + $0xc0] ss:$28 sps:$4 sm:$0xff]  }
 0x773   :  { %8236 = vmatmul.mubr.bf16.vlgmr.msra.gmra.mrb[40].mxu0 %v14035_v27  ;;  %8359 = vmatmul.mubr.bf16.vlgmr.msra.gmra.mrb[52].mxu1 %v14035_v27 }
 0x774   :  { %8245 = vmatpush1.bf16.msra.mxu0 %v11331_v31  ;;  %8368 = vmatpush1.bf16.msra.mxu1 %v11334_v9  ;;  %v11388_v31 = vld [vmem:[%s14540_s12 + $0x2b8] ss:$28 sps:$4 sm:$0xff]   ;;  %v11385_v9 = vld [vmem:[%s14540_s12 + $0xf0] ss:$28 sps:$4 sm:$0xff]  }
 0x775   :  { %8246 = vmatprep.subr.bf16.mxu0 %v11339_v15  ;;  %8369 = vmatprep.subr.bf16.mxu1 %v11342_v1  ;;  %v11389_v15 = vld [vmem:[%s14540_s12 + $0xf8] ss:$28 sps:$4 sm:$0xff]   ;;  %v11392_v1 = vld [vmem:[%s14540_s12 + $0x12c] ss:$28 sps:$4 sm:$0xff]  }
 0x776   :  { %8276 = vmatprep.mubr.bf16.mxu0 %v11701_v22  ;;  %8399 = vmatprep.mubr.bf16.mxu1 %v11701_v22 }
 0x778   :  { %8247 = vmatpush1.bf16.msra.mxu0 %v11337_v58  ;;  %8370 = vmatpush1.bf16.msra.mxu1 %v11340_v62  ;;  %v11393_v58 = vld [vmem:[%s14540_s12 + $0x2f0] ss:$28 sps:$4 sm:$0xff]   ;;  %v11390_v62 = vld [vmem:[%s14540_s12 + $0x128] ss:$28 sps:$4 sm:$0xff]  }
 0x779   :  { %8248 = vmatprep.subr.bf16.mxu0 %v11345_v3  ;;  %8371 = vmatprep.subr.bf16.mxu1 %v11348_v4  ;;  %v11394_v3 = vld [vmem:[%s14540_s12 + $0x130] ss:$28 sps:$4 sm:$0xff]   ;;  %v11397_v4 = vld [vmem:[%s14540_s12 + $0x164] ss:$28 sps:$4 sm:$0xff]  }
 0x77c   :  { %8249 = vmatpush1.bf16.msra.mxu0 %v11343_v61  ;;  %8372 = vmatpush1.bf16.msra.mxu1 %v11346_v7  ;;  %v11395_v61 = vld [vmem:[%s14540_s12 + $0x160] ss:$28 sps:$4 sm:$0xff]   ;;  %v11399_v7 = vld [vmem:[%s14540_s12 + $0x168] ss:$28 sps:$4 sm:$0xff]  }
 0x77d   :  { %8250 = vmatprep.subr.bf16.mxu0 %v11351_v8  ;;  %8373 = vmatprep.subr.bf16.mxu1 %v11354_v10  ;;  %v11402_v8 = vld [vmem:[%s14540_s12 + $0x19c] ss:$28 sps:$4 sm:$0xff]  }
 0x77e   :  { %v11403_v10 = vld [vmem:[%s14540_s12 + $0x360] ss:$28 sps:$4 sm:$0xff]  }
 0x780   :  { %8251 = vmatpush1.bf16.msra.mxu0 %v11349_v2  ;;  %8374 = vmatpush1.bf16.msra.mxu1 %v11352_v53  ;;  %v11404_v2 = vld [vmem:[%s14540_s12 + $0x1a0] ss:$28 sps:$4 sm:$0xff]   ;;  %v11408_v53 = vld [vmem:[%s14540_s12 + $0x558] ss:$28 sps:$4 sm:$0xff]  }
 0x781   :  { %8252 = vmatprep.subr.bf16.mxu0 %v11357_v34  ;;  %8375 = vmatprep.subr.bf16.mxu1 %v11360_v43  ;;  %v11405_v34 = vld [vmem:[%s14540_s12 + $0x1d0] ss:$28 sps:$4 sm:$0xff]  }
 0x782   :  { %v11412_v43 = vld [vmem:[%s14540_s12 + $0x20c] ss:$28 sps:$4 sm:$0xff]  }
 0x784   :  { %8253 = vmatpush1.bf16.msra.mxu0 %v11355_v33  ;;  %8376 = vmatpush1.bf16.msra.mxu1 %v11358_v36  ;;  %v11418_v33 = vld [vmem:[%s14540_s12 + $0x5c8] ss:$28 sps:$4 sm:$0xff]   ;;  %v11415_v36 = vld [vmem:[%s14540_s12 + $0x240] ss:$28 sps:$4 sm:$0xff]  }
 0x785   :  { %9724 = vmatprep.subr.msk.bf16.mxu0 %vm3492_vm7, %v9718_v63  ;;  %9726 = vmatprep.subr.msk.bf16.mxu1 %vm3492_vm7, %v9720_v35  ;;  %v11419_v63 = vld [vmem:[%s14540_s12 + $0x408] ss:$28 sps:$4 sm:$0xff]   ;;  %v11422_v35 = vld [vmem:[%s14540_s12 + $0x27c] ss:$28 sps:$4 sm:$0xff]  }
 0x788   :  { %8255 = vmatpush1.bf16.msra.mxu0 %v8142_v40  ;;  %8378 = vmatpush1.bf16.msra.mxu1 %v8148_v41  ;;  %v11425_v40 = vld [vmem:[%s14540_s12 + $0x2b0] ss:$28 sps:$4 sm:$0xff]   ;;  %v11429_v41 = vld [vmem:[%s14540_s12 + $0x478] ss:$28 sps:$4 sm:$0xff]  }
 0x789   :  { %8408 = vmatprep.subr.bf16.mxu0 %v11367_v42  ;;  %9957 = vmatprep.subr.bf16.mxu1 %v11368_v44  ;;  %v11432_v42 = vld [vmem:[%s14540_s12 + $0x2ec] ss:$28 sps:$4 sm:$0xff]  }
 0x78a   :  { %v11433_v44 = vld [vmem:[%s14540_s12 + $0x670] ss:$28 sps:$4 sm:$0xff]  }
 0x78b   :  { %9725 = vmatmul.mubr.msk.bf16.vlgmr.msra.gmra.mrb[40].mxu0 %vm3488_vm8, %v14112_v45  ;;  %9727 = vmatmul.mubr.msk.bf16.vlgmr.msra.gmra.mrb[52].mxu1 %vm3488_vm8, %v14112_v45 }
 0x78c   :  { %8409 = vmatpush1.bf16.msra.mxu0 %v11365_v39  ;;  %8440 = vmatprep.mubr.bf16.mxu0 %v13812_v11  ;;  %v11430_v39 = vld [vmem:[%s14540_s12 + $0x2e8] ss:$28 sps:$4 sm:$0xff]  }
 0x78d   :  { %9958 = vmatpush3.bf16.msra.mxu1 %v11369_v47  ;;  %8563 = vmatprep.mubr.bf16.mxu1 %v13812_v11  ;;  %v11379_v11 = vld [vmem:[%s14540_s12 + $0x88] ss:$28 sps:$4 sm:$0xff]   ;;  %v11434_v47 = vld [vmem:[%s14540_s12 + $0x4b0] ss:$28 sps:$4 sm:$0xff]  }
 0x78e   :  { %8410 = vmatprep.subr.bf16.mxu0 %v11372_v48  ;;  %9959 = vmatprep.subr.bf16.mxu1 %v11373_v14  ;;  %v11437_v48 = vld [vmem:[%s14540_s12 + $0x324] ss:$28 sps:$4 sm:$0xff]  }
 0x78f   :  { %v11438_v14 = vld [vmem:[%s14540_s12 + $0x6a8] ss:$28 sps:$4 sm:$0xff]  }
 0x790   :  { %8411 = vmatpush1.bf16.msra.mxu0 %v11370_v26  ;;  %v11435_v26 = vld [vmem:[%s14540_s12 + $0x320] ss:$28 sps:$4 sm:$0xff]  }
 0x791   :  { %9960 = vmatpush3.bf16.msra.mxu1 %v11374_v50  ;;  %8412 = vmatprep.subr.bf16.mxu0 %v11377_v52  ;;  %v11439_v50 = vld [vmem:[%s14540_s12 + $0x4e8] ss:$28 sps:$4 sm:$0xff]   ;;  %v11442_v52 = vld [vmem:[%s14540_s12 + $0x35c] ss:$28 sps:$4 sm:$0xff]  }
 0x792   :  { %9961 = vmatprep.subr.bf16.mxu1 %v11378_v54  ;;  %v11443_v54 = vld [vmem:[%s14540_s12 + $0x6e0] ss:$28 sps:$4 sm:$0xff]  }
 0x794   :  { %8413 = vmatpush1.bf16.msra.mxu0 %v11375_v55  ;;  %v11440_v55 = vld [vmem:[%s14540_s12 + $0x358] ss:$28 sps:$4 sm:$0xff]  }
 0x795   :  { %9962 = vmatpush3.bf16.msra.mxu1 %v11379_v11  ;;  %8414 = vmatprep.subr.bf16.mxu0 %v11382_v56  ;;  %v11444_v11 = vld [vmem:[%s14540_s12 + $0x520] ss:$28 sps:$4 sm:$0xff]   ;;  %v11447_v56 = vld [vmem:[%s14540_s12 + $0x394] ss:$28 sps:$4 sm:$0xff]  }
 0x796   :  { %9963 = vmatprep.subr.bf16.mxu1 %v11383_v24  ;;  %v11445_v24 = vld [vmem:[%s14540_s12 + $0x390] ss:$28 sps:$4 sm:$0xff]  }
 0x798   :  { %8415 = vmatpush1.bf16.msra.mxu0 %v11380_v60  ;;  %v11448_v60 = vld [vmem:[%s14540_s12 + $0x718] ss:$28 sps:$4 sm:$0xff]  }
 0x799   :  { %9964 = vmatpush3.bf16.msra.mxu1 %v11384_v5  ;;  %8416 = vmatprep.subr.bf16.mxu0 %v11387_v29  ;;  %v11451_v5 = vld [vmem:[%s14540_s12 + $0x3cc] ss:$28 sps:$4 sm:$0xff]  }
 0x79a   :  { %9965 = vmatprep.subr.bf16.mxu1 %v11388_v31  ;;  %v11449_v29 = vld [vmem:[%s14540_s12 + $0x3c8] ss:$28 sps:$4 sm:$0xff]   ;;  %v11452_v31 = vld [vmem:[%s14540_s12 + $0x750] ss:$28 sps:$4 sm:$0xff]  }
 0x79c   :  { %8417 = vmatpush1.bf16.msra.mxu0 %v11385_v9  ;;  %v11455_v9 = vld [vmem:[%s14540_s12 + $0x404] ss:$28 sps:$4 sm:$0xff]  }
 0x79d   :  { %9966 = vmatpush3.bf16.msra.mxu1 %v11389_v15  ;;  %8418 = vmatprep.subr.bf16.mxu0 %v11392_v1  ;;  %v11459_v15 = vld [vmem:[%s14540_s12 + $0x43c] ss:$28 sps:$4 sm:$0xff]  }
 0x79e   :  { %9967 = vmatprep.subr.bf16.mxu1 %v11393_v58  ;;  %v11457_v1 = vld [vmem:[%s14540_s12 + $0x438] ss:$28 sps:$4 sm:$0xff]   ;;  %v11460_v58 = vld [vmem:[%s14540_s12 + $0x7c0] ss:$28 sps:$4 sm:$0xff]  }
 0x7a0   :  { %8419 = vmatpush1.bf16.msra.mxu0 %v11390_v62  ;;  %v11463_v62 = vld [vmem:[%s14540_s12 + $0x474] ss:$28 sps:$4 sm:$0xff]  }
 0x7a1   :  { %9968 = vmatpush3.bf16.msra.mxu1 %v11394_v3  ;;  %8420 = vmatprep.subr.bf16.mxu0 %v11397_v4  ;;  %v11461_v3 = vld [vmem:[%s14540_s12 + $0x470] ss:$28 sps:$4 sm:$0xff]   ;;  %v11464_v4 = vld [vmem:[%s14540_s12 + $0x7f8] ss:$28 sps:$4 sm:$0xff]  }
 0x7a2   :  { %9969 = vmatprep.subr.bf16.mxu1 %v11398_v6  ;;  %v11467_v6 = vld [vmem:[%s14540_s12 + $0x4ac] ss:$28 sps:$4 sm:$0xff]  }
 0x7a4   :  { %8421 = vmatpush1.bf16.msra.mxu0 %v11395_v61  ;;  %v11468_v61 = vld [vmem:[%s14540_s12 + $0x830] ss:$0 sps:$4 sm:$0xff]  }
 0x7a5   :  { %9970 = vmatpush3.bf16.msra.mxu1 %v11399_v7  ;;  %8422 = vmatprep.subr.bf16.mxu0 %v11402_v8  ;;  %v11465_v7 = vld [vmem:[%s14540_s12 + $0x4a8] ss:$28 sps:$4 sm:$0xff]  }
 0x7a6   :  { %9971 = vmatprep.subr.bf16.mxu1 %v11403_v10  ;;  %v11471_v8 = vld [vmem:[%s14540_s12 + $0x4e4] ss:$28 sps:$4 sm:$0xff]   ;;  %v8160_v10 = vsel %vm3492_vm7, %v11468_v61, 0 }
 0x7a8   :  { %8423 = vmatpush1.bf16.msra.mxu0 %v11400_v20  ;;  %v11469_v20 = vld [vmem:[%s14540_s12 + $0x4e0] ss:$28 sps:$4 sm:$0xff]  }
 0x7a9   :  { %9972 = vmatpush3.bf16.msra.mxu1 %v11404_v2  ;;  %8424 = vmatprep.subr.bf16.mxu0 %v11407_v21  ;;  %v11474_v2 = vld [vmem:[%s14540_s12 + $0x51c] ss:$28 sps:$4 sm:$0xff]   ;;  %v11477_v21 = vld [vmem:[%s14540_s12 + $0x554] ss:$28 sps:$4 sm:$0xff]  }
 0x7aa   :  { %9979 = vmatprep.subr.bf16.mxu1 %v11408_v53  ;;  %v11475_v53 = vld [vmem:[%s14540_s12 + $0x550] ss:$28 sps:$4 sm:$0xff]  }
 0x7ac   :  { %8564 = vmatmul.mubr.bf16.vlgmr.msra.gmra.mrb[56].mxu1 %v13820_v13  ;;  %8425 = vmatpush1.bf16.msra.mxu0 %v11405_v34  ;;  %v11480_v34 = vld [vmem:[%s14540_s12 + $0x58c] ss:$28 sps:$4 sm:$0xff]  }
 0x7ad   :  { %9980 = vmatpush3.bf16.msra.mxu1 %v11409_v0  ;;  %8603 = vmatprep.mubr.bf16.mxu1 %v13830_v23  ;;  %v11478_v0 = vld [vmem:[%s14540_s12 + $0x588] ss:$28 sps:$4 sm:$0xff]  }
 0x7ae   :  { %8426 = vmatprep.subr.bf16.mxu0 %v11412_v43  ;;  %9981 = vmatprep.subr.bf16.mxu1 %v11413_v25  ;;  %v11483_v43 = vld [vmem:[%s14540_s12 + $0x5c4] ss:$28 sps:$4 sm:$0xff]  }
 0x7af   :  { %v11481_v25 = vld [vmem:[%s14540_s12 + $0x5c0] ss:$28 sps:$4 sm:$0xff]  }
 0x7b0   :  { %8427 = vmatpush1.bf16.msra.mxu0 %v11410_v49  ;;  %v11486_v49 = vld [vmem:[%s14540_s12 + $0x5fc] ss:$28 sps:$4 sm:$0xff]  }
 0x7b1   :  { %9982 = vmatpush3.bf16.msra.mxu1 %v11414_v57  ;;  %8428 = vmatprep.subr.bf16.mxu0 %v11417_v32  ;;  %v11484_v57 = vld [vmem:[%s14540_s12 + $0x5f8] ss:$28 sps:$4 sm:$0xff]  }
 0x7b2   :  { %9983 = vmatprep.subr.bf16.mxu1 %v11418_v33  ;;  %v11489_v32 = vld [vmem:[%s14540_s12 + $0x634] ss:$28 sps:$4 sm:$0xff]  }
 0x7b3   :  { %v11487_v33 = vld [vmem:[%s14540_s12 + $0x630] ss:$28 sps:$4 sm:$0xff]  }
 0x7b4   :  { %8429 = vmatpush1.bf16.msra.mxu0 %v11415_v36  ;;  %v11492_v36 = vld [vmem:[%s14540_s12 + $0x66c] ss:$28 sps:$4 sm:$0xff]  }
 0x7b5   :  { %9984 = vmatpush3.bf16.msra.mxu1 %v11419_v63  ;;  %8430 = vmatprep.subr.bf16.mxu0 %v11422_v35  ;;  %v11490_v63 = vld [vmem:[%s14540_s12 + $0x668] ss:$28 sps:$4 sm:$0xff]  }
 0x7b6   :  { %9985 = vmatprep.subr.bf16.mxu1 %v11423_v30  ;;  %v11495_v35 = vld [vmem:[%s14540_s12 + $0x6a4] ss:$28 sps:$4 sm:$0xff]  }
 0x7b7   :  { %v11493_v30 = vld [vmem:[%s14540_s12 + $0x6a0] ss:$28 sps:$4 sm:$0xff]  }
 0x7b8   :  { %8431 = vmatpush1.bf16.msra.mxu0 %v11420_v37  ;;  %v11498_v37 = vld [vmem:[%s14540_s12 + $0x6dc] ss:$28 sps:$4 sm:$0xff]  }
 0x7b9   :  { %9986 = vmatpush3.bf16.msra.mxu1 %v11424_v18  ;;  %8432 = vmatprep.subr.bf16.mxu0 %v11427_v46  ;;  %v11496_v18 = vld [vmem:[%s14540_s12 + $0x6d8] ss:$28 sps:$4 sm:$0xff]  }
 0x7ba   :  { %9987 = vmatprep.subr.bf16.mxu1 %v11428_v38  ;;  %v11501_v46 = vld [vmem:[%s14540_s12 + $0x714] ss:$28 sps:$4 sm:$0xff]  }
 0x7bb   :  { %v11499_v38 = vld [vmem:[%s14540_s12 + $0x710] ss:$28 sps:$4 sm:$0xff]  }
 0x7bc   :  { %8433 = vmatpush1.bf16.msra.mxu0 %v11425_v40  ;;  %v11504_v40 = vld [vmem:[%s14540_s12 + $0x74c] ss:$28 sps:$4 sm:$0xff]  }
 0x7bd   :  { %9988 = vmatpush3.bf16.msra.mxu1 %v11429_v41  ;;  %8434 = vmatprep.subr.bf16.mxu0 %v11432_v42  ;;  %v11502_v41 = vld [vmem:[%s14540_s12 + $0x748] ss:$28 sps:$4 sm:$0xff]  }
 0x7be   :  { %9989 = vmatprep.subr.bf16.mxu1 %v11433_v44  ;;  %v11507_v42 = vld [vmem:[%s14540_s12 + $0x784] ss:$28 sps:$4 sm:$0xff]  }
 0x7bf   :  { %v11505_v44 = vld [vmem:[%s14540_s12 + $0x780] ss:$28 sps:$4 sm:$0xff]  }
 0x7c0   :  { %8435 = vmatpush1.bf16.msra.mxu0 %v11430_v39  ;;  %v11513_v39 = vld [vmem:[%s14540_s12 + $0x7f4] ss:$28 sps:$4 sm:$0xff]  }
 0x7c1   :  { %9990 = vmatpush3.bf16.msra.mxu1 %v11434_v47  ;;  %8436 = vmatprep.subr.bf16.mxu0 %v11437_v48  ;;  %v6749_v47 = vld [vmem:[%s14540_s12 + $0x828] sm:$0xff] }
 0x7c2   :  { %9991 = vmatprep.subr.bf16.mxu1 %v11438_v14  ;;  %v11511_v48 = vld [vmem:[%s14540_s12 + $0x7f0] ss:$28 sps:$4 sm:$0xff]   ;;  %v9722_v14 = vcombine.high %v6749_v47, %v6749_v47 }
 0x7c4   :  { %8437 = vmatpush1.bf16.msra.mxu0 %v11435_v26  ;;  %v9721_v26 = vcombine.low %v6749_v47, %v6749_v47 }
 0x7c5   :  { %9992 = vmatpush3.bf16.msra.mxu1 %v11439_v50  ;;  %8438 = vmatprep.subr.bf16.mxu0 %v11442_v52  ;;  %v14475_v52 = vld [vmem:[%s14541_s13] sm:$0x7f] }
 0x7c6   :  { %9993 = vmatprep.subr.bf16.mxu1 %v11443_v54  ;;  %v8154_v50 = vsel %vm3492_vm7, %v9721_v26, 0  ;;  %v6756_v54 = vrot.slane %v14475_v52, %v12807_v16 }
 0x7c8   :  { %8439 = vmatpush1.bf16.msra.mxu0 %v11440_v55  ;;  %v6764_v55 = vrot.slane %v14475_v52, %v12855_v28 }
 0x7c9   :  { %9994 = vmatpush3.bf16.msra.mxu1 %v11444_v11  ;;  %8449 = vmatprep.subr.bf16.mxu0 %v11447_v56  ;;  %v6760_v11 = vrot.slane %v14475_v52, %v12810_v17  ;;  %v6768_v56 = vrot.slane %v14475_v52, %v12813_v19 }
 0x7ca   :  { %10074 = vmatprep.subr.bf16.mxu1 %v11702_v59 }
 0x7cb   :  { %8441 = vmatmul.mubr.bf16.vlgmr.msra.gmra.mrb[44].mxu0 %v13820_v13  ;;  %v11453_v13 = vld [vmem:[%s14540_s12 + $0x400] ss:$28 sps:$4 sm:$0xff]  }
 0x7cc   :  { %8604 = vmatmul.mubr.bf16.vlgmr.msra.gmra.mrb[60].mxu1 %v14035_v27  ;;  %8450 = vmatpush1.bf16.msra.mxu0 %v11445_v24 }
 0x7cd   :  { %8481 = vmatprep.mubr.bf16.mxu0 %v13830_v23  ;;  %10075 = vmatpush3.bf16.msra.mxu1 %v11448_v60  ;;  %v11456_v23 = vld [vmem:[%s14540_s12 + $0x788] ss:$28 sps:$4 sm:$0xff]  }
 0x7ce   :  { %8451 = vmatprep.subr.bf16.mxu0 %v11451_v5  ;;  %10076 = vmatprep.subr.bf16.mxu1 %v11702_v59 }
 0x7cf   :  { %10086 = vmatprep.mubr.msk.bf16.mxu1 %vm11703_vm1, %v11702_v59 }
 0x7d0   :  { %8452 = vmatpush1.bf16.msra.mxu0 %v11449_v29 }
 0x7d1   :  { %10077 = vmatpush3.bf16.msra.mxu1 %v11452_v31  ;;  %8453 = vmatprep.subr.bf16.mxu0 %v11455_v9 }
 0x7d2   :  { %10078 = vmatprep.subr.bf16.mxu1 %v11702_v59 }
 0x7d4   :  { %8454 = vmatpush1.bf16.msra.mxu0 %v11453_v13 }
 0x7d5   :  { %10079 = vmatpush3.bf16.msra.mxu1 %v11456_v23  ;;  %8455 = vmatprep.subr.bf16.mxu0 %v11459_v15 }
 0x7d6   :  { %10080 = vmatprep.subr.bf16.mxu1 %v11702_v59 }
 0x7d8   :  { %8456 = vmatpush1.bf16.msra.mxu0 %v11457_v1 }
 0x7d9   :  { %10081 = vmatpush3.bf16.msra.mxu1 %v11460_v58  ;;  %8457 = vmatprep.subr.bf16.mxu0 %v11463_v62 }
 0x7da   :  { %10082 = vmatprep.subr.bf16.mxu1 %v11702_v59 }
 0x7dc   :  { %8458 = vmatpush1.bf16.msra.mxu0 %v11461_v3 }
 0x7dd   :  { %10083 = vmatpush3.bf16.msra.mxu1 %v11464_v4  ;;  %8459 = vmatprep.subr.bf16.mxu0 %v11467_v6 }
 0x7de   :  { %10084 = vmatprep.subr.bf16.mxu1 %v11702_v59  ;;  %v11472_v59 = vld [vmem:[%s14540_s12 + $0x518] ss:$28 sps:$4 sm:$0xff]  }
 0x7e0   :  { %8460 = vmatpush1.bf16.msra.mxu0 %v11465_v7 }
 0x7e1   :  { %10085 = vmatpush3.bf16.msra.mxu1 %v8160_v10  ;;  %8461 = vmatprep.subr.bf16.mxu0 %v11471_v8 }
 0x7e4   :  { %10087 = vmatmul.mubr.msk.bf16.vlgmr.msra.gmra.mrb[64].mxu1 %vm3488_vm8, %v14112_v45  ;;  %8462 = vmatpush1.bf16.msra.mxu0 %v11469_v20 }
 0x7e5   :  { %8463 = vmatprep.subr.bf16.mxu0 %v11474_v2 }
 0x7e8   :  { %8464 = vmatpush1.bf16.msra.mxu0 %v11472_v59 }
 0x7e9   :  { %8465 = vmatprep.subr.bf16.mxu0 %v11477_v21 }
 0x7ec   :  { %8466 = vmatpush1.bf16.msra.mxu0 %v11475_v53 }
 0x7ed   :  { %8467 = vmatprep.subr.bf16.mxu0 %v11480_v34 }
 0x7f0   :  { %8468 = vmatpush1.bf16.msra.mxu0 %v11478_v0 }
 0x7f1   :  { %8469 = vmatprep.subr.bf16.mxu0 %v11483_v43 }
 0x7f4   :  { %8470 = vmatpush1.bf16.msra.mxu0 %v11481_v25 }
 0x7f5   :  { %8471 = vmatprep.subr.bf16.mxu0 %v11486_v49 }
 0x7f8   :  { %8472 = vmatpush1.bf16.msra.mxu0 %v11484_v57 }
 0x7f9   :  { %8473 = vmatprep.subr.bf16.mxu0 %v11489_v32 }
 0x7fc   :  { %8474 = vmatpush1.bf16.msra.mxu0 %v11487_v33 }
 0x7fd   :  { %8475 = vmatprep.subr.bf16.mxu0 %v11492_v36 }
 0x800   :  { %8476 = vmatpush1.bf16.msra.mxu0 %v11490_v63 }
 0x801   :  { %8477 = vmatprep.subr.bf16.mxu0 %v11495_v35 }
 0x804   :  { %8478 = vmatpush1.bf16.msra.mxu0 %v11493_v30 }
 0x805   :  { %8479 = vmatprep.subr.bf16.mxu0 %v11498_v37 }
 0x808   :  { %8480 = vmatpush1.bf16.msra.mxu0 %v11496_v18 }
 0x809   :  { %8490 = vmatprep.subr.bf16.mxu0 %v11501_v46 }
 0x80b   :  { %8482 = vmatmul.mubr.bf16.vlgmr.msra.gmra.mrb[44].mxu0 %v14035_v27  ;;  %v11510_v27 = vld [vmem:[%s14540_s12 + $0x7bc] ss:$28 sps:$4 sm:$0xff]  }
 0x80c   :  { %8491 = vmatpush1.bf16.msra.mxu0 %v11499_v38  ;;  %8522 = vmatprep.mubr.bf16.mxu0 %v11701_v22  ;;  %v11508_v22 = vld [vmem:[%s14540_s12 + $0x7b8] ss:$28 sps:$4 sm:$0xff]   ;;  %s11705_s12 = smov [#allocation6]  }
 0x80d   :  { %8492 = vmatprep.subr.bf16.mxu0 %v11504_v40  ;;  %s8737_s13 = sshll.u32 %s11705_s12, 4  ;;  %s8738_s13 = int_to_ptr.vmem [resolvable:$true] %s8737_s13 }
 0x80e   :  { %s11648_s28 = scalar_lea.vmem %s8738_s13, 128  ;;  %p11653_p9 = scmp.lt.s32.totalorder %s8738_s13, %s8738_s13 }
 0x80f   :  { %p11649_p8 = scmp.ne.s32.totalorder %s8738_s13, %s11648_s28  ;;  %p11654_p10 = scmp.lt.s32.totalorder %s11648_s28, %s11648_s28 }
 0x810   :  { %8493 = vmatpush1.bf16.msra.mxu0 %v11502_v41 }
 0x811   :  { %8494 = vmatprep.subr.bf16.mxu0 %v11507_v42  ;;  %p11655_p11 = por %p11654_p10, %p11653_p9 }
 0x813   :  { %p11656_p12 = pnand %p11655_p11, %p11649_p8 }
 0x814   :  { %8495 = vmatpush1.bf16.msra.mxu0 %v11505_v44 }
 0x815   :  { %8496 = vmatprep.subr.bf16.mxu0 %v11510_v27  ;;  %v6779_v27 = vsub.s32 6, %v12799_v12 }
 0x818   :  { %8497 = vmatpush1.bf16.msra.mxu0 %v11508_v22  ;;  %v6780_v22 = vrot.slane %v14475_v52, %v6779_v27 }
 0x819   :  { %8498 = vmatprep.subr.bf16.mxu0 %v11513_v39 }
 0x81c   :  { %8499 = vmatpush1.bf16.msra.mxu0 %v11511_v48 }
 0x81d   :  { %9728 = vmatprep.subr.msk.bf16.mxu0 %vm3492_vm7, %v9722_v14 }
 0x820   :  { %8501 = vmatpush1.bf16.msra.mxu0 %v8154_v50 }
 0x823   :  { %9729 = vmatmul.mubr.msk.bf16.vlgmr.msra.gmra.mrb[44].mxu0 %vm3488_vm8, %v14112_v45 }
 0x85e   :  { %v8278_v24 = vpop.f32.mrb[40].mxu0  ;;  %v8401_v60 = vpop.f32.mrb[52].mxu1 }
 0x85f   :  { %v10104_v45 = vadd.f32 %v8278_v24, %v6756_v54  ;;  %v10106_v5 = vadd.f32 %v8401_v60, %v6764_v55  ;;  %v8280_v29 = vpop.f32.mrb[41].mxu0  ;;  %v8403_v31 = vpop.f32.mrb[53].mxu1 }
 0x860   :  { %v10105_v9 = vadd.f32 %v8280_v29, %v6760_v11  ;;  %v10107_v13 = vadd.f32 %v8403_v31, %v6768_v56  ;;  %v8282_v23 = vpop.f32.mrb[42].mxu0  ;;  %v8405_v15 = vpop.f32.mrb[54].mxu1 }
 0x861   :  { %vm8651_vm1 = vcmp.ge.f32.partialorder %v10104_v45, 0.0  ;;  %v8658_v16 = vsub.f32 0.0, %v10104_v45  ;;  %vm8653_vm7 = vcmp.ge.f32.partialorder %v10106_v5, 0.0  ;;  %v8660_v28 = vsub.f32 0.0, %v10106_v5  ;;  %v8283_v1 = vpop.f32.mrb[43].mxu0  ;;  %v8406_v58 = vpop.f32.mrb[55].mxu1 }
 0x862   :  { %vm8652_vm8 = vcmp.ge.f32.partialorder %v10105_v9, 0.0  ;;  %v8659_v17 = vsub.f32 0.0, %v10105_v9  ;;  %vm8654_vm13 = vcmp.ge.f32.partialorder %v10107_v13, 0.0  ;;  %v8661_v19 = vsub.f32 0.0, %v10107_v13 }
 0x863   :  { %v8665_v62 = vsel %vm8651_vm1, %v8658_v16, %v10104_v45  ;;  %v8667_v3 = vsel %vm8653_vm7, %v8660_v28, %v10106_v5 }
 0x864   :  { %v8672_v4 = vmul.f32 1.442695, %v8665_v62  ;;  %v8676_v6 = vmul.f32 1.442695, %v8667_v3  ;;  %v8666_v61 = vsel %vm8652_vm8, %v8659_v17, %v10105_v9  ;;  %v8668_v7 = vsel %vm8654_vm13, %v8661_v19, %v10107_v13 }
 0x865   :  { %v8674_v8 = vmul.f32 1.442695, %v8666_v61  ;;  %v8678_v10 = vmul.f32 1.442695, %v8668_v7 }
 0x866   :  { %11598 = vpow2.f32 %v8672_v4 }
 0x867   :  { %11600 = vpow2.f32 %v8676_v6 }
 0x868   :  { %11602 = vpow2.f32 %v8674_v8 }
 0x869   :  { %11604 = vpow2.f32 %v8678_v10 }
 0x870   :  { %v11599_v20 = vpop.eup %11598 }
 0x871   :  { %v11601_v2 = vpop.eup %11600  ;;  %v8686_v59 = vadd.f32 1.0, %v11599_v20 }
 0x872   :  { %v11603_v21 = vpop.eup %11602  ;;  %v8688_v53 = vadd.f32 1.0, %v11601_v2 }
 0x873   :  { %v11605_v34 = vpop.eup %11604  ;;  %11606 = vrcp.f32 %v8686_v59  ;;  %v8687_v0 = vadd.f32 1.0, %v11603_v21 }
 0x874   :  { %11608 = vrcp.f32 %v8688_v53  ;;  %v8689_v43 = vadd.f32 1.0, %v11605_v34 }
 0x875   :  { %11610 = vrcp.f32 %v8687_v0 }
 0x876   :  { %11612 = vrcp.f32 %v8689_v43 }
 0x87d   :  { %v11607_v25 = vpop.eup %11606 }
 0x87e   :  { %v11609_v49 = vpop.eup %11608  ;;  %v8700_v57 = vmul.f32 %v11607_v25, %v11599_v20 }
 0x87f   :  { %v11611_v32 = vpop.eup %11610  ;;  %v8702_v33 = vmul.f32 %v11609_v49, %v11601_v2  ;;  %v9973_v36 = vpop.f32.mrb[56].mxu1 }
 0x880   :  { %v11613_v63 = vpop.eup %11612  ;;  %v8707_v35 = vsel %vm8651_vm1, %v11607_v25, %v8700_v57  ;;  %v8701_v30 = vmul.f32 %v11611_v32, %v11603_v21  ;;  %v9974_v37 = vpop.f32.mrb[57].mxu1 }
 0x881   :  { %8714 = vst [vmem:[#allocation5] sm:$0xff] %v8707_v35  ;;  %v8709_v18 = vsel %vm8653_vm7, %v11609_v49, %v8702_v33  ;;  %v8703_v46 = vmul.f32 %v11613_v63, %v11605_v34  ;;  %v9975_v38 = vadd.f32 %v9974_v37, %v9973_v36  ;;  %v9976_v40 = vpop.f32.mrb[58].mxu1 }
 0x882   :  { %8716 = vst [vmem:[#allocation5 + $0x10] sm:$0xff] %v8709_v18  ;;  %v8708_v41 = vsel %vm8652_vm8, %v11611_v32, %v8701_v30  ;;  %v9977_v42 = vpop.f32.mrb[59].mxu1 }
 0x883   :  { %8715 = vst [vmem:[#allocation5 + $0x8] sm:$0xff] %v8708_v41  ;;  %v8710_v44 = vsel %vm8654_vm13, %v11613_v63, %v8703_v46 }
 0x884   :  { %8717 = vst [vmem:[#allocation5 + $0x18] sm:$0xff] %v8710_v44 }
 0x885   :  { %11659 = shalt.err (!%p11656_p12)
}
 0x886   :  { %s11660_s8 = scalar_lea.hbm %s14543_s15, 128 }
 0x887   :  { %p11661_p13 = scmp.ne.s32.totalorder %s14543_s15, %s11660_s8  ;;  %p11664_p0 = scmp.lt.u32.totalorder %s11660_s8, %s14543_s15 }
 0x889   :  { %p11666_p1 = pnand %p11664_p0, %p11661_p13 }
 0x88b   :  { %11669 = shalt.err (!%p11666_p1)
}
 0x88c   :  { %8740 = dma.vmem_to_hbm [thread:$0]  %s8738_s13, 128, %s14543_s15, [#allocation7]   ;;  %v8566_v48 = vadd.f32 %v9975_v38, %v6780_v22  ;;  %v6775_v16 = vsub.s32 5, %v12799_v12  ;;  %v6772_v28 = vrot.slane %v14475_v52, %v12833_v51 }
 0x88d   :  { %s11706_s15 = smov [#allocation5]  }
 0x88e   :  { %v6776_v1 = vrot.slane %v14475_v52, %v6775_v16  ;;  %s8727_s17 = sshll.u32 %s11706_s15, 4  ;;  %s8728_s17 = int_to_ptr.vmem [resolvable:$true] %s8727_s17 }
 0x88f   :  { %s11670_s18 = scalar_lea.vmem %s8728_s17, 896  ;;  %p11675_p3 = scmp.lt.s32.totalorder %s8728_s17, %s8728_s17 }
 0x890   :  { %p11671_p2 = scmp.ne.s32.totalorder %s8728_s17, %s11670_s18  ;;  %p11676_p4 = scmp.lt.s32.totalorder %s11670_s18, %s11670_s18 }
 0x892   :  { %p11677_p5 = por %p11676_p4, %p11675_p3 }
 0x894   :  { %p11678_p6 = pnand %p11677_p5, %p11671_p2 }
 0x89f   :  { %v9995_v39 = vpop.f32.mrb[60].mxu1 }
 0x8a0   :  { %v9996_v47 = vpop.f32.mrb[61].mxu1 }
 0x8a1   :  { %v9997_v14 = vadd.f32 %v9996_v47, %v9995_v39  ;;  %v9998_v26 = vpop.f32.mrb[62].mxu1 }
 0x8a2   :  { %v9999_v50 = vpop.f32.mrb[63].mxu1 }
 0x8a3   :  { %v8606_v54 = vadd.f32 %v9997_v14, %v8566_v48 }
 0x8b7   :  { %v8645_v55 = vpop.f32.mrb[64].mxu1 }
 0x8b8   :  { %v8646_v11 = vadd.f32 %v8645_v55, %v8606_v54  ;;  %v10088_v56 = vpop.f32.mrb[65].mxu1 }
 0x8b9   :  { %v8648_v24 = vpop.f32.mrb[66].mxu1 }
 0x8ba   :  { %vm8657_vm14 = vcmp.ge.f32.partialorder %v8646_v11, 0.0  ;;  %v8664_v60 = vsub.f32 0.0, %v8646_v11  ;;  %v10089_v45 = vpop.f32.mrb[67].mxu1 }
 0x8bc   :  { %v8671_v5 = vsel %vm8657_vm14, %v8664_v60, %v8646_v11 }
 0x8bd   :  { %v8684_v29 = vmul.f32 1.442695, %v8671_v5 }
 0x8bf   :  { %11614 = vpow2.f32 %v8684_v29 }
 0x8c9   :  { %v11615_v31 = vpop.eup %11614 }
 0x8ca   :  { %v8692_v9 = vadd.f32 1.0, %v11615_v31 }
 0x8cc   :  { %11616 = vrcp.f32 %v8692_v9 }
 0x8d6   :  { %v11617_v13 = vpop.eup %11616 }
 0x8d7   :  { %v8706_v23 = vmul.f32 %v11617_v13, %v11615_v31 }
 0x8d9   :  { %v8713_v15 = vsel %vm8657_vm14, %v11617_v13, %v8706_v23 }
 0x8da   :  { %8720 = vst.msk [vmem:[#allocation5 + $0x30] sm:$0xff] %vm1689_vm0, %v8713_v15 }
 0x8f6   :  { %v8524_v58 = vpop.f32.mrb[44].mxu0 }
 0x8f7   :  { %v10108_v17 = vadd.f32 %v8524_v58, %v6772_v28  ;;  %v8526_v19 = vpop.f32.mrb[45].mxu0 }
 0x8f8   :  { %v10109_v62 = vadd.f32 %v8526_v19, %v6776_v1  ;;  %v8528_v3 = vpop.f32.mrb[46].mxu0 }
 0x8f9   :  { %vm8655_vm15 = vcmp.ge.f32.partialorder %v10108_v17, 0.0  ;;  %v8662_v4 = vsub.f32 0.0, %v10108_v17  ;;  %v8529_v6 = vpop.f32.mrb[47].mxu0 }
 0x8fa   :  { %vm8656_vm2 = vcmp.ge.f32.partialorder %v10109_v62, 0.0  ;;  %v8663_v61 = vsub.f32 0.0, %v10109_v62 }
 0x8fb   :  { %v8669_v7 = vsel %vm8655_vm15, %v8662_v4, %v10108_v17 }
 0x8fc   :  { %v8680_v8 = vmul.f32 1.442695, %v8669_v7  ;;  %v8670_v12 = vsel %vm8656_vm2, %v8663_v61, %v10109_v62 }
 0x8fd   :  { %v8682_v10 = vmul.f32 1.442695, %v8670_v12 }
 0x8fe   :  { %11618 = vpow2.f32 %v8680_v8 }
 0x8ff   :  { %11620 = vpow2.f32 %v8682_v10 }
 0x908   :  { %v11619_v51 = vpop.eup %11618 }
 0x909   :  { %v11621_v52 = vpop.eup %11620  ;;  %v8690_v20 = vadd.f32 1.0, %v11619_v51 }
 0x90a   :  { %v8691_v2 = vadd.f32 1.0, %v11621_v52 }
 0x90b   :  { %11622 = vrcp.f32 %v8690_v20 }
 0x90c   :  { %11624 = vrcp.f32 %v8691_v2 }
 0x915   :  { %v11623_v59 = vpop.eup %11622 }
 0x916   :  { %v11625_v21 = vpop.eup %11624  ;;  %v8704_v53 = vmul.f32 %v11623_v59, %v11619_v51 }
 0x917   :  { %v8705_v34 = vmul.f32 %v11625_v21, %v11621_v52 }
 0x918   :  { %v8711_v0 = vsel %vm8655_vm15, %v11623_v59, %v8704_v53 }
 0x919   :  { %8718 = vst [vmem:[#allocation5 + $0x20] sm:$0xff] %v8711_v0  ;;  %v8712_v43 = vsel %vm8656_vm2, %v11625_v21, %v8705_v34 }
 0x91a   :  { %8719 = vst [vmem:[#allocation5 + $0x28] sm:$0xff] %v8712_v43 }
 0x91b   :  { %11681 = shalt.err (!%p11678_p6)
}
 0x91c   :  { %s11682_s22 = scalar_lea.hbm %s14542_s14, 896 }
 0x91d   :  { %p11683_p7 = scmp.ne.s32.totalorder %s14542_s14, %s11682_s22  ;;  %p11686_p8 = scmp.lt.u32.totalorder %s11682_s22, %s14542_s14 }
 0x91f   :  { %p11688_p9 = pnand %p11686_p8, %p11683_p7 }
 0x921   :  { %11691 = shalt.err (!%p11688_p9)
}
 0x922   :  { %8730 = dma.vmem_to_hbm [thread:$0]  %s8728_s17, 896, %s14542_s14, [#allocation4]  }
 0x923   :  { %11694 = dma.done.wait [#allocation4], 896  }
 0x924   :  { %11695 = vsyncadd [#allocation4], 4294966400 }
 0x925   :  { %11696 = dma.done.wait [#allocation7], 128  }
 0x926   :  { %11697 = vsyncadd [#allocation7], 4294967168 }
 0x927   :  { %8747 = vsyncpa [#allocation3], 1 }
 0x928   :  { %8748 = vsyncpa [#allocation4], 1 }
 0x929   :  { %8749 = vsyncpa [#allocation7], 1 }

</bundles_post_ra>
